<compile_context>
chip_gen: v7x
topology: tpu7x:2x2x1
jax: 0.10.0
libtpu: 0.0.40
codegen_flags: <defaults>
</compile_context>

<pallas_src>
import math

import jax
import jax.numpy as jnp
from jax.experimental import pallas as pl
from jax.experimental.pallas import tpu as pltpu

BN_SCALE = 1.0 / math.sqrt(1.0 + 1e-5)   # eval-mode BatchNorm with init stats


def _round_up(x, m):
    return (x + m - 1) // m * m


# ----------------------------------------------------------------------------
# Pallas kernel: tiled matmul, bf16 operands, fp32 acc, fused bias + activation
# ----------------------------------------------------------------------------
def _make_mm_kernel(act):
    def kernel(x_ref, w_ref, b_ref, o_ref, acc_ref):
        @pl.when(pl.program_id(2) == 0)
        def _():
            # initialize the accumulator with the (broadcast) bias
            acc_ref[...] = jnp.broadcast_to(b_ref[...], acc_ref.shape)

        acc_ref[...] += jnp.dot(x_ref[...], w_ref[...],
                                preferred_element_type=jnp.float32)

        @pl.when(pl.program_id(2) == pl.num_programs(2) - 1)
        def _():
            r = acc_ref[...]
            if act == "relu":
                r = jnp.maximum(r, 0.0)
            elif act == "leaky_relu":
                r = jnp.where(r > 0, r, 0.01 * r)
            elif act == "sigmoid":
                r = jax.nn.sigmoid(r)
            o_ref[...] = r.astype(o_ref.dtype)

    return kernel


def _apply_act(r, act):
    if act == "relu":
        return jnp.maximum(r, 0.0)
    if act == "leaky_relu":
        return jnp.where(r > 0, r, 0.01 * r)
    if act == "sigmoid":
        return jax.nn.sigmoid(r)
    return r


def pallas_matmul(x, w, b, act="none"):
    """y = act(x @ w + b).  x:[M,K]  w:[K,N]  b:[N].  bf16 MXU operands, fp32 acc."""
    M, K = x.shape
    _, N = w.shape

    # Tiny-M path (CAM linears, M == batch): the MXU would be ~idle and the
    # pallas_call fixed overhead dominates -> let XLA handle it.
    if M < 64:
        return _apply_act(
            jnp.dot(x.astype(jnp.float32), w.astype(jnp.float32)) + b, act)

    xb = x.astype(jnp.bfloat16)
    wb = w.astype(jnp.bfloat16)
    bf = b.astype(jnp.float32)

    # --- tile selection ------------------------------------------------------
    # M: pad to a 128 multiple, tile up to 512.
    Mp = _round_up(M, 128)
    tm = Mp if Mp <= 512 else 512
    Mp = _round_up(Mp, tm)
    # K / N: a single full-extent block when small/unaligned (legal under the
    # (8,128)-or-full-dim rule) so the big im2col patches never get a pad copy.
    if K <= 1024:
        Kp, tk = K, K
    else:
        Kp = _round_up(K, 128)
        tk = next(c for c in (512, 384, 256, 128) if Kp % c == 0)
    if N <= 512:
        Np, tn = N, N
    else:
        Np = _round_up(N, 128)
        tn = next(c for c in (512, 256, 128) if Np % c == 0)

    if (Mp, Kp) != (M, K):
        xb = jnp.pad(xb, ((0, Mp - M), (0, Kp - K)))
    if (Kp, Np) != (K, N):
        wb = jnp.pad(wb, ((0, Kp - K), (0, Np - N)))
    if Np != N:
        bf = jnp.pad(bf, ((0, Np - N),))
    bf = bf.reshape(1, Np)

    out = pl.pallas_call(
        _make_mm_kernel(act),
        out_shape=jax.ShapeDtypeStruct((Mp, Np), jnp.float32),
        grid_spec=pltpu.PrefetchScalarGridSpec(
            num_scalar_prefetch=0,
            grid=(Mp // tm, Np // tn, Kp // tk),
            in_specs=[
                pl.BlockSpec((tm, tk), lambda i, j, k: (i, k)),
                pl.BlockSpec((tk, tn), lambda i, j, k: (k, j)),
                pl.BlockSpec((1, tn), lambda i, j, k: (0, j)),
            ],
            out_specs=pl.BlockSpec((tm, tn), lambda i, j, k: (i, j)),
            scratch_shapes=[pltpu.VMEM((tm, tn), jnp.float32)],
        ),
        compiler_params=pltpu.CompilerParams(
            dimension_semantics=("parallel", "parallel", "arbitrary")),
    )(xb, wb, bf)

    if (Mp, Np) != (M, N):
        out = out[:M, :N]
    return out


# ----------------------------------------------------------------------------
# conv2d (stride 1) -> im2col + Pallas matmul with fused bias/act (+ BN fold)
# ----------------------------------------------------------------------------
def conv2d(x, w, b=None, padding=0, act="none", scale=None):
    """x: NHWC float32.  w: PyTorch layout (Cout, Cin, KH, KW).
    `scale` (folded eval-mode BatchNorm) multiplies w and b before the matmul."""
    N, H, W, Cin = x.shape
    Cout, _, KH, KW = w.shape
    if scale is not None:
        w = w * scale
        b = None if b is None else b * scale
    bias = jnp.zeros((Cout,), jnp.float32) if b is None else b.astype(jnp.float32)

    xb = x.astype(jnp.bfloat16)                       # bf16 halves im2col HBM bytes
    if padding:
        xb = jnp.pad(xb, ((0, 0), (padding, padding), (padding, padding), (0, 0)))
    Ho = xb.shape[1] - KH + 1
    Wo = xb.shape[2] - KW + 1

    if KH == 1 and KW == 1:
        patches = xb.reshape(N * Ho * Wo, Cin)        # no im2col copy for 1x1
    else:
        # TODO(synk): im2col still materializes KH*KW shifted copies in HBM; folding
        # the taps into the pallas grid (extra grid axis + element offsets) would
        # remove this inflation entirely.
        taps = [xb[:, ky:ky + Ho, kx:kx + Wo, :]
                for ky in range(KH) for kx in range(KW)]
        patches = jnp.concatenate(taps, axis=-1).reshape(N * Ho * Wo, KH * KW * Cin)

    wmat = jnp.transpose(w, (2, 3, 1, 0)).reshape(KH * KW * Cin, Cout)
    y = pallas_matmul(patches, wmat, bias, act=act)
    return y.reshape(N, Ho, Wo, Cout)


def maxpool3x3_s1p1(x):
    xp = jnp.pad(x, ((0, 0), (1, 1), (1, 1), (0, 0)), constant_values=-jnp.inf)
    H, W = x.shape[1], x.shape[2]
    vals = [xp[:, i:i + H, j:j + W, :] for i in range(3) for j in range(3)]
    return jnp.max(jnp.stack(vals, 0), axis=0)


# ----------------------------------------------------------------------------
# deterministic parameter init (PyTorch default uniform(-1/sqrt(fan_in), ...))
# ----------------------------------------------------------------------------
class KeyGen:
    def __init__(self, seed):
        self.key = jax.random.PRNGKey(seed)

    def __call__(self):
        self.key, k = jax.random.split(self.key)
        return k


def conv_init(kg, cout, cin, kh, kw):
    s = 1.0 / math.sqrt(cin * kh * kw)
    return {"w": jax.random.uniform(kg(), (cout, cin, kh, kw), jnp.float32, -s, s),
            "b": jax.random.uniform(kg(), (cout,), jnp.float32, -s, s)}


def linear_init(kg, fin, fout):
    s = 1.0 / math.sqrt(fin)
    return {"w": jax.random.uniform(kg(), (fout, fin), jnp.float32, -s, s),
            "b": jax.random.uniform(kg(), (fout,), jnp.float32, -s, s)}


# ----------------------------------------------------------------------------
# sub-modules: CAM, MSM, AttentionModule, MSCABlock
# ----------------------------------------------------------------------------
def cam_init(kg, C, r=4):
    return {"l1": linear_init(kg, C, C // r), "l2": linear_init(kg, C // r, C)}


def cam_fwd(p, x):
    v = x.mean(axis=(1, 2))                                   # AdaptiveAvgPool2d(1)+Flatten
    v = pallas_matmul(v, p["l1"]["w"].T, p["l1"]["b"], act="sigmoid")
    v = pallas_matmul(v, p["l2"]["w"].T, p["l2"]["b"], act="sigmoid")
    return x * v[:, None, None, :]


def msm_init(kg, cin, f):
    return {"b1a": conv_init(kg, f, cin, 1, 1), "b1b": conv_init(kg, f, f, 3, 3),
            "b2a": conv_init(kg, f, cin, 1, 1), "b2b": conv_init(kg, f, f, 5, 5),
            "b3": conv_init(kg, f, cin, 1, 1), "b4": conv_init(kg, f, cin, 1, 1)}


def msm_fwd(p, x):
    o1 = conv2d(x, p["b1a"]["w"], p["b1a"]["b"], act="leaky_relu")
    o1 = conv2d(o1, p["b1b"]["w"], p["b1b"]["b"], padding=1, act="leaky_relu")
    o2 = conv2d(x, p["b2a"]["w"], p["b2a"]["b"], act="leaky_relu")
    o2 = conv2d(o2, p["b2b"]["w"], p["b2b"]["b"], padding=2, act="leaky_relu")
    o3 = conv2d(maxpool3x3_s1p1(x), p["b3"]["w"], p["b3"]["b"], act="leaky_relu")
    o4 = conv2d(x, p["b4"]["w"], p["b4"]["b"], act="leaky_relu")
    return jnp.concatenate([o1, o2, o3, o4], axis=-1)


def attmod_init(kg, cin, f, r=4):
    return {"msm": msm_init(kg, cin, f),
            "adj": conv_init(kg, cin, f * 4, 1, 1),
            "cam": cam_init(kg, cin, r)}


def attmod_fwd(p, x):
    y = msm_fwd(p["msm"], x)
    y = conv2d(y, p["adj"]["w"], p["adj"]["b"])
    return cam_fwd(p["cam"], y)


def msca_init(kg, cin, cout):
    return {"c1": conv_init(kg, cout, cin, 3, 3),
            "c2": conv_init(kg, cout, cout, 3, 3),
            "att": attmod_init(kg, cout, cout // 4),
            "res": conv_init(kg, cout, cin, 1, 1)}


def msca_forward(p, x_nchw):
    x = jnp.transpose(x_nchw, (0, 2, 3, 1)).astype(jnp.float32)   # NCHW -> NHWC
    residual = conv2d(x, p["res"]["w"], p["res"]["b"])
    # eval-mode BatchNorm folded into the conv (scale) and ReLU fused in the epilogue
    out = conv2d(x, p["c1"]["w"], p["c1"]["b"], padding=1, act="relu", scale=BN_SCALE)
    out = conv2d(out, p["c2"]["w"], p["c2"]["b"], padding=1, act="relu", scale=BN_SCALE)
    out = attmod_fwd(p["att"], out)
    out = out + residual
    return jnp.transpose(out, (0, 3, 1, 2))                       # NHWC -> NCHW


if __name__ == "__main__":
    # ch_out must be divisible by 16 (filters = ch_out//4, CAM reduction = 4).
    ch_in, ch_out = 4, 32
    batch, spatial = 2, 16
    params = msca_init(KeyGen(1), ch_in, ch_out)
    x = jax.random.normal(jax.random.PRNGKey(0),
                          (batch, ch_in, spatial, spatial), jnp.float32)
    fwd = jax.jit(msca_forward)
    y = jax.block_until_ready(fwd(params, x))
    assert y.shape == (batch, ch_out, spatial, spatial) and y.dtype == jnp.float32
    print("KERNEL_OK")
</pallas_src>

<mosaic_0001>
module attributes {stable_mosaic.version = 11 : i64} {
  func.func @kernel(%arg0: i32, %arg1: i32, %arg2: i32, %arg3: memref<512x36xbf16, #tpu.memory_space<vmem>>, %arg4: memref<36x32xbf16, #tpu.memory_space<vmem>>, %arg5: memref<1x32xf32, #tpu.memory_space<vmem>>, %arg6: memref<512x32xf32, #tpu.memory_space<vmem>>, %arg7: memref<512x32xf32, #tpu.memory_space<vmem>>) attributes {dimension_semantics = [#tpu.dimension_semantics<parallel>, #tpu.dimension_semantics<parallel>, #tpu.dimension_semantics<arbitrary>], iteration_bounds = array<i64: 1, 1, 1>, scalar_prefetch = 0 : i64, scratch_operands = 1 : i64, tpu.core_type = #tpu.core_type<tc>, window_params = [{transform_indices = @transform_0, window_bounds = array<i64: 512, 36>}, {transform_indices = @transform_1, window_bounds = array<i64: 36, 32>}, {transform_indices = @transform_2, window_bounds = array<i64: 1, 32>}, {transform_indices = @transform_3, window_bounds = array<i64: 512, 32>}]} {
    %c0_i32 = arith.constant 0 : i32
    %0 = arith.cmpi eq, %arg2, %c0_i32 : i32
    %1 = arith.extui %0 : i1 to i32
    %c0_i32_0 = arith.constant 0 : i32
    %2 = arith.cmpi ne, %1, %c0_i32_0 : i32
    scf.if %2 {
      %c0_10 = arith.constant 0 : index
      %c0_11 = arith.constant 0 : index
      %12 = vector.load %arg5[%c0_10, %c0_11] : memref<1x32xf32, #tpu.memory_space<vmem>>, vector<1x32xf32>
      %13 = vector.shape_cast %12 : vector<1x32xf32> to vector<1x32xf32>
      %14 = vector.broadcast %13 : vector<1x32xf32> to vector<512x32xf32>
      %c0_12 = arith.constant 0 : index
      %c0_13 = arith.constant 0 : index
      %15 = vector.load %arg7[%c0_12, %c0_13] : memref<512x32xf32, #tpu.memory_space<vmem>>, vector<512x32xf32>
      tpu.vector_store %arg7[%c0_12, %c0_13], %14 {strides = array<i32>} : memref<512x32xf32, #tpu.memory_space<vmem>>, vector<512x32xf32>,
    } else {
    }
    %c0 = arith.constant 0 : index
    %c0_1 = arith.constant 0 : index
    %3 = vector.load %arg7[%c0, %c0_1] : memref<512x32xf32, #tpu.memory_space<vmem>>, vector<512x32xf32>
    %c0_2 = arith.constant 0 : index
    %c0_3 = arith.constant 0 : index
    %4 = vector.load %arg3[%c0_2, %c0_3] : memref<512x36xbf16, #tpu.memory_space<vmem>>, vector<512x36xbf16>
    %c0_4 = arith.constant 0 : index
    %c0_5 = arith.constant 0 : index
    %5 = vector.load %arg4[%c0_4, %c0_5] : memref<36x32xbf16, #tpu.memory_space<vmem>>, vector<36x32xbf16>
    %cst = arith.constant dense<0.000000e+00> : vector<512x32xf32>
    %6 = tpu.matmul %4, %5, %cst {dimension_numbers = #tpu.dot_dimension_numbers<[1], [0], [0], [1], [0, 0, 1, 1], [], []>} : vector<512x36xbf16>, vector<36x32xbf16>, vector<512x32xf32> -> vector<512x32xf32>
    %7 = arith.addf %3, %6 : vector<512x32xf32>
    %c0_6 = arith.constant 0 : index
    %c0_7 = arith.constant 0 : index
    %8 = vector.load %arg7[%c0_6, %c0_7] : memref<512x32xf32, #tpu.memory_space<vmem>>, vector<512x32xf32>
    tpu.vector_store %arg7[%c0_6, %c0_7], %7 {strides = array<i32>} : memref<512x32xf32, #tpu.memory_space<vmem>>, vector<512x32xf32>,
    %c0_i32_8 = arith.constant 0 : i32
    %9 = arith.cmpi eq, %arg2, %c0_i32_8 : i32
    %10 = arith.extui %9 : i1 to i32
    %c0_i32_9 = arith.constant 0 : i32
    %11 = arith.cmpi ne, %10, %c0_i32_9 : i32
    scf.if %11 {
      %c0_10 = arith.constant 0 : index
      %c0_11 = arith.constant 0 : index
      %12 = vector.load %arg7[%c0_10, %c0_11] : memref<512x32xf32, #tpu.memory_space<vmem>>, vector<512x32xf32>
      %cst_12 = arith.constant 0.000000e+00 : f32
      %13 = vector.broadcast %cst_12 : f32 to vector<512x32xf32>
      %14 = arith.maximumf %12, %13 : vector<512x32xf32>
      %c0_13 = arith.constant 0 : index
      %c0_14 = arith.constant 0 : index
      %15 = vector.load %arg6[%c0_13, %c0_14] : memref<512x32xf32, #tpu.memory_space<vmem>>, vector<512x32xf32>
      tpu.vector_store %arg6[%c0_13, %c0_14], %14 {strides = array<i32>} : memref<512x32xf32, #tpu.memory_space<vmem>>, vector<512x32xf32>,
    } else {
    }
    return
  }
  func.func @transform_0(%arg0: i32, %arg1: i32, %arg2: i32) -> (i32, i32) {
    %c0_i32 = arith.constant 0 : i32
    return %arg0, %arg2 : i32, i32
  }
  func.func @transform_1(%arg0: i32, %arg1: i32, %arg2: i32) -> (i32, i32) {
    %c0_i32 = arith.constant 0 : i32
    return %arg2, %arg1 : i32, i32
  }
  func.func @transform_2(%arg0: i32, %arg1: i32, %arg2: i32) -> (i32, i32) {
    %c0_i32 = arith.constant 0 : i32
    %c0_i32_0 = arith.constant 0 : i32
    return %c0_i32, %arg1 : i32, i32
  }
  func.func @transform_3(%arg0: i32, %arg1: i32, %arg2: i32) -> (i32, i32) {
    %c0_i32 = arith.constant 0 : i32
    return %arg0, %arg1 : i32, i32
  }
}

module attributes {stable_mosaic.version = 11 : i64} {
  func.func @kernel(%arg0: i32, %arg1: i32, %arg2: i32, %arg3: memref<512x288xbf16, #tpu.memory_space<vmem>>, %arg4: memref<288x32xbf16, #tpu.memory_space<vmem>>, %arg5: memref<1x32xf32, #tpu.memory_space<vmem>>, %arg6: memref<512x32xf32, #tpu.memory_space<vmem>>, %arg7: memref<512x32xf32, #tpu.memory_space<vmem>>) attributes {dimension_semantics = [#tpu.dimension_semantics<parallel>, #tpu.dimension_semantics<parallel>, #tpu.dimension_semantics<arbitrary>], iteration_bounds = array<i64: 1, 1, 1>, scalar_prefetch = 0 : i64, scratch_operands = 1 : i64, tpu.core_type = #tpu.core_type<tc>, window_params = [{transform_indices = @transform_0, window_bounds = array<i64: 512, 288>}, {transform_indices = @transform_1, window_bounds = array<i64: 288, 32>}, {transform_indices = @transform_2, window_bounds = array<i64: 1, 32>}, {transform_indices = @transform_3, window_bounds = array<i64: 512, 32>}]} {
    %c0_i32 = arith.constant 0 : i32
    %0 = arith.cmpi eq, %arg2, %c0_i32 : i32
    %1 = arith.extui %0 : i1 to i32
    %c0_i32_0 = arith.constant 0 : i32
    %2 = arith.cmpi ne, %1, %c0_i32_0 : i32
    scf.if %2 {
      %c0_10 = arith.constant 0 : index
      %c0_11 = arith.constant 0 : index
      %12 = vector.load %arg5[%c0_10, %c0_11] : memref<1x32xf32, #tpu.memory_space<vmem>>, vector<1x32xf32>
      %13 = vector.shape_cast %12 : vector<1x32xf32> to vector<1x32xf32>
      %14 = vector.broadcast %13 : vector<1x32xf32> to vector<512x32xf32>
      %c0_12 = arith.constant 0 : index
      %c0_13 = arith.constant 0 : index
      %15 = vector.load %arg7[%c0_12, %c0_13] : memref<512x32xf32, #tpu.memory_space<vmem>>, vector<512x32xf32>
      tpu.vector_store %arg7[%c0_12, %c0_13], %14 {strides = array<i32>} : memref<512x32xf32, #tpu.memory_space<vmem>>, vector<512x32xf32>,
    } else {
    }
    %c0 = arith.constant 0 : index
    %c0_1 = arith.constant 0 : index
    %3 = vector.load %arg7[%c0, %c0_1] : memref<512x32xf32, #tpu.memory_space<vmem>>, vector<512x32xf32>
    %c0_2 = arith.constant 0 : index
    %c0_3 = arith.constant 0 : index
    %4 = vector.load %arg3[%c0_2, %c0_3] : memref<512x288xbf16, #tpu.memory_space<vmem>>, vector<512x288xbf16>
    %c0_4 = arith.constant 0 : index
    %c0_5 = arith.constant 0 : index
    %5 = vector.load %arg4[%c0_4, %c0_5] : memref<288x32xbf16, #tpu.memory_space<vmem>>, vector<288x32xbf16>
    %cst = arith.constant dense<0.000000e+00> : vector<512x32xf32>
    %6 = tpu.matmul %4, %5, %cst {dimension_numbers = #tpu.dot_dimension_numbers<[1], [0], [0], [1], [0, 0, 1, 1], [], []>} : vector<512x288xbf16>, vector<288x32xbf16>, vector<512x32xf32> -> vector<512x32xf32>
    %7 = arith.addf %3, %6 : vector<512x32xf32>
    %c0_6 = arith.constant 0 : index
    %c0_7 = arith.constant 0 : index
    %8 = vector.load %arg7[%c0_6, %c0_7] : memref<512x32xf32, #tpu.memory_space<vmem>>, vector<512x32xf32>
    tpu.vector_store %arg7[%c0_6, %c0_7], %7 {strides = array<i32>} : memref<512x32xf32, #tpu.memory_space<vmem>>, vector<512x32xf32>,
    %c0_i32_8 = arith.constant 0 : i32
    %9 = arith.cmpi eq, %arg2, %c0_i32_8 : i32
    %10 = arith.extui %9 : i1 to i32
    %c0_i32_9 = arith.constant 0 : i32
    %11 = arith.cmpi ne, %10, %c0_i32_9 : i32
    scf.if %11 {
      %c0_10 = arith.constant 0 : index
      %c0_11 = arith.constant 0 : index
      %12 = vector.load %arg7[%c0_10, %c0_11] : memref<512x32xf32, #tpu.memory_space<vmem>>, vector<512x32xf32>
      %cst_12 = arith.constant 0.000000e+00 : f32
      %13 = vector.broadcast %cst_12 : f32 to vector<512x32xf32>
      %14 = arith.maximumf %12, %13 : vector<512x32xf32>
      %c0_13 = arith.constant 0 : index
      %c0_14 = arith.constant 0 : index
      %15 = vector.load %arg6[%c0_13, %c0_14] : memref<512x32xf32, #tpu.memory_space<vmem>>, vector<512x32xf32>
      tpu.vector_store %arg6[%c0_13, %c0_14], %14 {strides = array<i32>} : memref<512x32xf32, #tpu.memory_space<vmem>>, vector<512x32xf32>,
    } else {
    }
    return
  }
  func.func @transform_0(%arg0: i32, %arg1: i32, %arg2: i32) -> (i32, i32) {
    %c0_i32 = arith.constant 0 : i32
    return %arg0, %arg2 : i32, i32
  }
  func.func @transform_1(%arg0: i32, %arg1: i32, %arg2: i32) -> (i32, i32) {
    %c0_i32 = arith.constant 0 : i32
    return %arg2, %arg1 : i32, i32
  }
  func.func @transform_2(%arg0: i32, %arg1: i32, %arg2: i32) -> (i32, i32) {
    %c0_i32 = arith.constant 0 : i32
    %c0_i32_0 = arith.constant 0 : i32
    return %c0_i32, %arg1 : i32, i32
  }
  func.func @transform_3(%arg0: i32, %arg1: i32, %arg2: i32) -> (i32, i32) {
    %c0_i32 = arith.constant 0 : i32
    return %arg0, %arg1 : i32, i32
  }
}

module attributes {stable_mosaic.version = 11 : i64} {
  func.func @kernel(%arg0: i32, %arg1: i32, %arg2: i32, %arg3: memref<512x32xbf16, #tpu.memory_space<vmem>>, %arg4: memref<32x8xbf16, #tpu.memory_space<vmem>>, %arg5: memref<1x8xf32, #tpu.memory_space<vmem>>, %arg6: memref<512x8xf32, #tpu.memory_space<vmem>>, %arg7: memref<512x8xf32, #tpu.memory_space<vmem>>) attributes {dimension_semantics = [#tpu.dimension_semantics<parallel>, #tpu.dimension_semantics<parallel>, #tpu.dimension_semantics<arbitrary>], iteration_bounds = array<i64: 1, 1, 1>, scalar_prefetch = 0 : i64, scratch_operands = 1 : i64, tpu.core_type = #tpu.core_type<tc>, window_params = [{transform_indices = @transform_0, window_bounds = array<i64: 512, 32>}, {transform_indices = @transform_1, window_bounds = array<i64: 32, 8>}, {transform_indices = @transform_2, window_bounds = array<i64: 1, 8>}, {transform_indices = @transform_3, window_bounds = array<i64: 512, 8>}]} {
    %c0_i32 = arith.constant 0 : i32
    %0 = arith.cmpi eq, %arg2, %c0_i32 : i32
    %1 = arith.extui %0 : i1 to i32
    %c0_i32_0 = arith.constant 0 : i32
    %2 = arith.cmpi ne, %1, %c0_i32_0 : i32
    scf.if %2 {
      %c0_10 = arith.constant 0 : index
      %c0_11 = arith.constant 0 : index
      %12 = vector.load %arg5[%c0_10, %c0_11] : memref<1x8xf32, #tpu.memory_space<vmem>>, vector<1x8xf32>
      %13 = vector.shape_cast %12 : vector<1x8xf32> to vector<1x8xf32>
      %14 = vector.broadcast %13 : vector<1x8xf32> to vector<512x8xf32>
      %c0_12 = arith.constant 0 : index
      %c0_13 = arith.constant 0 : index
      %15 = vector.load %arg7[%c0_12, %c0_13] : memref<512x8xf32, #tpu.memory_space<vmem>>, vector<512x8xf32>
      tpu.vector_store %arg7[%c0_12, %c0_13], %14 {strides = array<i32>} : memref<512x8xf32, #tpu.memory_space<vmem>>, vector<512x8xf32>,
    } else {
    }
    %c0 = arith.constant 0 : index
    %c0_1 = arith.constant 0 : index
    %3 = vector.load %arg7[%c0, %c0_1] : memref<512x8xf32, #tpu.memory_space<vmem>>, vector<512x8xf32>
    %c0_2 = arith.constant 0 : index
    %c0_3 = arith.constant 0 : index
    %4 = vector.load %arg3[%c0_2, %c0_3] : memref<512x32xbf16, #tpu.memory_space<vmem>>, vector<512x32xbf16>
    %c0_4 = arith.constant 0 : index
    %c0_5 = arith.constant 0 : index
    %5 = vector.load %arg4[%c0_4, %c0_5] : memref<32x8xbf16, #tpu.memory_space<vmem>>, vector<32x8xbf16>
    %cst = arith.constant dense<0.000000e+00> : vector<512x8xf32>
    %6 = tpu.matmul %4, %5, %cst {dimension_numbers = #tpu.dot_dimension_numbers<[1], [0], [0], [1], [0, 0, 1, 1], [], []>} : vector<512x32xbf16>, vector<32x8xbf16>, vector<512x8xf32> -> vector<512x8xf32>
    %7 = arith.addf %3, %6 : vector<512x8xf32>
    %c0_6 = arith.constant 0 : index
    %c0_7 = arith.constant 0 : index
    %8 = vector.load %arg7[%c0_6, %c0_7] : memref<512x8xf32, #tpu.memory_space<vmem>>, vector<512x8xf32>
    tpu.vector_store %arg7[%c0_6, %c0_7], %7 {strides = array<i32>} : memref<512x8xf32, #tpu.memory_space<vmem>>, vector<512x8xf32>,
    %c0_i32_8 = arith.constant 0 : i32
    %9 = arith.cmpi eq, %arg2, %c0_i32_8 : i32
    %10 = arith.extui %9 : i1 to i32
    %c0_i32_9 = arith.constant 0 : i32
    %11 = arith.cmpi ne, %10, %c0_i32_9 : i32
    scf.if %11 {
      %c0_10 = arith.constant 0 : index
      %c0_11 = arith.constant 0 : index
      %12 = vector.load %arg7[%c0_10, %c0_11] : memref<512x8xf32, #tpu.memory_space<vmem>>, vector<512x8xf32>
      %cst_12 = arith.constant 0.000000e+00 : f32
      %13 = vector.broadcast %cst_12 : f32 to vector<512x8xf32>
      %14 = arith.cmpf ogt, %12, %13 : vector<512x8xf32>
      %cst_13 = arith.constant 0.00999999977 : f32
      %15 = vector.broadcast %cst_13 : f32 to vector<512x8xf32>
      %16 = arith.mulf %15, %12 : vector<512x8xf32>
      %17 = arith.select %14, %12, %16 : vector<512x8xi1>, vector<512x8xf32>
      %c0_14 = arith.constant 0 : index
      %c0_15 = arith.constant 0 : index
      %18 = vector.load %arg6[%c0_14, %c0_15] : memref<512x8xf32, #tpu.memory_space<vmem>>, vector<512x8xf32>
      tpu.vector_store %arg6[%c0_14, %c0_15], %17 {strides = array<i32>} : memref<512x8xf32, #tpu.memory_space<vmem>>, vector<512x8xf32>,
    } else {
    }
    return
  }
  func.func @transform_0(%arg0: i32, %arg1: i32, %arg2: i32) -> (i32, i32) {
    %c0_i32 = arith.constant 0 : i32
    return %arg0, %arg2 : i32, i32
  }
  func.func @transform_1(%arg0: i32, %arg1: i32, %arg2: i32) -> (i32, i32) {
    %c0_i32 = arith.constant 0 : i32
    return %arg2, %arg1 : i32, i32
  }
  func.func @transform_2(%arg0: i32, %arg1: i32, %arg2: i32) -> (i32, i32) {
    %c0_i32 = arith.constant 0 : i32
    %c0_i32_0 = arith.constant 0 : i32
    return %c0_i32, %arg1 : i32, i32
  }
  func.func @transform_3(%arg0: i32, %arg1: i32, %arg2: i32) -> (i32, i32) {
    %c0_i32 = arith.constant 0 : i32
    return %arg0, %arg1 : i32, i32
  }
}

module attributes {stable_mosaic.version = 11 : i64} {
  func.func @kernel(%arg0: i32, %arg1: i32, %arg2: i32, %arg3: memref<512x72xbf16, #tpu.memory_space<vmem>>, %arg4: memref<72x8xbf16, #tpu.memory_space<vmem>>, %arg5: memref<1x8xf32, #tpu.memory_space<vmem>>, %arg6: memref<512x8xf32, #tpu.memory_space<vmem>>, %arg7: memref<512x8xf32, #tpu.memory_space<vmem>>) attributes {dimension_semantics = [#tpu.dimension_semantics<parallel>, #tpu.dimension_semantics<parallel>, #tpu.dimension_semantics<arbitrary>], iteration_bounds = array<i64: 1, 1, 1>, scalar_prefetch = 0 : i64, scratch_operands = 1 : i64, tpu.core_type = #tpu.core_type<tc>, window_params = [{transform_indices = @transform_0, window_bounds = array<i64: 512, 72>}, {transform_indices = @transform_1, window_bounds = array<i64: 72, 8>}, {transform_indices = @transform_2, window_bounds = array<i64: 1, 8>}, {transform_indices = @transform_3, window_bounds = array<i64: 512, 8>}]} {
    %c0_i32 = arith.constant 0 : i32
    %0 = arith.cmpi eq, %arg2, %c0_i32 : i32
    %1 = arith.extui %0 : i1 to i32
    %c0_i32_0 = arith.constant 0 : i32
    %2 = arith.cmpi ne, %1, %c0_i32_0 : i32
    scf.if %2 {
      %c0_10 = arith.constant 0 : index
      %c0_11 = arith.constant 0 : index
      %12 = vector.load %arg5[%c0_10, %c0_11] : memref<1x8xf32, #tpu.memory_space<vmem>>, vector<1x8xf32>
      %13 = vector.shape_cast %12 : vector<1x8xf32> to vector<1x8xf32>
      %14 = vector.broadcast %13 : vector<1x8xf32> to vector<512x8xf32>
      %c0_12 = arith.constant 0 : index
      %c0_13 = arith.constant 0 : index
      %15 = vector.load %arg7[%c0_12, %c0_13] : memref<512x8xf32, #tpu.memory_space<vmem>>, vector<512x8xf32>
      tpu.vector_store %arg7[%c0_12, %c0_13], %14 {strides = array<i32>} : memref<512x8xf32, #tpu.memory_space<vmem>>, vector<512x8xf32>,
    } else {
    }
    %c0 = arith.constant 0 : index
    %c0_1 = arith.constant 0 : index
    %3 = vector.load %arg7[%c0, %c0_1] : memref<512x8xf32, #tpu.memory_space<vmem>>, vector<512x8xf32>
    %c0_2 = arith.constant 0 : index
    %c0_3 = arith.constant 0 : index
    %4 = vector.load %arg3[%c0_2, %c0_3] : memref<512x72xbf16, #tpu.memory_space<vmem>>, vector<512x72xbf16>
    %c0_4 = arith.constant 0 : index
    %c0_5 = arith.constant 0 : index
    %5 = vector.load %arg4[%c0_4, %c0_5] : memref<72x8xbf16, #tpu.memory_space<vmem>>, vector<72x8xbf16>
    %cst = arith.constant dense<0.000000e+00> : vector<512x8xf32>
    %6 = tpu.matmul %4, %5, %cst {dimension_numbers = #tpu.dot_dimension_numbers<[1], [0], [0], [1], [0, 0, 1, 1], [], []>} : vector<512x72xbf16>, vector<72x8xbf16>, vector<512x8xf32> -> vector<512x8xf32>
    %7 = arith.addf %3, %6 : vector<512x8xf32>
    %c0_6 = arith.constant 0 : index
    %c0_7 = arith.constant 0 : index
    %8 = vector.load %arg7[%c0_6, %c0_7] : memref<512x8xf32, #tpu.memory_space<vmem>>, vector<512x8xf32>
    tpu.vector_store %arg7[%c0_6, %c0_7], %7 {strides = array<i32>} : memref<512x8xf32, #tpu.memory_space<vmem>>, vector<512x8xf32>,
    %c0_i32_8 = arith.constant 0 : i32
    %9 = arith.cmpi eq, %arg2, %c0_i32_8 : i32
    %10 = arith.extui %9 : i1 to i32
    %c0_i32_9 = arith.constant 0 : i32
    %11 = arith.cmpi ne, %10, %c0_i32_9 : i32
    scf.if %11 {
      %c0_10 = arith.constant 0 : index
      %c0_11 = arith.constant 0 : index
      %12 = vector.load %arg7[%c0_10, %c0_11] : memref<512x8xf32, #tpu.memory_space<vmem>>, vector<512x8xf32>
      %cst_12 = arith.constant 0.000000e+00 : f32
      %13 = vector.broadcast %cst_12 : f32 to vector<512x8xf32>
      %14 = arith.cmpf ogt, %12, %13 : vector<512x8xf32>
      %cst_13 = arith.constant 0.00999999977 : f32
      %15 = vector.broadcast %cst_13 : f32 to vector<512x8xf32>
      %16 = arith.mulf %15, %12 : vector<512x8xf32>
      %17 = arith.select %14, %12, %16 : vector<512x8xi1>, vector<512x8xf32>
      %c0_14 = arith.constant 0 : index
      %c0_15 = arith.constant 0 : index
      %18 = vector.load %arg6[%c0_14, %c0_15] : memref<512x8xf32, #tpu.memory_space<vmem>>, vector<512x8xf32>
      tpu.vector_store %arg6[%c0_14, %c0_15], %17 {strides = array<i32>} : memref<512x8xf32, #tpu.memory_space<vmem>>, vector<512x8xf32>,
    } else {
    }
    return
  }
  func.func @transform_0(%arg0: i32, %arg1: i32, %arg2: i32) -> (i32, i32) {
    %c0_i32 = arith.constant 0 : i32
    return %arg0, %arg2 : i32, i32
  }
  func.func @transform_1(%arg0: i32, %arg1: i32, %arg2: i32) -> (i32, i32) {
    %c0_i32 = arith.constant 0 : i32
    return %arg2, %arg1 : i32, i32
  }
  func.func @transform_2(%arg0: i32, %arg1: i32, %arg2: i32) -> (i32, i32) {
    %c0_i32 = arith.constant 0 : i32
    %c0_i32_0 = arith.constant 0 : i32
    return %c0_i32, %arg1 : i32, i32
  }
  func.func @transform_3(%arg0: i32, %arg1: i32, %arg2: i32) -> (i32, i32) {
    %c0_i32 = arith.constant 0 : i32
    return %arg0, %arg1 : i32, i32
  }
}

module attributes {stable_mosaic.version = 11 : i64} {
  func.func @kernel(%arg0: i32, %arg1: i32, %arg2: i32, %arg3: memref<512x200xbf16, #tpu.memory_space<vmem>>, %arg4: memref<200x8xbf16, #tpu.memory_space<vmem>>, %arg5: memref<1x8xf32, #tpu.memory_space<vmem>>, %arg6: memref<512x8xf32, #tpu.memory_space<vmem>>, %arg7: memref<512x8xf32, #tpu.memory_space<vmem>>) attributes {dimension_semantics = [#tpu.dimension_semantics<parallel>, #tpu.dimension_semantics<parallel>, #tpu.dimension_semantics<arbitrary>], iteration_bounds = array<i64: 1, 1, 1>, scalar_prefetch = 0 : i64, scratch_operands = 1 : i64, tpu.core_type = #tpu.core_type<tc>, window_params = [{transform_indices = @transform_0, window_bounds = array<i64: 512, 200>}, {transform_indices = @transform_1, window_bounds = array<i64: 200, 8>}, {transform_indices = @transform_2, window_bounds = array<i64: 1, 8>}, {transform_indices = @transform_3, window_bounds = array<i64: 512, 8>}]} {
    %c0_i32 = arith.constant 0 : i32
    %0 = arith.cmpi eq, %arg2, %c0_i32 : i32
    %1 = arith.extui %0 : i1 to i32
    %c0_i32_0 = arith.constant 0 : i32
    %2 = arith.cmpi ne, %1, %c0_i32_0 : i32
    scf.if %2 {
      %c0_10 = arith.constant 0 : index
      %c0_11 = arith.constant 0 : index
      %12 = vector.load %arg5[%c0_10, %c0_11] : memref<1x8xf32, #tpu.memory_space<vmem>>, vector<1x8xf32>
      %13 = vector.shape_cast %12 : vector<1x8xf32> to vector<1x8xf32>
      %14 = vector.broadcast %13 : vector<1x8xf32> to vector<512x8xf32>
      %c0_12 = arith.constant 0 : index
      %c0_13 = arith.constant 0 : index
      %15 = vector.load %arg7[%c0_12, %c0_13] : memref<512x8xf32, #tpu.memory_space<vmem>>, vector<512x8xf32>
      tpu.vector_store %arg7[%c0_12, %c0_13], %14 {strides = array<i32>} : memref<512x8xf32, #tpu.memory_space<vmem>>, vector<512x8xf32>,
    } else {
    }
    %c0 = arith.constant 0 : index
    %c0_1 = arith.constant 0 : index
    %3 = vector.load %arg7[%c0, %c0_1] : memref<512x8xf32, #tpu.memory_space<vmem>>, vector<512x8xf32>
    %c0_2 = arith.constant 0 : index
    %c0_3 = arith.constant 0 : index
    %4 = vector.load %arg3[%c0_2, %c0_3] : memref<512x200xbf16, #tpu.memory_space<vmem>>, vector<512x200xbf16>
    %c0_4 = arith.constant 0 : index
    %c0_5 = arith.constant 0 : index
    %5 = vector.load %arg4[%c0_4, %c0_5] : memref<200x8xbf16, #tpu.memory_space<vmem>>, vector<200x8xbf16>
    %cst = arith.constant dense<0.000000e+00> : vector<512x8xf32>
    %6 = tpu.matmul %4, %5, %cst {dimension_numbers = #tpu.dot_dimension_numbers<[1], [0], [0], [1], [0, 0, 1, 1], [], []>} : vector<512x200xbf16>, vector<200x8xbf16>, vector<512x8xf32> -> vector<512x8xf32>
    %7 = arith.addf %3, %6 : vector<512x8xf32>
    %c0_6 = arith.constant 0 : index
    %c0_7 = arith.constant 0 : index
    %8 = vector.load %arg7[%c0_6, %c0_7] : memref<512x8xf32, #tpu.memory_space<vmem>>, vector<512x8xf32>
    tpu.vector_store %arg7[%c0_6, %c0_7], %7 {strides = array<i32>} : memref<512x8xf32, #tpu.memory_space<vmem>>, vector<512x8xf32>,
    %c0_i32_8 = arith.constant 0 : i32
    %9 = arith.cmpi eq, %arg2, %c0_i32_8 : i32
    %10 = arith.extui %9 : i1 to i32
    %c0_i32_9 = arith.constant 0 : i32
    %11 = arith.cmpi ne, %10, %c0_i32_9 : i32
    scf.if %11 {
      %c0_10 = arith.constant 0 : index
      %c0_11 = arith.constant 0 : index
      %12 = vector.load %arg7[%c0_10, %c0_11] : memref<512x8xf32, #tpu.memory_space<vmem>>, vector<512x8xf32>
      %cst_12 = arith.constant 0.000000e+00 : f32
      %13 = vector.broadcast %cst_12 : f32 to vector<512x8xf32>
      %14 = arith.cmpf ogt, %12, %13 : vector<512x8xf32>
      %cst_13 = arith.constant 0.00999999977 : f32
      %15 = vector.broadcast %cst_13 : f32 to vector<512x8xf32>
      %16 = arith.mulf %15, %12 : vector<512x8xf32>
      %17 = arith.select %14, %12, %16 : vector<512x8xi1>, vector<512x8xf32>
      %c0_14 = arith.constant 0 : index
      %c0_15 = arith.constant 0 : index
      %18 = vector.load %arg6[%c0_14, %c0_15] : memref<512x8xf32, #tpu.memory_space<vmem>>, vector<512x8xf32>
      tpu.vector_store %arg6[%c0_14, %c0_15], %17 {strides = array<i32>} : memref<512x8xf32, #tpu.memory_space<vmem>>, vector<512x8xf32>,
    } else {
    }
    return
  }
  func.func @transform_0(%arg0: i32, %arg1: i32, %arg2: i32) -> (i32, i32) {
    %c0_i32 = arith.constant 0 : i32
    return %arg0, %arg2 : i32, i32
  }
  func.func @transform_1(%arg0: i32, %arg1: i32, %arg2: i32) -> (i32, i32) {
    %c0_i32 = arith.constant 0 : i32
    return %arg2, %arg1 : i32, i32
  }
  func.func @transform_2(%arg0: i32, %arg1: i32, %arg2: i32) -> (i32, i32) {
    %c0_i32 = arith.constant 0 : i32
    %c0_i32_0 = arith.constant 0 : i32
    return %c0_i32, %arg1 : i32, i32
  }
  func.func @transform_3(%arg0: i32, %arg1: i32, %arg2: i32) -> (i32, i32) {
    %c0_i32 = arith.constant 0 : i32
    return %arg0, %arg1 : i32, i32
  }
}

module attributes {stable_mosaic.version = 11 : i64} {
  func.func @kernel(%arg0: i32, %arg1: i32, %arg2: i32, %arg3: memref<512x32xbf16, #tpu.memory_space<vmem>>, %arg4: memref<32x32xbf16, #tpu.memory_space<vmem>>, %arg5: memref<1x32xf32, #tpu.memory_space<vmem>>, %arg6: memref<512x32xf32, #tpu.memory_space<vmem>>, %arg7: memref<512x32xf32, #tpu.memory_space<vmem>>) attributes {dimension_semantics = [#tpu.dimension_semantics<parallel>, #tpu.dimension_semantics<parallel>, #tpu.dimension_semantics<arbitrary>], iteration_bounds = array<i64: 1, 1, 1>, scalar_prefetch = 0 : i64, scratch_operands = 1 : i64, tpu.core_type = #tpu.core_type<tc>, window_params = [{transform_indices = @transform_0, window_bounds = array<i64: 512, 32>}, {transform_indices = @transform_1, window_bounds = array<i64: 32, 32>}, {transform_indices = @transform_2, window_bounds = array<i64: 1, 32>}, {transform_indices = @transform_3, window_bounds = array<i64: 512, 32>}]} {
    %c0_i32 = arith.constant 0 : i32
    %0 = arith.cmpi eq, %arg2, %c0_i32 : i32
    %1 = arith.extui %0 : i1 to i32
    %c0_i32_0 = arith.constant 0 : i32
    %2 = arith.cmpi ne, %1, %c0_i32_0 : i32
    scf.if %2 {
      %c0_10 = arith.constant 0 : index
      %c0_11 = arith.constant 0 : index
      %12 = vector.load %arg5[%c0_10, %c0_11] : memref<1x32xf32, #tpu.memory_space<vmem>>, vector<1x32xf32>
      %13 = vector.shape_cast %12 : vector<1x32xf32> to vector<1x32xf32>
      %14 = vector.broadcast %13 : vector<1x32xf32> to vector<512x32xf32>
      %c0_12 = arith.constant 0 : index
      %c0_13 = arith.constant 0 : index
      %15 = vector.load %arg7[%c0_12, %c0_13] : memref<512x32xf32, #tpu.memory_space<vmem>>, vector<512x32xf32>
      tpu.vector_store %arg7[%c0_12, %c0_13], %14 {strides = array<i32>} : memref<512x32xf32, #tpu.memory_space<vmem>>, vector<512x32xf32>,
    } else {
    }
    %c0 = arith.constant 0 : index
    %c0_1 = arith.constant 0 : index
    %3 = vector.load %arg7[%c0, %c0_1] : memref<512x32xf32, #tpu.memory_space<vmem>>, vector<512x32xf32>
    %c0_2 = arith.constant 0 : index
    %c0_3 = arith.constant 0 : index
    %4 = vector.load %arg3[%c0_2, %c0_3] : memref<512x32xbf16, #tpu.memory_space<vmem>>, vector<512x32xbf16>
    %c0_4 = arith.constant 0 : index
    %c0_5 = arith.constant 0 : index
    %5 = vector.load %arg4[%c0_4, %c0_5] : memref<32x32xbf16, #tpu.memory_space<vmem>>, vector<32x32xbf16>
    %cst = arith.constant dense<0.000000e+00> : vector<512x32xf32>
    %6 = tpu.matmul %4, %5, %cst {dimension_numbers = #tpu.dot_dimension_numbers<[1], [0], [0], [1], [0, 0, 1, 1], [], []>} : vector<512x32xbf16>, vector<32x32xbf16>, vector<512x32xf32> -> vector<512x32xf32>
    %7 = arith.addf %3, %6 : vector<512x32xf32>
    %c0_6 = arith.constant 0 : index
    %c0_7 = arith.constant 0 : index
    %8 = vector.load %arg7[%c0_6, %c0_7] : memref<512x32xf32, #tpu.memory_space<vmem>>, vector<512x32xf32>
    tpu.vector_store %arg7[%c0_6, %c0_7], %7 {strides = array<i32>} : memref<512x32xf32, #tpu.memory_space<vmem>>, vector<512x32xf32>,
    %c0_i32_8 = arith.constant 0 : i32
    %9 = arith.cmpi eq, %arg2, %c0_i32_8 : i32
    %10 = arith.extui %9 : i1 to i32
    %c0_i32_9 = arith.constant 0 : i32
    %11 = arith.cmpi ne, %10, %c0_i32_9 : i32
    scf.if %11 {
      %c0_10 = arith.constant 0 : index
      %c0_11 = arith.constant 0 : index
      %12 = vector.load %arg7[%c0_10, %c0_11] : memref<512x32xf32, #tpu.memory_space<vmem>>, vector<512x32xf32>
      %c0_12 = arith.constant 0 : index
      %c0_13 = arith.constant 0 : index
      %13 = vector.load %arg6[%c0_12, %c0_13] : memref<512x32xf32, #tpu.memory_space<vmem>>, vector<512x32xf32>
      tpu.vector_store %arg6[%c0_12, %c0_13], %12 {strides = array<i32>} : memref<512x32xf32, #tpu.memory_space<vmem>>, vector<512x32xf32>,
    } else {
    }
    return
  }
  func.func @transform_0(%arg0: i32, %arg1: i32, %arg2: i32) -> (i32, i32) {
    %c0_i32 = arith.constant 0 : i32
    return %arg0, %arg2 : i32, i32
  }
  func.func @transform_1(%arg0: i32, %arg1: i32, %arg2: i32) -> (i32, i32) {
    %c0_i32 = arith.constant 0 : i32
    return %arg2, %arg1 : i32, i32
  }
  func.func @transform_2(%arg0: i32, %arg1: i32, %arg2: i32) -> (i32, i32) {
    %c0_i32 = arith.constant 0 : i32
    %c0_i32_0 = arith.constant 0 : i32
    return %c0_i32, %arg1 : i32, i32
  }
  func.func @transform_3(%arg0: i32, %arg1: i32, %arg2: i32) -> (i32, i32) {
    %c0_i32 = arith.constant 0 : i32
    return %arg0, %arg1 : i32, i32
  }
}

module attributes {stable_mosaic.version = 11 : i64} {
  func.func @kernel(%arg0: i32, %arg1: i32, %arg2: i32, %arg3: memref<512x4xbf16, #tpu.memory_space<vmem>>, %arg4: memref<4x32xbf16, #tpu.memory_space<vmem>>, %arg5: memref<1x32xf32, #tpu.memory_space<vmem>>, %arg6: memref<512x32xf32, #tpu.memory_space<vmem>>, %arg7: memref<512x32xf32, #tpu.memory_space<vmem>>) attributes {dimension_semantics = [#tpu.dimension_semantics<parallel>, #tpu.dimension_semantics<parallel>, #tpu.dimension_semantics<arbitrary>], iteration_bounds = array<i64: 1, 1, 1>, scalar_prefetch = 0 : i64, scratch_operands = 1 : i64, tpu.core_type = #tpu.core_type<tc>, window_params = [{transform_indices = @transform_0, window_bounds = array<i64: 512, 4>}, {transform_indices = @transform_1, window_bounds = array<i64: 4, 32>}, {transform_indices = @transform_2, window_bounds = array<i64: 1, 32>}, {transform_indices = @transform_3, window_bounds = array<i64: 512, 32>}]} {
    %c0_i32 = arith.constant 0 : i32
    %0 = arith.cmpi eq, %arg2, %c0_i32 : i32
    %1 = arith.extui %0 : i1 to i32
    %c0_i32_0 = arith.constant 0 : i32
    %2 = arith.cmpi ne, %1, %c0_i32_0 : i32
    scf.if %2 {
      %c0_10 = arith.constant 0 : index
      %c0_11 = arith.constant 0 : index
      %12 = vector.load %arg5[%c0_10, %c0_11] : memref<1x32xf32, #tpu.memory_space<vmem>>, vector<1x32xf32>
      %13 = vector.shape_cast %12 : vector<1x32xf32> to vector<1x32xf32>
      %14 = vector.broadcast %13 : vector<1x32xf32> to vector<512x32xf32>
      %c0_12 = arith.constant 0 : index
      %c0_13 = arith.constant 0 : index
      %15 = vector.load %arg7[%c0_12, %c0_13] : memref<512x32xf32, #tpu.memory_space<vmem>>, vector<512x32xf32>
      tpu.vector_store %arg7[%c0_12, %c0_13], %14 {strides = array<i32>} : memref<512x32xf32, #tpu.memory_space<vmem>>, vector<512x32xf32>,
    } else {
    }
    %c0 = arith.constant 0 : index
    %c0_1 = arith.constant 0 : index
    %3 = vector.load %arg7[%c0, %c0_1] : memref<512x32xf32, #tpu.memory_space<vmem>>, vector<512x32xf32>
    %c0_2 = arith.constant 0 : index
    %c0_3 = arith.constant 0 : index
    %4 = vector.load %arg3[%c0_2, %c0_3] : memref<512x4xbf16, #tpu.memory_space<vmem>>, vector<512x4xbf16>
    %c0_4 = arith.constant 0 : index
    %c0_5 = arith.constant 0 : index
    %5 = vector.load %arg4[%c0_4, %c0_5] : memref<4x32xbf16, #tpu.memory_space<vmem>>, vector<4x32xbf16>
    %cst = arith.constant dense<0.000000e+00> : vector<512x32xf32>
    %6 = tpu.matmul %4, %5, %cst {dimension_numbers = #tpu.dot_dimension_numbers<[1], [0], [0], [1], [0, 0, 1, 1], [], []>} : vector<512x4xbf16>, vector<4x32xbf16>, vector<512x32xf32> -> vector<512x32xf32>
    %7 = arith.addf %3, %6 : vector<512x32xf32>
    %c0_6 = arith.constant 0 : index
    %c0_7 = arith.constant 0 : index
    %8 = vector.load %arg7[%c0_6, %c0_7] : memref<512x32xf32, #tpu.memory_space<vmem>>, vector<512x32xf32>
    tpu.vector_store %arg7[%c0_6, %c0_7], %7 {strides = array<i32>} : memref<512x32xf32, #tpu.memory_space<vmem>>, vector<512x32xf32>,
    %c0_i32_8 = arith.constant 0 : i32
    %9 = arith.cmpi eq, %arg2, %c0_i32_8 : i32
    %10 = arith.extui %9 : i1 to i32
    %c0_i32_9 = arith.constant 0 : i32
    %11 = arith.cmpi ne, %10, %c0_i32_9 : i32
    scf.if %11 {
      %c0_10 = arith.constant 0 : index
      %c0_11 = arith.constant 0 : index
      %12 = vector.load %arg7[%c0_10, %c0_11] : memref<512x32xf32, #tpu.memory_space<vmem>>, vector<512x32xf32>
      %c0_12 = arith.constant 0 : index
      %c0_13 = arith.constant 0 : index
      %13 = vector.load %arg6[%c0_12, %c0_13] : memref<512x32xf32, #tpu.memory_space<vmem>>, vector<512x32xf32>
      tpu.vector_store %arg6[%c0_12, %c0_13], %12 {strides = array<i32>} : memref<512x32xf32, #tpu.memory_space<vmem>>, vector<512x32xf32>,
    } else {
    }
    return
  }
  func.func @transform_0(%arg0: i32, %arg1: i32, %arg2: i32) -> (i32, i32) {
    %c0_i32 = arith.constant 0 : i32
    return %arg0, %arg2 : i32, i32
  }
  func.func @transform_1(%arg0: i32, %arg1: i32, %arg2: i32) -> (i32, i32) {
    %c0_i32 = arith.constant 0 : i32
    return %arg2, %arg1 : i32, i32
  }
  func.func @transform_2(%arg0: i32, %arg1: i32, %arg2: i32) -> (i32, i32) {
    %c0_i32 = arith.constant 0 : i32
    %c0_i32_0 = arith.constant 0 : i32
    return %c0_i32, %arg1 : i32, i32
  }
  func.func @transform_3(%arg0: i32, %arg1: i32, %arg2: i32) -> (i32, i32) {
    %c0_i32 = arith.constant 0 : i32
    return %arg0, %arg1 : i32, i32
  }
}

</mosaic_0001>

<bundles_post_ra>
// kernel: msca_forward.11
= control target key start
LH: loop header
LB: loop body
LE: loop exit
PB: predicated region body
PF: predicated region fallthrough
CT: control target
= control target key end

     0   :  { %vm399_vm0 = vcmask 293888   ;;  %vm496_vm1 = vcmask 1041408   ;;  %vm26_vm2 = vcmask 261120   ;;  %s1955_s1 = inlined_call_operand.vmem [shape: bf16[36,32], index: 1, kind: input, shape index: {}]   ;;  %s1956_s0 = inlined_call_operand.vmem [shape: bf16[512,36], index: 0, kind: input, shape index: {}]   ;;  %s1957_s2 = inlined_call_operand.vmem [shape: f32[1,32], index: 2, kind: input, shape index: {}]   ;;  %s1958_s3 = inlined_call_operand.vmem [shape: f32[512,32], index: 3, kind: output, shape index: {}]  }
   0x1   :  { %v1298_v0 = vld [vmem:[%s1955_s1] sm:$0xff]   ;;  %v1299_v1 = vld [vmem:[%s1955_s1 + $0x8] sm:$0xff]   ;;  %v1300_v2 = vld [vmem:[%s1955_s1 + $0x10] ss:$0 sps:$4 sm:$0x33]  }
   0x2   :  { %1220 = vmatprep.subr.bf16.mxu0 %v1298_v0  ;;  %1290 = vmatprep.subr.bf16.mxu1 %v1298_v0  ;;  %v1301_v3 = vld [vmem:[%s1956_s0] sm:$0xff]   ;;  %v498_v5 = vsel %vm496_vm1, %v1300_v2, 0  ;;  %v1303_v6 = vld [vmem:[%s1956_s0 + $0x8] sm:$0xff]   ;;  %v1305_v8 = vld [vmem:[%s1956_s0 + $0x10] sm:$0xff]  }
   0x3   :  { %1221 = vmatpush3.bf16.msra.mxu0 %v1298_v0  ;;  %1293 = vmatpush3.bf16.msra.mxu1 %v1298_v0  ;;  %v1302_v4 = vld [vmem:[%s1956_s0 + $0x80] sm:$0xff]   ;;  %v1304_v7 = vld [vmem:[%s1956_s0 + $0x88] sm:$0xff]   ;;  %v1306_v9 = vld [vmem:[%s1956_s0 + $0x90] sm:$0xff]  }
   0x4   :  { %1222 = vmatprep.subr.bf16.mxu0 %v1299_v1  ;;  %1291 = vmatprep.subr.bf16.mxu1 %v1299_v1  ;;  %v1307_v10 = vld [vmem:[%s1956_s0 + $0x18] sm:$0xff]   ;;  %v1309_v12 = vld [vmem:[%s1956_s0 + $0x20] sm:$0xff]   ;;  %v1311_v14 = vld [vmem:[%s1956_s0 + $0x28] sm:$0xff]  }
   0x5   :  { %1226 = vmatprep.mubr.msk.bf16.mxu0 %vm399_vm0, %v1301_v3  ;;  %1258 = vmatprep.mubr.msk.bf16.mxu1 %vm399_vm0, %v1302_v4  ;;  %v1308_v11 = vld [vmem:[%s1956_s0 + $0x98] sm:$0xff]   ;;  %v1310_v13 = vld [vmem:[%s1956_s0 + $0xa0] sm:$0xff]   ;;  %v1312_v15 = vld [vmem:[%s1956_s0 + $0xa8] sm:$0xff]  }
   0x6   :  { %v1313_v16 = vld [vmem:[%s1956_s0 + $0x30] sm:$0xff]   ;;  %v1421_v18 = vld [vmem:[%s1956_s0 + $0x38] sm:$0xff]   ;;  %v1431_v20 = vld [vmem:[%s1957_s2] ss:$0 sm:$0xff] }
   0x7   :  { %1223 = vmatpush3.bf16.msra.mxu0 %v1299_v1  ;;  %1294 = vmatpush3.bf16.msra.mxu1 %v1299_v1  ;;  %v1314_v17 = vld [vmem:[%s1956_s0 + $0xb0] sm:$0xff]   ;;  %v1426_v19 = vld [vmem:[%s1956_s0 + $0xb8] sm:$0xff]   ;;  %v1436_v21 = vld [vmem:[%s1956_s0 + $0x40] sm:$0xff]   ;;  %29 = vst.msk [vmem:[#allocation2 + $0x10] sm:$0xff] %vm26_vm2, %v1431_v20 }
   0x8   :  { %1296 = vmatprep.subr.msk.bf16.mxu0 %vm496_vm1, %v1300_v2  ;;  %1297 = vmatprep.subr.msk.bf16.mxu1 %vm496_vm1, %v1300_v2  ;;  %v1441_v22 = vld [vmem:[%s1956_s0 + $0xc0] sm:$0xff]   ;;  %27 = vst.msk [vmem:[#allocation2] sm:$0xff] %vm26_vm2, %v1431_v20  ;;  %28 = vst.msk [vmem:[#allocation2 + $0x8] sm:$0xff] %vm26_vm2, %v1431_v20  ;;  %v1319_v23 = vld [vmem:[%s1956_s0 + $0x48] sm:$0xff]  }
   0x9   :  { %30 = vst.msk [vmem:[#allocation2 + $0x18] sm:$0xff] %vm26_vm2, %v1431_v20  ;;  %31 = vst.msk [vmem:[#allocation2 + $0x20] sm:$0xff] %vm26_vm2, %v1431_v20  ;;  %v1320_v24 = vld [vmem:[%s1956_s0 + $0xc8] sm:$0xff]   ;;  %v1321_v25 = vld [vmem:[%s1956_s0 + $0x50] sm:$0xff]  }
   0xa   :  { %32 = vst.msk [vmem:[#allocation2 + $0x28] sm:$0xff] %vm26_vm2, %v1431_v20  ;;  %33 = vst.msk [vmem:[#allocation2 + $0x30] sm:$0xff] %vm26_vm2, %v1431_v20  ;;  %v1322_v26 = vld [vmem:[%s1956_s0 + $0xd0] sm:$0xff]   ;;  %v1323_v27 = vld [vmem:[%s1956_s0 + $0x58] sm:$0xff]  }
   0xb   :  { %1225 = vmatpush3.bf16.msra.mxu0 %v498_v5  ;;  %1295 = vmatpush3.bf16.msra.mxu1 %v498_v5  ;;  %34 = vst.msk [vmem:[#allocation2 + $0x38] sm:$0xff] %vm26_vm2, %v1431_v20  ;;  %35 = vst.msk [vmem:[#allocation2 + $0x40] sm:$0xff] %vm26_vm2, %v1431_v20  ;;  %v1324_v28 = vld [vmem:[%s1956_s0 + $0xd8] sm:$0xff]   ;;  %v1325_v29 = vld [vmem:[%s1956_s0 + $0x60] sm:$0xff]  }
   0xc   :  { %36 = vst.msk [vmem:[#allocation2 + $0x48] sm:$0xff] %vm26_vm2, %v1431_v20  ;;  %37 = vst.msk [vmem:[#allocation2 + $0x50] sm:$0xff] %vm26_vm2, %v1431_v20  ;;  %v1326_v30 = vld [vmem:[%s1956_s0 + $0xe0] sm:$0xff]   ;;  %v1327_v31 = vld [vmem:[%s1956_s0 + $0x68] sm:$0xff]  }
   0xd   :  { %38 = vst.msk [vmem:[#allocation2 + $0x58] sm:$0xff] %vm26_vm2, %v1431_v20  ;;  %39 = vst.msk [vmem:[#allocation2 + $0x60] sm:$0xff] %vm26_vm2, %v1431_v20  ;;  %v1328_v32 = vld [vmem:[%s1956_s0 + $0xe8] sm:$0xff]   ;;  %v1329_v33 = vld [vmem:[%s1956_s0 + $0x70] sm:$0xff]  }
   0xe   :  { %1227 = vmatmul.mubr.msk.bf16.vlgmr.msra.gmra.mrb[0].mxu0 %vm399_vm0, %v1303_v6  ;;  %1259 = vmatmul.mubr.msk.bf16.vlgmr.msra.gmra.mrb[0].mxu1 %vm399_vm0, %v1304_v7  ;;  %40 = vst.msk [vmem:[#allocation2 + $0x68] sm:$0xff] %vm26_vm2, %v1431_v20  ;;  %41 = vst.msk [vmem:[#allocation2 + $0x70] sm:$0xff] %vm26_vm2, %v1431_v20  ;;  %v1330_v34 = vld [vmem:[%s1956_s0 + $0xf0] sm:$0xff]   ;;  %v1331_v35 = vld [vmem:[%s1956_s0 + $0x78] sm:$0xff]  }
   0xf   :  { %1230 = vmatprep.mubr.msk.bf16.mxu0 %vm399_vm0, %v1305_v8  ;;  %1262 = vmatprep.mubr.msk.bf16.mxu1 %vm399_vm0, %v1306_v9  ;;  %42 = vst.msk [vmem:[#allocation2 + $0x78] sm:$0xff] %vm26_vm2, %v1431_v20  ;;  %43 = vst.msk [vmem:[#allocation2 + $0x80] sm:$0xff] %vm26_vm2, %v1431_v20  ;;  %v1332_v36 = vld [vmem:[%s1956_s0 + $0xf8] sm:$0xff]   ;;  %v93_v37 = vld [vmem:[#allocation2 + $0x10] sm:$0xff] }
  0x10   :  { %44 = vst.msk [vmem:[#allocation2 + $0x88] sm:$0xff] %vm26_vm2, %v1431_v20  ;;  %45 = vst.msk [vmem:[#allocation2 + $0x90] sm:$0xff] %vm26_vm2, %v1431_v20  ;;  %v91_v39 = vld [vmem:[#allocation2] sm:$0xff]  ;;  %v94_v43 = vld [vmem:[#allocation2 + $0x18] sm:$0xff] }
  0x11   :  { %46 = vst.msk [vmem:[#allocation2 + $0x98] sm:$0xff] %vm26_vm2, %v1431_v20  ;;  %47 = vst.msk [vmem:[#allocation2 + $0xa0] sm:$0xff] %vm26_vm2, %v1431_v20  ;;  %v92_v49 = vld [vmem:[#allocation2 + $0x8] sm:$0xff]  ;;  %v97_v61 = vld [vmem:[#allocation2 + $0x30] sm:$0xff] }
  0x12   :  { %48 = vst.msk [vmem:[#allocation2 + $0xa8] sm:$0xff] %vm26_vm2, %v1431_v20  ;;  %49 = vst.msk [vmem:[#allocation2 + $0xb0] sm:$0xff] %vm26_vm2, %v1431_v20  ;;  %v95_v63 = vld [vmem:[#allocation2 + $0x20] sm:$0xff]  ;;  %v98_v3 = vld [vmem:[#allocation2 + $0x38] sm:$0xff] }
  0x13   :  { %50 = vst.msk [vmem:[#allocation2 + $0xb8] sm:$0xff] %vm26_vm2, %v1431_v20  ;;  %51 = vst.msk [vmem:[#allocation2 + $0xc0] sm:$0xff] %vm26_vm2, %v1431_v20  ;;  %v96_v9 = vld [vmem:[#allocation2 + $0x28] sm:$0xff] }
  0x14   :  { %52 = vst.msk [vmem:[#allocation2 + $0xc8] sm:$0xff] %vm26_vm2, %v1431_v20  ;;  %53 = vst.msk [vmem:[#allocation2 + $0xd0] sm:$0xff] %vm26_vm2, %v1431_v20 }
  0x15   :  { %54 = vst.msk [vmem:[#allocation2 + $0xd8] sm:$0xff] %vm26_vm2, %v1431_v20  ;;  %55 = vst.msk [vmem:[#allocation2 + $0xe0] sm:$0xff] %vm26_vm2, %v1431_v20 }
  0x16   :  { %1231 = vmatmul.mubr.msk.bf16.gmra.mrb[4].mxu0 %vm399_vm0, %v1307_v10  ;;  %1263 = vmatmul.mubr.msk.bf16.gmra.mrb[4].mxu1 %vm399_vm0, %v1308_v11  ;;  %56 = vst.msk [vmem:[#allocation2 + $0xe8] sm:$0xff] %vm26_vm2, %v1431_v20  ;;  %57 = vst.msk [vmem:[#allocation2 + $0xf0] sm:$0xff] %vm26_vm2, %v1431_v20 }
  0x17   :  { %1234 = vmatprep.mubr.msk.bf16.mxu0 %vm399_vm0, %v1309_v12  ;;  %1266 = vmatprep.mubr.msk.bf16.mxu1 %vm399_vm0, %v1310_v13  ;;  %58 = vst.msk [vmem:[#allocation2 + $0xf8] sm:$0xff] %vm26_vm2, %v1431_v20  ;;  %59 = vst.msk [vmem:[#allocation2 + $0x100] sm:$0xff] %vm26_vm2, %v1431_v20 }
  0x18   :  { %60 = vst.msk [vmem:[#allocation2 + $0x108] sm:$0xff] %vm26_vm2, %v1431_v20  ;;  %61 = vst.msk [vmem:[#allocation2 + $0x110] sm:$0xff] %vm26_vm2, %v1431_v20 }
  0x19   :  { %62 = vst.msk [vmem:[#allocation2 + $0x118] sm:$0xff] %vm26_vm2, %v1431_v20  ;;  %63 = vst.msk [vmem:[#allocation2 + $0x120] sm:$0xff] %vm26_vm2, %v1431_v20 }
  0x1a   :  { %64 = vst.msk [vmem:[#allocation2 + $0x128] sm:$0xff] %vm26_vm2, %v1431_v20  ;;  %65 = vst.msk [vmem:[#allocation2 + $0x130] sm:$0xff] %vm26_vm2, %v1431_v20 }
  0x1b   :  { %66 = vst.msk [vmem:[#allocation2 + $0x138] sm:$0xff] %vm26_vm2, %v1431_v20  ;;  %67 = vst.msk [vmem:[#allocation2 + $0x140] sm:$0xff] %vm26_vm2, %v1431_v20 }
  0x1c   :  { %68 = vst.msk [vmem:[#allocation2 + $0x148] sm:$0xff] %vm26_vm2, %v1431_v20  ;;  %69 = vst.msk [vmem:[#allocation2 + $0x150] sm:$0xff] %vm26_vm2, %v1431_v20 }
  0x1d   :  { %70 = vst.msk [vmem:[#allocation2 + $0x158] sm:$0xff] %vm26_vm2, %v1431_v20  ;;  %71 = vst.msk [vmem:[#allocation2 + $0x160] sm:$0xff] %vm26_vm2, %v1431_v20 }
  0x1e   :  { %1235 = vmatmul.mubr.msk.bf16.gmra.mrb[8].mxu0 %vm399_vm0, %v1311_v14  ;;  %1267 = vmatmul.mubr.msk.bf16.gmra.mrb[8].mxu1 %vm399_vm0, %v1312_v15  ;;  %72 = vst.msk [vmem:[#allocation2 + $0x168] sm:$0xff] %vm26_vm2, %v1431_v20  ;;  %73 = vst.msk [vmem:[#allocation2 + $0x170] sm:$0xff] %vm26_vm2, %v1431_v20  ;;  %v123_v40 = vld [vmem:[#allocation2 + $0x100] sm:$0xff] }
  0x1f   :  { %1238 = vmatprep.mubr.msk.bf16.mxu0 %vm399_vm0, %v1313_v16  ;;  %1270 = vmatprep.mubr.msk.bf16.mxu1 %vm399_vm0, %v1314_v17  ;;  %74 = vst.msk [vmem:[#allocation2 + $0x178] sm:$0xff] %vm26_vm2, %v1431_v20  ;;  %75 = vst.msk [vmem:[#allocation2 + $0x180] sm:$0xff] %vm26_vm2, %v1431_v20  ;;  %v125_v38 = vld [vmem:[#allocation2 + $0x110] sm:$0xff]  ;;  %v124_v50 = vld [vmem:[#allocation2 + $0x108] sm:$0xff] }
  0x20   :  { %76 = vst.msk [vmem:[#allocation2 + $0x188] sm:$0xff] %vm26_vm2, %v1431_v20  ;;  %77 = vst.msk [vmem:[#allocation2 + $0x190] sm:$0xff] %vm26_vm2, %v1431_v20  ;;  %v126_v44 = vld [vmem:[#allocation2 + $0x118] sm:$0xff]  ;;  %v127_v0 = vld [vmem:[#allocation2 + $0x120] sm:$0xff] }
  0x21   :  { %78 = vst.msk [vmem:[#allocation2 + $0x198] sm:$0xff] %vm26_vm2, %v1431_v20  ;;  %79 = vst.msk [vmem:[#allocation2 + $0x1a0] sm:$0xff] %vm26_vm2, %v1431_v20  ;;  %v129_v62 = vld [vmem:[#allocation2 + $0x130] sm:$0xff]  ;;  %v128_v10 = vld [vmem:[#allocation2 + $0x128] sm:$0xff] }
  0x22   :  { %80 = vst.msk [vmem:[#allocation2 + $0x1a8] sm:$0xff] %vm26_vm2, %v1431_v20  ;;  %81 = vst.msk [vmem:[#allocation2 + $0x1b0] sm:$0xff] %vm26_vm2, %v1431_v20  ;;  %v130_v4 = vld [vmem:[#allocation2 + $0x138] sm:$0xff] }
  0x23   :  { %82 = vst.msk [vmem:[#allocation2 + $0x1b8] sm:$0xff] %vm26_vm2, %v1431_v20  ;;  %83 = vst.msk [vmem:[#allocation2 + $0x1c0] sm:$0xff] %vm26_vm2, %v1431_v20 }
  0x24   :  { %84 = vst.msk [vmem:[#allocation2 + $0x1c8] sm:$0xff] %vm26_vm2, %v1431_v20  ;;  %85 = vst.msk [vmem:[#allocation2 + $0x1d0] sm:$0xff] %vm26_vm2, %v1431_v20 }
  0x25   :  { %86 = vst.msk [vmem:[#allocation2 + $0x1d8] sm:$0xff] %vm26_vm2, %v1431_v20  ;;  %87 = vst.msk [vmem:[#allocation2 + $0x1e0] sm:$0xff] %vm26_vm2, %v1431_v20 }
  0x26   :  { %88 = vst.msk [vmem:[#allocation2 + $0x1e8] sm:$0xff] %vm26_vm2, %v1431_v20  ;;  %89 = vst.msk [vmem:[#allocation2 + $0x1f0] sm:$0xff] %vm26_vm2, %v1431_v20  ;;  %1239 = vmatmul.mubr.msk.bf16.gmra.mrb[12].mxu0 %vm399_vm0, %v1421_v18  ;;  %1271 = vmatmul.mubr.msk.bf16.gmra.mrb[12].mxu1 %vm399_vm0, %v1426_v19 }
  0x27   :  { %90 = vst.msk [vmem:[#allocation2 + $0x1f8] sm:$0xff] %vm26_vm2, %v1431_v20  ;;  %1242 = vmatprep.mubr.msk.bf16.mxu0 %vm399_vm0, %v1436_v21  ;;  %1274 = vmatprep.mubr.msk.bf16.mxu1 %vm399_vm0, %v1441_v22 }
  0x2e   :  { %1243 = vmatmul.mubr.msk.bf16.gmra.mrb[16].mxu0 %vm399_vm0, %v1319_v23  ;;  %1275 = vmatmul.mubr.msk.bf16.gmra.mrb[16].mxu1 %vm399_vm0, %v1320_v24 }
  0x2f   :  { %1246 = vmatprep.mubr.msk.bf16.mxu0 %vm399_vm0, %v1321_v25  ;;  %1278 = vmatprep.mubr.msk.bf16.mxu1 %vm399_vm0, %v1322_v26 }
  0x36   :  { %1247 = vmatmul.mubr.msk.bf16.gmra.mrb[20].mxu0 %vm399_vm0, %v1323_v27  ;;  %1279 = vmatmul.mubr.msk.bf16.gmra.mrb[20].mxu1 %vm399_vm0, %v1324_v28 }
  0x37   :  { %1250 = vmatprep.mubr.msk.bf16.mxu0 %vm399_vm0, %v1325_v29  ;;  %1282 = vmatprep.mubr.msk.bf16.mxu1 %vm399_vm0, %v1326_v30 }
  0x3e   :  { %1251 = vmatmul.mubr.msk.bf16.gmra.mrb[24].mxu0 %vm399_vm0, %v1327_v31  ;;  %1283 = vmatmul.mubr.msk.bf16.gmra.mrb[24].mxu1 %vm399_vm0, %v1328_v32 }
  0x3f   :  { %1254 = vmatprep.mubr.msk.bf16.mxu0 %vm399_vm0, %v1329_v33  ;;  %1286 = vmatprep.mubr.msk.bf16.mxu1 %vm399_vm0, %v1330_v34 }
  0x46   :  { %1255 = vmatmul.mubr.msk.bf16.gmra.mrb[28].mxu0 %vm399_vm0, %v1331_v35  ;;  %1287 = vmatmul.mubr.msk.bf16.gmra.mrb[28].mxu1 %vm399_vm0, %v1332_v36 }
  0xe1   :  { %v1228_v41 = vpop.f32.mrb[0].mxu0  ;;  %v1260_v42 = vpop.f32.mrb[0].mxu1 }
  0xe2   :  { %v791_v45 = vadd.f32 %v1228_v41, %v93_v37  ;;  %v823_v46 = vadd.f32 %v1260_v42, %v125_v38  ;;  %v534_v47 = vpop.f32.mrb[1].mxu0  ;;  %v662_v48 = vpop.f32.mrb[1].mxu1  ;;  %v101_v37 = vld [vmem:[#allocation2 + $0x50] sm:$0xff] }
  0xe3   :  { %v789_v51 = vadd.f32 %v534_v47, %v91_v39  ;;  %v821_v52 = vadd.f32 %v662_v48, %v123_v40  ;;  %v1229_v53 = vpop.f32.mrb[2].mxu0  ;;  %v1261_v54 = vpop.f32.mrb[2].mxu1  ;;  %v133_v38 = vld [vmem:[#allocation2 + $0x150] sm:$0xff]  ;;  %v99_v39 = vld [vmem:[#allocation2 + $0x40] sm:$0xff] }
  0xe4   :  { %856 = vst.msk [vmem:[#allocation2 + $0x10] sm:$0xff] %vm26_vm2, %v791_v45  ;;  %888 = vst.msk [vmem:[#allocation2 + $0x110] sm:$0xff] %vm26_vm2, %v823_v46  ;;  %v792_v55 = vadd.f32 %v1229_v53, %v94_v43  ;;  %v824_v56 = vadd.f32 %v1261_v54, %v126_v44  ;;  %v537_v57 = vpop.f32.mrb[3].mxu0  ;;  %v665_v58 = vpop.f32.mrb[3].mxu1  ;;  %v131_v40 = vld [vmem:[#allocation2 + $0x140] sm:$0xff]  ;;  %v102_v43 = vld [vmem:[#allocation2 + $0x58] sm:$0xff] }
  0xe5   :  { %854 = vst.msk [vmem:[#allocation2] sm:$0xff] %vm26_vm2, %v789_v51  ;;  %886 = vst.msk [vmem:[#allocation2 + $0x100] sm:$0xff] %vm26_vm2, %v821_v52  ;;  %v790_v59 = vadd.f32 %v537_v57, %v92_v49  ;;  %v822_v60 = vadd.f32 %v665_v58, %v124_v50  ;;  %v134_v44 = vld [vmem:[#allocation2 + $0x158] sm:$0xff]  ;;  %v100_v49 = vld [vmem:[#allocation2 + $0x48] sm:$0xff] }
  0xe6   :  { %857 = vst.msk [vmem:[#allocation2 + $0x18] sm:$0xff] %vm26_vm2, %v792_v55  ;;  %889 = vst.msk [vmem:[#allocation2 + $0x118] sm:$0xff] %vm26_vm2, %v824_v56  ;;  %v132_v50 = vld [vmem:[#allocation2 + $0x148] sm:$0xff] }
  0xe7   :  { %855 = vst.msk [vmem:[#allocation2 + $0x8] sm:$0xff] %vm26_vm2, %v790_v59  ;;  %887 = vst.msk [vmem:[#allocation2 + $0x108] sm:$0xff] %vm26_vm2, %v822_v60 }
  0xe9   :  { %v1232_v1 = vpop.f32.mrb[4].mxu0  ;;  %v1264_v2 = vpop.f32.mrb[4].mxu1 }
  0xea   :  { %v795_v5 = vadd.f32 %v1232_v1, %v97_v61  ;;  %v827_v6 = vadd.f32 %v1264_v2, %v129_v62  ;;  %v550_v7 = vpop.f32.mrb[5].mxu0  ;;  %v678_v8 = vpop.f32.mrb[5].mxu1 }
  0xeb   :  { %v923_v11 = vld [vmem:[#allocation2 + $0x10] sm:$0xff]  ;;  %v793_v13 = vadd.f32 %v550_v7, %v95_v63  ;;  %v825_v14 = vadd.f32 %v678_v8, %v127_v0  ;;  %v1233_v15 = vpop.f32.mrb[6].mxu0  ;;  %v1265_v16 = vpop.f32.mrb[6].mxu1 }
  0xec   :  { %v955_v12 = vld [vmem:[#allocation2 + $0x110] sm:$0xff]  ;;  %v987_v17 = vmax.f32 %v923_v11, 0.0  ;;  %v921_v19 = vld [vmem:[#allocation2] sm:$0xff]  ;;  %860 = vst.msk [vmem:[#allocation2 + $0x30] sm:$0xff] %vm26_vm2, %v795_v5  ;;  %892 = vst.msk [vmem:[#allocation2 + $0x130] sm:$0xff] %vm26_vm2, %v827_v6  ;;  %v796_v21 = vadd.f32 %v1233_v15, %v98_v3  ;;  %v828_v22 = vadd.f32 %v1265_v16, %v130_v4  ;;  %v553_v23 = vpop.f32.mrb[7].mxu0 }
  0xed   :  { %v1019_v18 = vmax.f32 %v955_v12, 0.0  ;;  %v953_v20 = vld [vmem:[#allocation2 + $0x100] sm:$0xff]  ;;  %v681_v24 = vpop.f32.mrb[7].mxu1  ;;  %v985_v25 = vmax.f32 %v921_v19, 0.0  ;;  %v924_v27 = vld [vmem:[#allocation2 + $0x18] sm:$0xff]  ;;  %858 = vst.msk [vmem:[#allocation2 + $0x20] sm:$0xff] %vm26_vm2, %v793_v13  ;;  %v794_v29 = vadd.f32 %v553_v23, %v96_v9 }
  0xee   :  { %v1017_v26 = vmax.f32 %v953_v20, 0.0  ;;  %v956_v28 = vld [vmem:[#allocation2 + $0x118] sm:$0xff]  ;;  %890 = vst.msk [vmem:[#allocation2 + $0x120] sm:$0xff] %vm26_vm2, %v825_v14  ;;  %v826_v30 = vadd.f32 %v681_v24, %v128_v10  ;;  %1051 = vst.msk [vmem:[%s1958_s3 + $0x10] sm:$0xff] %vm26_vm2, %v987_v17  ;;  %v988_v31 = vmax.f32 %v924_v27, 0.0  ;;  %v922_v33 = vld [vmem:[#allocation2 + $0x8] sm:$0xff] }
  0xef   :  { %1083 = vst.msk [vmem:[%s1958_s3 + $0x110] sm:$0xff] %vm26_vm2, %v1019_v18  ;;  %v1020_v32 = vmax.f32 %v956_v28, 0.0  ;;  %v954_v34 = vld [vmem:[#allocation2 + $0x108] sm:$0xff]  ;;  %861 = vst.msk [vmem:[#allocation2 + $0x38] sm:$0xff] %vm26_vm2, %v796_v21  ;;  %v986_v35 = vmax.f32 %v922_v33, 0.0  ;;  %v105_v13 = vld [vmem:[#allocation2 + $0x70] sm:$0xff] }
  0xf0   :  { %893 = vst.msk [vmem:[#allocation2 + $0x138] sm:$0xff] %vm26_vm2, %v828_v22  ;;  %1049 = vst.msk [vmem:[%s1958_s3] sm:$0xff] %vm26_vm2, %v985_v25  ;;  %v1018_v36 = vmax.f32 %v954_v34, 0.0  ;;  %v137_v14 = vld [vmem:[#allocation2 + $0x170] sm:$0xff]  ;;  %v103_v15 = vld [vmem:[#allocation2 + $0x60] sm:$0xff] }
  0xf1   :  { %1081 = vst.msk [vmem:[%s1958_s3 + $0x100] sm:$0xff] %vm26_vm2, %v1017_v26  ;;  %859 = vst.msk [vmem:[#allocation2 + $0x28] sm:$0xff] %vm26_vm2, %v794_v29  ;;  %v1236_v41 = vpop.f32.mrb[8].mxu0  ;;  %v1268_v42 = vpop.f32.mrb[8].mxu1  ;;  %v135_v16 = vld [vmem:[#allocation2 + $0x160] sm:$0xff]  ;;  %v106_v19 = vld [vmem:[#allocation2 + $0x78] sm:$0xff] }
  0xf2   :  { %891 = vst.msk [vmem:[#allocation2 + $0x128] sm:$0xff] %vm26_vm2, %v826_v30  ;;  %1052 = vst.msk [vmem:[%s1958_s3 + $0x18] sm:$0xff] %vm26_vm2, %v988_v31  ;;  %v799_v45 = vadd.f32 %v1236_v41, %v101_v37  ;;  %v831_v46 = vadd.f32 %v1268_v42, %v133_v38  ;;  %v566_v47 = vpop.f32.mrb[9].mxu0  ;;  %v694_v48 = vpop.f32.mrb[9].mxu1  ;;  %v138_v20 = vld [vmem:[#allocation2 + $0x178] sm:$0xff]  ;;  %v104_v25 = vld [vmem:[#allocation2 + $0x68] sm:$0xff] }
  0xf3   :  { %1084 = vst.msk [vmem:[%s1958_s3 + $0x118] sm:$0xff] %vm26_vm2, %v1020_v32  ;;  %1050 = vst.msk [vmem:[%s1958_s3 + $0x8] sm:$0xff] %vm26_vm2, %v986_v35  ;;  %v927_v51 = vld [vmem:[#allocation2 + $0x30] sm:$0xff]  ;;  %v797_v53 = vadd.f32 %v566_v47, %v99_v39  ;;  %v829_v54 = vadd.f32 %v694_v48, %v131_v40  ;;  %v1237_v55 = vpop.f32.mrb[10].mxu0  ;;  %v1269_v56 = vpop.f32.mrb[10].mxu1  ;;  %v136_v26 = vld [vmem:[#allocation2 + $0x168] sm:$0xff] }
  0xf4   :  { %1082 = vst.msk [vmem:[%s1958_s3 + $0x108] sm:$0xff] %vm26_vm2, %v1018_v36  ;;  %v959_v52 = vld [vmem:[#allocation2 + $0x130] sm:$0xff]  ;;  %v991_v57 = vmax.f32 %v927_v51, 0.0  ;;  %v925_v59 = vld [vmem:[#allocation2 + $0x20] sm:$0xff]  ;;  %864 = vst.msk [vmem:[#allocation2 + $0x50] sm:$0xff] %vm26_vm2, %v799_v45  ;;  %v800_v61 = vadd.f32 %v1237_v55, %v102_v43  ;;  %v832_v62 = vadd.f32 %v1269_v56, %v134_v44  ;;  %v569_v63 = vpop.f32.mrb[11].mxu0 }
  0xf5   :  { %v1023_v58 = vmax.f32 %v959_v52, 0.0  ;;  %v957_v60 = vld [vmem:[#allocation2 + $0x120] sm:$0xff]  ;;  %896 = vst.msk [vmem:[#allocation2 + $0x150] sm:$0xff] %vm26_vm2, %v831_v46  ;;  %v697_v0 = vpop.f32.mrb[11].mxu1  ;;  %v989_v1 = vmax.f32 %v925_v59, 0.0  ;;  %862 = vst.msk [vmem:[#allocation2 + $0x40] sm:$0xff] %vm26_vm2, %v797_v53  ;;  %v798_v5 = vadd.f32 %v569_v63, %v100_v49 }
  0xf6   :  { %v1021_v2 = vmax.f32 %v957_v60, 0.0  ;;  %v928_v3 = vld [vmem:[#allocation2 + $0x38] sm:$0xff]  ;;  %894 = vst.msk [vmem:[#allocation2 + $0x140] sm:$0xff] %vm26_vm2, %v829_v54  ;;  %v830_v6 = vadd.f32 %v697_v0, %v132_v50  ;;  %1055 = vst.msk [vmem:[%s1958_s3 + $0x30] sm:$0xff] %vm26_vm2, %v991_v57  ;;  %v109_v53 = vld [vmem:[#allocation2 + $0x90] sm:$0xff] }
  0xf7   :  { %v960_v4 = vld [vmem:[#allocation2 + $0x138] sm:$0xff]  ;;  %1087 = vst.msk [vmem:[%s1958_s3 + $0x130] sm:$0xff] %vm26_vm2, %v1023_v58  ;;  %v992_v7 = vmax.f32 %v928_v3, 0.0  ;;  %865 = vst.msk [vmem:[#allocation2 + $0x58] sm:$0xff] %vm26_vm2, %v800_v61  ;;  %v141_v54 = vld [vmem:[#allocation2 + $0x190] sm:$0xff] }
  0xf8   :  { %v1024_v8 = vmax.f32 %v960_v4, 0.0  ;;  %v926_v9 = vld [vmem:[#allocation2 + $0x28] sm:$0xff]  ;;  %897 = vst.msk [vmem:[#allocation2 + $0x158] sm:$0xff] %vm26_vm2, %v832_v62  ;;  %1053 = vst.msk [vmem:[%s1958_s3 + $0x20] sm:$0xff] %vm26_vm2, %v989_v1  ;;  %v107_v55 = vld [vmem:[#allocation2 + $0x80] sm:$0xff] }
  0xf9   :  { %v958_v10 = vld [vmem:[#allocation2 + $0x128] sm:$0xff]  ;;  %1085 = vst.msk [vmem:[%s1958_s3 + $0x120] sm:$0xff] %vm26_vm2, %v1021_v2  ;;  %v990_v11 = vmax.f32 %v926_v9, 0.0  ;;  %863 = vst.msk [vmem:[#allocation2 + $0x48] sm:$0xff] %vm26_vm2, %v798_v5  ;;  %v1240_v17 = vpop.f32.mrb[12].mxu0  ;;  %v1272_v18 = vpop.f32.mrb[12].mxu1 }
  0xfa   :  { %v1022_v12 = vmax.f32 %v958_v10, 0.0  ;;  %895 = vst.msk [vmem:[#allocation2 + $0x148] sm:$0xff] %vm26_vm2, %v830_v6  ;;  %1056 = vst.msk [vmem:[%s1958_s3 + $0x38] sm:$0xff] %vm26_vm2, %v992_v7  ;;  %v803_v21 = vadd.f32 %v1240_v17, %v105_v13  ;;  %v835_v22 = vadd.f32 %v1272_v18, %v137_v14  ;;  %v582_v23 = vpop.f32.mrb[13].mxu0  ;;  %v710_v24 = vpop.f32.mrb[13].mxu1  ;;  %v139_v56 = vld [vmem:[#allocation2 + $0x180] sm:$0xff] }
  0xfb   :  { %1088 = vst.msk [vmem:[%s1958_s3 + $0x138] sm:$0xff] %vm26_vm2, %v1024_v8  ;;  %1054 = vst.msk [vmem:[%s1958_s3 + $0x28] sm:$0xff] %vm26_vm2, %v990_v11  ;;  %v931_v27 = vld [vmem:[#allocation2 + $0x50] sm:$0xff]  ;;  %v801_v29 = vadd.f32 %v582_v23, %v103_v15  ;;  %v833_v30 = vadd.f32 %v710_v24, %v135_v16  ;;  %v1241_v31 = vpop.f32.mrb[14].mxu0  ;;  %v1273_v32 = vpop.f32.mrb[14].mxu1  ;;  %v110_v59 = vld [vmem:[#allocation2 + $0x98] sm:$0xff] }
  0xfc   :  { %1086 = vst.msk [vmem:[%s1958_s3 + $0x128] sm:$0xff] %vm26_vm2, %v1022_v12  ;;  %v963_v28 = vld [vmem:[#allocation2 + $0x150] sm:$0xff]  ;;  %v995_v33 = vmax.f32 %v931_v27, 0.0  ;;  %v929_v35 = vld [vmem:[#allocation2 + $0x40] sm:$0xff]  ;;  %868 = vst.msk [vmem:[#allocation2 + $0x70] sm:$0xff] %vm26_vm2, %v803_v21  ;;  %v804_v37 = vadd.f32 %v1241_v31, %v106_v19  ;;  %v836_v38 = vadd.f32 %v1273_v32, %v138_v20  ;;  %v585_v39 = vpop.f32.mrb[15].mxu0 }
  0xfd   :  { %v1027_v34 = vmax.f32 %v963_v28, 0.0  ;;  %v961_v36 = vld [vmem:[#allocation2 + $0x140] sm:$0xff]  ;;  %900 = vst.msk [vmem:[#allocation2 + $0x170] sm:$0xff] %vm26_vm2, %v835_v22  ;;  %v713_v40 = vpop.f32.mrb[15].mxu1  ;;  %v993_v41 = vmax.f32 %v929_v35, 0.0  ;;  %866 = vst.msk [vmem:[#allocation2 + $0x60] sm:$0xff] %vm26_vm2, %v801_v29  ;;  %v802_v45 = vadd.f32 %v585_v39, %v104_v25 }
  0xfe   :  { %v1025_v42 = vmax.f32 %v961_v36, 0.0  ;;  %v932_v43 = vld [vmem:[#allocation2 + $0x58] sm:$0xff]  ;;  %898 = vst.msk [vmem:[#allocation2 + $0x160] sm:$0xff] %vm26_vm2, %v833_v30  ;;  %v834_v46 = vadd.f32 %v713_v40, %v136_v26  ;;  %1059 = vst.msk [vmem:[%s1958_s3 + $0x50] sm:$0xff] %vm26_vm2, %v995_v33  ;;  %v108_v1 = vld [vmem:[#allocation2 + $0x88] sm:$0xff] }
  0xff   :  { %v964_v44 = vld [vmem:[#allocation2 + $0x158] sm:$0xff]  ;;  %1091 = vst.msk [vmem:[%s1958_s3 + $0x150] sm:$0xff] %vm26_vm2, %v1027_v34  ;;  %v996_v47 = vmax.f32 %v932_v43, 0.0  ;;  %869 = vst.msk [vmem:[#allocation2 + $0x78] sm:$0xff] %vm26_vm2, %v804_v37  ;;  %v140_v2 = vld [vmem:[#allocation2 + $0x188] sm:$0xff] }
 0x100   :  { %v1028_v48 = vmax.f32 %v964_v44, 0.0  ;;  %v930_v49 = vld [vmem:[#allocation2 + $0x48] sm:$0xff]  ;;  %901 = vst.msk [vmem:[#allocation2 + $0x178] sm:$0xff] %vm26_vm2, %v836_v38  ;;  %1057 = vst.msk [vmem:[%s1958_s3 + $0x40] sm:$0xff] %vm26_vm2, %v993_v41  ;;  %v142_v60 = vld [vmem:[#allocation2 + $0x198] sm:$0xff] }
 0x101   :  { %v962_v50 = vld [vmem:[#allocation2 + $0x148] sm:$0xff]  ;;  %1089 = vst.msk [vmem:[%s1958_s3 + $0x140] sm:$0xff] %vm26_vm2, %v1025_v42  ;;  %v994_v51 = vmax.f32 %v930_v49, 0.0  ;;  %867 = vst.msk [vmem:[#allocation2 + $0x68] sm:$0xff] %vm26_vm2, %v802_v45  ;;  %v1244_v57 = vpop.f32.mrb[16].mxu0  ;;  %v1276_v58 = vpop.f32.mrb[16].mxu1 }
 0x102   :  { %v1026_v52 = vmax.f32 %v962_v50, 0.0  ;;  %899 = vst.msk [vmem:[#allocation2 + $0x168] sm:$0xff] %vm26_vm2, %v834_v46  ;;  %1060 = vst.msk [vmem:[%s1958_s3 + $0x58] sm:$0xff] %vm26_vm2, %v996_v47  ;;  %v807_v61 = vadd.f32 %v1244_v57, %v109_v53  ;;  %v839_v62 = vadd.f32 %v1276_v58, %v141_v54  ;;  %v598_v63 = vpop.f32.mrb[17].mxu0  ;;  %v726_v0 = vpop.f32.mrb[17].mxu1  ;;  %v113_v29 = vld [vmem:[#allocation2 + $0xb0] sm:$0xff] }
 0x103   :  { %1092 = vst.msk [vmem:[%s1958_s3 + $0x158] sm:$0xff] %vm26_vm2, %v1028_v48  ;;  %1058 = vst.msk [vmem:[%s1958_s3 + $0x48] sm:$0xff] %vm26_vm2, %v994_v51  ;;  %v935_v3 = vld [vmem:[#allocation2 + $0x70] sm:$0xff]  ;;  %v805_v5 = vadd.f32 %v598_v63, %v107_v55  ;;  %v837_v6 = vadd.f32 %v726_v0, %v139_v56  ;;  %v1245_v7 = vpop.f32.mrb[18].mxu0  ;;  %v1277_v8 = vpop.f32.mrb[18].mxu1  ;;  %v111_v31 = vld [vmem:[#allocation2 + $0xa0] sm:$0xff] }
 0x104   :  { %1090 = vst.msk [vmem:[%s1958_s3 + $0x148] sm:$0xff] %vm26_vm2, %v1026_v52  ;;  %v967_v4 = vld [vmem:[#allocation2 + $0x170] sm:$0xff]  ;;  %v999_v9 = vmax.f32 %v935_v3, 0.0  ;;  %v933_v11 = vld [vmem:[#allocation2 + $0x60] sm:$0xff]  ;;  %872 = vst.msk [vmem:[#allocation2 + $0x90] sm:$0xff] %vm26_vm2, %v807_v61  ;;  %v808_v13 = vadd.f32 %v1245_v7, %v110_v59  ;;  %v840_v14 = vadd.f32 %v1277_v8, %v142_v60  ;;  %v601_v15 = vpop.f32.mrb[19].mxu0 }
 0x105   :  { %v1031_v10 = vmax.f32 %v967_v4, 0.0  ;;  %v965_v12 = vld [vmem:[#allocation2 + $0x160] sm:$0xff]  ;;  %904 = vst.msk [vmem:[#allocation2 + $0x190] sm:$0xff] %vm26_vm2, %v839_v62  ;;  %v729_v16 = vpop.f32.mrb[19].mxu1  ;;  %v997_v17 = vmax.f32 %v933_v11, 0.0  ;;  %870 = vst.msk [vmem:[#allocation2 + $0x80] sm:$0xff] %vm26_vm2, %v805_v5  ;;  %v806_v21 = vadd.f32 %v601_v15, %v108_v1 }
 0x106   :  { %v1029_v18 = vmax.f32 %v965_v12, 0.0  ;;  %v936_v19 = vld [vmem:[#allocation2 + $0x78] sm:$0xff]  ;;  %902 = vst.msk [vmem:[#allocation2 + $0x180] sm:$0xff] %vm26_vm2, %v837_v6  ;;  %v838_v22 = vadd.f32 %v729_v16, %v140_v2  ;;  %1063 = vst.msk [vmem:[%s1958_s3 + $0x70] sm:$0xff] %vm26_vm2, %v999_v9  ;;  %v145_v30 = vld [vmem:[#allocation2 + $0x1b0] sm:$0xff] }
 0x107   :  { %v968_v20 = vld [vmem:[#allocation2 + $0x178] sm:$0xff]  ;;  %1095 = vst.msk [vmem:[%s1958_s3 + $0x170] sm:$0xff] %vm26_vm2, %v1031_v10  ;;  %v1000_v23 = vmax.f32 %v936_v19, 0.0  ;;  %873 = vst.msk [vmem:[#allocation2 + $0x98] sm:$0xff] %vm26_vm2, %v808_v13  ;;  %v143_v32 = vld [vmem:[#allocation2 + $0x1a0] sm:$0xff] }
 0x108   :  { %v1032_v24 = vmax.f32 %v968_v20, 0.0  ;;  %v934_v25 = vld [vmem:[#allocation2 + $0x68] sm:$0xff]  ;;  %905 = vst.msk [vmem:[#allocation2 + $0x198] sm:$0xff] %vm26_vm2, %v840_v14  ;;  %1061 = vst.msk [vmem:[%s1958_s3 + $0x60] sm:$0xff] %vm26_vm2, %v997_v17  ;;  %v114_v35 = vld [vmem:[#allocation2 + $0xb8] sm:$0xff] }
 0x109   :  { %v966_v26 = vld [vmem:[#allocation2 + $0x168] sm:$0xff]  ;;  %1093 = vst.msk [vmem:[%s1958_s3 + $0x160] sm:$0xff] %vm26_vm2, %v1029_v18  ;;  %v998_v27 = vmax.f32 %v934_v25, 0.0  ;;  %871 = vst.msk [vmem:[#allocation2 + $0x88] sm:$0xff] %vm26_vm2, %v806_v21  ;;  %v1248_v33 = vpop.f32.mrb[20].mxu0  ;;  %v1280_v34 = vpop.f32.mrb[20].mxu1 }
 0x10a   :  { %v1030_v28 = vmax.f32 %v966_v26, 0.0  ;;  %903 = vst.msk [vmem:[#allocation2 + $0x188] sm:$0xff] %vm26_vm2, %v838_v22  ;;  %1064 = vst.msk [vmem:[%s1958_s3 + $0x78] sm:$0xff] %vm26_vm2, %v1000_v23  ;;  %v146_v36 = vld [vmem:[#allocation2 + $0x1b8] sm:$0xff]  ;;  %v811_v37 = vadd.f32 %v1248_v33, %v113_v29  ;;  %v843_v38 = vadd.f32 %v1280_v34, %v145_v30  ;;  %v614_v39 = vpop.f32.mrb[21].mxu0  ;;  %v742_v40 = vpop.f32.mrb[21].mxu1 }
 0x10b   :  { %1096 = vst.msk [vmem:[%s1958_s3 + $0x178] sm:$0xff] %vm26_vm2, %v1032_v24  ;;  %1062 = vst.msk [vmem:[%s1958_s3 + $0x68] sm:$0xff] %vm26_vm2, %v998_v27  ;;  %v112_v41 = vld [vmem:[#allocation2 + $0xa8] sm:$0xff]  ;;  %v939_v43 = vld [vmem:[#allocation2 + $0x90] sm:$0xff]  ;;  %v809_v45 = vadd.f32 %v614_v39, %v111_v31  ;;  %v841_v46 = vadd.f32 %v742_v40, %v143_v32  ;;  %v1249_v47 = vpop.f32.mrb[22].mxu0  ;;  %v1281_v48 = vpop.f32.mrb[22].mxu1 }
 0x10c   :  { %1094 = vst.msk [vmem:[%s1958_s3 + $0x168] sm:$0xff] %vm26_vm2, %v1030_v28  ;;  %v144_v42 = vld [vmem:[#allocation2 + $0x1a8] sm:$0xff]  ;;  %v971_v44 = vld [vmem:[#allocation2 + $0x190] sm:$0xff]  ;;  %v1003_v49 = vmax.f32 %v939_v43, 0.0  ;;  %v937_v51 = vld [vmem:[#allocation2 + $0x80] sm:$0xff]  ;;  %v812_v53 = vadd.f32 %v1249_v47, %v114_v35  ;;  %v844_v54 = vadd.f32 %v1281_v48, %v146_v36  ;;  %v617_v55 = vpop.f32.mrb[23].mxu0 }
 0x10d   :  { %v1035_v50 = vmax.f32 %v971_v44, 0.0  ;;  %v969_v52 = vld [vmem:[#allocation2 + $0x180] sm:$0xff]  ;;  %876 = vst.msk [vmem:[#allocation2 + $0xb0] sm:$0xff] %vm26_vm2, %v811_v37  ;;  %908 = vst.msk [vmem:[#allocation2 + $0x1b0] sm:$0xff] %vm26_vm2, %v843_v38  ;;  %v745_v56 = vpop.f32.mrb[23].mxu1  ;;  %v1001_v57 = vmax.f32 %v937_v51, 0.0  ;;  %v810_v61 = vadd.f32 %v617_v55, %v112_v41 }
 0x10e   :  { %v1033_v58 = vmax.f32 %v969_v52, 0.0  ;;  %v940_v59 = vld [vmem:[#allocation2 + $0x98] sm:$0xff]  ;;  %874 = vst.msk [vmem:[#allocation2 + $0xa0] sm:$0xff] %vm26_vm2, %v809_v45  ;;  %906 = vst.msk [vmem:[#allocation2 + $0x1a0] sm:$0xff] %vm26_vm2, %v841_v46  ;;  %v842_v62 = vadd.f32 %v745_v56, %v144_v42  ;;  %v117_v5 = vld [vmem:[#allocation2 + $0xd0] sm:$0xff] }
 0x10f   :  { %v972_v60 = vld [vmem:[#allocation2 + $0x198] sm:$0xff]  ;;  %1067 = vst.msk [vmem:[%s1958_s3 + $0x90] sm:$0xff] %vm26_vm2, %v1003_v49  ;;  %1099 = vst.msk [vmem:[%s1958_s3 + $0x190] sm:$0xff] %vm26_vm2, %v1035_v50  ;;  %v1004_v63 = vmax.f32 %v940_v59, 0.0  ;;  %v149_v6 = vld [vmem:[#allocation2 + $0x1d0] sm:$0xff] }
 0x110   :  { %v1036_v0 = vmax.f32 %v972_v60, 0.0  ;;  %v938_v1 = vld [vmem:[#allocation2 + $0x88] sm:$0xff]  ;;  %877 = vst.msk [vmem:[#allocation2 + $0xb8] sm:$0xff] %vm26_vm2, %v812_v53  ;;  %909 = vst.msk [vmem:[#allocation2 + $0x1b8] sm:$0xff] %vm26_vm2, %v844_v54  ;;  %v115_v7 = vld [vmem:[#allocation2 + $0xc0] sm:$0xff] }
 0x111   :  { %v970_v2 = vld [vmem:[#allocation2 + $0x188] sm:$0xff]  ;;  %1065 = vst.msk [vmem:[%s1958_s3 + $0x80] sm:$0xff] %vm26_vm2, %v1001_v57  ;;  %1097 = vst.msk [vmem:[%s1958_s3 + $0x180] sm:$0xff] %vm26_vm2, %v1033_v58  ;;  %v1002_v3 = vmax.f32 %v938_v1, 0.0  ;;  %v147_v8 = vld [vmem:[#allocation2 + $0x1c0] sm:$0xff]  ;;  %v1252_v9 = vpop.f32.mrb[24].mxu0 }
 0x112   :  { %v1034_v4 = vmax.f32 %v970_v2, 0.0  ;;  %875 = vst.msk [vmem:[#allocation2 + $0xa8] sm:$0xff] %vm26_vm2, %v810_v61  ;;  %907 = vst.msk [vmem:[#allocation2 + $0x1a8] sm:$0xff] %vm26_vm2, %v842_v62  ;;  %v1284_v10 = vpop.f32.mrb[24].mxu1  ;;  %v118_v11 = vld [vmem:[#allocation2 + $0xd8] sm:$0xff]  ;;  %v815_v13 = vadd.f32 %v1252_v9, %v117_v5  ;;  %v630_v15 = vpop.f32.mrb[25].mxu0 }
 0x113   :  { %1068 = vst.msk [vmem:[%s1958_s3 + $0x98] sm:$0xff] %vm26_vm2, %v1004_v63  ;;  %1100 = vst.msk [vmem:[%s1958_s3 + $0x198] sm:$0xff] %vm26_vm2, %v1036_v0  ;;  %v150_v12 = vld [vmem:[#allocation2 + $0x1d8] sm:$0xff]  ;;  %v847_v14 = vadd.f32 %v1284_v10, %v149_v6  ;;  %v758_v16 = vpop.f32.mrb[25].mxu1  ;;  %v116_v17 = vld [vmem:[#allocation2 + $0xc8] sm:$0xff]  ;;  %v813_v21 = vadd.f32 %v630_v15, %v115_v7  ;;  %v1253_v23 = vpop.f32.mrb[26].mxu0 }
 0x114   :  { %1066 = vst.msk [vmem:[%s1958_s3 + $0x88] sm:$0xff] %vm26_vm2, %v1002_v3  ;;  %1098 = vst.msk [vmem:[%s1958_s3 + $0x188] sm:$0xff] %vm26_vm2, %v1034_v4  ;;  %v148_v18 = vld [vmem:[#allocation2 + $0x1c8] sm:$0xff]  ;;  %v943_v19 = vld [vmem:[#allocation2 + $0xb0] sm:$0xff]  ;;  %v845_v22 = vadd.f32 %v758_v16, %v147_v8  ;;  %v1285_v24 = vpop.f32.mrb[26].mxu1  ;;  %v816_v29 = vadd.f32 %v1253_v23, %v118_v11  ;;  %v633_v31 = vpop.f32.mrb[27].mxu0 }
 0x115   :  { %v975_v20 = vld [vmem:[#allocation2 + $0x1b0] sm:$0xff]  ;;  %v1007_v25 = vmax.f32 %v943_v19, 0.0  ;;  %v941_v27 = vld [vmem:[#allocation2 + $0xa0] sm:$0xff]  ;;  %880 = vst.msk [vmem:[#allocation2 + $0xd0] sm:$0xff] %vm26_vm2, %v815_v13  ;;  %912 = vst.msk [vmem:[#allocation2 + $0x1d0] sm:$0xff] %vm26_vm2, %v847_v14  ;;  %v848_v30 = vadd.f32 %v1285_v24, %v150_v12  ;;  %v761_v32 = vpop.f32.mrb[27].mxu1  ;;  %v814_v37 = vadd.f32 %v633_v31, %v116_v17 }
 0x116   :  { %v1039_v26 = vmax.f32 %v975_v20, 0.0  ;;  %v973_v28 = vld [vmem:[#allocation2 + $0x1a0] sm:$0xff]  ;;  %v1005_v33 = vmax.f32 %v941_v27, 0.0  ;;  %878 = vst.msk [vmem:[#allocation2 + $0xc0] sm:$0xff] %vm26_vm2, %v813_v21  ;;  %910 = vst.msk [vmem:[#allocation2 + $0x1c0] sm:$0xff] %vm26_vm2, %v845_v22  ;;  %v846_v38 = vadd.f32 %v761_v32, %v148_v18  ;;  %v121_v45 = vld [vmem:[#allocation2 + $0xf0] sm:$0xff] }
 0x117   :  { %v1037_v34 = vmax.f32 %v973_v28, 0.0  ;;  %v944_v35 = vld [vmem:[#allocation2 + $0xb8] sm:$0xff]  ;;  %1071 = vst.msk [vmem:[%s1958_s3 + $0xb0] sm:$0xff] %vm26_vm2, %v1007_v25  ;;  %881 = vst.msk [vmem:[#allocation2 + $0xd8] sm:$0xff] %vm26_vm2, %v816_v29  ;;  %v153_v46 = vld [vmem:[#allocation2 + $0x1f0] sm:$0xff] }
 0x118   :  { %v976_v36 = vld [vmem:[#allocation2 + $0x1b8] sm:$0xff]  ;;  %1103 = vst.msk [vmem:[%s1958_s3 + $0x1b0] sm:$0xff] %vm26_vm2, %v1039_v26  ;;  %v1008_v39 = vmax.f32 %v944_v35, 0.0  ;;  %913 = vst.msk [vmem:[#allocation2 + $0x1d8] sm:$0xff] %vm26_vm2, %v848_v30  ;;  %v119_v47 = vld [vmem:[#allocation2 + $0xe0] sm:$0xff] }
 0x119   :  { %v1040_v40 = vmax.f32 %v976_v36, 0.0  ;;  %v942_v41 = vld [vmem:[#allocation2 + $0xa8] sm:$0xff]  ;;  %1069 = vst.msk [vmem:[%s1958_s3 + $0xa0] sm:$0xff] %vm26_vm2, %v1005_v33  ;;  %1101 = vst.msk [vmem:[%s1958_s3 + $0x1a0] sm:$0xff] %vm26_vm2, %v1037_v34  ;;  %v151_v48 = vld [vmem:[#allocation2 + $0x1e0] sm:$0xff]  ;;  %v1256_v49 = vpop.f32.mrb[28].mxu0 }
 0x11a   :  { %v974_v42 = vld [vmem:[#allocation2 + $0x1a8] sm:$0xff]  ;;  %v1006_v43 = vmax.f32 %v942_v41, 0.0  ;;  %879 = vst.msk [vmem:[#allocation2 + $0xc8] sm:$0xff] %vm26_vm2, %v814_v37  ;;  %911 = vst.msk [vmem:[#allocation2 + $0x1c8] sm:$0xff] %vm26_vm2, %v846_v38  ;;  %v1288_v50 = vpop.f32.mrb[28].mxu1  ;;  %v122_v51 = vld [vmem:[#allocation2 + $0xf8] sm:$0xff]  ;;  %v819_v53 = vadd.f32 %v1256_v49, %v121_v45 }
 0x11b   :  { %v1038_v44 = vmax.f32 %v974_v42, 0.0  ;;  %1072 = vst.msk [vmem:[%s1958_s3 + $0xb8] sm:$0xff] %vm26_vm2, %v1008_v39  ;;  %1104 = vst.msk [vmem:[%s1958_s3 + $0x1b8] sm:$0xff] %vm26_vm2, %v1040_v40  ;;  %v154_v52 = vld [vmem:[#allocation2 + $0x1f8] sm:$0xff]  ;;  %v851_v54 = vadd.f32 %v1288_v50, %v153_v46  ;;  %v646_v55 = vpop.f32.mrb[29].mxu0  ;;  %v774_v56 = vpop.f32.mrb[29].mxu1 }
 0x11c   :  { %1070 = vst.msk [vmem:[%s1958_s3 + $0xa8] sm:$0xff] %vm26_vm2, %v1006_v43  ;;  %v120_v57 = vld [vmem:[#allocation2 + $0xe8] sm:$0xff]  ;;  %v947_v59 = vld [vmem:[#allocation2 + $0xd0] sm:$0xff]  ;;  %v817_v61 = vadd.f32 %v646_v55, %v119_v47  ;;  %v849_v62 = vadd.f32 %v774_v56, %v151_v48  ;;  %v1257_v63 = vpop.f32.mrb[30].mxu0  ;;  %v1289_v0 = vpop.f32.mrb[30].mxu1  ;;  %884 = vst.msk [vmem:[#allocation2 + $0xf0] sm:$0xff] %vm26_vm2, %v819_v53 }
 0x11d   :  { %1102 = vst.msk [vmem:[%s1958_s3 + $0x1a8] sm:$0xff] %vm26_vm2, %v1038_v44  ;;  %v152_v58 = vld [vmem:[#allocation2 + $0x1e8] sm:$0xff]  ;;  %v979_v60 = vld [vmem:[#allocation2 + $0x1d0] sm:$0xff]  ;;  %v1011_v1 = vmax.f32 %v947_v59, 0.0  ;;  %v945_v3 = vld [vmem:[#allocation2 + $0xc0] sm:$0xff]  ;;  %v820_v5 = vadd.f32 %v1257_v63, %v122_v51  ;;  %v852_v6 = vadd.f32 %v1289_v0, %v154_v52  ;;  %v649_v7 = vpop.f32.mrb[31].mxu0 }
 0x11e   :  { %v1043_v2 = vmax.f32 %v979_v60, 0.0  ;;  %v977_v4 = vld [vmem:[#allocation2 + $0x1c0] sm:$0xff]  ;;  %916 = vst.msk [vmem:[#allocation2 + $0x1f0] sm:$0xff] %vm26_vm2, %v851_v54  ;;  %v777_v8 = vpop.f32.mrb[31].mxu1  ;;  %v1009_v9 = vmax.f32 %v945_v3, 0.0  ;;  %v948_v11 = vld [vmem:[#allocation2 + $0xd8] sm:$0xff]  ;;  %v818_v13 = vadd.f32 %v649_v7, %v120_v57 }
 0x11f   :  { %v1041_v10 = vmax.f32 %v977_v4, 0.0  ;;  %v980_v12 = vld [vmem:[#allocation2 + $0x1d8] sm:$0xff]  ;;  %882 = vst.msk [vmem:[#allocation2 + $0xe0] sm:$0xff] %vm26_vm2, %v817_v61  ;;  %914 = vst.msk [vmem:[#allocation2 + $0x1e0] sm:$0xff] %vm26_vm2, %v849_v62  ;;  %v850_v14 = vadd.f32 %v777_v8, %v152_v58  ;;  %v1012_v15 = vmax.f32 %v948_v11, 0.0 }
 0x120   :  { %1075 = vst.msk [vmem:[%s1958_s3 + $0xd0] sm:$0xff] %vm26_vm2, %v1011_v1  ;;  %1107 = vst.msk [vmem:[%s1958_s3 + $0x1d0] sm:$0xff] %vm26_vm2, %v1043_v2  ;;  %v1044_v16 = vmax.f32 %v980_v12, 0.0 }
 0x121   :  { %v946_v17 = vld [vmem:[#allocation2 + $0xc8] sm:$0xff]  ;;  %885 = vst.msk [vmem:[#allocation2 + $0xf8] sm:$0xff] %vm26_vm2, %v820_v5  ;;  %917 = vst.msk [vmem:[#allocation2 + $0x1f8] sm:$0xff] %vm26_vm2, %v852_v6 }
 0x122   :  { %v978_v18 = vld [vmem:[#allocation2 + $0x1c8] sm:$0xff]  ;;  %1073 = vst.msk [vmem:[%s1958_s3 + $0xc0] sm:$0xff] %vm26_vm2, %v1009_v9  ;;  %1105 = vst.msk [vmem:[%s1958_s3 + $0x1c0] sm:$0xff] %vm26_vm2, %v1041_v10  ;;  %v1010_v19 = vmax.f32 %v946_v17, 0.0 }
 0x123   :  { %v1042_v20 = vmax.f32 %v978_v18, 0.0  ;;  %883 = vst.msk [vmem:[#allocation2 + $0xe8] sm:$0xff] %vm26_vm2, %v818_v13  ;;  %915 = vst.msk [vmem:[#allocation2 + $0x1e8] sm:$0xff] %vm26_vm2, %v850_v14  ;;  %v951_v21 = vld [vmem:[#allocation2 + $0xf0] sm:$0xff] }
 0x124   :  { %1076 = vst.msk [vmem:[%s1958_s3 + $0xd8] sm:$0xff] %vm26_vm2, %v1012_v15  ;;  %1108 = vst.msk [vmem:[%s1958_s3 + $0x1d8] sm:$0xff] %vm26_vm2, %v1044_v16  ;;  %v1015_v23 = vmax.f32 %v951_v21, 0.0 }
 0x125   :  { %1074 = vst.msk [vmem:[%s1958_s3 + $0xc8] sm:$0xff] %vm26_vm2, %v1010_v19  ;;  %1106 = vst.msk [vmem:[%s1958_s3 + $0x1c8] sm:$0xff] %vm26_vm2, %v1042_v20  ;;  %v983_v22 = vld [vmem:[#allocation2 + $0x1f0] sm:$0xff] }
 0x126   :  { %v1047_v24 = vmax.f32 %v983_v22, 0.0  ;;  %v949_v25 = vld [vmem:[#allocation2 + $0xe0] sm:$0xff]  ;;  %1079 = vst.msk [vmem:[%s1958_s3 + $0xf0] sm:$0xff] %vm26_vm2, %v1015_v23 }
 0x127   :  { %v981_v26 = vld [vmem:[#allocation2 + $0x1e0] sm:$0xff]  ;;  %v1013_v27 = vmax.f32 %v949_v25, 0.0 }
 0x128   :  { %v1045_v28 = vmax.f32 %v981_v26, 0.0  ;;  %v952_v29 = vld [vmem:[#allocation2 + $0xf8] sm:$0xff]  ;;  %1111 = vst.msk [vmem:[%s1958_s3 + $0x1f0] sm:$0xff] %vm26_vm2, %v1047_v24 }
 0x129   :  { %v984_v30 = vld [vmem:[#allocation2 + $0x1f8] sm:$0xff]  ;;  %v1016_v31 = vmax.f32 %v952_v29, 0.0  ;;  %1077 = vst.msk [vmem:[%s1958_s3 + $0xe0] sm:$0xff] %vm26_vm2, %v1013_v27 }
 0x12a   :  { %v1048_v32 = vmax.f32 %v984_v30, 0.0  ;;  %v950_v33 = vld [vmem:[#allocation2 + $0xe8] sm:$0xff]  ;;  %1109 = vst.msk [vmem:[%s1958_s3 + $0x1e0] sm:$0xff] %vm26_vm2, %v1045_v28 }
 0x12b   :  { %v982_v34 = vld [vmem:[#allocation2 + $0x1e8] sm:$0xff]  ;;  %v1014_v35 = vmax.f32 %v950_v33, 0.0  ;;  %1080 = vst.msk [vmem:[%s1958_s3 + $0xf8] sm:$0xff] %vm26_vm2, %v1016_v31 }
 0x12c   :  { %v1046_v36 = vmax.f32 %v982_v34, 0.0  ;;  %1112 = vst.msk [vmem:[%s1958_s3 + $0x1f8] sm:$0xff] %vm26_vm2, %v1048_v32 }
 0x12d   :  { %1078 = vst.msk [vmem:[%s1958_s3 + $0xe8] sm:$0xff] %vm26_vm2, %v1014_v35 }
 0x12e   :  { %1110 = vst.msk [vmem:[%s1958_s3 + $0x1e8] sm:$0xff] %vm26_vm2, %v1046_v36 }

// kernel: msca_forward.12
= control target key start
LH: loop header
LB: loop body
LE: loop exit
PB: predicated region body
PF: predicated region fallthrough
CT: control target
= control target key end

     0   :  { %v2337_v0 = vmov 0   ;;  %vm26_vm0 = vcmask 261120   ;;  %s3370_s1 = inlined_call_operand.vmem [shape: bf16[288,32], index: 1, kind: input, shape index: {}]   ;;  %s3371_s0 = inlined_call_operand.vmem [shape: bf16[512,288], index: 0, kind: input, shape index: {}]   ;;  %s3372_s2 = inlined_call_operand.vmem [shape: f32[1,32], index: 2, kind: input, shape index: {}]   ;;  %s3373_s3 = inlined_call_operand.vmem [shape: f32[512,32], index: 3, kind: output, shape index: {}]  }
   0x1   :  { %1004 = vmatprep.subr.bf16.mxu0 %v2337_v0  ;;  %2158 = vmatprep.subr.bf16.mxu1 %v2337_v0  ;;  %v2191_v1 = vld [vmem:[%s3370_s1] sm:$0xff]   ;;  %v2192_v2 = vld [vmem:[%s3370_s1 + $0x8] sm:$0xff]   ;;  %v2193_v3 = vld [vmem:[%s3370_s1 + $0x10] sm:$0xff]  }
   0x2   :  { %1005 = vmatpush1.bf16.msra.mxu0 %v2191_v1  ;;  %2174 = vmatpush1.bf16.msra.mxu1 %v2191_v1  ;;  %v2194_v4 = vld [vmem:[%s3370_s1 + $0x18] sm:$0xff]   ;;  %v2195_v5 = vld [vmem:[%s3370_s1 + $0x20] sm:$0xff]   ;;  %v2196_v7 = vld [vmem:[%s3370_s1 + $0x28] sm:$0xff]  }
   0x3   :  { %1006 = vmatprep.subr.bf16.mxu0 %v2337_v0  ;;  %2159 = vmatprep.subr.bf16.mxu1 %v2337_v0  ;;  %v2209_v6 = vld [vmem:[%s3371_s0 + $0x4] ss:$12 sps:$4 sm:$0xff]   ;;  %v2198_v10 = vld [vmem:[%s3370_s1 + $0x38] sm:$0xff]   ;;  %v2200_v12 = vld [vmem:[%s3370_s1 + $0x48] sm:$0xff]  }
   0x4   :  { %v2212_v8 = vld [vmem:[%s3371_s0 + $0x244] ss:$12 sps:$4 sm:$0xff]   ;;  %1036 = vmatprep.mubr.bf16.mxu0 %v2209_v6  ;;  %v2202_v14 = vld [vmem:[%s3370_s1 + $0x58] sm:$0xff]   ;;  %v2204_v16 = vld [vmem:[%s3370_s1 + $0x68] sm:$0xff]  }
   0x5   :  { %1228 = vmatprep.mubr.bf16.mxu1 %v2212_v8  ;;  %v2197_v9 = vld [vmem:[%s3370_s1 + $0x30] sm:$0xff]   ;;  %v2199_v11 = vld [vmem:[%s3370_s1 + $0x40] sm:$0xff]   ;;  %v2206_v18 = vld [vmem:[%s3370_s1 + $0x78] sm:$0xff]  }
   0x6   :  { %1007 = vmatpush1.bf16.msra.mxu0 %v2192_v2  ;;  %2175 = vmatpush1.bf16.msra.mxu1 %v2192_v2  ;;  %v2201_v13 = vld [vmem:[%s3370_s1 + $0x50] sm:$0xff]   ;;  %v2203_v15 = vld [vmem:[%s3370_s1 + $0x60] sm:$0xff]   ;;  %v2214_v22 = vld [vmem:[%s3371_s0 + $0x1c] ss:$12 sps:$4 sm:$0xff]  }
   0x7   :  { %1008 = vmatprep.subr.bf16.mxu0 %v2337_v0  ;;  %2160 = vmatprep.subr.bf16.mxu1 %v2337_v0  ;;  %v2205_v17 = vld [vmem:[%s3370_s1 + $0x70] sm:$0xff]   ;;  %v2213_v19 = vld [vmem:[%s3370_s1 + $0x80] sm:$0xff]   ;;  %v2216_v23 = vld [vmem:[%s3371_s0 + $0x25c] ss:$12 sps:$4 sm:$0xff]  }
   0x8   :  { %v2207_v20 = vld [vmem:[%s3371_s0] ss:$12 sps:$4 sm:$0xff]   ;;  %v2218_v25 = vld [vmem:[%s3371_s0 + $0x18] ss:$12 sps:$4 sm:$0xff]   ;;  %v2224_v29 = vld [vmem:[%s3371_s0 + $0x30] ss:$12 sps:$4 sm:$0xff]  }
   0x9   :  { %v2210_v21 = vld [vmem:[%s3371_s0 + $0x240] ss:$12 sps:$4 sm:$0xff]   ;;  %v2219_v26 = vld [vmem:[%s3371_s0 + $0x258] ss:$12 sps:$4 sm:$0xff]   ;;  %v2225_v30 = vld [vmem:[%s3371_s0 + $0x270] ss:$12 sps:$4 sm:$0xff]  }
   0xa   :  { %1009 = vmatpush1.bf16.msra.mxu0 %v2193_v3  ;;  %2176 = vmatpush1.bf16.msra.mxu1 %v2193_v3  ;;  %v2238_v24 = vld [vmem:[%s3370_s1 + $0x88] sm:$0xff]   ;;  %v2220_v27 = vld [vmem:[%s3371_s0 + $0x34] ss:$12 sps:$4 sm:$0xff]   ;;  %v2232_v35 = vld [vmem:[%s3371_s0 + $0x64] ss:$12 sps:$4 sm:$0xff]  }
   0xb   :  { %1010 = vmatprep.subr.bf16.mxu0 %v2337_v0  ;;  %2161 = vmatprep.subr.bf16.mxu1 %v2337_v0  ;;  %v2222_v28 = vld [vmem:[%s3371_s0 + $0x274] ss:$12 sps:$4 sm:$0xff]   ;;  %v2226_v31 = vld [vmem:[%s3371_s0 + $0x4c] ss:$12 sps:$4 sm:$0xff]   ;;  %v2234_v36 = vld [vmem:[%s3371_s0 + $0x2a4] ss:$12 sps:$4 sm:$0xff]  }
   0xc   :  { %v2228_v32 = vld [vmem:[%s3371_s0 + $0x28c] ss:$12 sps:$4 sm:$0xff]   ;;  %v2230_v33 = vld [vmem:[%s3371_s0 + $0x48] ss:$12 sps:$4 sm:$0xff]   ;;  %v2249_v45 = vld [vmem:[%s3371_s0 + $0x90] ss:$12 sps:$4 sm:$0xff]  }
   0xd   :  { %v2231_v34 = vld [vmem:[%s3371_s0 + $0x288] ss:$12 sps:$4 sm:$0xff]   ;;  %v2236_v37 = vld [vmem:[%s3371_s0 + $0x60] ss:$12 sps:$4 sm:$0xff]   ;;  %v2243_v41 = vld [vmem:[%s3371_s0 + $0x78] ss:$12 sps:$4 sm:$0xff]  }
   0xe   :  { %1011 = vmatpush1.bf16.msra.mxu0 %v2194_v4  ;;  %2177 = vmatpush1.bf16.msra.mxu1 %v2194_v4  ;;  %v2237_v38 = vld [vmem:[%s3371_s0 + $0x2a0] ss:$12 sps:$4 sm:$0xff]   ;;  %v2239_v39 = vld [vmem:[%s3371_s0 + $0x7c] ss:$12 sps:$4 sm:$0xff]   ;;  %v2244_v42 = vld [vmem:[%s3371_s0 + $0x2b8] ss:$12 sps:$4 sm:$0xff]  }
   0xf   :  { %1012 = vmatprep.subr.bf16.mxu0 %v2337_v0  ;;  %2162 = vmatprep.subr.bf16.mxu1 %v2337_v0  ;;  %v2241_v40 = vld [vmem:[%s3371_s0 + $0x2bc] ss:$12 sps:$4 sm:$0xff]   ;;  %v2245_v43 = vld [vmem:[%s3371_s0 + $0x94] ss:$12 sps:$4 sm:$0xff]   ;;  %v2251_v47 = vld [vmem:[%s3371_s0 + $0xac] ss:$12 sps:$4 sm:$0xff]  }
  0x10   :  { %v2247_v44 = vld [vmem:[%s3371_s0 + $0x2d4] ss:$12 sps:$4 sm:$0xff]   ;;  %v2250_v46 = vld [vmem:[%s3371_s0 + $0x2d0] ss:$12 sps:$4 sm:$0xff]   ;;  %v2253_v48 = vld [vmem:[%s3371_s0 + $0x2ec] ss:$12 sps:$4 sm:$0xff]  }
  0x11   :  { %v2255_v49 = vld [vmem:[%s3371_s0 + $0xa8] ss:$12 sps:$4 sm:$0xff]   ;;  %v2257_v51 = vld [vmem:[%s3371_s0 + $0xc4] ss:$12 sps:$4 sm:$0xff]   ;;  %v2260_v53 = vld [vmem:[%s3371_s0 + $0xc0] ss:$12 sps:$4 sm:$0xff]  }
  0x12   :  { %1013 = vmatpush1.bf16.msra.mxu0 %v2195_v5  ;;  %2178 = vmatpush1.bf16.msra.mxu1 %v2195_v5  ;;  %v2256_v50 = vld [vmem:[%s3371_s0 + $0x2e8] ss:$12 sps:$4 sm:$0xff]   ;;  %v2261_v54 = vld [vmem:[%s3371_s0 + $0x20] ss:$12 sps:$4 sm:$0xff]   ;;  %v2264_v56 = vld [vmem:[%s3371_s0 + $0x38] ss:$12 sps:$4 sm:$0xff]  }
  0x13   :  { %1014 = vmatprep.subr.bf16.mxu0 %v2337_v0  ;;  %2163 = vmatprep.subr.bf16.mxu1 %v2337_v0  ;;  %v2259_v52 = vld [vmem:[%s3371_s0 + $0x8] ss:$12 sps:$4 sm:$0xff]   ;;  %v2265_v57 = vld [vmem:[%s3371_s0 + $0xd8] ss:$12 sps:$4 sm:$0xff]   ;;  %v2266_v58 = vld [vmem:[%s3371_s0 + $0x50] ss:$12 sps:$4 sm:$0xff]  }
  0x14   :  { %v2262_v55 = vld [vmem:[%s3371_s0 + $0xdc] ss:$12 sps:$4 sm:$0xff]   ;;  %v2267_v59 = vld [vmem:[%s3371_s0 + $0xf4] ss:$12 sps:$4 sm:$0xff]   ;;  %v2272_v63 = vld [vmem:[%s3371_s0 + $0x10c] ss:$12 sps:$4 sm:$0xff]  }
  0x15   :  { %v2269_v60 = vld [vmem:[%s3371_s0 + $0x68] ss:$12 sps:$4 sm:$0xff]   ;;  %v2270_v61 = vld [vmem:[%s3371_s0 + $0xf0] ss:$12 sps:$4 sm:$0xff]   ;;  %v2271_v62 = vld [vmem:[%s3371_s0 + $0x80] ss:$12 sps:$4 sm:$0xff]  }
  0x16   :  { %1015 = vmatpush1.bf16.msra.mxu0 %v2196_v7  ;;  %2179 = vmatpush1.bf16.msra.mxu1 %v2196_v7  ;;  %v2275_v1 = vld [vmem:[%s3371_s0 + $0x108] ss:$12 sps:$4 sm:$0xff]   ;;  %v2276_v2 = vld [vmem:[%s3371_s0 + $0xb0] ss:$12 sps:$4 sm:$0xff]   ;;  %v2280_v5 = vld [vmem:[%s3371_s0 + $0x120] ss:$12 sps:$4 sm:$0xff]  }
  0x17   :  { %1016 = vmatprep.subr.bf16.mxu0 %v2337_v0  ;;  %2164 = vmatprep.subr.bf16.mxu1 %v2337_v0  ;;  %v2277_v3 = vld [vmem:[%s3371_s0 + $0x124] ss:$12 sps:$4 sm:$0xff]   ;;  %v2279_v4 = vld [vmem:[%s3371_s0 + $0xc8] ss:$12 sps:$4 sm:$0xff]   ;;  %v2281_v6 = vld [vmem:[%s3371_s0 + $0xe0] ss:$12 sps:$4 sm:$0xff]  }
  0x18   :  { %v2282_v7 = vld [vmem:[%s3371_s0 + $0x13c] ss:$12 sps:$4 sm:$0xff]   ;;  %v2284_v8 = vld [vmem:[%s3371_s0 + $0xf8] ss:$12 sps:$4 sm:$0xff]  }
  0x1a   :  { %1017 = vmatpush1.bf16.msra.mxu0 %v2197_v9  ;;  %2180 = vmatpush1.bf16.msra.mxu1 %v2197_v9  ;;  %v2285_v9 = vld [vmem:[%s3371_s0 + $0x138] ss:$12 sps:$4 sm:$0xff]  }
  0x1b   :  { %1018 = vmatprep.subr.bf16.mxu0 %v2337_v0  ;;  %2165 = vmatprep.subr.bf16.mxu1 %v2337_v0 }
  0x1e   :  { %1019 = vmatpush1.bf16.msra.mxu0 %v2198_v10  ;;  %2181 = vmatpush1.bf16.msra.mxu1 %v2198_v10  ;;  %v2286_v10 = vld [vmem:[%s3371_s0 + $0x110] ss:$12 sps:$4 sm:$0xff]  }
  0x1f   :  { %1020 = vmatprep.subr.bf16.mxu0 %v2337_v0  ;;  %2166 = vmatprep.subr.bf16.mxu1 %v2337_v0 }
  0x22   :  { %1021 = vmatpush1.bf16.msra.mxu0 %v2199_v11  ;;  %2182 = vmatpush1.bf16.msra.mxu1 %v2199_v11  ;;  %v2287_v11 = vld [vmem:[%s3371_s0 + $0x154] ss:$12 sps:$4 sm:$0xff]  }
  0x23   :  { %1022 = vmatprep.subr.bf16.mxu0 %v2337_v0  ;;  %2167 = vmatprep.subr.bf16.mxu1 %v2337_v0 }
  0x26   :  { %1023 = vmatpush1.bf16.msra.mxu0 %v2200_v12  ;;  %2183 = vmatpush1.bf16.msra.mxu1 %v2200_v12  ;;  %v2289_v12 = vld [vmem:[%s3371_s0 + $0x128] ss:$12 sps:$4 sm:$0xff]  }
  0x27   :  { %1024 = vmatprep.subr.bf16.mxu0 %v2337_v0  ;;  %2168 = vmatprep.subr.bf16.mxu1 %v2337_v0 }
  0x2a   :  { %1025 = vmatpush1.bf16.msra.mxu0 %v2201_v13  ;;  %2184 = vmatpush1.bf16.msra.mxu1 %v2201_v13  ;;  %v2290_v13 = vld [vmem:[%s3371_s0 + $0x150] ss:$12 sps:$4 sm:$0xff]  }
  0x2b   :  { %1026 = vmatprep.subr.bf16.mxu0 %v2337_v0  ;;  %2169 = vmatprep.subr.bf16.mxu1 %v2337_v0 }
  0x2e   :  { %1027 = vmatpush1.bf16.msra.mxu0 %v2202_v14  ;;  %2185 = vmatpush1.bf16.msra.mxu1 %v2202_v14  ;;  %v2291_v14 = vld [vmem:[%s3371_s0 + $0x140] ss:$12 sps:$4 sm:$0xff]  }
  0x2f   :  { %1028 = vmatprep.subr.bf16.mxu0 %v2337_v0  ;;  %2170 = vmatprep.subr.bf16.mxu1 %v2337_v0 }
  0x32   :  { %1029 = vmatpush1.bf16.msra.mxu0 %v2203_v15  ;;  %2186 = vmatpush1.bf16.msra.mxu1 %v2203_v15  ;;  %v2292_v15 = vld [vmem:[%s3371_s0 + $0x16c] ss:$12 sps:$4 sm:$0xff]  }
  0x33   :  { %1030 = vmatprep.subr.bf16.mxu0 %v2337_v0  ;;  %2171 = vmatprep.subr.bf16.mxu1 %v2337_v0 }
  0x36   :  { %1031 = vmatpush1.bf16.msra.mxu0 %v2204_v16  ;;  %2187 = vmatpush1.bf16.msra.mxu1 %v2204_v16  ;;  %v2294_v16 = vld [vmem:[%s3371_s0 + $0x158] ss:$12 sps:$4 sm:$0xff]  }
  0x37   :  { %1032 = vmatprep.subr.bf16.mxu0 %v2337_v0  ;;  %2172 = vmatprep.subr.bf16.mxu1 %v2337_v0 }
  0x3a   :  { %1033 = vmatpush1.bf16.msra.mxu0 %v2205_v17  ;;  %2188 = vmatpush1.bf16.msra.mxu1 %v2205_v17  ;;  %v2295_v17 = vld [vmem:[%s3371_s0 + $0x168] ss:$12 sps:$4 sm:$0xff]  }
  0x3b   :  { %1034 = vmatprep.subr.bf16.mxu0 %v2337_v0  ;;  %2173 = vmatprep.subr.bf16.mxu1 %v2337_v0  ;;  %v2274_v0 = vld [vmem:[%s3371_s0 + $0x98] ss:$12 sps:$4 sm:$0xff]  }
  0x3e   :  { %1035 = vmatpush1.bf16.msra.mxu0 %v2206_v18  ;;  %2189 = vmatpush1.bf16.msra.mxu1 %v2206_v18  ;;  %v2296_v18 = vld [vmem:[%s3371_s0 + $0x170] ss:$12 sps:$4 sm:$0xff]  }
  0x3f   :  { %2090 = vmatprep.subr.bf16.mxu1 %v2213_v19 }
  0x41   :  { %1037 = vmatmul.mubr.bf16.vlgmr.msra.gmra.mrb[0].mxu0 %v2207_v20  ;;  %1229 = vmatmul.mubr.bf16.vlgmr.msra.gmra.mrb[0].mxu1 %v2210_v21  ;;  %v2299_v20 = vld [vmem:[%s3371_s0 + $0x188] ss:$12 sps:$4 sm:$0xff]   ;;  %v2300_v21 = vld [vmem:[%s3371_s0 + $0x180] ss:$12 sps:$4 sm:$0xff]  }
  0x42   :  { %2091 = vmatpush3.bf16.msra.mxu1 %v2213_v19  ;;  %1044 = vmatprep.mubr.bf16.mxu0 %v2214_v22  ;;  %v2297_v19 = vld [vmem:[%s3371_s0 + $0x184] ss:$12 sps:$4 sm:$0xff]   ;;  %v2301_v22 = vld [vmem:[%s3371_s0 + $0x1a0] ss:$12 sps:$4 sm:$0xff]  }
  0x43   :  { %1236 = vmatprep.mubr.bf16.mxu1 %v2216_v23  ;;  %2092 = vmatprep.subr.bf16.mxu1 %v2238_v24  ;;  %v2302_v23 = vld [vmem:[%s3371_s0 + $0x19c] ss:$12 sps:$4 sm:$0xff]  }
  0x46   :  { %2093 = vmatpush3.bf16.msra.mxu1 %v2238_v24  ;;  %v2304_v24 = vld [vmem:[%s3371_s0 + $0x1b8] ss:$12 sps:$4 sm:$0xff]  }
  0x49   :  { %1045 = vmatmul.mubr.bf16.gmra.mrb[4].mxu0 %v2218_v25  ;;  %1237 = vmatmul.mubr.bf16.gmra.mrb[4].mxu1 %v2219_v26  ;;  %v2305_v25 = vld [vmem:[%s3371_s0 + $0x198] ss:$12 sps:$4 sm:$0xff]   ;;  %v2306_v26 = vld [vmem:[%s3371_s0 + $0x1d0] ss:$12 sps:$4 sm:$0xff]  }
  0x4a   :  { %1052 = vmatprep.mubr.bf16.mxu0 %v2220_v27  ;;  %1244 = vmatprep.mubr.bf16.mxu1 %v2222_v28  ;;  %v2307_v27 = vld [vmem:[%s3371_s0 + $0x1b4] ss:$12 sps:$4 sm:$0xff]  }
  0x4b   :  { %v2309_v28 = vld [vmem:[%s3371_s0 + $0x1e8] ss:$12 sps:$4 sm:$0xff]  }
  0x51   :  { %1053 = vmatmul.mubr.bf16.gmra.mrb[8].mxu0 %v2224_v29  ;;  %1245 = vmatmul.mubr.bf16.gmra.mrb[8].mxu1 %v2225_v30  ;;  %v2690_v29 = vld [vmem:[%s3371_s0 + $0x1b0] ss:$12 sps:$4 sm:$0xff]   ;;  %v2695_v30 = vld [vmem:[%s3371_s0 + $0x200] ss:$12 sps:$4 sm:$0xff]  }
  0x52   :  { %1060 = vmatprep.mubr.bf16.mxu0 %v2226_v31  ;;  %1252 = vmatprep.mubr.bf16.mxu1 %v2228_v32  ;;  %v2700_v31 = vld [vmem:[%s3371_s0 + $0x1cc] ss:$12 sps:$4 sm:$0xff]  }
  0x53   :  { %v2705_v32 = vld [vmem:[%s3371_s0 + $0x218] ss:$12 sps:$4 sm:$0xff]  }
  0x59   :  { %1061 = vmatmul.mubr.bf16.gmra.mrb[12].mxu0 %v2230_v33  ;;  %1253 = vmatmul.mubr.bf16.gmra.mrb[12].mxu1 %v2231_v34  ;;  %v2710_v33 = vld [vmem:[%s3372_s2] ss:$0 sm:$0xff]  ;;  %v2315_v34 = vld [vmem:[%s3371_s0 + $0x1c8] ss:$12 sps:$4 sm:$0xff]  }
  0x5a   :  { %1068 = vmatprep.mubr.bf16.mxu0 %v2232_v35  ;;  %1260 = vmatprep.mubr.bf16.mxu1 %v2234_v36  ;;  %29 = vst.msk [vmem:[#allocation2 + $0x10] sm:$0xff] %vm26_vm0, %v2710_v33  ;;  %27 = vst.msk [vmem:[#allocation2] sm:$0xff] %vm26_vm0, %v2710_v33  ;;  %v2316_v35 = vld [vmem:[%s3371_s0 + $0x230] ss:$12 sps:$4 sm:$0xff]  }
  0x5b   :  { %28 = vst.msk [vmem:[#allocation2 + $0x8] sm:$0xff] %vm26_vm0, %v2710_v33  ;;  %30 = vst.msk [vmem:[#allocation2 + $0x18] sm:$0xff] %vm26_vm0, %v2710_v33  ;;  %v2317_v36 = vld [vmem:[%s3371_s0 + $0x1e4] ss:$12 sps:$4 sm:$0xff]  }
  0x5c   :  { %31 = vst.msk [vmem:[#allocation2 + $0x20] sm:$0xff] %vm26_vm0, %v2710_v33  ;;  %32 = vst.msk [vmem:[#allocation2 + $0x28] sm:$0xff] %vm26_vm0, %v2710_v33 }
  0x5d   :  { %33 = vst.msk [vmem:[#allocation2 + $0x30] sm:$0xff] %vm26_vm0, %v2710_v33  ;;  %34 = vst.msk [vmem:[#allocation2 + $0x38] sm:$0xff] %vm26_vm0, %v2710_v33 }
  0x5e   :  { %35 = vst.msk [vmem:[#allocation2 + $0x40] sm:$0xff] %vm26_vm0, %v2710_v33  ;;  %36 = vst.msk [vmem:[#allocation2 + $0x48] sm:$0xff] %vm26_vm0, %v2710_v33 }
  0x5f   :  { %37 = vst.msk [vmem:[#allocation2 + $0x50] sm:$0xff] %vm26_vm0, %v2710_v33  ;;  %38 = vst.msk [vmem:[#allocation2 + $0x58] sm:$0xff] %vm26_vm0, %v2710_v33 }
  0x60   :  { %39 = vst.msk [vmem:[#allocation2 + $0x60] sm:$0xff] %vm26_vm0, %v2710_v33  ;;  %40 = vst.msk [vmem:[#allocation2 + $0x68] sm:$0xff] %vm26_vm0, %v2710_v33 }
  0x61   :  { %1069 = vmatmul.mubr.bf16.gmra.mrb[16].mxu0 %v2236_v37  ;;  %1261 = vmatmul.mubr.bf16.gmra.mrb[16].mxu1 %v2237_v38  ;;  %41 = vst.msk [vmem:[#allocation2 + $0x70] sm:$0xff] %vm26_vm0, %v2710_v33  ;;  %42 = vst.msk [vmem:[#allocation2 + $0x78] sm:$0xff] %vm26_vm0, %v2710_v33  ;;  %v2319_v37 = vld [vmem:[%s3371_s0 + $0x248] ss:$12 sps:$4 sm:$0xff]   ;;  %v2320_v38 = vld [vmem:[%s3371_s0 + $0x1e0] ss:$12 sps:$4 sm:$0xff]  }
  0x62   :  { %1076 = vmatprep.mubr.bf16.mxu0 %v2239_v39  ;;  %1268 = vmatprep.mubr.bf16.mxu1 %v2241_v40  ;;  %43 = vst.msk [vmem:[#allocation2 + $0x80] sm:$0xff] %vm26_vm0, %v2710_v33  ;;  %44 = vst.msk [vmem:[#allocation2 + $0x88] sm:$0xff] %vm26_vm0, %v2710_v33  ;;  %v2321_v39 = vld [vmem:[%s3371_s0 + $0x260] ss:$12 sps:$4 sm:$0xff]   ;;  %v2322_v40 = vld [vmem:[%s3371_s0 + $0x1fc] ss:$12 sps:$4 sm:$0xff]  }
  0x63   :  { %45 = vst.msk [vmem:[#allocation2 + $0x90] sm:$0xff] %vm26_vm0, %v2710_v33  ;;  %46 = vst.msk [vmem:[#allocation2 + $0x98] sm:$0xff] %vm26_vm0, %v2710_v33 }
  0x64   :  { %47 = vst.msk [vmem:[#allocation2 + $0xa0] sm:$0xff] %vm26_vm0, %v2710_v33  ;;  %48 = vst.msk [vmem:[#allocation2 + $0xa8] sm:$0xff] %vm26_vm0, %v2710_v33 }
  0x65   :  { %49 = vst.msk [vmem:[#allocation2 + $0xb0] sm:$0xff] %vm26_vm0, %v2710_v33  ;;  %50 = vst.msk [vmem:[#allocation2 + $0xb8] sm:$0xff] %vm26_vm0, %v2710_v33 }
  0x66   :  { %51 = vst.msk [vmem:[#allocation2 + $0xc0] sm:$0xff] %vm26_vm0, %v2710_v33  ;;  %52 = vst.msk [vmem:[#allocation2 + $0xc8] sm:$0xff] %vm26_vm0, %v2710_v33 }
  0x67   :  { %53 = vst.msk [vmem:[#allocation2 + $0xd0] sm:$0xff] %vm26_vm0, %v2710_v33  ;;  %54 = vst.msk [vmem:[#allocation2 + $0xd8] sm:$0xff] %vm26_vm0, %v2710_v33 }
  0x68   :  { %55 = vst.msk [vmem:[#allocation2 + $0xe0] sm:$0xff] %vm26_vm0, %v2710_v33  ;;  %56 = vst.msk [vmem:[#allocation2 + $0xe8] sm:$0xff] %vm26_vm0, %v2710_v33 }
  0x69   :  { %1077 = vmatmul.mubr.bf16.gmra.mrb[20].mxu0 %v2243_v41  ;;  %1269 = vmatmul.mubr.bf16.gmra.mrb[20].mxu1 %v2244_v42  ;;  %57 = vst.msk [vmem:[#allocation2 + $0xf0] sm:$0xff] %vm26_vm0, %v2710_v33  ;;  %58 = vst.msk [vmem:[#allocation2 + $0xf8] sm:$0xff] %vm26_vm0, %v2710_v33  ;;  %v2324_v41 = vld [vmem:[%s3371_s0 + $0x278] ss:$12 sps:$4 sm:$0xff]  }
  0x6a   :  { %1084 = vmatprep.mubr.bf16.mxu0 %v2245_v43  ;;  %1276 = vmatprep.mubr.bf16.mxu1 %v2247_v44  ;;  %59 = vst.msk [vmem:[#allocation2 + $0x100] sm:$0xff] %vm26_vm0, %v2710_v33  ;;  %60 = vst.msk [vmem:[#allocation2 + $0x108] sm:$0xff] %vm26_vm0, %v2710_v33  ;;  %v2325_v42 = vld [vmem:[%s3371_s0 + $0x1f8] ss:$12 sps:$4 sm:$0xff]   ;;  %v2326_v43 = vld [vmem:[%s3371_s0 + $0x290] ss:$12 sps:$4 sm:$0xff]  }
  0x6b   :  { %61 = vst.msk [vmem:[#allocation2 + $0x110] sm:$0xff] %vm26_vm0, %v2710_v33  ;;  %62 = vst.msk [vmem:[#allocation2 + $0x118] sm:$0xff] %vm26_vm0, %v2710_v33  ;;  %v2327_v44 = vld [vmem:[%s3371_s0 + $0x214] ss:$12 sps:$4 sm:$0xff]  }
  0x6c   :  { %63 = vst.msk [vmem:[#allocation2 + $0x120] sm:$0xff] %vm26_vm0, %v2710_v33  ;;  %64 = vst.msk [vmem:[#allocation2 + $0x128] sm:$0xff] %vm26_vm0, %v2710_v33 }
  0x6d   :  { %65 = vst.msk [vmem:[#allocation2 + $0x130] sm:$0xff] %vm26_vm0, %v2710_v33  ;;  %66 = vst.msk [vmem:[#allocation2 + $0x138] sm:$0xff] %vm26_vm0, %v2710_v33 }
  0x6e   :  { %67 = vst.msk [vmem:[#allocation2 + $0x140] sm:$0xff] %vm26_vm0, %v2710_v33  ;;  %68 = vst.msk [vmem:[#allocation2 + $0x148] sm:$0xff] %vm26_vm0, %v2710_v33 }
  0x6f   :  { %69 = vst.msk [vmem:[#allocation2 + $0x150] sm:$0xff] %vm26_vm0, %v2710_v33  ;;  %70 = vst.msk [vmem:[#allocation2 + $0x158] sm:$0xff] %vm26_vm0, %v2710_v33 }
  0x70   :  { %71 = vst.msk [vmem:[#allocation2 + $0x160] sm:$0xff] %vm26_vm0, %v2710_v33  ;;  %72 = vst.msk [vmem:[#allocation2 + $0x168] sm:$0xff] %vm26_vm0, %v2710_v33 }
  0x71   :  { %1085 = vmatmul.mubr.bf16.gmra.mrb[24].mxu0 %v2249_v45  ;;  %1277 = vmatmul.mubr.bf16.gmra.mrb[24].mxu1 %v2250_v46  ;;  %73 = vst.msk [vmem:[#allocation2 + $0x170] sm:$0xff] %vm26_vm0, %v2710_v33  ;;  %74 = vst.msk [vmem:[#allocation2 + $0x178] sm:$0xff] %vm26_vm0, %v2710_v33  ;;  %v2329_v45 = vld [vmem:[%s3371_s0 + $0x2a8] ss:$12 sps:$4 sm:$0xff]   ;;  %v2330_v46 = vld [vmem:[%s3371_s0 + $0x210] ss:$12 sps:$4 sm:$0xff]  }
  0x72   :  { %1092 = vmatprep.mubr.bf16.mxu0 %v2251_v47  ;;  %1284 = vmatprep.mubr.bf16.mxu1 %v2253_v48  ;;  %75 = vst.msk [vmem:[#allocation2 + $0x180] sm:$0xff] %vm26_vm0, %v2710_v33  ;;  %76 = vst.msk [vmem:[#allocation2 + $0x188] sm:$0xff] %vm26_vm0, %v2710_v33  ;;  %v2331_v47 = vld [vmem:[%s3371_s0 + $0x2c0] ss:$12 sps:$4 sm:$0xff]  }
  0x73   :  { %77 = vst.msk [vmem:[#allocation2 + $0x190] sm:$0xff] %vm26_vm0, %v2710_v33  ;;  %78 = vst.msk [vmem:[#allocation2 + $0x198] sm:$0xff] %vm26_vm0, %v2710_v33  ;;  %v2332_v48 = vld [vmem:[%s3371_s0 + $0x22c] ss:$12 sps:$4 sm:$0xff]  }
  0x74   :  { %79 = vst.msk [vmem:[#allocation2 + $0x1a0] sm:$0xff] %vm26_vm0, %v2710_v33  ;;  %80 = vst.msk [vmem:[#allocation2 + $0x1a8] sm:$0xff] %vm26_vm0, %v2710_v33 }
  0x75   :  { %81 = vst.msk [vmem:[#allocation2 + $0x1b0] sm:$0xff] %vm26_vm0, %v2710_v33  ;;  %82 = vst.msk [vmem:[#allocation2 + $0x1b8] sm:$0xff] %vm26_vm0, %v2710_v33 }
  0x76   :  { %83 = vst.msk [vmem:[#allocation2 + $0x1c0] sm:$0xff] %vm26_vm0, %v2710_v33  ;;  %84 = vst.msk [vmem:[#allocation2 + $0x1c8] sm:$0xff] %vm26_vm0, %v2710_v33 }
  0x77   :  { %85 = vst.msk [vmem:[#allocation2 + $0x1d0] sm:$0xff] %vm26_vm0, %v2710_v33  ;;  %86 = vst.msk [vmem:[#allocation2 + $0x1d8] sm:$0xff] %vm26_vm0, %v2710_v33 }
  0x78   :  { %87 = vst.msk [vmem:[#allocation2 + $0x1e0] sm:$0xff] %vm26_vm0, %v2710_v33  ;;  %88 = vst.msk [vmem:[#allocation2 + $0x1e8] sm:$0xff] %vm26_vm0, %v2710_v33 }
  0x79   :  { %1093 = vmatmul.mubr.bf16.gmra.mrb[28].mxu0 %v2255_v49  ;;  %1285 = vmatmul.mubr.bf16.gmra.mrb[28].mxu1 %v2256_v50  ;;  %89 = vst.msk [vmem:[#allocation2 + $0x1f0] sm:$0xff] %vm26_vm0, %v2710_v33  ;;  %90 = vst.msk [vmem:[#allocation2 + $0x1f8] sm:$0xff] %vm26_vm0, %v2710_v33  ;;  %v2334_v49 = vld [vmem:[%s3371_s0 + $0x2d8] ss:$12 sps:$4 sm:$0xff]   ;;  %v2335_v50 = vld [vmem:[%s3371_s0 + $0x228] ss:$12 sps:$4 sm:$0xff]  }
  0x7a   :  { %1100 = vmatprep.mubr.bf16.mxu0 %v2257_v51  ;;  %2094 = vmatprep.mubr.msk.bf16.mxu1 %vm26_vm0, %v2259_v52  ;;  %v2336_v51 = vld [vmem:[%s3371_s0 + $0x2f0] ss:$12 sps:$4 sm:$0xff]  }
  0x81   :  { %1101 = vmatmul.mubr.bf16.gmra.mrb[32].mxu0 %v2260_v53  ;;  %2095 = vmatmul.mubr.msk.bf16.vlgmr.msra.gmra.mrb[32].mxu1 %vm26_vm0, %v2261_v54 }
  0x82   :  { %1108 = vmatprep.mubr.bf16.mxu0 %v2262_v55  ;;  %2098 = vmatprep.mubr.msk.bf16.mxu1 %vm26_vm0, %v2264_v56 }
  0x89   :  { %1109 = vmatmul.mubr.bf16.gmra.mrb[36].mxu0 %v2265_v57  ;;  %2099 = vmatmul.mubr.msk.bf16.gmra.mrb[36].mxu1 %vm26_vm0, %v2266_v58 }
  0x8a   :  { %1116 = vmatprep.mubr.bf16.mxu0 %v2267_v59  ;;  %2102 = vmatprep.mubr.msk.bf16.mxu1 %vm26_vm0, %v2269_v60 }
  0x91   :  { %1117 = vmatmul.mubr.bf16.gmra.mrb[40].mxu0 %v2270_v61  ;;  %2103 = vmatmul.mubr.msk.bf16.gmra.mrb[40].mxu1 %vm26_vm0, %v2271_v62 }
  0x92   :  { %1124 = vmatprep.mubr.bf16.mxu0 %v2272_v63  ;;  %2106 = vmatprep.mubr.msk.bf16.mxu1 %vm26_vm0, %v2274_v0 }
  0x99   :  { %1125 = vmatmul.mubr.bf16.gmra.mrb[44].mxu0 %v2275_v1  ;;  %2107 = vmatmul.mubr.msk.bf16.gmra.mrb[44].mxu1 %vm26_vm0, %v2276_v2 }
  0x9a   :  { %1132 = vmatprep.mubr.bf16.mxu0 %v2277_v3  ;;  %2110 = vmatprep.mubr.msk.bf16.mxu1 %vm26_vm0, %v2279_v4 }
  0xa1   :  { %1133 = vmatmul.mubr.bf16.gmra.mrb[48].mxu0 %v2280_v5  ;;  %2111 = vmatmul.mubr.msk.bf16.gmra.mrb[48].mxu1 %vm26_vm0, %v2281_v6 }
  0xa2   :  { %1140 = vmatprep.mubr.bf16.mxu0 %v2282_v7  ;;  %2114 = vmatprep.mubr.msk.bf16.mxu1 %vm26_vm0, %v2284_v8 }
  0xa9   :  { %1141 = vmatmul.mubr.bf16.gmra.mrb[52].mxu0 %v2285_v9  ;;  %2115 = vmatmul.mubr.msk.bf16.gmra.mrb[52].mxu1 %vm26_vm0, %v2286_v10 }
  0xaa   :  { %1148 = vmatprep.mubr.bf16.mxu0 %v2287_v11  ;;  %2118 = vmatprep.mubr.msk.bf16.mxu1 %vm26_vm0, %v2289_v12 }
  0xb1   :  { %1149 = vmatmul.mubr.bf16.gmra.mrb[56].mxu0 %v2290_v13  ;;  %2119 = vmatmul.mubr.msk.bf16.gmra.mrb[56].mxu1 %vm26_vm0, %v2291_v14 }
  0xb2   :  { %1156 = vmatprep.mubr.bf16.mxu0 %v2292_v15  ;;  %2122 = vmatprep.mubr.msk.bf16.mxu1 %vm26_vm0, %v2294_v16 }
  0xb9   :  { %1157 = vmatmul.mubr.bf16.gmra.mrb[60].mxu0 %v2295_v17  ;;  %2123 = vmatmul.mubr.msk.bf16.gmra.mrb[60].mxu1 %vm26_vm0, %v2296_v18 }
  0xba   :  { %1164 = vmatprep.mubr.bf16.mxu0 %v2297_v19  ;;  %2126 = vmatprep.mubr.msk.bf16.mxu1 %vm26_vm0, %v2299_v20 }
  0xc1   :  { %1165 = vmatmul.mubr.bf16.gmra.mrb[64].mxu0 %v2300_v21  ;;  %2127 = vmatmul.mubr.msk.bf16.gmra.mrb[64].mxu1 %vm26_vm0, %v2301_v22 }
  0xc2   :  { %1172 = vmatprep.mubr.bf16.mxu0 %v2302_v23  ;;  %2130 = vmatprep.mubr.msk.bf16.mxu1 %vm26_vm0, %v2304_v24 }
  0xc9   :  { %1173 = vmatmul.mubr.bf16.gmra.mrb[68].mxu0 %v2305_v25  ;;  %2131 = vmatmul.mubr.msk.bf16.gmra.mrb[68].mxu1 %vm26_vm0, %v2306_v26 }
  0xca   :  { %1180 = vmatprep.mubr.bf16.mxu0 %v2307_v27  ;;  %2134 = vmatprep.mubr.msk.bf16.mxu1 %vm26_vm0, %v2309_v28 }
  0xd1   :  { %1181 = vmatmul.mubr.bf16.gmra.mrb[72].mxu0 %v2690_v29  ;;  %2135 = vmatmul.mubr.msk.bf16.gmra.mrb[72].mxu1 %vm26_vm0, %v2695_v30 }
  0xd2   :  { %1188 = vmatprep.mubr.bf16.mxu0 %v2700_v31  ;;  %2138 = vmatprep.mubr.msk.bf16.mxu1 %vm26_vm0, %v2705_v32 }
  0xd9   :  { %1189 = vmatmul.mubr.bf16.gmra.mrb[76].mxu0 %v2315_v34  ;;  %2139 = vmatmul.mubr.msk.bf16.gmra.mrb[76].mxu1 %vm26_vm0, %v2316_v35 }
  0xda   :  { %1196 = vmatprep.mubr.bf16.mxu0 %v2317_v36  ;;  %2142 = vmatprep.mubr.msk.bf16.mxu1 %vm26_vm0, %v2319_v37 }
  0xe1   :  { %1197 = vmatmul.mubr.bf16.gmra.mrb[80].mxu0 %v2320_v38  ;;  %2143 = vmatmul.mubr.msk.bf16.gmra.mrb[80].mxu1 %vm26_vm0, %v2321_v39 }
  0xe2   :  { %1204 = vmatprep.mubr.bf16.mxu0 %v2322_v40  ;;  %2146 = vmatprep.mubr.msk.bf16.mxu1 %vm26_vm0, %v2324_v41 }
  0xe9   :  { %1205 = vmatmul.mubr.bf16.gmra.mrb[84].mxu0 %v2325_v42  ;;  %2147 = vmatmul.mubr.msk.bf16.gmra.mrb[84].mxu1 %vm26_vm0, %v2326_v43 }
  0xea   :  { %1212 = vmatprep.mubr.bf16.mxu0 %v2327_v44  ;;  %2150 = vmatprep.mubr.msk.bf16.mxu1 %vm26_vm0, %v2329_v45 }
  0xf1   :  { %1213 = vmatmul.mubr.bf16.gmra.mrb[88].mxu0 %v2330_v46  ;;  %2151 = vmatmul.mubr.msk.bf16.gmra.mrb[88].mxu1 %vm26_vm0, %v2331_v47 }
  0xf2   :  { %1220 = vmatprep.mubr.bf16.mxu0 %v2332_v48  ;;  %2154 = vmatprep.mubr.msk.bf16.mxu1 %vm26_vm0, %v2334_v49 }
  0xf9   :  { %1221 = vmatmul.mubr.bf16.gmra.mrb[92].mxu0 %v2335_v50  ;;  %2155 = vmatmul.mubr.msk.bf16.gmra.mrb[92].mxu1 %vm26_vm0, %v2336_v51 }
 0x114   :  { %v2909_v52 = vpop.f32.mrb[0].mxu0  ;;  %v2911_v53 = vpop.f32.mrb[0].mxu1 }
 0x115   :  { %v1040_v54 = vpop.f32.mrb[1].mxu0  ;;  %v1232_v55 = vpop.f32.mrb[1].mxu1 }
 0x116   :  { %v2913_v56 = vpop.f32.mrb[2].mxu0  ;;  %v2915_v57 = vpop.f32.mrb[2].mxu1  ;;  %v93_v55 = vld [vmem:[#allocation2 + $0x10] sm:$0xff] }
 0x117   :  { %v1043_v58 = vpop.f32.mrb[3].mxu0  ;;  %v1235_v59 = vpop.f32.mrb[3].mxu1 }
 0x11c   :  { %v1046_v60 = vpop.f32.mrb[4].mxu0  ;;  %v2917_v61 = vpop.f32.mrb[4].mxu1 }
 0x11d   :  { %v1048_v62 = vpop.f32.mrb[5].mxu0  ;;  %v1240_v63 = vpop.f32.mrb[5].mxu1 }
 0x11e   :  { %v2919_v0 = vpop.f32.mrb[6].mxu0  ;;  %v2921_v1 = vpop.f32.mrb[6].mxu1  ;;  %v91_v63 = vld [vmem:[#allocation2] sm:$0xff] }
 0x11f   :  { %v1051_v2 = vpop.f32.mrb[7].mxu0  ;;  %v1243_v3 = vpop.f32.mrb[7].mxu1 }
 0x124   :  { %v2923_v4 = vpop.f32.mrb[8].mxu0  ;;  %v2925_v5 = vpop.f32.mrb[8].mxu1 }
 0x125   :  { %v1056_v6 = vpop.f32.mrb[9].mxu0  ;;  %v1248_v7 = vpop.f32.mrb[9].mxu1 }
 0x126   :  { %v2927_v8 = vpop.f32.mrb[10].mxu0  ;;  %v2929_v9 = vpop.f32.mrb[10].mxu1  ;;  %v94_v7 = vld [vmem:[#allocation2 + $0x18] sm:$0xff] }
 0x127   :  { %v1059_v10 = vpop.f32.mrb[11].mxu0  ;;  %v1251_v11 = vpop.f32.mrb[11].mxu1 }
 0x12c   :  { %v2931_v12 = vpop.f32.mrb[12].mxu0  ;;  %v2933_v13 = vpop.f32.mrb[12].mxu1 }
 0x12d   :  { %v1064_v14 = vpop.f32.mrb[13].mxu0  ;;  %v1256_v15 = vpop.f32.mrb[13].mxu1 }
 0x12e   :  { %v2935_v16 = vpop.f32.mrb[14].mxu0  ;;  %v2937_v17 = vpop.f32.mrb[14].mxu1 }
 0x12f   :  { %v1067_v18 = vpop.f32.mrb[15].mxu0  ;;  %v1259_v19 = vpop.f32.mrb[15].mxu1 }
 0x130   :  { %v92_v18 = vld [vmem:[#allocation2 + $0x8] sm:$0xff] }
 0x134   :  { %v2939_v20 = vpop.f32.mrb[16].mxu0  ;;  %v2941_v21 = vpop.f32.mrb[16].mxu1 }
 0x135   :  { %v1072_v22 = vpop.f32.mrb[17].mxu0  ;;  %v1264_v23 = vpop.f32.mrb[17].mxu1 }
 0x136   :  { %v2943_v24 = vpop.f32.mrb[18].mxu0  ;;  %v2945_v25 = vpop.f32.mrb[18].mxu1 }
 0x137   :  { %v1075_v26 = vpop.f32.mrb[19].mxu0  ;;  %v1267_v27 = vpop.f32.mrb[19].mxu1 }
 0x138   :  { %v97_v27 = vld [vmem:[#allocation2 + $0x30] sm:$0xff] }
 0x13c   :  { %v2947_v28 = vpop.f32.mrb[20].mxu0  ;;  %v2949_v29 = vpop.f32.mrb[20].mxu1 }
 0x13d   :  { %v1080_v30 = vpop.f32.mrb[21].mxu0  ;;  %v1272_v31 = vpop.f32.mrb[21].mxu1 }
 0x13e   :  { %v2951_v32 = vpop.f32.mrb[22].mxu0  ;;  %v2953_v33 = vpop.f32.mrb[22].mxu1 }
 0x13f   :  { %v1083_v34 = vpop.f32.mrb[23].mxu0  ;;  %v1275_v35 = vpop.f32.mrb[23].mxu1 }
 0x140   :  { %v95_v34 = vld [vmem:[#allocation2 + $0x20] sm:$0xff] }
 0x144   :  { %v2955_v36 = vpop.f32.mrb[24].mxu0  ;;  %v2957_v37 = vpop.f32.mrb[24].mxu1 }
 0x145   :  { %v1088_v38 = vpop.f32.mrb[25].mxu0  ;;  %v1280_v39 = vpop.f32.mrb[25].mxu1 }
 0x146   :  { %v2959_v40 = vpop.f32.mrb[26].mxu0  ;;  %v2961_v41 = vpop.f32.mrb[26].mxu1  ;;  %v98_v39 = vld [vmem:[#allocation2 + $0x38] sm:$0xff] }
 0x147   :  { %v1091_v42 = vpop.f32.mrb[27].mxu0  ;;  %v1283_v43 = vpop.f32.mrb[27].mxu1 }
 0x14c   :  { %v2963_v44 = vpop.f32.mrb[28].mxu0  ;;  %v2965_v45 = vpop.f32.mrb[28].mxu1 }
 0x14d   :  { %v1096_v46 = vpop.f32.mrb[29].mxu0  ;;  %v1288_v47 = vpop.f32.mrb[29].mxu1 }
 0x14e   :  { %v2967_v48 = vpop.f32.mrb[30].mxu0  ;;  %v2969_v49 = vpop.f32.mrb[30].mxu1 }
 0x14f   :  { %v1099_v50 = vpop.f32.mrb[31].mxu0  ;;  %v1291_v51 = vpop.f32.mrb[31].mxu1 }
 0x150   :  { %v96_v50 = vld [vmem:[#allocation2 + $0x28] sm:$0xff] }
 0x154   :  { %v2971_v54 = vpop.f32.mrb[32].mxu0  ;;  %v2096_v58 = vpop.f32.mrb[32].mxu1 }
 0x155   :  { %v1336_v59 = vadd.f32 %v2096_v58, %v1046_v60  ;;  %v1104_v62 = vpop.f32.mrb[33].mxu0  ;;  %v1327_v2 = vpop.f32.mrb[33].mxu1 }
 0x156   :  { %v1328_v3 = vadd.f32 %v1327_v2, %v2909_v52  ;;  %v2974_v6 = vpop.f32.mrb[34].mxu0  ;;  %v2097_v10 = vpop.f32.mrb[34].mxu1 }
 0x157   :  { %v1584_v11 = vadd.f32 %v1336_v59, %v93_v55  ;;  %v1339_v14 = vadd.f32 %v2097_v10, %v2919_v0  ;;  %v1107_v15 = vpop.f32.mrb[35].mxu0  ;;  %v1330_v19 = vpop.f32.mrb[35].mxu1 }
 0x158   :  { %v1582_v22 = vadd.f32 %v1328_v3, %v91_v63  ;;  %v1331_v23 = vadd.f32 %v1330_v19, %v2913_v56  ;;  %v99_v19 = vld [vmem:[#allocation2 + $0x40] sm:$0xff] }
 0x159   :  { %1648 = vst.msk [vmem:[#allocation2 + $0x10] sm:$0xff] %vm26_vm0, %v1584_v11  ;;  %v1585_v60 = vadd.f32 %v1339_v14, %v94_v7  ;;  %v101_v11 = vld [vmem:[#allocation2 + $0x50] sm:$0xff] }
 0x15a   :  { %1646 = vst.msk [vmem:[#allocation2] sm:$0xff] %vm26_vm0, %v1582_v22  ;;  %v1583_v26 = vadd.f32 %v1331_v23, %v92_v18 }
 0x15b   :  { %1649 = vst.msk [vmem:[#allocation2 + $0x18] sm:$0xff] %vm26_vm0, %v1585_v60 }
 0x15c   :  { %1647 = vst.msk [vmem:[#allocation2 + $0x8] sm:$0xff] %vm26_vm0, %v1583_v26  ;;  %v2982_v52 = vpop.f32.mrb[36].mxu0  ;;  %v2100_v0 = vpop.f32.mrb[36].mxu1  ;;  %v102_v26 = vld [vmem:[#allocation2 + $0x58] sm:$0xff] }
 0x15d   :  { %v1352_v30 = vadd.f32 %v2100_v0, %v2931_v12  ;;  %v1112_v31 = vpop.f32.mrb[37].mxu0  ;;  %v1343_v35 = vpop.f32.mrb[37].mxu1 }
 0x15e   :  { %v1344_v56 = vadd.f32 %v1343_v35, %v2923_v4  ;;  %v2986_v38 = vpop.f32.mrb[38].mxu0  ;;  %v2101_v42 = vpop.f32.mrb[38].mxu1 }
 0x15f   :  { %v1588_v43 = vadd.f32 %v1352_v30, %v97_v27  ;;  %v1355_v46 = vadd.f32 %v2101_v42, %v2935_v16  ;;  %v1115_v47 = vpop.f32.mrb[39].mxu0  ;;  %v1346_v51 = vpop.f32.mrb[39].mxu1 }
 0x160   :  { %v1715_v55 = vld [vmem:[#allocation2 + $0x10] sm:$0xff]  ;;  %v1586_v58 = vadd.f32 %v1344_v56, %v95_v34  ;;  %v1347_v59 = vadd.f32 %v1346_v51, %v2927_v8  ;;  %v100_v34 = vld [vmem:[#allocation2 + $0x48] sm:$0xff] }
 0x161   :  { %v1779_v12 = vmax.f32 %v1715_v55, 0.0  ;;  %v1713_v62 = vld [vmem:[#allocation2] sm:$0xff]  ;;  %1652 = vst.msk [vmem:[#allocation2 + $0x30] sm:$0xff] %vm26_vm0, %v1588_v43  ;;  %v1589_v63 = vadd.f32 %v1355_v46, %v98_v39 }
 0x162   :  { %v1777_v4 = vmax.f32 %v1713_v62, 0.0  ;;  %v1716_v2 = vld [vmem:[#allocation2 + $0x18] sm:$0xff]  ;;  %1650 = vst.msk [vmem:[#allocation2 + $0x20] sm:$0xff] %vm26_vm0, %v1586_v58  ;;  %v1587_v3 = vadd.f32 %v1347_v59, %v96_v50  ;;  %v105_v58 = vld [vmem:[#allocation2 + $0x70] sm:$0xff] }
 0x163   :  { %1843 = vst.msk [vmem:[%s3373_s3 + $0x10] sm:$0xff] %vm26_vm0, %v1779_v12  ;;  %v1780_v16 = vmax.f32 %v1716_v2, 0.0  ;;  %v1714_v7 = vld [vmem:[#allocation2 + $0x8] sm:$0xff]  ;;  %1653 = vst.msk [vmem:[#allocation2 + $0x38] sm:$0xff] %vm26_vm0, %v1589_v63  ;;  %v103_v63 = vld [vmem:[#allocation2 + $0x60] sm:$0xff] }
 0x164   :  { %1841 = vst.msk [vmem:[%s3373_s3] sm:$0xff] %vm26_vm0, %v1777_v4  ;;  %v1778_v8 = vmax.f32 %v1714_v7, 0.0  ;;  %1651 = vst.msk [vmem:[#allocation2 + $0x28] sm:$0xff] %vm26_vm0, %v1587_v3  ;;  %v3002_v10 = vpop.f32.mrb[40].mxu0  ;;  %v2104_v14 = vpop.f32.mrb[40].mxu1 }
 0x165   :  { %1844 = vst.msk [vmem:[%s3373_s3 + $0x18] sm:$0xff] %vm26_vm0, %v1780_v16  ;;  %v1368_v15 = vadd.f32 %v2104_v14, %v2947_v28  ;;  %v1120_v18 = vpop.f32.mrb[41].mxu0  ;;  %v1359_v22 = vpop.f32.mrb[41].mxu1  ;;  %v106_v16 = vld [vmem:[#allocation2 + $0x78] sm:$0xff] }
 0x166   :  { %1842 = vst.msk [vmem:[%s3373_s3 + $0x8] sm:$0xff] %vm26_vm0, %v1778_v8  ;;  %v1360_v23 = vadd.f32 %v1359_v22, %v2939_v20  ;;  %v3014_v60 = vpop.f32.mrb[42].mxu0  ;;  %v2105_v27 = vpop.f32.mrb[42].mxu1 }
 0x167   :  { %v1592_v0 = vadd.f32 %v1368_v15, %v101_v11  ;;  %v1371_v30 = vadd.f32 %v2105_v27, %v2951_v32  ;;  %v1123_v31 = vpop.f32.mrb[43].mxu0  ;;  %v1362_v28 = vpop.f32.mrb[43].mxu1  ;;  %v104_v15 = vld [vmem:[#allocation2 + $0x68] sm:$0xff] }
 0x168   :  { %v1719_v35 = vld [vmem:[#allocation2 + $0x30] sm:$0xff]  ;;  %v1590_v56 = vadd.f32 %v1360_v23, %v99_v19  ;;  %v1363_v39 = vadd.f32 %v1362_v28, %v2943_v24 }
 0x169   :  { %v1783_v42 = vmax.f32 %v1719_v35, 0.0  ;;  %v1717_v43 = vld [vmem:[#allocation2 + $0x20] sm:$0xff]  ;;  %1656 = vst.msk [vmem:[#allocation2 + $0x50] sm:$0xff] %vm26_vm0, %v1592_v0  ;;  %v1593_v46 = vadd.f32 %v1371_v30, %v102_v26  ;;  %v109_v28 = vld [vmem:[#allocation2 + $0x90] sm:$0xff] }
 0x16a   :  { %v1781_v20 = vmax.f32 %v1717_v43, 0.0  ;;  %v1720_v47 = vld [vmem:[#allocation2 + $0x38] sm:$0xff]  ;;  %1654 = vst.msk [vmem:[#allocation2 + $0x40] sm:$0xff] %vm26_vm0, %v1590_v56  ;;  %v1591_v50 = vadd.f32 %v1363_v39, %v100_v34 }
 0x16b   :  { %1847 = vst.msk [vmem:[%s3373_s3 + $0x30] sm:$0xff] %vm26_vm0, %v1783_v42  ;;  %v1784_v32 = vmax.f32 %v1720_v47, 0.0  ;;  %v1718_v51 = vld [vmem:[#allocation2 + $0x28] sm:$0xff]  ;;  %1657 = vst.msk [vmem:[#allocation2 + $0x58] sm:$0xff] %vm26_vm0, %v1593_v46  ;;  %v107_v42 = vld [vmem:[#allocation2 + $0x80] sm:$0xff] }
 0x16c   :  { %1845 = vst.msk [vmem:[%s3373_s3 + $0x20] sm:$0xff] %vm26_vm0, %v1781_v20  ;;  %v1782_v24 = vmax.f32 %v1718_v51, 0.0  ;;  %1655 = vst.msk [vmem:[#allocation2 + $0x48] sm:$0xff] %vm26_vm0, %v1591_v50  ;;  %v3030_v55 = vpop.f32.mrb[44].mxu0  ;;  %v2108_v59 = vpop.f32.mrb[44].mxu1  ;;  %v110_v47 = vld [vmem:[#allocation2 + $0x98] sm:$0xff] }
 0x16d   :  { %1848 = vst.msk [vmem:[%s3373_s3 + $0x38] sm:$0xff] %vm26_vm0, %v1784_v32  ;;  %v1384_v12 = vadd.f32 %v2108_v59, %v2963_v44  ;;  %v1128_v62 = vpop.f32.mrb[45].mxu0  ;;  %v1375_v4 = vpop.f32.mrb[45].mxu1 }
 0x16e   :  { %1846 = vst.msk [vmem:[%s3373_s3 + $0x28] sm:$0xff] %vm26_vm0, %v1782_v24  ;;  %v1376_v2 = vadd.f32 %v1375_v4, %v2955_v36  ;;  %v3042_v3 = vpop.f32.mrb[46].mxu0  ;;  %v2109_v7 = vpop.f32.mrb[46].mxu1 }
 0x16f   :  { %v1596_v8 = vadd.f32 %v1384_v12, %v105_v58  ;;  %v1387_v11 = vadd.f32 %v2109_v7, %v2967_v48  ;;  %v1131_v14 = vpop.f32.mrb[47].mxu0  ;;  %v1378_v44 = vpop.f32.mrb[47].mxu1  ;;  %v108_v58 = vld [vmem:[#allocation2 + $0x88] sm:$0xff] }
 0x170   :  { %v1723_v18 = vld [vmem:[#allocation2 + $0x50] sm:$0xff]  ;;  %v1594_v19 = vadd.f32 %v1376_v2, %v103_v63  ;;  %v1379_v22 = vadd.f32 %v1378_v44, %v2959_v40 }
 0x171   :  { %v1787_v23 = vmax.f32 %v1723_v18, 0.0  ;;  %v1721_v26 = vld [vmem:[#allocation2 + $0x40] sm:$0xff]  ;;  %1660 = vst.msk [vmem:[#allocation2 + $0x70] sm:$0xff] %vm26_vm0, %v1596_v8  ;;  %v1597_v27 = vadd.f32 %v1387_v11, %v106_v16  ;;  %v113_v14 = vld [vmem:[#allocation2 + $0xb0] sm:$0xff] }
 0x172   :  { %v1785_v36 = vmax.f32 %v1721_v26, 0.0  ;;  %v1724_v0 = vld [vmem:[#allocation2 + $0x58] sm:$0xff]  ;;  %1658 = vst.msk [vmem:[#allocation2 + $0x60] sm:$0xff] %vm26_vm0, %v1594_v19  ;;  %v1595_v30 = vadd.f32 %v1379_v22, %v104_v15  ;;  %v111_v19 = vld [vmem:[#allocation2 + $0xa0] sm:$0xff] }
 0x173   :  { %1851 = vst.msk [vmem:[%s3373_s3 + $0x50] sm:$0xff] %vm26_vm0, %v1787_v23  ;;  %v1788_v48 = vmax.f32 %v1724_v0, 0.0  ;;  %v1722_v31 = vld [vmem:[#allocation2 + $0x48] sm:$0xff]  ;;  %1661 = vst.msk [vmem:[#allocation2 + $0x78] sm:$0xff] %vm26_vm0, %v1597_v27  ;;  %v114_v27 = vld [vmem:[#allocation2 + $0xb8] sm:$0xff] }
 0x174   :  { %1849 = vst.msk [vmem:[%s3373_s3 + $0x40] sm:$0xff] %vm26_vm0, %v1785_v36  ;;  %v1786_v40 = vmax.f32 %v1722_v31, 0.0  ;;  %1659 = vst.msk [vmem:[#allocation2 + $0x68] sm:$0xff] %vm26_vm0, %v1595_v30  ;;  %v3058_v34 = vpop.f32.mrb[48].mxu0  ;;  %v2112_v35 = vpop.f32.mrb[48].mxu1  ;;  %v112_v31 = vld [vmem:[#allocation2 + $0xa8] sm:$0xff] }
 0x175   :  { %1852 = vst.msk [vmem:[%s3373_s3 + $0x58] sm:$0xff] %vm26_vm0, %v1788_v48  ;;  %v1400_v56 = vadd.f32 %v2112_v35, %v2982_v52  ;;  %v1136_v39 = vpop.f32.mrb[49].mxu0  ;;  %v1391_v43 = vpop.f32.mrb[49].mxu1 }
 0x176   :  { %1850 = vst.msk [vmem:[%s3373_s3 + $0x48] sm:$0xff] %vm26_vm0, %v1786_v40  ;;  %v1392_v46 = vadd.f32 %v1391_v43, %v2971_v54  ;;  %v3070_v20 = vpop.f32.mrb[50].mxu0  ;;  %v2113_v50 = vpop.f32.mrb[50].mxu1 }
 0x177   :  { %v1600_v32 = vadd.f32 %v1400_v56, %v109_v28  ;;  %v1403_v51 = vadd.f32 %v2113_v50, %v2986_v38  ;;  %v1139_v24 = vpop.f32.mrb[51].mxu0  ;;  %v1394_v52 = vpop.f32.mrb[51].mxu1 }
 0x178   :  { %v1727_v59 = vld [vmem:[#allocation2 + $0x70] sm:$0xff]  ;;  %v1598_v12 = vadd.f32 %v1392_v46, %v107_v42  ;;  %v1395_v62 = vadd.f32 %v1394_v52, %v2974_v6  ;;  %v115_v52 = vld [vmem:[#allocation2 + $0xc0] sm:$0xff] }
 0x179   :  { %v1791_v63 = vmax.f32 %v1727_v59, 0.0  ;;  %v1725_v4 = vld [vmem:[#allocation2 + $0x60] sm:$0xff]  ;;  %1664 = vst.msk [vmem:[#allocation2 + $0x90] sm:$0xff] %vm26_vm0, %v1600_v32  ;;  %v1601_v2 = vadd.f32 %v1403_v51, %v110_v47  ;;  %v117_v32 = vld [vmem:[#allocation2 + $0xd0] sm:$0xff] }
 0x17a   :  { %v1789_v54 = vmax.f32 %v1725_v4, 0.0  ;;  %v1728_v16 = vld [vmem:[#allocation2 + $0x78] sm:$0xff]  ;;  %1662 = vst.msk [vmem:[#allocation2 + $0x80] sm:$0xff] %vm26_vm0, %v1598_v12  ;;  %v1599_v7 = vadd.f32 %v1395_v62, %v108_v58 }
 0x17b   :  { %1855 = vst.msk [vmem:[%s3373_s3 + $0x70] sm:$0xff] %vm26_vm0, %v1791_v63  ;;  %v1792_v38 = vmax.f32 %v1728_v16, 0.0  ;;  %v1726_v8 = vld [vmem:[#allocation2 + $0x68] sm:$0xff]  ;;  %1665 = vst.msk [vmem:[#allocation2 + $0x98] sm:$0xff] %vm26_vm0, %v1601_v2  ;;  %v118_v63 = vld [vmem:[#allocation2 + $0xd8] sm:$0xff] }
 0x17c   :  { %1853 = vst.msk [vmem:[%s3373_s3 + $0x60] sm:$0xff] %vm26_vm0, %v1789_v54  ;;  %v1790_v6 = vmax.f32 %v1726_v8, 0.0  ;;  %1663 = vst.msk [vmem:[#allocation2 + $0x88] sm:$0xff] %vm26_vm0, %v1599_v7  ;;  %v1142_v11 = vpop.f32.mrb[52].mxu0  ;;  %v2116_v15 = vpop.f32.mrb[52].mxu1  ;;  %v116_v7 = vld [vmem:[#allocation2 + $0xc8] sm:$0xff] }
 0x17d   :  { %1856 = vst.msk [vmem:[%s3373_s3 + $0x78] sm:$0xff] %vm26_vm0, %v1792_v38  ;;  %v1416_v44 = vadd.f32 %v2116_v15, %v3030_v55  ;;  %v1144_v18 = vpop.f32.mrb[53].mxu0  ;;  %v1407_v22 = vpop.f32.mrb[53].mxu1 }
 0x17e   :  { %1854 = vst.msk [vmem:[%s3373_s3 + $0x68] sm:$0xff] %vm26_vm0, %v1790_v6  ;;  %v1408_v23 = vadd.f32 %v1407_v22, %v3002_v10  ;;  %v1145_v26 = vpop.f32.mrb[54].mxu0  ;;  %v2117_v36 = vpop.f32.mrb[54].mxu1 }
 0x17f   :  { %v1604_v0 = vadd.f32 %v1416_v44, %v113_v14  ;;  %v1419_v30 = vadd.f32 %v2117_v36, %v3042_v3  ;;  %v1147_v48 = vpop.f32.mrb[55].mxu0  ;;  %v1410_v40 = vpop.f32.mrb[55].mxu1 }
 0x180   :  { %v1731_v55 = vld [vmem:[#allocation2 + $0x90] sm:$0xff]  ;;  %v1602_v28 = vadd.f32 %v1408_v23, %v111_v19  ;;  %v1411_v35 = vadd.f32 %v1410_v40, %v3014_v60  ;;  %v119_v48 = vld [vmem:[#allocation2 + $0xe0] sm:$0xff] }
 0x181   :  { %v1795_v56 = vmax.f32 %v1731_v55, 0.0  ;;  %v1729_v39 = vld [vmem:[#allocation2 + $0x80] sm:$0xff]  ;;  %1668 = vst.msk [vmem:[#allocation2 + $0xb0] sm:$0xff] %vm26_vm0, %v1604_v0  ;;  %v1605_v42 = vadd.f32 %v1419_v30, %v114_v27  ;;  %v121_v27 = vld [vmem:[#allocation2 + $0xf0] sm:$0xff] }
 0x182   :  { %v1793_v43 = vmax.f32 %v1729_v39, 0.0  ;;  %v1732_v10 = vld [vmem:[#allocation2 + $0x98] sm:$0xff]  ;;  %1666 = vst.msk [vmem:[#allocation2 + $0xa0] sm:$0xff] %vm26_vm0, %v1602_v28  ;;  %v1603_v46 = vadd.f32 %v1411_v35, %v112_v31 }
 0x183   :  { %1859 = vst.msk [vmem:[%s3373_s3 + $0x90] sm:$0xff] %vm26_vm0, %v1795_v56  ;;  %v1796_v3 = vmax.f32 %v1732_v10, 0.0  ;;  %v1730_v47 = vld [vmem:[#allocation2 + $0x88] sm:$0xff]  ;;  %1669 = vst.msk [vmem:[#allocation2 + $0xb8] sm:$0xff] %vm26_vm0, %v1605_v42  ;;  %v122_v28 = vld [vmem:[#allocation2 + $0xf8] sm:$0xff] }
 0x184   :  { %1857 = vst.msk [vmem:[%s3373_s3 + $0x80] sm:$0xff] %vm26_vm0, %v1793_v43  ;;  %v1794_v60 = vmax.f32 %v1730_v47, 0.0  ;;  %1667 = vst.msk [vmem:[#allocation2 + $0xa8] sm:$0xff] %vm26_vm0, %v1603_v46  ;;  %v1150_v50 = vpop.f32.mrb[56].mxu0  ;;  %v2120_v51 = vpop.f32.mrb[56].mxu1  ;;  %v120_v43 = vld [vmem:[#allocation2 + $0xe8] sm:$0xff] }
 0x185   :  { %1860 = vst.msk [vmem:[%s3373_s3 + $0x98] sm:$0xff] %vm26_vm0, %v1796_v3  ;;  %v1432_v24 = vadd.f32 %v2120_v51, %v1142_v11  ;;  %v1152_v58 = vpop.f32.mrb[57].mxu0  ;;  %v1423_v59 = vpop.f32.mrb[57].mxu1 }
 0x186   :  { %1858 = vst.msk [vmem:[%s3373_s3 + $0x88] sm:$0xff] %vm26_vm0, %v1794_v60  ;;  %v1424_v12 = vadd.f32 %v1423_v59, %v3058_v34  ;;  %v1153_v62 = vpop.f32.mrb[58].mxu0  ;;  %v2121_v4 = vpop.f32.mrb[58].mxu1 }
 0x187   :  { %v1608_v2 = vadd.f32 %v1432_v24, %v117_v32  ;;  %v1435_v54 = vadd.f32 %v2121_v4, %v1145_v26  ;;  %v1155_v16 = vpop.f32.mrb[59].mxu0  ;;  %v1426_v38 = vpop.f32.mrb[59].mxu1 }
 0x188   :  { %v1735_v8 = vld [vmem:[#allocation2 + $0xb0] sm:$0xff]  ;;  %v1606_v6 = vadd.f32 %v1424_v12, %v115_v52  ;;  %v1427_v11 = vadd.f32 %v1426_v38, %v3070_v20 }
 0x189   :  { %v1799_v14 = vmax.f32 %v1735_v8, 0.0  ;;  %v1733_v15 = vld [vmem:[#allocation2 + $0xa0] sm:$0xff]  ;;  %1672 = vst.msk [vmem:[#allocation2 + $0xd0] sm:$0xff] %vm26_vm0, %v1608_v2  ;;  %v1609_v44 = vadd.f32 %v1435_v54, %v118_v63 }
 0x18a   :  { %v1797_v18 = vmax.f32 %v1733_v15, 0.0  ;;  %v1736_v19 = vld [vmem:[#allocation2 + $0xb8] sm:$0xff]  ;;  %1670 = vst.msk [vmem:[#allocation2 + $0xc0] sm:$0xff] %vm26_vm0, %v1606_v6  ;;  %v1607_v34 = vadd.f32 %v1427_v11, %v116_v7  ;;  %v123_v2 = vld [vmem:[#allocation2 + $0x100] sm:$0xff]  ;;  %v124_v6 = vld [vmem:[#allocation2 + $0x108] sm:$0xff] }
 0x18b   :  { %1863 = vst.msk [vmem:[%s3373_s3 + $0xb0] sm:$0xff] %vm26_vm0, %v1799_v14  ;;  %v1800_v22 = vmax.f32 %v1736_v19, 0.0  ;;  %v1734_v23 = vld [vmem:[#allocation2 + $0xa8] sm:$0xff]  ;;  %1673 = vst.msk [vmem:[#allocation2 + $0xd8] sm:$0xff] %vm26_vm0, %v1609_v44 }
 0x18c   :  { %1861 = vst.msk [vmem:[%s3373_s3 + $0xa0] sm:$0xff] %vm26_vm0, %v1797_v18  ;;  %v1798_v20 = vmax.f32 %v1734_v23, 0.0  ;;  %1671 = vst.msk [vmem:[#allocation2 + $0xc8] sm:$0xff] %vm26_vm0, %v1607_v34  ;;  %v1158_v26 = vpop.f32.mrb[60].mxu0  ;;  %v2124_v36 = vpop.f32.mrb[60].mxu1 }
 0x18d   :  { %1864 = vst.msk [vmem:[%s3373_s3 + $0xb8] sm:$0xff] %vm26_vm0, %v1800_v22  ;;  %v1448_v0 = vadd.f32 %v2124_v36, %v1158_v26  ;;  %v1160_v30 = vpop.f32.mrb[61].mxu0  ;;  %v1439_v31 = vpop.f32.mrb[61].mxu1  ;;  %v125_v36 = vld [vmem:[#allocation2 + $0x110] sm:$0xff] }
 0x18e   :  { %1862 = vst.msk [vmem:[%s3373_s3 + $0xa8] sm:$0xff] %vm26_vm0, %v1798_v20  ;;  %v1440_v40 = vadd.f32 %v1439_v31, %v1150_v50  ;;  %v1161_v55 = vpop.f32.mrb[62].mxu0  ;;  %v2125_v35 = vpop.f32.mrb[62].mxu1 }
 0x18f   :  { %v1612_v56 = vadd.f32 %v1448_v0, %v121_v27  ;;  %v1451_v39 = vadd.f32 %v2125_v35, %v1161_v55  ;;  %v1163_v42 = vpop.f32.mrb[63].mxu0  ;;  %v1442_v10 = vpop.f32.mrb[63].mxu1  ;;  %v126_v55 = vld [vmem:[#allocation2 + $0x118] sm:$0xff] }
 0x190   :  { %v1739_v46 = vld [vmem:[#allocation2 + $0xd0] sm:$0xff]  ;;  %v1610_v3 = vadd.f32 %v1440_v40, %v119_v48  ;;  %v1443_v47 = vadd.f32 %v1442_v10, %v1153_v62 }
 0x191   :  { %v1803_v60 = vmax.f32 %v1739_v46, 0.0  ;;  %v1737_v32 = vld [vmem:[#allocation2 + $0xc0] sm:$0xff]  ;;  %1676 = vst.msk [vmem:[#allocation2 + $0xf0] sm:$0xff] %vm26_vm0, %v1612_v56  ;;  %v1613_v51 = vadd.f32 %v1451_v39, %v122_v28 }
 0x192   :  { %v1801_v24 = vmax.f32 %v1737_v32, 0.0  ;;  %v1740_v58 = vld [vmem:[#allocation2 + $0xd8] sm:$0xff]  ;;  %1674 = vst.msk [vmem:[#allocation2 + $0xe0] sm:$0xff] %vm26_vm0, %v1610_v3  ;;  %v1611_v50 = vadd.f32 %v1443_v47, %v120_v43  ;;  %v127_v32 = vld [vmem:[#allocation2 + $0x120] sm:$0xff] }
 0x193   :  { %1867 = vst.msk [vmem:[%s3373_s3 + $0xd0] sm:$0xff] %vm26_vm0, %v1803_v60  ;;  %v1804_v52 = vmax.f32 %v1740_v58, 0.0  ;;  %v1738_v59 = vld [vmem:[#allocation2 + $0xc8] sm:$0xff]  ;;  %1677 = vst.msk [vmem:[#allocation2 + $0xf8] sm:$0xff] %vm26_vm0, %v1613_v51 }
 0x194   :  { %1865 = vst.msk [vmem:[%s3373_s3 + $0xc0] sm:$0xff] %vm26_vm0, %v1801_v24  ;;  %v1802_v12 = vmax.f32 %v1738_v59, 0.0  ;;  %1675 = vst.msk [vmem:[#allocation2 + $0xe8] sm:$0xff] %vm26_vm0, %v1611_v50  ;;  %v1166_v62 = vpop.f32.mrb[64].mxu0  ;;  %v2128_v63 = vpop.f32.mrb[64].mxu1  ;;  %v128_v59 = vld [vmem:[#allocation2 + $0x128] sm:$0xff] }
 0x195   :  { %1868 = vst.msk [vmem:[%s3373_s3 + $0xd8] sm:$0xff] %vm26_vm0, %v1804_v52  ;;  %v1168_v4 = vpop.f32.mrb[65].mxu0  ;;  %v1455_v54 = vpop.f32.mrb[65].mxu1 }
 0x196   :  { %1866 = vst.msk [vmem:[%s3373_s3 + $0xc8] sm:$0xff] %vm26_vm0, %v1802_v12  ;;  %v1456_v16 = vadd.f32 %v1455_v54, %v1166_v62  ;;  %v1169_v7 = vpop.f32.mrb[66].mxu0  ;;  %v2129_v38 = vpop.f32.mrb[66].mxu1 }
 0x197   :  { %v1171_v8 = vpop.f32.mrb[67].mxu0  ;;  %v1458_v11 = vpop.f32.mrb[67].mxu1 }
 0x198   :  { %v1743_v14 = vld [vmem:[#allocation2 + $0xf0] sm:$0xff]  ;;  %v1614_v15 = vadd.f32 %v1456_v16, %v123_v2  ;;  %v1459_v44 = vadd.f32 %v1458_v11, %v1169_v7 }
 0x199   :  { %v1807_v18 = vmax.f32 %v1743_v14, 0.0  ;;  %v1741_v19 = vld [vmem:[#allocation2 + $0xe0] sm:$0xff]  ;;  %v129_v11 = vld [vmem:[#allocation2 + $0x130] sm:$0xff] }
 0x19a   :  { %v1805_v34 = vmax.f32 %v1741_v19, 0.0  ;;  %v1744_v22 = vld [vmem:[#allocation2 + $0xf8] sm:$0xff]  ;;  %1678 = vst.msk [vmem:[#allocation2 + $0x100] sm:$0xff] %vm26_vm0, %v1614_v15  ;;  %v1615_v23 = vadd.f32 %v1459_v44, %v124_v6 }
 0x19b   :  { %1871 = vst.msk [vmem:[%s3373_s3 + $0xf0] sm:$0xff] %vm26_vm0, %v1807_v18  ;;  %v1808_v20 = vmax.f32 %v1744_v22, 0.0  ;;  %v1742_v26 = vld [vmem:[#allocation2 + $0xe8] sm:$0xff] }
 0x19c   :  { %1869 = vst.msk [vmem:[%s3373_s3 + $0xe0] sm:$0xff] %vm26_vm0, %v1805_v34  ;;  %v1806_v27 = vmax.f32 %v1742_v26, 0.0  ;;  %1679 = vst.msk [vmem:[#allocation2 + $0x108] sm:$0xff] %vm26_vm0, %v1615_v23  ;;  %v1174_v0 = vpop.f32.mrb[68].mxu0  ;;  %v2132_v30 = vpop.f32.mrb[68].mxu1  ;;  %v130_v34 = vld [vmem:[#allocation2 + $0x138] sm:$0xff] }
 0x19d   :  { %1872 = vst.msk [vmem:[%s3373_s3 + $0xf8] sm:$0xff] %vm26_vm0, %v1808_v20  ;;  %v1464_v48 = vadd.f32 %v2128_v63, %v1174_v0  ;;  %v1176_v31 = vpop.f32.mrb[69].mxu0  ;;  %v1471_v40 = vpop.f32.mrb[69].mxu1 }
 0x19e   :  { %1870 = vst.msk [vmem:[%s3373_s3 + $0xe8] sm:$0xff] %vm26_vm0, %v1806_v27  ;;  %v1177_v28 = vpop.f32.mrb[70].mxu0  ;;  %v2133_v35 = vpop.f32.mrb[70].mxu1 }
 0x19f   :  { %v1616_v56 = vadd.f32 %v1464_v48, %v125_v36  ;;  %v1467_v39 = vadd.f32 %v2129_v38, %v1177_v28  ;;  %v1179_v42 = vpop.f32.mrb[71].mxu0  ;;  %v1474_v43 = vpop.f32.mrb[71].mxu1 }
 0x1a1   :  { %v1745_v10 = vld [vmem:[#allocation2 + $0x100] sm:$0xff]  ;;  %1680 = vst.msk [vmem:[#allocation2 + $0x110] sm:$0xff] %vm26_vm0, %v1616_v56  ;;  %v1617_v46 = vadd.f32 %v1467_v39, %v126_v55 }
 0x1a2   :  { %v1809_v3 = vmax.f32 %v1745_v10, 0.0  ;;  %v131_v55 = vld [vmem:[#allocation2 + $0x140] sm:$0xff] }
 0x1a3   :  { %v1746_v47 = vld [vmem:[#allocation2 + $0x108] sm:$0xff]  ;;  %1681 = vst.msk [vmem:[#allocation2 + $0x118] sm:$0xff] %vm26_vm0, %v1617_v46  ;;  %v139_v10 = vld [vmem:[#allocation2 + $0x180] sm:$0xff] }
 0x1a4   :  { %1873 = vst.msk [vmem:[%s3373_s3 + $0x100] sm:$0xff] %vm26_vm0, %v1809_v3  ;;  %v1810_v60 = vmax.f32 %v1746_v47, 0.0  ;;  %v1182_v51 = vpop.f32.mrb[72].mxu0  ;;  %v3184_v24 = vpop.f32.mrb[72].mxu1  ;;  %v132_v47 = vld [vmem:[#allocation2 + $0x148] sm:$0xff] }
 0x1a5   :  { %v1472_v58 = vadd.f32 %v1471_v40, %v1182_v51  ;;  %v1184_v50 = vpop.f32.mrb[73].mxu0  ;;  %v1487_v52 = vpop.f32.mrb[73].mxu1 }
 0x1a6   :  { %1874 = vst.msk [vmem:[%s3373_s3 + $0x108] sm:$0xff] %vm26_vm0, %v1810_v60  ;;  %v1185_v12 = vpop.f32.mrb[74].mxu0  ;;  %v3190_v62 = vpop.f32.mrb[74].mxu1 }
 0x1a7   :  { %v1618_v63 = vadd.f32 %v1472_v58, %v127_v32  ;;  %v1475_v4 = vadd.f32 %v1474_v43, %v1185_v12  ;;  %v1187_v2 = vpop.f32.mrb[75].mxu0  ;;  %v1490_v54 = vpop.f32.mrb[75].mxu1  ;;  %v142_v32 = vld [vmem:[#allocation2 + $0x198] sm:$0xff] }
 0x1a8   :  { %v1747_v16 = vld [vmem:[#allocation2 + $0x110] sm:$0xff] }
 0x1a9   :  { %v1811_v7 = vmax.f32 %v1747_v16, 0.0  ;;  %1682 = vst.msk [vmem:[#allocation2 + $0x120] sm:$0xff] %vm26_vm0, %v1618_v63  ;;  %v1619_v38 = vadd.f32 %v1475_v4, %v128_v59  ;;  %v140_v4 = vld [vmem:[#allocation2 + $0x188] sm:$0xff] }
 0x1aa   :  { %v1748_v8 = vld [vmem:[#allocation2 + $0x118] sm:$0xff] }
 0x1ab   :  { %1875 = vst.msk [vmem:[%s3373_s3 + $0x110] sm:$0xff] %vm26_vm0, %v1811_v7  ;;  %v1812_v6 = vmax.f32 %v1748_v8, 0.0  ;;  %1683 = vst.msk [vmem:[#allocation2 + $0x128] sm:$0xff] %vm26_vm0, %v1619_v38 }
 0x1ac   :  { %v1190_v14 = vpop.f32.mrb[76].mxu0  ;;  %v3198_v15 = vpop.f32.mrb[76].mxu1 }
 0x1ad   :  { %1876 = vst.msk [vmem:[%s3373_s3 + $0x118] sm:$0xff] %vm26_vm0, %v1812_v6  ;;  %v1480_v44 = vadd.f32 %v2132_v30, %v1190_v14  ;;  %v1192_v18 = vpop.f32.mrb[77].mxu0  ;;  %v3204_v19 = vpop.f32.mrb[77].mxu1 }
 0x1ae   :  { %v1193_v22 = vpop.f32.mrb[78].mxu0  ;;  %v3206_v23 = vpop.f32.mrb[78].mxu1 }
 0x1af   :  { %v1620_v20 = vadd.f32 %v1480_v44, %v129_v11  ;;  %v1483_v26 = vadd.f32 %v2133_v35, %v1193_v22  ;;  %v1195_v27 = vpop.f32.mrb[79].mxu0  ;;  %v3208_v36 = vpop.f32.mrb[79].mxu1  ;;  %v141_v35 = vld [vmem:[#allocation2 + $0x190] sm:$0xff]  ;;  %v143_v22 = vld [vmem:[#allocation2 + $0x1a0] sm:$0xff] }
 0x1b0   :  { %v1749_v0 = vld [vmem:[#allocation2 + $0x120] sm:$0xff]  ;;  %v145_v11 = vld [vmem:[#allocation2 + $0x1b0] sm:$0xff]  ;;  %v134_v27 = vld [vmem:[#allocation2 + $0x158] sm:$0xff] }
 0x1b1   :  { %v1813_v48 = vmax.f32 %v1749_v0, 0.0  ;;  %1684 = vst.msk [vmem:[#allocation2 + $0x130] sm:$0xff] %vm26_vm0, %v1620_v20  ;;  %v1621_v31 = vadd.f32 %v1483_v26, %v130_v34 }
 0x1b2   :  { %v1750_v40 = vld [vmem:[#allocation2 + $0x128] sm:$0xff] }
 0x1b3   :  { %1877 = vst.msk [vmem:[%s3373_s3 + $0x120] sm:$0xff] %vm26_vm0, %v1813_v48  ;;  %v1814_v30 = vmax.f32 %v1750_v40, 0.0  ;;  %1685 = vst.msk [vmem:[#allocation2 + $0x138] sm:$0xff] %vm26_vm0, %v1621_v31  ;;  %v146_v48 = vld [vmem:[#allocation2 + $0x1b8] sm:$0xff] }
 0x1b4   :  { %v1198_v28 = vpop.f32.mrb[80].mxu0  ;;  %v2144_v56 = vpop.f32.mrb[80].mxu1 }
 0x1b5   :  { %1878 = vst.msk [vmem:[%s3373_s3 + $0x128] sm:$0xff] %vm26_vm0, %v1814_v30  ;;  %v1488_v39 = vadd.f32 %v1487_v52, %v1198_v28  ;;  %v1528_v42 = vadd.f32 %v2144_v56, %v2917_v61  ;;  %v1200_v43 = vpop.f32.mrb[81].mxu0  ;;  %v1519_v46 = vpop.f32.mrb[81].mxu1  ;;  %v144_v56 = vld [vmem:[#allocation2 + $0x1a8] sm:$0xff] }
 0x1b6   :  { %v1520_v3 = vadd.f32 %v1519_v46, %v2911_v53  ;;  %v1201_v60 = vpop.f32.mrb[82].mxu0  ;;  %v2145_v51 = vpop.f32.mrb[82].mxu1 }
 0x1b7   :  { %v1622_v58 = vadd.f32 %v1488_v39, %v131_v55  ;;  %v1632_v50 = vadd.f32 %v1528_v42, %v141_v35  ;;  %v1491_v59 = vadd.f32 %v1490_v54, %v1201_v60  ;;  %v1531_v12 = vadd.f32 %v2145_v51, %v2921_v1  ;;  %v1203_v63 = vpop.f32.mrb[83].mxu0  ;;  %v1522_v2 = vpop.f32.mrb[83].mxu1 }
 0x1b8   :  { %v1751_v52 = vld [vmem:[#allocation2 + $0x130] sm:$0xff]  ;;  %v1630_v16 = vadd.f32 %v1520_v3, %v139_v10  ;;  %v1523_v61 = vadd.f32 %v1522_v2, %v2915_v57 }
 0x1b9   :  { %v1815_v7 = vmax.f32 %v1751_v52, 0.0  ;;  %1686 = vst.msk [vmem:[#allocation2 + $0x140] sm:$0xff] %vm26_vm0, %v1622_v58  ;;  %1696 = vst.msk [vmem:[#allocation2 + $0x190] sm:$0xff] %vm26_vm0, %v1632_v50  ;;  %v1623_v53 = vadd.f32 %v1491_v59, %v132_v47  ;;  %v1633_v38 = vadd.f32 %v1531_v12, %v142_v32  ;;  %v133_v57 = vld [vmem:[#allocation2 + $0x150] sm:$0xff]  ;;  %v135_v59 = vld [vmem:[#allocation2 + $0x160] sm:$0xff] }
 0x1ba   :  { %v1752_v8 = vld [vmem:[#allocation2 + $0x138] sm:$0xff]  ;;  %1694 = vst.msk [vmem:[#allocation2 + $0x180] sm:$0xff] %vm26_vm0, %v1630_v16  ;;  %v1631_v54 = vadd.f32 %v1523_v61, %v140_v4  ;;  %v149_v63 = vld [vmem:[#allocation2 + $0x1d0] sm:$0xff]  ;;  %v147_v61 = vld [vmem:[#allocation2 + $0x1c0] sm:$0xff] }
 0x1bb   :  { %1879 = vst.msk [vmem:[%s3373_s3 + $0x130] sm:$0xff] %vm26_vm0, %v1815_v7  ;;  %v1816_v1 = vmax.f32 %v1752_v8, 0.0  ;;  %1687 = vst.msk [vmem:[#allocation2 + $0x148] sm:$0xff] %vm26_vm0, %v1623_v53 }
 0x1bc   :  { %1697 = vst.msk [vmem:[#allocation2 + $0x198] sm:$0xff] %vm26_vm0, %v1633_v38  ;;  %1695 = vst.msk [vmem:[#allocation2 + $0x188] sm:$0xff] %vm26_vm0, %v1631_v54  ;;  %v1206_v6 = vpop.f32.mrb[84].mxu0  ;;  %v2148_v14 = vpop.f32.mrb[84].mxu1  ;;  %v136_v38 = vld [vmem:[#allocation2 + $0x168] sm:$0xff]  ;;  %v150_v54 = vld [vmem:[#allocation2 + $0x1d8] sm:$0xff] }
 0x1bd   :  { %1880 = vst.msk [vmem:[%s3373_s3 + $0x138] sm:$0xff] %vm26_vm0, %v1816_v1  ;;  %v1496_v44 = vadd.f32 %v3184_v24, %v1206_v6  ;;  %v1544_v18 = vadd.f32 %v2148_v14, %v2933_v13  ;;  %v1208_v34 = vpop.f32.mrb[85].mxu0  ;;  %v1535_v20 = vpop.f32.mrb[85].mxu1  ;;  %v148_v14 = vld [vmem:[#allocation2 + $0x1c8] sm:$0xff] }
 0x1be   :  { %v1536_v26 = vadd.f32 %v1535_v20, %v2925_v5  ;;  %v1209_v0 = vpop.f32.mrb[86].mxu0  ;;  %v2149_v31 = vpop.f32.mrb[86].mxu1 }
 0x1bf   :  { %v1624_v40 = vadd.f32 %v1496_v44, %v133_v57  ;;  %v1636_v30 = vadd.f32 %v1544_v18, %v145_v11  ;;  %v1499_v55 = vadd.f32 %v3190_v62, %v1209_v0  ;;  %v1547_v28 = vadd.f32 %v2149_v31, %v2937_v17  ;;  %v1211_v35 = vpop.f32.mrb[87].mxu0  ;;  %v1538_v24 = vpop.f32.mrb[87].mxu1 }
 0x1c0   :  { %v1753_v39 = vld [vmem:[#allocation2 + $0x140] sm:$0xff]  ;;  %v1763_v13 = vld [vmem:[#allocation2 + $0x190] sm:$0xff]  ;;  %v1634_v42 = vadd.f32 %v1536_v26, %v143_v22  ;;  %v1539_v43 = vadd.f32 %v1538_v24, %v2929_v9 }
 0x1c1   :  { %v1817_v10 = vmax.f32 %v1753_v39, 0.0  ;;  %v1827_v5 = vmax.f32 %v1763_v13, 0.0  ;;  %v1761_v46 = vld [vmem:[#allocation2 + $0x180] sm:$0xff]  ;;  %1688 = vst.msk [vmem:[#allocation2 + $0x150] sm:$0xff] %vm26_vm0, %v1624_v40  ;;  %1700 = vst.msk [vmem:[#allocation2 + $0x1b0] sm:$0xff] %vm26_vm0, %v1636_v30  ;;  %v1625_v3 = vadd.f32 %v1499_v55, %v134_v27  ;;  %v1637_v47 = vadd.f32 %v1547_v28, %v146_v48  ;;  %v137_v35 = vld [vmem:[#allocation2 + $0x170] sm:$0xff] }
 0x1c2   :  { %v1825_v62 = vmax.f32 %v1761_v46, 0.0  ;;  %v1754_v60 = vld [vmem:[#allocation2 + $0x148] sm:$0xff]  ;;  %1698 = vst.msk [vmem:[#allocation2 + $0x1a0] sm:$0xff] %vm26_vm0, %v1634_v42  ;;  %v1635_v32 = vadd.f32 %v1539_v43, %v144_v56  ;;  %v153_v24 = vld [vmem:[#allocation2 + $0x1f0] sm:$0xff] }
 0x1c3   :  { %v1764_v17 = vld [vmem:[#allocation2 + $0x198] sm:$0xff]  ;;  %1881 = vst.msk [vmem:[%s3373_s3 + $0x140] sm:$0xff] %vm26_vm0, %v1817_v10  ;;  %1891 = vst.msk [vmem:[%s3373_s3 + $0x190] sm:$0xff] %vm26_vm0, %v1827_v5  ;;  %v1818_v9 = vmax.f32 %v1754_v60, 0.0  ;;  %v1762_v58 = vld [vmem:[#allocation2 + $0x188] sm:$0xff] }
 0x1c4   :  { %v1828_v51 = vmax.f32 %v1764_v17, 0.0  ;;  %1689 = vst.msk [vmem:[#allocation2 + $0x158] sm:$0xff] %vm26_vm0, %v1625_v3  ;;  %1701 = vst.msk [vmem:[#allocation2 + $0x1b8] sm:$0xff] %vm26_vm0, %v1637_v47  ;;  %v1826_v50 = vmax.f32 %v1762_v58, 0.0  ;;  %v1214_v12 = vpop.f32.mrb[88].mxu0  ;;  %v2152_v4 = vpop.f32.mrb[88].mxu1 }
 0x1c5   :  { %1889 = vst.msk [vmem:[%s3373_s3 + $0x180] sm:$0xff] %vm26_vm0, %v1825_v62  ;;  %1699 = vst.msk [vmem:[#allocation2 + $0x1a8] sm:$0xff] %vm26_vm0, %v1635_v32  ;;  %v1504_v2 = vadd.f32 %v3204_v19, %v1214_v12  ;;  %v1560_v52 = vadd.f32 %v2152_v4, %v2949_v29  ;;  %v1216_v16 = vpop.f32.mrb[89].mxu0  ;;  %v1551_v7 = vpop.f32.mrb[89].mxu1  ;;  %v151_v10 = vld [vmem:[#allocation2 + $0x1e0] sm:$0xff]  ;;  %v138_v3 = vld [vmem:[#allocation2 + $0x178] sm:$0xff] }
 0x1c6   :  { %1882 = vst.msk [vmem:[%s3373_s3 + $0x148] sm:$0xff] %vm26_vm0, %v1818_v9  ;;  %1892 = vst.msk [vmem:[%s3373_s3 + $0x198] sm:$0xff] %vm26_vm0, %v1828_v51  ;;  %v1552_v53 = vadd.f32 %v1551_v7, %v2941_v21  ;;  %v1217_v8 = vpop.f32.mrb[90].mxu0  ;;  %v2153_v1 = vpop.f32.mrb[90].mxu1  ;;  %v154_v62 = vld [vmem:[#allocation2 + $0x1f8] sm:$0xff]  ;;  %v152_v51 = vld [vmem:[#allocation2 + $0x1e8] sm:$0xff] }
 0x1c7   :  { %1890 = vst.msk [vmem:[%s3373_s3 + $0x188] sm:$0xff] %vm26_vm0, %v1826_v50  ;;  %v1626_v57 = vadd.f32 %v1504_v2, %v135_v59  ;;  %v1640_v6 = vadd.f32 %v1560_v52, %v149_v63  ;;  %v1507_v19 = vadd.f32 %v3208_v36, %v1217_v8  ;;  %v1563_v29 = vadd.f32 %v2153_v1, %v2953_v33  ;;  %v1219_v11 = vpop.f32.mrb[91].mxu0  ;;  %v1554_v44 = vpop.f32.mrb[91].mxu1 }
 0x1c8   :  { %v1755_v18 = vld [vmem:[#allocation2 + $0x150] sm:$0xff]  ;;  %v1638_v22 = vadd.f32 %v1552_v53, %v147_v61  ;;  %v1555_v20 = vadd.f32 %v1554_v44, %v2945_v25 }
 0x1c9   :  { %v1767_v34 = vld [vmem:[#allocation2 + $0x1b0] sm:$0xff]  ;;  %v1819_v26 = vmax.f32 %v1755_v18, 0.0  ;;  %v1765_v27 = vld [vmem:[#allocation2 + $0x1a0] sm:$0xff]  ;;  %1690 = vst.msk [vmem:[#allocation2 + $0x160] sm:$0xff] %vm26_vm0, %v1626_v57  ;;  %1704 = vst.msk [vmem:[#allocation2 + $0x1d0] sm:$0xff] %vm26_vm0, %v1640_v6  ;;  %v1627_v0 = vadd.f32 %v1507_v19, %v136_v38  ;;  %v1641_v48 = vadd.f32 %v1563_v29, %v150_v54 }
 0x1ca   :  { %v1831_v21 = vmax.f32 %v1767_v34, 0.0  ;;  %v1829_v36 = vmax.f32 %v1765_v27, 0.0  ;;  %1702 = vst.msk [vmem:[#allocation2 + $0x1c0] sm:$0xff] %vm26_vm0, %v1638_v22  ;;  %v1639_v40 = vadd.f32 %v1555_v20, %v148_v14 }
 0x1cb   :  { %v1756_v31 = vld [vmem:[#allocation2 + $0x158] sm:$0xff]  ;;  %1883 = vst.msk [vmem:[%s3373_s3 + $0x150] sm:$0xff] %vm26_vm0, %v1819_v26  ;;  %1691 = vst.msk [vmem:[#allocation2 + $0x168] sm:$0xff] %vm26_vm0, %v1627_v0 }
 0x1cc   :  { %v1768_v33 = vld [vmem:[#allocation2 + $0x1b8] sm:$0xff]  ;;  %1895 = vst.msk [vmem:[%s3373_s3 + $0x1b0] sm:$0xff] %vm26_vm0, %v1831_v21  ;;  %v1820_v25 = vmax.f32 %v1756_v31, 0.0  ;;  %v1766_v55 = vld [vmem:[#allocation2 + $0x1a8] sm:$0xff]  ;;  %1705 = vst.msk [vmem:[#allocation2 + $0x1d8] sm:$0xff] %vm26_vm0, %v1641_v48  ;;  %v1222_v56 = vpop.f32.mrb[92].mxu0 }
 0x1cd   :  { %v1832_v30 = vmax.f32 %v1768_v33, 0.0  ;;  %1893 = vst.msk [vmem:[%s3373_s3 + $0x1a0] sm:$0xff] %vm26_vm0, %v1829_v36  ;;  %v1830_v28 = vmax.f32 %v1766_v55, 0.0  ;;  %1703 = vst.msk [vmem:[#allocation2 + $0x1c8] sm:$0xff] %vm26_vm0, %v1639_v40  ;;  %v2156_v39 = vpop.f32.mrb[92].mxu1  ;;  %v1512_v13 = vadd.f32 %v3198_v15, %v1222_v56  ;;  %v1224_v43 = vpop.f32.mrb[93].mxu0 }
 0x1ce   :  { %1884 = vst.msk [vmem:[%s3373_s3 + $0x158] sm:$0xff] %vm26_vm0, %v1820_v25  ;;  %v1576_v42 = vadd.f32 %v2156_v39, %v2965_v45  ;;  %v1567_v5 = vpop.f32.mrb[93].mxu1  ;;  %v1225_v47 = vpop.f32.mrb[94].mxu0 }
 0x1cf   :  { %1896 = vst.msk [vmem:[%s3373_s3 + $0x1b8] sm:$0xff] %vm26_vm0, %v1832_v30  ;;  %1894 = vst.msk [vmem:[%s3373_s3 + $0x1a8] sm:$0xff] %vm26_vm0, %v1830_v28  ;;  %v1568_v46 = vadd.f32 %v1567_v5, %v2957_v37  ;;  %v2157_v60 = vpop.f32.mrb[94].mxu1  ;;  %v1628_v17 = vadd.f32 %v1512_v13, %v137_v35  ;;  %v1515_v15 = vadd.f32 %v3206_v23, %v1225_v47  ;;  %v1227_v9 = vpop.f32.mrb[95].mxu0 }
 0x1d0   :  { %v1644_v32 = vadd.f32 %v1576_v42, %v153_v24  ;;  %v1579_v45 = vadd.f32 %v2157_v60, %v2969_v49  ;;  %v1570_v58 = vpop.f32.mrb[95].mxu1  ;;  %v1757_v50 = vld [vmem:[#allocation2 + $0x160] sm:$0xff]  ;;  %v1771_v59 = vld [vmem:[#allocation2 + $0x1d0] sm:$0xff] }
 0x1d1   :  { %v1642_v12 = vadd.f32 %v1568_v46, %v151_v10  ;;  %v1571_v63 = vadd.f32 %v1570_v58, %v2961_v41  ;;  %v1821_v4 = vmax.f32 %v1757_v50, 0.0  ;;  %v1835_v37 = vmax.f32 %v1771_v59, 0.0  ;;  %v1769_v2 = vld [vmem:[#allocation2 + $0x1c0] sm:$0xff]  ;;  %1692 = vst.msk [vmem:[#allocation2 + $0x170] sm:$0xff] %vm26_vm0, %v1628_v17 }
 0x1d2   :  { %1708 = vst.msk [vmem:[#allocation2 + $0x1f0] sm:$0xff] %vm26_vm0, %v1644_v32  ;;  %v1629_v52 = vadd.f32 %v1515_v15, %v138_v3  ;;  %v1645_v16 = vadd.f32 %v1579_v45, %v154_v62  ;;  %v1833_v23 = vmax.f32 %v1769_v2, 0.0  ;;  %v1758_v61 = vld [vmem:[#allocation2 + $0x168] sm:$0xff] }
 0x1d3   :  { %v1772_v49 = vld [vmem:[#allocation2 + $0x1d8] sm:$0xff]  ;;  %1706 = vst.msk [vmem:[#allocation2 + $0x1e0] sm:$0xff] %vm26_vm0, %v1642_v12  ;;  %v1643_v7 = vadd.f32 %v1571_v63, %v152_v51  ;;  %1885 = vst.msk [vmem:[%s3373_s3 + $0x160] sm:$0xff] %vm26_vm0, %v1821_v4  ;;  %v1822_v41 = vmax.f32 %v1758_v61, 0.0 }
 0x1d4   :  { %1899 = vst.msk [vmem:[%s3373_s3 + $0x1d0] sm:$0xff] %vm26_vm0, %v1835_v37  ;;  %v1836_v53 = vmax.f32 %v1772_v49, 0.0  ;;  %v1770_v38 = vld [vmem:[#allocation2 + $0x1c8] sm:$0xff]  ;;  %1693 = vst.msk [vmem:[#allocation2 + $0x178] sm:$0xff] %vm26_vm0, %v1629_v52 }
 0x1d5   :  { %1709 = vst.msk [vmem:[#allocation2 + $0x1f8] sm:$0xff] %vm26_vm0, %v1645_v16  ;;  %1897 = vst.msk [vmem:[%s3373_s3 + $0x1c0] sm:$0xff] %vm26_vm0, %v1833_v23  ;;  %v1834_v8 = vmax.f32 %v1770_v38, 0.0 }
 0x1d6   :  { %1707 = vst.msk [vmem:[#allocation2 + $0x1e8] sm:$0xff] %vm26_vm0, %v1643_v7  ;;  %1886 = vst.msk [vmem:[%s3373_s3 + $0x168] sm:$0xff] %vm26_vm0, %v1822_v41 }
 0x1d7   :  { %1900 = vst.msk [vmem:[%s3373_s3 + $0x1d8] sm:$0xff] %vm26_vm0, %v1836_v53  ;;  %1898 = vst.msk [vmem:[%s3373_s3 + $0x1c8] sm:$0xff] %vm26_vm0, %v1834_v8 }
 0x1d8   :  { %v1759_v54 = vld [vmem:[#allocation2 + $0x170] sm:$0xff] }
 0x1d9   :  { %v1775_v1 = vld [vmem:[#allocation2 + $0x1f0] sm:$0xff]  ;;  %v1823_v57 = vmax.f32 %v1759_v54, 0.0 }
 0x1da   :  { %v1839_v6 = vmax.f32 %v1775_v1, 0.0  ;;  %v1773_v19 = vld [vmem:[#allocation2 + $0x1e0] sm:$0xff] }
 0x1db   :  { %v1837_v29 = vmax.f32 %v1773_v19, 0.0  ;;  %v1760_v11 = vld [vmem:[#allocation2 + $0x178] sm:$0xff]  ;;  %1887 = vst.msk [vmem:[%s3373_s3 + $0x170] sm:$0xff] %vm26_vm0, %v1823_v57 }
 0x1dc   :  { %v1776_v14 = vld [vmem:[#allocation2 + $0x1f8] sm:$0xff]  ;;  %1903 = vst.msk [vmem:[%s3373_s3 + $0x1f0] sm:$0xff] %vm26_vm0, %v1839_v6  ;;  %v1824_v44 = vmax.f32 %v1760_v11, 0.0 }
 0x1dd   :  { %v1840_v18 = vmax.f32 %v1776_v14, 0.0  ;;  %v1774_v34 = vld [vmem:[#allocation2 + $0x1e8] sm:$0xff]  ;;  %1901 = vst.msk [vmem:[%s3373_s3 + $0x1e0] sm:$0xff] %vm26_vm0, %v1837_v29 }
 0x1de   :  { %v1838_v22 = vmax.f32 %v1774_v34, 0.0  ;;  %1888 = vst.msk [vmem:[%s3373_s3 + $0x178] sm:$0xff] %vm26_vm0, %v1824_v44 }
 0x1df   :  { %1904 = vst.msk [vmem:[%s3373_s3 + $0x1f8] sm:$0xff] %vm26_vm0, %v1840_v18 }
 0x1e0   :  { %1902 = vst.msk [vmem:[%s3373_s3 + $0x1e8] sm:$0xff] %vm26_vm0, %v1838_v22 }

// kernel: msca_forward.13
= control target key start
LH: loop header
LB: loop body
LE: loop exit
PB: predicated region body
PF: predicated region fallthrough
CT: control target
= control target key end

     0   :  { %vm395_vm0 = vcmask 261120   ;;  %vm26_vm1 = vcmask 64512   ;;  %s2081_s1 = inlined_call_operand.vmem [shape: bf16[32,8], index: 1, kind: input, shape index: {}]   ;;  %s2082_s0 = inlined_call_operand.vmem [shape: bf16[512,32], index: 0, kind: input, shape index: {}]   ;;  %s2083_s2 = inlined_call_operand.vmem [shape: f32[1,8], index: 2, kind: input, shape index: {}]   ;;  %s2084_s3 = inlined_call_operand.vmem [shape: f32[512,8], index: 3, kind: output, shape index: {}]  }
   0x1   :  { %v1410_v0 = vld [vmem:[%s2081_s1] sm:$0xff]   ;;  %v1411_v1 = vld [vmem:[%s2081_s1 + $0x8] sm:$0xff]   ;;  %v1416_v6 = vld [vmem:[%s2082_s0 + $0x10] sm:$0xff]  }
   0x2   :  { %1338 = vmatprep.subr.bf16.mxu0 %v1410_v0  ;;  %1406 = vmatprep.subr.bf16.mxu1 %v1410_v0  ;;  %v1412_v2 = vld [vmem:[%s2082_s0] sm:$0xff]   ;;  %v1414_v4 = vld [vmem:[%s2082_s0 + $0x8] sm:$0xff]   ;;  %v1417_v7 = vld [vmem:[%s2082_s0 + $0x90] sm:$0xff]  }
   0x3   :  { %1339 = vmatpush3.bf16.msra.mxu0 %v1410_v0  ;;  %1408 = vmatpush3.bf16.msra.mxu1 %v1410_v0  ;;  %v1413_v3 = vld [vmem:[%s2082_s0 + $0x80] sm:$0xff]   ;;  %v1415_v5 = vld [vmem:[%s2082_s0 + $0x88] sm:$0xff]   ;;  %v1418_v8 = vld [vmem:[%s2082_s0 + $0x18] sm:$0xff]  }
   0x4   :  { %1340 = vmatprep.subr.bf16.mxu0 %v1411_v1  ;;  %1407 = vmatprep.subr.bf16.mxu1 %v1411_v1  ;;  %v1419_v9 = vld [vmem:[%s2082_s0 + $0x98] sm:$0xff]   ;;  %v1420_v10 = vld [vmem:[%s2082_s0 + $0x20] sm:$0xff]   ;;  %v1422_v12 = vld [vmem:[%s2082_s0 + $0x28] sm:$0xff]  }
   0x5   :  { %1342 = vmatprep.mubr.msk.bf16.mxu0 %vm395_vm0, %v1412_v2  ;;  %1374 = vmatprep.mubr.msk.bf16.mxu1 %vm395_vm0, %v1413_v3  ;;  %v1421_v11 = vld [vmem:[%s2082_s0 + $0xa0] sm:$0xff]   ;;  %v1423_v13 = vld [vmem:[%s2082_s0 + $0xa8] sm:$0xff]   ;;  %v1424_v14 = vld [vmem:[%s2082_s0 + $0x30] sm:$0xff]  }
   0x6   :  { %v1425_v15 = vld [vmem:[%s2082_s0 + $0xb0] sm:$0xff]   ;;  %v1426_v16 = vld [vmem:[%s2082_s0 + $0x38] sm:$0xff]   ;;  %v1428_v18 = vld [vmem:[%s2082_s0 + $0x40] sm:$0xff]  }
   0x7   :  { %1341 = vmatpush3.bf16.msra.mxu0 %v1411_v1  ;;  %1409 = vmatpush3.bf16.msra.mxu1 %v1411_v1  ;;  %v1427_v17 = vld [vmem:[%s2082_s0 + $0xb8] sm:$0xff]   ;;  %v1429_v19 = vld [vmem:[%s2082_s0 + $0xc0] sm:$0xff]   ;;  %v1430_v21 = vld [vmem:[%s2082_s0 + $0x48] sm:$0xff]  }
   0x8   :  { %v1543_v20 = vld [vmem:[%s2083_s2] ss:$0 sm:$0xff]  ;;  %v1431_v22 = vld [vmem:[%s2082_s0 + $0xc8] sm:$0xff]   ;;  %v1432_v23 = vld [vmem:[%s2082_s0 + $0x50] sm:$0xff]  }
   0x9   :  { %29 = vst.msk [vmem:[#allocation2 + $0x10] sm:$0xff] %vm26_vm1, %v1543_v20  ;;  %27 = vst.msk [vmem:[#allocation2] sm:$0xff] %vm26_vm1, %v1543_v20  ;;  %v1433_v24 = vld [vmem:[%s2082_s0 + $0xd0] sm:$0xff]   ;;  %v1434_v25 = vld [vmem:[%s2082_s0 + $0x58] sm:$0xff]  }
   0xa   :  { %1343 = vmatmul.mubr.msk.bf16.vlgmr.msra.gmra.mrb[0].mxu0 %vm395_vm0, %v1414_v4  ;;  %1375 = vmatmul.mubr.msk.bf16.vlgmr.msra.gmra.mrb[0].mxu1 %vm395_vm0, %v1415_v5  ;;  %28 = vst.msk [vmem:[#allocation2 + $0x8] sm:$0xff] %vm26_vm1, %v1543_v20  ;;  %30 = vst.msk [vmem:[#allocation2 + $0x18] sm:$0xff] %vm26_vm1, %v1543_v20  ;;  %v1435_v26 = vld [vmem:[%s2082_s0 + $0xd8] sm:$0xff]   ;;  %v1436_v27 = vld [vmem:[%s2082_s0 + $0x60] sm:$0xff]  }
   0xb   :  { %1346 = vmatprep.mubr.msk.bf16.mxu0 %vm395_vm0, %v1416_v6  ;;  %1378 = vmatprep.mubr.msk.bf16.mxu1 %vm395_vm0, %v1417_v7  ;;  %31 = vst.msk [vmem:[#allocation2 + $0x20] sm:$0xff] %vm26_vm1, %v1543_v20  ;;  %32 = vst.msk [vmem:[#allocation2 + $0x28] sm:$0xff] %vm26_vm1, %v1543_v20  ;;  %v1437_v28 = vld [vmem:[%s2082_s0 + $0xe0] sm:$0xff]   ;;  %v1438_v29 = vld [vmem:[%s2082_s0 + $0x68] sm:$0xff]  }
   0xc   :  { %33 = vst.msk [vmem:[#allocation2 + $0x30] sm:$0xff] %vm26_vm1, %v1543_v20  ;;  %34 = vst.msk [vmem:[#allocation2 + $0x38] sm:$0xff] %vm26_vm1, %v1543_v20  ;;  %v1439_v30 = vld [vmem:[%s2082_s0 + $0xe8] sm:$0xff]   ;;  %v1440_v31 = vld [vmem:[%s2082_s0 + $0x70] sm:$0xff]  }
   0xd   :  { %35 = vst.msk [vmem:[#allocation2 + $0x40] sm:$0xff] %vm26_vm1, %v1543_v20  ;;  %36 = vst.msk [vmem:[#allocation2 + $0x48] sm:$0xff] %vm26_vm1, %v1543_v20  ;;  %v1441_v32 = vld [vmem:[%s2082_s0 + $0xf0] sm:$0xff]   ;;  %v1442_v33 = vld [vmem:[%s2082_s0 + $0x78] sm:$0xff]  }
   0xe   :  { %37 = vst.msk [vmem:[#allocation2 + $0x50] sm:$0xff] %vm26_vm1, %v1543_v20  ;;  %38 = vst.msk [vmem:[#allocation2 + $0x58] sm:$0xff] %vm26_vm1, %v1543_v20  ;;  %v1443_v34 = vld [vmem:[%s2082_s0 + $0xf8] sm:$0xff]  }
   0xf   :  { %39 = vst.msk [vmem:[#allocation2 + $0x60] sm:$0xff] %vm26_vm1, %v1543_v20  ;;  %40 = vst.msk [vmem:[#allocation2 + $0x68] sm:$0xff] %vm26_vm1, %v1543_v20 }
  0x10   :  { %41 = vst.msk [vmem:[#allocation2 + $0x70] sm:$0xff] %vm26_vm1, %v1543_v20  ;;  %42 = vst.msk [vmem:[#allocation2 + $0x78] sm:$0xff] %vm26_vm1, %v1543_v20  ;;  %v93_v35 = vld [vmem:[#allocation2 + $0x10] sm:$0xff]  ;;  %v91_v37 = vld [vmem:[#allocation2] sm:$0xff] }
  0x11   :  { %43 = vst.msk [vmem:[#allocation2 + $0x80] sm:$0xff] %vm26_vm1, %v1543_v20  ;;  %44 = vst.msk [vmem:[#allocation2 + $0x88] sm:$0xff] %vm26_vm1, %v1543_v20  ;;  %v94_v41 = vld [vmem:[#allocation2 + $0x18] sm:$0xff]  ;;  %v92_v47 = vld [vmem:[#allocation2 + $0x8] sm:$0xff] }
  0x12   :  { %1347 = vmatmul.mubr.msk.bf16.gmra.mrb[4].mxu0 %vm395_vm0, %v1418_v8  ;;  %1379 = vmatmul.mubr.msk.bf16.gmra.mrb[4].mxu1 %vm395_vm0, %v1419_v9  ;;  %45 = vst.msk [vmem:[#allocation2 + $0x90] sm:$0xff] %vm26_vm1, %v1543_v20  ;;  %46 = vst.msk [vmem:[#allocation2 + $0x98] sm:$0xff] %vm26_vm1, %v1543_v20  ;;  %v95_v61 = vld [vmem:[#allocation2 + $0x20] sm:$0xff] }
  0x13   :  { %1350 = vmatprep.mubr.msk.bf16.mxu0 %vm395_vm0, %v1420_v10  ;;  %1382 = vmatprep.mubr.msk.bf16.mxu1 %vm395_vm0, %v1421_v11  ;;  %47 = vst.msk [vmem:[#allocation2 + $0xa0] sm:$0xff] %vm26_vm1, %v1543_v20  ;;  %48 = vst.msk [vmem:[#allocation2 + $0xa8] sm:$0xff] %vm26_vm1, %v1543_v20  ;;  %v97_v59 = vld [vmem:[#allocation2 + $0x30] sm:$0xff]  ;;  %v98_v5 = vld [vmem:[#allocation2 + $0x38] sm:$0xff] }
  0x14   :  { %49 = vst.msk [vmem:[#allocation2 + $0xb0] sm:$0xff] %vm26_vm1, %v1543_v20  ;;  %50 = vst.msk [vmem:[#allocation2 + $0xb8] sm:$0xff] %vm26_vm1, %v1543_v20 }
  0x15   :  { %51 = vst.msk [vmem:[#allocation2 + $0xc0] sm:$0xff] %vm26_vm1, %v1543_v20  ;;  %52 = vst.msk [vmem:[#allocation2 + $0xc8] sm:$0xff] %vm26_vm1, %v1543_v20 }
  0x16   :  { %53 = vst.msk [vmem:[#allocation2 + $0xd0] sm:$0xff] %vm26_vm1, %v1543_v20  ;;  %54 = vst.msk [vmem:[#allocation2 + $0xd8] sm:$0xff] %vm26_vm1, %v1543_v20 }
  0x17   :  { %55 = vst.msk [vmem:[#allocation2 + $0xe0] sm:$0xff] %vm26_vm1, %v1543_v20  ;;  %56 = vst.msk [vmem:[#allocation2 + $0xe8] sm:$0xff] %vm26_vm1, %v1543_v20 }
  0x18   :  { %57 = vst.msk [vmem:[#allocation2 + $0xf0] sm:$0xff] %vm26_vm1, %v1543_v20  ;;  %58 = vst.msk [vmem:[#allocation2 + $0xf8] sm:$0xff] %vm26_vm1, %v1543_v20 }
  0x19   :  { %59 = vst.msk [vmem:[#allocation2 + $0x100] sm:$0xff] %vm26_vm1, %v1543_v20  ;;  %60 = vst.msk [vmem:[#allocation2 + $0x108] sm:$0xff] %vm26_vm1, %v1543_v20 }
  0x1a   :  { %1351 = vmatmul.mubr.msk.bf16.gmra.mrb[8].mxu0 %vm395_vm0, %v1422_v12  ;;  %1383 = vmatmul.mubr.msk.bf16.gmra.mrb[8].mxu1 %vm395_vm0, %v1423_v13  ;;  %61 = vst.msk [vmem:[#allocation2 + $0x110] sm:$0xff] %vm26_vm1, %v1543_v20  ;;  %62 = vst.msk [vmem:[#allocation2 + $0x118] sm:$0xff] %vm26_vm1, %v1543_v20 }
  0x1b   :  { %1354 = vmatprep.mubr.msk.bf16.mxu0 %vm395_vm0, %v1424_v14  ;;  %1386 = vmatprep.mubr.msk.bf16.mxu1 %vm395_vm0, %v1425_v15  ;;  %63 = vst.msk [vmem:[#allocation2 + $0x120] sm:$0xff] %vm26_vm1, %v1543_v20  ;;  %64 = vst.msk [vmem:[#allocation2 + $0x128] sm:$0xff] %vm26_vm1, %v1543_v20 }
  0x1c   :  { %65 = vst.msk [vmem:[#allocation2 + $0x130] sm:$0xff] %vm26_vm1, %v1543_v20  ;;  %66 = vst.msk [vmem:[#allocation2 + $0x138] sm:$0xff] %vm26_vm1, %v1543_v20 }
  0x1d   :  { %67 = vst.msk [vmem:[#allocation2 + $0x140] sm:$0xff] %vm26_vm1, %v1543_v20  ;;  %68 = vst.msk [vmem:[#allocation2 + $0x148] sm:$0xff] %vm26_vm1, %v1543_v20 }
  0x1e   :  { %69 = vst.msk [vmem:[#allocation2 + $0x150] sm:$0xff] %vm26_vm1, %v1543_v20  ;;  %70 = vst.msk [vmem:[#allocation2 + $0x158] sm:$0xff] %vm26_vm1, %v1543_v20 }
  0x1f   :  { %71 = vst.msk [vmem:[#allocation2 + $0x160] sm:$0xff] %vm26_vm1, %v1543_v20  ;;  %72 = vst.msk [vmem:[#allocation2 + $0x168] sm:$0xff] %vm26_vm1, %v1543_v20 }
  0x20   :  { %73 = vst.msk [vmem:[#allocation2 + $0x170] sm:$0xff] %vm26_vm1, %v1543_v20  ;;  %74 = vst.msk [vmem:[#allocation2 + $0x178] sm:$0xff] %vm26_vm1, %v1543_v20  ;;  %v123_v38 = vld [vmem:[#allocation2 + $0x100] sm:$0xff]  ;;  %v124_v48 = vld [vmem:[#allocation2 + $0x108] sm:$0xff] }
  0x21   :  { %75 = vst.msk [vmem:[#allocation2 + $0x180] sm:$0xff] %vm26_vm1, %v1543_v20  ;;  %76 = vst.msk [vmem:[#allocation2 + $0x188] sm:$0xff] %vm26_vm1, %v1543_v20  ;;  %v125_v36 = vld [vmem:[#allocation2 + $0x110] sm:$0xff]  ;;  %v126_v42 = vld [vmem:[#allocation2 + $0x118] sm:$0xff] }
  0x22   :  { %1355 = vmatmul.mubr.msk.bf16.gmra.mrb[12].mxu0 %vm395_vm0, %v1426_v16  ;;  %1387 = vmatmul.mubr.msk.bf16.gmra.mrb[12].mxu1 %vm395_vm0, %v1427_v17  ;;  %77 = vst.msk [vmem:[#allocation2 + $0x190] sm:$0xff] %vm26_vm1, %v1543_v20  ;;  %78 = vst.msk [vmem:[#allocation2 + $0x198] sm:$0xff] %vm26_vm1, %v1543_v20  ;;  %v127_v62 = vld [vmem:[#allocation2 + $0x120] sm:$0xff] }
  0x23   :  { %1358 = vmatprep.mubr.msk.bf16.mxu0 %vm395_vm0, %v1428_v18  ;;  %1390 = vmatprep.mubr.msk.bf16.mxu1 %vm395_vm0, %v1429_v19  ;;  %79 = vst.msk [vmem:[#allocation2 + $0x1a0] sm:$0xff] %vm26_vm1, %v1543_v20  ;;  %80 = vst.msk [vmem:[#allocation2 + $0x1a8] sm:$0xff] %vm26_vm1, %v1543_v20  ;;  %v129_v60 = vld [vmem:[#allocation2 + $0x130] sm:$0xff]  ;;  %v130_v6 = vld [vmem:[#allocation2 + $0x138] sm:$0xff] }
  0x24   :  { %81 = vst.msk [vmem:[#allocation2 + $0x1b0] sm:$0xff] %vm26_vm1, %v1543_v20  ;;  %82 = vst.msk [vmem:[#allocation2 + $0x1b8] sm:$0xff] %vm26_vm1, %v1543_v20 }
  0x25   :  { %83 = vst.msk [vmem:[#allocation2 + $0x1c0] sm:$0xff] %vm26_vm1, %v1543_v20  ;;  %84 = vst.msk [vmem:[#allocation2 + $0x1c8] sm:$0xff] %vm26_vm1, %v1543_v20 }
  0x26   :  { %85 = vst.msk [vmem:[#allocation2 + $0x1d0] sm:$0xff] %vm26_vm1, %v1543_v20  ;;  %86 = vst.msk [vmem:[#allocation2 + $0x1d8] sm:$0xff] %vm26_vm1, %v1543_v20 }
  0x27   :  { %87 = vst.msk [vmem:[#allocation2 + $0x1e0] sm:$0xff] %vm26_vm1, %v1543_v20  ;;  %88 = vst.msk [vmem:[#allocation2 + $0x1e8] sm:$0xff] %vm26_vm1, %v1543_v20 }
  0x28   :  { %89 = vst.msk [vmem:[#allocation2 + $0x1f0] sm:$0xff] %vm26_vm1, %v1543_v20  ;;  %90 = vst.msk [vmem:[#allocation2 + $0x1f8] sm:$0xff] %vm26_vm1, %v1543_v20  ;;  %v96_v20 = vld [vmem:[#allocation2 + $0x28] sm:$0xff] }
  0x2a   :  { %1359 = vmatmul.mubr.msk.bf16.gmra.mrb[16].mxu0 %vm395_vm0, %v1430_v21  ;;  %1391 = vmatmul.mubr.msk.bf16.gmra.mrb[16].mxu1 %vm395_vm0, %v1431_v22  ;;  %v128_v22 = vld [vmem:[#allocation2 + $0x128] sm:$0xff] }
  0x2b   :  { %1362 = vmatprep.mubr.msk.bf16.mxu0 %vm395_vm0, %v1432_v23  ;;  %1394 = vmatprep.mubr.msk.bf16.mxu1 %vm395_vm0, %v1433_v24 }
  0x32   :  { %1363 = vmatmul.mubr.msk.bf16.gmra.mrb[20].mxu0 %vm395_vm0, %v1434_v25  ;;  %1395 = vmatmul.mubr.msk.bf16.gmra.mrb[20].mxu1 %vm395_vm0, %v1435_v26 }
  0x33   :  { %1366 = vmatprep.mubr.msk.bf16.mxu0 %vm395_vm0, %v1436_v27  ;;  %1398 = vmatprep.mubr.msk.bf16.mxu1 %vm395_vm0, %v1437_v28 }
  0x3a   :  { %1367 = vmatmul.mubr.msk.bf16.gmra.mrb[24].mxu0 %vm395_vm0, %v1438_v29  ;;  %1399 = vmatmul.mubr.msk.bf16.gmra.mrb[24].mxu1 %vm395_vm0, %v1439_v30  ;;  %v101_v30 = vld [vmem:[#allocation2 + $0x50] sm:$0xff] }
  0x3b   :  { %1370 = vmatprep.mubr.msk.bf16.mxu0 %vm395_vm0, %v1440_v31  ;;  %1402 = vmatprep.mubr.msk.bf16.mxu1 %vm395_vm0, %v1441_v32 }
  0x42   :  { %1371 = vmatmul.mubr.msk.bf16.gmra.mrb[28].mxu0 %vm395_vm0, %v1442_v33  ;;  %1403 = vmatmul.mubr.msk.bf16.gmra.mrb[28].mxu1 %vm395_vm0, %v1443_v34 }
  0xdd   :  { %v1344_v39 = vpop.f32.mrb[0].mxu0  ;;  %v1376_v40 = vpop.f32.mrb[0].mxu1 }
  0xde   :  { %v783_v43 = vadd.f32 %v1344_v39, %v93_v35  ;;  %v815_v44 = vadd.f32 %v1376_v40, %v125_v36  ;;  %v526_v45 = vpop.f32.mrb[1].mxu0  ;;  %v654_v46 = vpop.f32.mrb[1].mxu1  ;;  %v133_v35 = vld [vmem:[#allocation2 + $0x150] sm:$0xff]  ;;  %v99_v36 = vld [vmem:[#allocation2 + $0x40] sm:$0xff] }
  0xdf   :  { %v781_v49 = vadd.f32 %v526_v45, %v91_v37  ;;  %v813_v50 = vadd.f32 %v654_v46, %v123_v38  ;;  %v1345_v51 = vpop.f32.mrb[2].mxu0  ;;  %v1377_v52 = vpop.f32.mrb[2].mxu1 }
  0xe0   :  { %848 = vst.msk [vmem:[#allocation2 + $0x10] sm:$0xff] %vm26_vm1, %v783_v43  ;;  %880 = vst.msk [vmem:[#allocation2 + $0x110] sm:$0xff] %vm26_vm1, %v815_v44  ;;  %v784_v53 = vadd.f32 %v1345_v51, %v94_v41  ;;  %v816_v54 = vadd.f32 %v1377_v52, %v126_v42  ;;  %v529_v55 = vpop.f32.mrb[3].mxu0  ;;  %v657_v56 = vpop.f32.mrb[3].mxu1 }
  0xe1   :  { %846 = vst.msk [vmem:[#allocation2] sm:$0xff] %vm26_vm1, %v781_v49  ;;  %878 = vst.msk [vmem:[#allocation2 + $0x100] sm:$0xff] %vm26_vm1, %v813_v50  ;;  %v782_v57 = vadd.f32 %v529_v55, %v92_v47  ;;  %v814_v58 = vadd.f32 %v657_v56, %v124_v48  ;;  %v131_v47 = vld [vmem:[#allocation2 + $0x140] sm:$0xff]  ;;  %v102_v49 = vld [vmem:[#allocation2 + $0x58] sm:$0xff] }
  0xe2   :  { %849 = vst.msk [vmem:[#allocation2 + $0x18] sm:$0xff] %vm26_vm1, %v784_v53  ;;  %881 = vst.msk [vmem:[#allocation2 + $0x118] sm:$0xff] %vm26_vm1, %v816_v54 }
  0xe3   :  { %847 = vst.msk [vmem:[#allocation2 + $0x8] sm:$0xff] %vm26_vm1, %v782_v57  ;;  %879 = vst.msk [vmem:[#allocation2 + $0x108] sm:$0xff] %vm26_vm1, %v814_v58  ;;  %v134_v57 = vld [vmem:[#allocation2 + $0x158] sm:$0xff] }
  0xe5   :  { %v1348_v63 = vpop.f32.mrb[4].mxu0  ;;  %v1380_v0 = vpop.f32.mrb[4].mxu1 }
  0xe6   :  { %v787_v1 = vadd.f32 %v1348_v63, %v97_v59  ;;  %v819_v2 = vadd.f32 %v1380_v0, %v129_v60  ;;  %v542_v3 = vpop.f32.mrb[5].mxu0  ;;  %v670_v4 = vpop.f32.mrb[5].mxu1  ;;  %v100_v63 = vld [vmem:[#allocation2 + $0x48] sm:$0xff] }
  0xe7   :  { %v915_v7 = vld [vmem:[#allocation2 + $0x10] sm:$0xff]  ;;  %v785_v9 = vadd.f32 %v542_v3, %v95_v61  ;;  %v817_v10 = vadd.f32 %v670_v4, %v127_v62  ;;  %v1349_v11 = vpop.f32.mrb[6].mxu0  ;;  %v1381_v12 = vpop.f32.mrb[6].mxu1  ;;  %v132_v0 = vld [vmem:[#allocation2 + $0x148] sm:$0xff] }
  0xe8   :  { %v947_v8 = vld [vmem:[#allocation2 + $0x110] sm:$0xff]  ;;  %vm979_vm2 = vcmp.gt.f32.partialorder %v915_v7, 0.0  ;;  %v1043_v13 = vmul.f32 0.01, %v915_v7  ;;  %852 = vst.msk [vmem:[#allocation2 + $0x30] sm:$0xff] %vm26_vm1, %v787_v1  ;;  %884 = vst.msk [vmem:[#allocation2 + $0x130] sm:$0xff] %vm26_vm1, %v819_v2  ;;  %v788_v18 = vadd.f32 %v1349_v11, %v98_v5  ;;  %v820_v19 = vadd.f32 %v1381_v12, %v130_v6 }
  0xe9   :  { %vm1011_vm3 = vcmp.gt.f32.partialorder %v947_v8, 0.0  ;;  %v1075_v14 = vmul.f32 0.01, %v947_v8  ;;  %v913_v15 = vld [vmem:[#allocation2] sm:$0xff]  ;;  %v916_v17 = vld [vmem:[#allocation2 + $0x18] sm:$0xff]  ;;  %850 = vst.msk [vmem:[#allocation2 + $0x20] sm:$0xff] %vm26_vm1, %v785_v9 }
  0xea   :  { %v945_v16 = vld [vmem:[#allocation2 + $0x100] sm:$0xff]  ;;  %882 = vst.msk [vmem:[#allocation2 + $0x120] sm:$0xff] %vm26_vm1, %v817_v10  ;;  %v545_v21 = vpop.f32.mrb[7].mxu0  ;;  %v673_v23 = vpop.f32.mrb[7].mxu1  ;;  %v1107_v24 = vsel %vm979_vm2, %v915_v7, %v1043_v13  ;;  %vm977_vm4 = vcmp.gt.f32.partialorder %v913_v15, 0.0  ;;  %v948_v27 = vld [vmem:[#allocation2 + $0x118] sm:$0xff] }
  0xeb   :  { %v1139_v25 = vsel %vm1011_vm3, %v947_v8, %v1075_v14  ;;  %v1041_v26 = vmul.f32 0.01, %v913_v15  ;;  %v914_v28 = vld [vmem:[#allocation2 + $0x8] sm:$0xff]  ;;  %1171 = vst.msk [vmem:[%s2084_s3 + $0x10] sm:$0xff] %vm26_vm1, %v1107_v24  ;;  %vm1009_vm5 = vcmp.gt.f32.partialorder %v945_v16, 0.0  ;;  %vm980_vm6 = vcmp.gt.f32.partialorder %v916_v17, 0.0 }
  0xec   :  { %v946_v29 = vld [vmem:[#allocation2 + $0x108] sm:$0xff]  ;;  %1203 = vst.msk [vmem:[%s2084_s3 + $0x110] sm:$0xff] %vm26_vm1, %v1139_v25  ;;  %v1073_v31 = vmul.f32 0.01, %v945_v16  ;;  %v1044_v32 = vmul.f32 0.01, %v916_v17  ;;  %v786_v44 = vadd.f32 %v545_v21, %v96_v20  ;;  %v818_v45 = vadd.f32 %v673_v23, %v128_v22 }
  0xed   :  { %853 = vst.msk [vmem:[#allocation2 + $0x38] sm:$0xff] %vm26_vm1, %v788_v18  ;;  %885 = vst.msk [vmem:[#allocation2 + $0x138] sm:$0xff] %vm26_vm1, %v820_v19  ;;  %v1105_v33 = vsel %vm977_vm4, %v913_v15, %v1041_v26  ;;  %vm1012_vm7 = vcmp.gt.f32.partialorder %v948_v27, 0.0  ;;  %v1076_v34 = vmul.f32 0.01, %v948_v27  ;;  %vm978_vm8 = vcmp.gt.f32.partialorder %v914_v28, 0.0 }
  0xee   :  { %1169 = vst.msk [vmem:[%s2084_s3] sm:$0xff] %vm26_vm1, %v1105_v33  ;;  %v1137_v37 = vsel %vm1009_vm5, %v945_v16, %v1073_v31  ;;  %v1108_v38 = vsel %vm980_vm6, %v916_v17, %v1044_v32  ;;  %v1042_v39 = vmul.f32 0.01, %v914_v28  ;;  %vm1010_vm9 = vcmp.gt.f32.partialorder %v946_v29, 0.0  ;;  %v1352_v40 = vpop.f32.mrb[8].mxu0  ;;  %v1384_v41 = vpop.f32.mrb[8].mxu1 }
  0xef   :  { %1201 = vst.msk [vmem:[%s2084_s3 + $0x100] sm:$0xff] %vm26_vm1, %v1137_v37  ;;  %1172 = vst.msk [vmem:[%s2084_s3 + $0x18] sm:$0xff] %vm26_vm1, %v1108_v38  ;;  %v1140_v42 = vsel %vm1012_vm7, %v948_v27, %v1076_v34  ;;  %v1074_v43 = vmul.f32 0.01, %v946_v29  ;;  %v558_v46 = vpop.f32.mrb[9].mxu0  ;;  %v686_v48 = vpop.f32.mrb[9].mxu1  ;;  %v791_v53 = vadd.f32 %v1352_v40, %v101_v30  ;;  %v823_v54 = vadd.f32 %v1384_v41, %v133_v35 }
  0xf0   :  { %1204 = vst.msk [vmem:[%s2084_s3 + $0x118] sm:$0xff] %vm26_vm1, %v1140_v42  ;;  %v1106_v50 = vsel %vm978_vm8, %v914_v28, %v1042_v39  ;;  %v919_v51 = vld [vmem:[#allocation2 + $0x30] sm:$0xff]  ;;  %v789_v55 = vadd.f32 %v558_v46, %v99_v36  ;;  %v1353_v56 = vpop.f32.mrb[10].mxu0  ;;  %v1385_v58 = vpop.f32.mrb[10].mxu1  ;;  %v917_v61 = vld [vmem:[#allocation2 + $0x20] sm:$0xff]  ;;  %851 = vst.msk [vmem:[#allocation2 + $0x28] sm:$0xff] %vm26_vm1, %v786_v44  ;;  %v821_v7 = vadd.f32 %v686_v48, %v131_v47 }
  0xf1   :  { %v951_v52 = vld [vmem:[#allocation2 + $0x130] sm:$0xff]  ;;  %1170 = vst.msk [vmem:[%s2084_s3 + $0x8] sm:$0xff] %vm26_vm1, %v1106_v50  ;;  %v1138_v59 = vsel %vm1010_vm9, %v946_v29, %v1074_v43  ;;  %vm983_vm10 = vcmp.gt.f32.partialorder %v919_v51, 0.0  ;;  %v1047_v60 = vmul.f32 0.01, %v919_v51  ;;  %v949_v62 = vld [vmem:[#allocation2 + $0x120] sm:$0xff]  ;;  %v792_v8 = vadd.f32 %v1353_v56, %v102_v49 }
  0xf2   :  { %vm1015_vm11 = vcmp.gt.f32.partialorder %v951_v52, 0.0  ;;  %883 = vst.msk [vmem:[#allocation2 + $0x128] sm:$0xff] %vm26_vm1, %v818_v45  ;;  %1202 = vst.msk [vmem:[%s2084_s3 + $0x108] sm:$0xff] %vm26_vm1, %v1138_v59  ;;  %v1079_v1 = vmul.f32 0.01, %v951_v52  ;;  %vm981_vm12 = vcmp.gt.f32.partialorder %v917_v61, 0.0  ;;  %v824_v18 = vadd.f32 %v1385_v58, %v134_v57 }
  0xf3   :  { %v1045_v2 = vmul.f32 0.01, %v917_v61  ;;  %vm1013_vm13 = vcmp.gt.f32.partialorder %v949_v62, 0.0  ;;  %856 = vst.msk [vmem:[#allocation2 + $0x50] sm:$0xff] %vm26_vm1, %v791_v53  ;;  %888 = vst.msk [vmem:[#allocation2 + $0x150] sm:$0xff] %vm26_vm1, %v823_v54  ;;  %v1111_v3 = vsel %vm983_vm10, %v919_v51, %v1047_v60  ;;  %v561_v9 = vpop.f32.mrb[11].mxu0 }
  0xf4   :  { %854 = vst.msk [vmem:[#allocation2 + $0x40] sm:$0xff] %vm26_vm1, %v789_v55  ;;  %v1077_v4 = vmul.f32 0.01, %v949_v62  ;;  %v920_v5 = vld [vmem:[#allocation2 + $0x38] sm:$0xff]  ;;  %v689_v10 = vpop.f32.mrb[11].mxu1  ;;  %1175 = vst.msk [vmem:[%s2084_s3 + $0x30] sm:$0xff] %vm26_vm1, %v1111_v3  ;;  %v1143_v11 = vsel %vm1015_vm11, %v951_v52, %v1079_v1  ;;  %v790_v22 = vadd.f32 %v561_v9, %v100_v63 }
  0xf5   :  { %v952_v6 = vld [vmem:[#allocation2 + $0x138] sm:$0xff]  ;;  %v1109_v12 = vsel %vm981_vm12, %v917_v61, %v1045_v2  ;;  %vm984_vm14 = vcmp.gt.f32.partialorder %v920_v5, 0.0  ;;  %v1048_v13 = vmul.f32 0.01, %v920_v5  ;;  %v105_v14 = vld [vmem:[#allocation2 + $0x70] sm:$0xff]  ;;  %1207 = vst.msk [vmem:[%s2084_s3 + $0x130] sm:$0xff] %vm26_vm1, %v1143_v11  ;;  %v822_v23 = vadd.f32 %v689_v10, %v132_v0 }
  0xf6   :  { %v137_v15 = vld [vmem:[#allocation2 + $0x170] sm:$0xff]  ;;  %1173 = vst.msk [vmem:[%s2084_s3 + $0x20] sm:$0xff] %vm26_vm1, %v1109_v12  ;;  %v1141_v16 = vsel %vm1013_vm13, %v949_v62, %v1077_v4  ;;  %vm1016_vm15 = vcmp.gt.f32.partialorder %v952_v6, 0.0  ;;  %v1080_v17 = vmul.f32 0.01, %v952_v6  ;;  %886 = vst.msk [vmem:[#allocation2 + $0x140] sm:$0xff] %vm26_vm1, %v821_v7 }
  0xf7   :  { %857 = vst.msk [vmem:[#allocation2 + $0x58] sm:$0xff] %vm26_vm1, %v792_v8  ;;  %v103_v19 = vld [vmem:[#allocation2 + $0x60] sm:$0xff]  ;;  %1205 = vst.msk [vmem:[%s2084_s3 + $0x120] sm:$0xff] %vm26_vm1, %v1141_v16  ;;  %v1112_v21 = vsel %vm984_vm14, %v920_v5, %v1048_v13  ;;  %v1356_v24 = vpop.f32.mrb[12].mxu0  ;;  %v1388_v25 = vpop.f32.mrb[12].mxu1  ;;  %v106_v31 = vld [vmem:[#allocation2 + $0x78] sm:$0xff] }
  0xf8   :  { %v135_v20 = vld [vmem:[#allocation2 + $0x160] sm:$0xff]  ;;  %1176 = vst.msk [vmem:[%s2084_s3 + $0x38] sm:$0xff] %vm26_vm1, %v1112_v21  ;;  %v1144_v26 = vsel %vm1016_vm15, %v952_v6, %v1080_v17  ;;  %889 = vst.msk [vmem:[#allocation2 + $0x158] sm:$0xff] %vm26_vm1, %v824_v18  ;;  %v795_v27 = vadd.f32 %v1356_v24, %v105_v14  ;;  %v827_v28 = vadd.f32 %v1388_v25, %v137_v15  ;;  %v574_v29 = vpop.f32.mrb[13].mxu0  ;;  %v702_v30 = vpop.f32.mrb[13].mxu1  ;;  %v138_v32 = vld [vmem:[#allocation2 + $0x178] sm:$0xff] }
  0xf9   :  { %1208 = vst.msk [vmem:[%s2084_s3 + $0x138] sm:$0xff] %vm26_vm1, %v1144_v26  ;;  %v918_v33 = vld [vmem:[#allocation2 + $0x28] sm:$0xff]  ;;  %855 = vst.msk [vmem:[#allocation2 + $0x48] sm:$0xff] %vm26_vm1, %v790_v22  ;;  %v793_v35 = vadd.f32 %v574_v29, %v103_v19  ;;  %v825_v36 = vadd.f32 %v702_v30, %v135_v20  ;;  %v1357_v37 = vpop.f32.mrb[14].mxu0  ;;  %v1389_v38 = vpop.f32.mrb[14].mxu1  ;;  %v109_v53 = vld [vmem:[#allocation2 + $0x90] sm:$0xff] }
  0xfa   :  { %v950_v34 = vld [vmem:[#allocation2 + $0x128] sm:$0xff]  ;;  %887 = vst.msk [vmem:[#allocation2 + $0x148] sm:$0xff] %vm26_vm1, %v822_v23  ;;  %vm982_vm0 = vcmp.gt.f32.partialorder %v918_v33, 0.0  ;;  %v1046_v41 = vmul.f32 0.01, %v918_v33  ;;  %860 = vst.msk [vmem:[#allocation2 + $0x70] sm:$0xff] %vm26_vm1, %v795_v27  ;;  %v796_v46 = vadd.f32 %v1357_v37, %v106_v31  ;;  %v828_v47 = vadd.f32 %v1389_v38, %v138_v32 }
  0xfb   :  { %v104_v39 = vld [vmem:[#allocation2 + $0x68] sm:$0xff]  ;;  %vm1014_vm2 = vcmp.gt.f32.partialorder %v950_v34, 0.0  ;;  %v1078_v42 = vmul.f32 0.01, %v950_v34  ;;  %892 = vst.msk [vmem:[#allocation2 + $0x170] sm:$0xff] %vm26_vm1, %v827_v28  ;;  %v923_v43 = vld [vmem:[#allocation2 + $0x50] sm:$0xff] }
  0xfc   :  { %v136_v40 = vld [vmem:[#allocation2 + $0x168] sm:$0xff]  ;;  %v955_v44 = vld [vmem:[#allocation2 + $0x150] sm:$0xff]  ;;  %v921_v45 = vld [vmem:[#allocation2 + $0x40] sm:$0xff]  ;;  %858 = vst.msk [vmem:[#allocation2 + $0x60] sm:$0xff] %vm26_vm1, %v793_v35  ;;  %v577_v48 = vpop.f32.mrb[15].mxu0  ;;  %v705_v49 = vpop.f32.mrb[15].mxu1  ;;  %v1110_v50 = vsel %vm982_vm0, %v918_v33, %v1046_v41 }
  0xfd   :  { %890 = vst.msk [vmem:[#allocation2 + $0x160] sm:$0xff] %vm26_vm1, %v825_v36  ;;  %v1142_v51 = vsel %vm1014_vm2, %v950_v34, %v1078_v42  ;;  %vm987_vm3 = vcmp.gt.f32.partialorder %v923_v43, 0.0  ;;  %v1051_v52 = vmul.f32 0.01, %v923_v43  ;;  %1174 = vst.msk [vmem:[%s2084_s3 + $0x28] sm:$0xff] %vm26_vm1, %v1110_v50  ;;  %vm1019_vm4 = vcmp.gt.f32.partialorder %v955_v44, 0.0 }
  0xfe   :  { %1206 = vst.msk [vmem:[%s2084_s3 + $0x128] sm:$0xff] %vm26_vm1, %v1142_v51  ;;  %v1083_v54 = vmul.f32 0.01, %v955_v44  ;;  %vm985_vm5 = vcmp.gt.f32.partialorder %v921_v45, 0.0  ;;  %v1049_v55 = vmul.f32 0.01, %v921_v45  ;;  %v794_v59 = vadd.f32 %v577_v48, %v104_v39 }
  0xff   :  { %861 = vst.msk [vmem:[#allocation2 + $0x78] sm:$0xff] %vm26_vm1, %v796_v46  ;;  %893 = vst.msk [vmem:[#allocation2 + $0x178] sm:$0xff] %vm26_vm1, %v828_v47  ;;  %v1115_v56 = vsel %vm987_vm3, %v923_v43, %v1051_v52  ;;  %v953_v57 = vld [vmem:[#allocation2 + $0x140] sm:$0xff]  ;;  %v924_v58 = vld [vmem:[#allocation2 + $0x58] sm:$0xff]  ;;  %v826_v60 = vadd.f32 %v705_v49, %v136_v40  ;;  %v1360_v2 = vpop.f32.mrb[16].mxu0  ;;  %v1392_v3 = vpop.f32.mrb[16].mxu1 }
 0x100   :  { %v141_v61 = vld [vmem:[#allocation2 + $0x190] sm:$0xff]  ;;  %1179 = vst.msk [vmem:[%s2084_s3 + $0x50] sm:$0xff] %vm26_vm1, %v1115_v56  ;;  %v1147_v62 = vsel %vm1019_vm4, %v955_v44, %v1083_v54  ;;  %v1113_v63 = vsel %vm985_vm5, %v921_v45, %v1049_v55  ;;  %vm1017_vm6 = vcmp.gt.f32.partialorder %v953_v57, 0.0  ;;  %v1081_v0 = vmul.f32 0.01, %v953_v57  ;;  %v956_v1 = vld [vmem:[#allocation2 + $0x158] sm:$0xff] }
 0x101   :  { %1211 = vst.msk [vmem:[%s2084_s3 + $0x150] sm:$0xff] %vm26_vm1, %v1147_v62  ;;  %1177 = vst.msk [vmem:[%s2084_s3 + $0x40] sm:$0xff] %vm26_vm1, %v1113_v63  ;;  %vm988_vm7 = vcmp.gt.f32.partialorder %v924_v58, 0.0  ;;  %v1052_v4 = vmul.f32 0.01, %v924_v58  ;;  %vm1020_vm8 = vcmp.gt.f32.partialorder %v956_v1, 0.0  ;;  %v799_v10 = vadd.f32 %v1360_v2, %v109_v53 }
 0x102   :  { %v1084_v5 = vmul.f32 0.01, %v956_v1  ;;  %859 = vst.msk [vmem:[#allocation2 + $0x68] sm:$0xff] %vm26_vm1, %v794_v59  ;;  %891 = vst.msk [vmem:[#allocation2 + $0x168] sm:$0xff] %vm26_vm1, %v826_v60  ;;  %v1145_v6 = vsel %vm1017_vm6, %v953_v57, %v1081_v0  ;;  %v922_v7 = vld [vmem:[#allocation2 + $0x48] sm:$0xff]  ;;  %v927_v9 = vld [vmem:[#allocation2 + $0x70] sm:$0xff]  ;;  %v831_v11 = vadd.f32 %v1392_v3, %v141_v61 }
 0x103   :  { %v954_v8 = vld [vmem:[#allocation2 + $0x148] sm:$0xff]  ;;  %v590_v12 = vpop.f32.mrb[17].mxu0  ;;  %v1847_v13 = vpop.f32.mrb[17].mxu1  ;;  %1209 = vst.msk [vmem:[%s2084_s3 + $0x140] sm:$0xff] %vm26_vm1, %v1145_v6  ;;  %v1116_v14 = vsel %vm988_vm7, %v924_v58, %v1052_v4  ;;  %vm986_vm9 = vcmp.gt.f32.partialorder %v922_v7, 0.0  ;;  %v959_v17 = vld [vmem:[#allocation2 + $0x170] sm:$0xff] }
 0x104   :  { %v1148_v15 = vsel %vm1020_vm8, %v956_v1, %v1084_v5  ;;  %v1050_v16 = vmul.f32 0.01, %v922_v7  ;;  %v925_v18 = vld [vmem:[#allocation2 + $0x60] sm:$0xff]  ;;  %1180 = vst.msk [vmem:[%s2084_s3 + $0x58] sm:$0xff] %vm26_vm1, %v1116_v14  ;;  %vm1018_vm10 = vcmp.gt.f32.partialorder %v954_v8, 0.0  ;;  %vm991_vm11 = vcmp.gt.f32.partialorder %v927_v9, 0.0 }
 0x105   :  { %v957_v19 = vld [vmem:[#allocation2 + $0x160] sm:$0xff]  ;;  %1212 = vst.msk [vmem:[%s2084_s3 + $0x158] sm:$0xff] %vm26_vm1, %v1148_v15  ;;  %v1082_v21 = vmul.f32 0.01, %v954_v8  ;;  %v1055_v22 = vmul.f32 0.01, %v927_v9 }
 0x106   :  { %v107_v20 = vld [vmem:[#allocation2 + $0x80] sm:$0xff]  ;;  %864 = vst.msk [vmem:[#allocation2 + $0x90] sm:$0xff] %vm26_vm1, %v799_v10  ;;  %896 = vst.msk [vmem:[#allocation2 + $0x190] sm:$0xff] %vm26_vm1, %v831_v11  ;;  %v1114_v23 = vsel %vm986_vm9, %v922_v7, %v1050_v16  ;;  %vm1023_vm12 = vcmp.gt.f32.partialorder %v959_v17, 0.0  ;;  %v1087_v24 = vmul.f32 0.01, %v959_v17 }
 0x107   :  { %vm989_vm13 = vcmp.gt.f32.partialorder %v925_v18, 0.0  ;;  %v928_v25 = vld [vmem:[#allocation2 + $0x78] sm:$0xff]  ;;  %v139_v27 = vld [vmem:[#allocation2 + $0x180] sm:$0xff]  ;;  %1178 = vst.msk [vmem:[%s2084_s3 + $0x48] sm:$0xff] %vm26_vm1, %v1114_v23  ;;  %v1146_v28 = vsel %vm1018_vm10, %v954_v8, %v1082_v21  ;;  %v1119_v29 = vsel %vm991_vm11, %v927_v9, %v1055_v22  ;;  %v1053_v30 = vmul.f32 0.01, %v925_v18 }
 0x108   :  { %v960_v26 = vld [vmem:[#allocation2 + $0x178] sm:$0xff]  ;;  %vm1021_vm14 = vcmp.gt.f32.partialorder %v957_v19, 0.0  ;;  %v1361_v32 = vpop.f32.mrb[18].mxu0  ;;  %v1393_v34 = vpop.f32.mrb[18].mxu1  ;;  %v108_v35 = vld [vmem:[#allocation2 + $0x88] sm:$0xff]  ;;  %1210 = vst.msk [vmem:[%s2084_s3 + $0x148] sm:$0xff] %vm26_vm1, %v1146_v28  ;;  %v1151_v36 = vsel %vm1023_vm12, %v959_v17, %v1087_v24  ;;  %v797_v44 = vadd.f32 %v590_v12, %v107_v20  ;;  %v829_v59 = vadd.f32 %v1847_v13, %v139_v27 }
 0x109   :  { %v110_v31 = vld [vmem:[#allocation2 + $0x98] sm:$0xff]  ;;  %1183 = vst.msk [vmem:[%s2084_s3 + $0x70] sm:$0xff] %vm26_vm1, %v1119_v29  ;;  %v1085_v37 = vmul.f32 0.01, %v957_v19  ;;  %vm992_vm15 = vcmp.gt.f32.partialorder %v928_v25, 0.0  ;;  %v593_v39 = vpop.f32.mrb[19].mxu0  ;;  %v1117_v40 = vsel %vm989_vm13, %v925_v18, %v1053_v30 }
 0x10a   :  { %v142_v33 = vld [vmem:[#allocation2 + $0x198] sm:$0xff]  ;;  %v1056_v38 = vmul.f32 0.01, %v928_v25  ;;  %1215 = vst.msk [vmem:[%s2084_s3 + $0x170] sm:$0xff] %vm26_vm1, %v1151_v36  ;;  %vm1024_vm0 = vcmp.gt.f32.partialorder %v960_v26, 0.0  ;;  %v926_v42 = vld [vmem:[#allocation2 + $0x68] sm:$0xff]  ;;  %v800_v3 = vadd.f32 %v1361_v32, %v110_v31  ;;  %v798_v5 = vadd.f32 %v593_v39, %v108_v35 }
 0x10b   :  { %v1088_v41 = vmul.f32 0.01, %v960_v26  ;;  %v958_v43 = vld [vmem:[#allocation2 + $0x168] sm:$0xff]  ;;  %v721_v46 = vpop.f32.mrb[19].mxu1  ;;  %v113_v47 = vld [vmem:[#allocation2 + $0xb0] sm:$0xff]  ;;  %1181 = vst.msk [vmem:[%s2084_s3 + $0x60] sm:$0xff] %vm26_vm1, %v1117_v40  ;;  %v1149_v49 = vsel %vm1021_vm14, %v957_v19, %v1085_v37  ;;  %v832_v4 = vadd.f32 %v1393_v34, %v142_v33 }
 0x10c   :  { %v140_v45 = vld [vmem:[#allocation2 + $0x188] sm:$0xff]  ;;  %v145_v48 = vld [vmem:[#allocation2 + $0x1b0] sm:$0xff]  ;;  %v1120_v50 = vsel %vm992_vm15, %v928_v25, %v1056_v38  ;;  %vm990_vm2 = vcmp.gt.f32.partialorder %v926_v42, 0.0  ;;  %v1054_v51 = vmul.f32 0.01, %v926_v42  ;;  %v1364_v52 = vpop.f32.mrb[20].mxu0 }
 0x10d   :  { %v1396_v53 = vpop.f32.mrb[20].mxu1  ;;  %v111_v54 = vld [vmem:[#allocation2 + $0xa0] sm:$0xff]  ;;  %v114_v56 = vld [vmem:[#allocation2 + $0xb8] sm:$0xff]  ;;  %1213 = vst.msk [vmem:[%s2084_s3 + $0x160] sm:$0xff] %vm26_vm1, %v1149_v49  ;;  %1184 = vst.msk [vmem:[%s2084_s3 + $0x78] sm:$0xff] %vm26_vm1, %v1120_v50  ;;  %v1152_v57 = vsel %vm1024_vm0, %v960_v26, %v1088_v41  ;;  %vm1022_vm3 = vcmp.gt.f32.partialorder %v958_v43, 0.0  ;;  %v830_v14 = vadd.f32 %v721_v46, %v140_v45  ;;  %v803_v15 = vadd.f32 %v1364_v52, %v113_v47 }
 0x10e   :  { %v143_v55 = vld [vmem:[#allocation2 + $0x1a0] sm:$0xff]  ;;  %v1086_v58 = vmul.f32 0.01, %v958_v43  ;;  %862 = vst.msk [vmem:[#allocation2 + $0x80] sm:$0xff] %vm26_vm1, %v797_v44  ;;  %v606_v60 = vpop.f32.mrb[21].mxu0  ;;  %v734_v61 = vpop.f32.mrb[21].mxu1  ;;  %v1118_v0 = vsel %vm990_vm2, %v926_v42, %v1054_v51  ;;  %v835_v16 = vadd.f32 %v1396_v53, %v145_v48 }
 0x10f   :  { %v146_v62 = vld [vmem:[#allocation2 + $0x1b8] sm:$0xff]  ;;  %v112_v63 = vld [vmem:[#allocation2 + $0xa8] sm:$0xff]  ;;  %1216 = vst.msk [vmem:[%s2084_s3 + $0x178] sm:$0xff] %vm26_vm1, %v1152_v57  ;;  %v931_v1 = vld [vmem:[#allocation2 + $0x90] sm:$0xff]  ;;  %v1365_v6 = vpop.f32.mrb[22].mxu0  ;;  %v1397_v7 = vpop.f32.mrb[22].mxu1  ;;  %v801_v18 = vadd.f32 %v606_v60, %v111_v54  ;;  %v833_v19 = vadd.f32 %v734_v61, %v143_v55 }
 0x110   :  { %v963_v2 = vld [vmem:[#allocation2 + $0x190] sm:$0xff]  ;;  %v144_v8 = vld [vmem:[#allocation2 + $0x1a8] sm:$0xff]  ;;  %1182 = vst.msk [vmem:[%s2084_s3 + $0x68] sm:$0xff] %vm26_vm1, %v1118_v0  ;;  %v1150_v9 = vsel %vm1022_vm3, %v958_v43, %v1086_v58  ;;  %vm995_vm4 = vcmp.gt.f32.partialorder %v931_v1, 0.0  ;;  %v1059_v10 = vmul.f32 0.01, %v931_v1  ;;  %v804_v20 = vadd.f32 %v1365_v6, %v114_v56 }
 0x111   :  { %vm1027_vm5 = vcmp.gt.f32.partialorder %v963_v2, 0.0  ;;  %894 = vst.msk [vmem:[#allocation2 + $0x180] sm:$0xff] %vm26_vm1, %v829_v59  ;;  %v609_v11 = vpop.f32.mrb[23].mxu0  ;;  %v737_v12 = vpop.f32.mrb[23].mxu1  ;;  %1214 = vst.msk [vmem:[%s2084_s3 + $0x168] sm:$0xff] %vm26_vm1, %v1150_v9  ;;  %v117_v21 = vld [vmem:[#allocation2 + $0xd0] sm:$0xff]  ;;  %v836_v24 = vadd.f32 %v1397_v7, %v146_v62 }
 0x112   :  { %v1091_v13 = vmul.f32 0.01, %v963_v2  ;;  %865 = vst.msk [vmem:[#allocation2 + $0x98] sm:$0xff] %vm26_vm1, %v800_v3  ;;  %897 = vst.msk [vmem:[#allocation2 + $0x198] sm:$0xff] %vm26_vm1, %v832_v4  ;;  %v1123_v17 = vsel %vm995_vm4, %v931_v1, %v1059_v10  ;;  %v149_v22 = vld [vmem:[#allocation2 + $0x1d0] sm:$0xff]  ;;  %v802_v25 = vadd.f32 %v609_v11, %v112_v63  ;;  %v834_v26 = vadd.f32 %v737_v12, %v144_v8  ;;  %v115_v27 = vld [vmem:[#allocation2 + $0xc0] sm:$0xff] }
 0x113   :  { %863 = vst.msk [vmem:[#allocation2 + $0x88] sm:$0xff] %vm26_vm1, %v798_v5  ;;  %1187 = vst.msk [vmem:[%s2084_s3 + $0x90] sm:$0xff] %vm26_vm1, %v1123_v17  ;;  %v147_v28 = vld [vmem:[#allocation2 + $0x1c0] sm:$0xff]  ;;  %v1368_v29 = vpop.f32.mrb[24].mxu0  ;;  %v1400_v30 = vpop.f32.mrb[24].mxu1  ;;  %v118_v31 = vld [vmem:[#allocation2 + $0xd8] sm:$0xff] }
 0x114   :  { %v1155_v23 = vsel %vm1027_vm5, %v963_v2, %v1091_v13  ;;  %895 = vst.msk [vmem:[#allocation2 + $0x188] sm:$0xff] %vm26_vm1, %v830_v14  ;;  %868 = vst.msk [vmem:[#allocation2 + $0xb0] sm:$0xff] %vm26_vm1, %v803_v15  ;;  %v150_v32 = vld [vmem:[#allocation2 + $0x1d8] sm:$0xff]  ;;  %v807_v34 = vadd.f32 %v1368_v29, %v117_v21  ;;  %v839_v35 = vadd.f32 %v1400_v30, %v149_v22  ;;  %v622_v36 = vpop.f32.mrb[25].mxu0  ;;  %v750_v37 = vpop.f32.mrb[25].mxu1  ;;  %v116_v38 = vld [vmem:[#allocation2 + $0xc8] sm:$0xff] }
 0x115   :  { %900 = vst.msk [vmem:[#allocation2 + $0x1b0] sm:$0xff] %vm26_vm1, %v835_v16  ;;  %1219 = vst.msk [vmem:[%s2084_s3 + $0x190] sm:$0xff] %vm26_vm1, %v1155_v23  ;;  %v929_v33 = vld [vmem:[#allocation2 + $0x80] sm:$0xff]  ;;  %v805_v40 = vadd.f32 %v622_v36, %v115_v27  ;;  %v837_v41 = vadd.f32 %v750_v37, %v147_v28  ;;  %v1369_v42 = vpop.f32.mrb[26].mxu0  ;;  %v1401_v43 = vpop.f32.mrb[26].mxu1  ;;  %v148_v48 = vld [vmem:[#allocation2 + $0x1c8] sm:$0xff] }
 0x116   :  { %866 = vst.msk [vmem:[#allocation2 + $0xa0] sm:$0xff] %vm26_vm1, %v801_v18  ;;  %898 = vst.msk [vmem:[#allocation2 + $0x1a0] sm:$0xff] %vm26_vm1, %v833_v19  ;;  %vm993_vm6 = vcmp.gt.f32.partialorder %v929_v33, 0.0  ;;  %v1057_v39 = vmul.f32 0.01, %v929_v33  ;;  %v808_v45 = vadd.f32 %v1369_v42, %v118_v31  ;;  %v840_v46 = vadd.f32 %v1401_v43, %v150_v32  ;;  %v625_v47 = vpop.f32.mrb[27].mxu0 }
 0x117   :  { %869 = vst.msk [vmem:[#allocation2 + $0xb8] sm:$0xff] %vm26_vm1, %v804_v20  ;;  %901 = vst.msk [vmem:[#allocation2 + $0x1b8] sm:$0xff] %vm26_vm1, %v836_v24  ;;  %v753_v49 = vpop.f32.mrb[27].mxu1  ;;  %v806_v55 = vadd.f32 %v625_v47, %v116_v38  ;;  %v1372_v22 = vpop.f32.mrb[28].mxu0  ;;  %v153_v42 = vld [vmem:[#allocation2 + $0x1f0] sm:$0xff]  ;;  %v119_v43 = vld [vmem:[#allocation2 + $0xe0] sm:$0xff] }
 0x118   :  { %867 = vst.msk [vmem:[#allocation2 + $0xa8] sm:$0xff] %vm26_vm1, %v802_v25  ;;  %899 = vst.msk [vmem:[#allocation2 + $0x1a8] sm:$0xff] %vm26_vm1, %v834_v26  ;;  %v961_v44 = vld [vmem:[#allocation2 + $0x180] sm:$0xff]  ;;  %v1121_v50 = vsel %vm993_vm6, %v929_v33, %v1057_v39  ;;  %v838_v63 = vadd.f32 %v753_v49, %v148_v48  ;;  %v1404_v36 = vpop.f32.mrb[28].mxu1  ;;  %v638_v37 = vpop.f32.mrb[29].mxu0  ;;  %v122_v48 = vld [vmem:[#allocation2 + $0xf8] sm:$0xff] }
 0x119   :  { %872 = vst.msk [vmem:[#allocation2 + $0xd0] sm:$0xff] %vm26_vm1, %v807_v34  ;;  %904 = vst.msk [vmem:[#allocation2 + $0x1d0] sm:$0xff] %vm26_vm1, %v839_v35  ;;  %vm1025_vm7 = vcmp.gt.f32.partialorder %v961_v44, 0.0  ;;  %v1089_v51 = vmul.f32 0.01, %v961_v44  ;;  %v932_v52 = vld [vmem:[#allocation2 + $0x98] sm:$0xff] }
 0x11a   :  { %v964_v53 = vld [vmem:[#allocation2 + $0x198] sm:$0xff]  ;;  %v930_v54 = vld [vmem:[#allocation2 + $0x88] sm:$0xff]  ;;  %870 = vst.msk [vmem:[#allocation2 + $0xc0] sm:$0xff] %vm26_vm1, %v805_v40  ;;  %902 = vst.msk [vmem:[#allocation2 + $0x1c0] sm:$0xff] %vm26_vm1, %v837_v41  ;;  %vm996_vm8 = vcmp.gt.f32.partialorder %v932_v52, 0.0  ;;  %v766_v47 = vpop.f32.mrb[29].mxu1 }
 0x11b   :  { %1185 = vst.msk [vmem:[%s2084_s3 + $0x80] sm:$0xff] %vm26_vm1, %v1121_v50  ;;  %v1060_v56 = vmul.f32 0.01, %v932_v52  ;;  %vm1028_vm9 = vcmp.gt.f32.partialorder %v964_v53, 0.0  ;;  %v1092_v57 = vmul.f32 0.01, %v964_v53  ;;  %v1153_v58 = vsel %vm1025_vm7, %v961_v44, %v1089_v51 }
 0x11c   :  { %873 = vst.msk [vmem:[#allocation2 + $0xd8] sm:$0xff] %vm26_vm1, %v808_v45  ;;  %905 = vst.msk [vmem:[#allocation2 + $0x1d8] sm:$0xff] %vm26_vm1, %v840_v46  ;;  %vm994_vm10 = vcmp.gt.f32.partialorder %v930_v54, 0.0  ;;  %v1058_v59 = vmul.f32 0.01, %v930_v54  ;;  %v962_v60 = vld [vmem:[#allocation2 + $0x188] sm:$0xff] }
 0x11d   :  { %v935_v61 = vld [vmem:[#allocation2 + $0xb0] sm:$0xff]  ;;  %871 = vst.msk [vmem:[#allocation2 + $0xc8] sm:$0xff] %vm26_vm1, %v806_v55  ;;  %1217 = vst.msk [vmem:[%s2084_s3 + $0x180] sm:$0xff] %vm26_vm1, %v1153_v58  ;;  %v1124_v0 = vsel %vm996_vm8, %v932_v52, %v1060_v56  ;;  %v1156_v1 = vsel %vm1028_vm9, %v964_v53, %v1092_v57  ;;  %vm1026_vm11 = vcmp.gt.f32.partialorder %v962_v60, 0.0  ;;  %v1090_v2 = vmul.f32 0.01, %v962_v60 }
 0x11e   :  { %v967_v62 = vld [vmem:[#allocation2 + $0x1b0] sm:$0xff]  ;;  %v933_v3 = vld [vmem:[#allocation2 + $0xa0] sm:$0xff]  ;;  %v936_v5 = vld [vmem:[#allocation2 + $0xb8] sm:$0xff]  ;;  %1188 = vst.msk [vmem:[%s2084_s3 + $0x98] sm:$0xff] %vm26_vm1, %v1124_v0  ;;  %v1122_v6 = vsel %vm994_vm10, %v930_v54, %v1058_v59  ;;  %vm999_vm12 = vcmp.gt.f32.partialorder %v935_v61, 0.0  ;;  %v1373_v49 = vpop.f32.mrb[30].mxu0 }
 0x11f   :  { %v965_v4 = vld [vmem:[#allocation2 + $0x1a0] sm:$0xff]  ;;  %1220 = vst.msk [vmem:[%s2084_s3 + $0x198] sm:$0xff] %vm26_vm1, %v1156_v1  ;;  %v1063_v7 = vmul.f32 0.01, %v935_v61  ;;  %vm1031_vm13 = vcmp.gt.f32.partialorder %v967_v62, 0.0  ;;  %v968_v8 = vld [vmem:[#allocation2 + $0x1b8] sm:$0xff]  ;;  %v1154_v9 = vsel %vm1026_vm11, %v962_v60, %v1090_v2 }
 0x120   :  { %903 = vst.msk [vmem:[#allocation2 + $0x1c8] sm:$0xff] %vm26_vm1, %v838_v63  ;;  %1186 = vst.msk [vmem:[%s2084_s3 + $0x88] sm:$0xff] %vm26_vm1, %v1122_v6  ;;  %v1095_v10 = vmul.f32 0.01, %v967_v62  ;;  %vm997_vm14 = vcmp.gt.f32.partialorder %v933_v3, 0.0  ;;  %v934_v12 = vld [vmem:[#allocation2 + $0xa8] sm:$0xff] }
 0x121   :  { %v1061_v11 = vmul.f32 0.01, %v933_v3  ;;  %1218 = vst.msk [vmem:[%s2084_s3 + $0x188] sm:$0xff] %vm26_vm1, %v1154_v9  ;;  %v1127_v13 = vsel %vm999_vm12, %v935_v61, %v1063_v7  ;;  %vm1029_vm15 = vcmp.gt.f32.partialorder %v965_v4, 0.0  ;;  %v1093_v14 = vmul.f32 0.01, %v965_v4 }
 0x122   :  { %vm1000_vm0 = vcmp.gt.f32.partialorder %v936_v5, 0.0  ;;  %v966_v15 = vld [vmem:[#allocation2 + $0x1a8] sm:$0xff]  ;;  %v939_v16 = vld [vmem:[#allocation2 + $0xd0] sm:$0xff]  ;;  %1191 = vst.msk [vmem:[%s2084_s3 + $0xb0] sm:$0xff] %vm26_vm1, %v1127_v13  ;;  %v1159_v17 = vsel %vm1031_vm13, %v967_v62, %v1095_v10  ;;  %v1064_v19 = vmul.f32 0.01, %v936_v5  ;;  %v812_v7 = vadd.f32 %v1373_v49, %v122_v48 }
 0x123   :  { %v1125_v18 = vsel %vm997_vm14, %v933_v3, %v1061_v11  ;;  %vm1032_vm2 = vcmp.gt.f32.partialorder %v968_v8, 0.0  ;;  %v971_v20 = vld [vmem:[#allocation2 + $0x1d0] sm:$0xff]  ;;  %v937_v21 = vld [vmem:[#allocation2 + $0xc0] sm:$0xff]  ;;  %1223 = vst.msk [vmem:[%s2084_s3 + $0x1b0] sm:$0xff] %vm26_vm1, %v1159_v17  ;;  %v1157_v23 = vsel %vm1029_vm15, %v965_v4, %v1093_v14  ;;  %v1096_v24 = vmul.f32 0.01, %v968_v8 }
 0x124   :  { %1189 = vst.msk [vmem:[%s2084_s3 + $0xa0] sm:$0xff] %vm26_vm1, %v1125_v18  ;;  %vm998_vm3 = vcmp.gt.f32.partialorder %v934_v12, 0.0  ;;  %v1062_v25 = vmul.f32 0.01, %v934_v12  ;;  %v969_v26 = vld [vmem:[#allocation2 + $0x1c0] sm:$0xff]  ;;  %1221 = vst.msk [vmem:[%s2084_s3 + $0x1a0] sm:$0xff] %vm26_vm1, %v1157_v23  ;;  %v1128_v27 = vsel %vm1000_vm0, %v936_v5, %v1064_v19  ;;  %v843_v3 = vadd.f32 %v1404_v36, %v153_v42 }
 0x125   :  { %vm1030_vm4 = vcmp.gt.f32.partialorder %v966_v15, 0.0  ;;  %v1094_v28 = vmul.f32 0.01, %v966_v15  ;;  %vm1003_vm5 = vcmp.gt.f32.partialorder %v939_v16, 0.0  ;;  %v940_v29 = vld [vmem:[#allocation2 + $0xd8] sm:$0xff]  ;;  %1192 = vst.msk [vmem:[%s2084_s3 + $0xb8] sm:$0xff] %vm26_vm1, %v1128_v27  ;;  %v1160_v31 = vsel %vm1032_vm2, %v968_v8, %v1096_v24 }
 0x126   :  { %v972_v30 = vld [vmem:[#allocation2 + $0x1d8] sm:$0xff]  ;;  %v1126_v32 = vsel %vm998_vm3, %v934_v12, %v1062_v25  ;;  %v1067_v33 = vmul.f32 0.01, %v939_v16  ;;  %vm1035_vm6 = vcmp.gt.f32.partialorder %v971_v20, 0.0  ;;  %v938_v34 = vld [vmem:[#allocation2 + $0xc8] sm:$0xff]  ;;  %v121_v35 = vld [vmem:[#allocation2 + $0xf0] sm:$0xff]  ;;  %v809_v4 = vadd.f32 %v638_v37, %v119_v43 }
 0x127   :  { %1224 = vst.msk [vmem:[%s2084_s3 + $0x1b8] sm:$0xff] %vm26_vm1, %v1160_v31  ;;  %1190 = vst.msk [vmem:[%s2084_s3 + $0xa8] sm:$0xff] %vm26_vm1, %v1126_v32  ;;  %v1158_v38 = vsel %vm1030_vm4, %v966_v15, %v1094_v28  ;;  %v1099_v39 = vmul.f32 0.01, %v971_v20  ;;  %vm1001_vm7 = vcmp.gt.f32.partialorder %v937_v21, 0.0  ;;  %v970_v41 = vld [vmem:[#allocation2 + $0x1c8] sm:$0xff]  ;;  %v811_v62 = vadd.f32 %v1372_v22, %v121_v35 }
 0x128   :  { %v1065_v40 = vmul.f32 0.01, %v937_v21  ;;  %1222 = vst.msk [vmem:[%s2084_s3 + $0x1a8] sm:$0xff] %vm26_vm1, %v1158_v38  ;;  %v1131_v44 = vsel %vm1003_vm5, %v939_v16, %v1067_v33  ;;  %vm1033_vm8 = vcmp.gt.f32.partialorder %v969_v26, 0.0  ;;  %v1097_v45 = vmul.f32 0.01, %v969_v26 }
 0x129   :  { %vm1004_vm9 = vcmp.gt.f32.partialorder %v940_v29, 0.0  ;;  %v151_v46 = vld [vmem:[#allocation2 + $0x1e0] sm:$0xff]  ;;  %1195 = vst.msk [vmem:[%s2084_s3 + $0xd0] sm:$0xff] %vm26_vm1, %v1131_v44  ;;  %v1163_v50 = vsel %vm1035_vm6, %v971_v20, %v1099_v39  ;;  %v1068_v52 = vmul.f32 0.01, %v940_v29  ;;  %vm1036_vm10 = vcmp.gt.f32.partialorder %v972_v30, 0.0 }
 0x12a   :  { %v1129_v51 = vsel %vm1001_vm7, %v937_v21, %v1065_v40  ;;  %v154_v53 = vld [vmem:[#allocation2 + $0x1f8] sm:$0xff]  ;;  %v1405_v54 = vpop.f32.mrb[30].mxu1  ;;  %v641_v55 = vpop.f32.mrb[31].mxu0  ;;  %1227 = vst.msk [vmem:[%s2084_s3 + $0x1d0] sm:$0xff] %vm26_vm1, %v1163_v50  ;;  %v1161_v56 = vsel %vm1033_vm8, %v969_v26, %v1097_v45  ;;  %v1100_v57 = vmul.f32 0.01, %v972_v30  ;;  %v841_v6 = vadd.f32 %v766_v47, %v151_v46 }
 0x12b   :  { %1193 = vst.msk [vmem:[%s2084_s3 + $0xc0] sm:$0xff] %vm26_vm1, %v1129_v51  ;;  %vm1002_vm11 = vcmp.gt.f32.partialorder %v938_v34, 0.0  ;;  %v1066_v58 = vmul.f32 0.01, %v938_v34  ;;  %v769_v59 = vpop.f32.mrb[31].mxu1  ;;  %1225 = vst.msk [vmem:[%s2084_s3 + $0x1c0] sm:$0xff] %vm26_vm1, %v1161_v56  ;;  %v1132_v60 = vsel %vm1004_vm9, %v940_v29, %v1068_v52  ;;  %v844_v8 = vadd.f32 %v1405_v54, %v154_v53 }
 0x12c   :  { %vm1034_vm12 = vcmp.gt.f32.partialorder %v970_v41, 0.0  ;;  %v1098_v61 = vmul.f32 0.01, %v970_v41  ;;  %v120_v63 = vld [vmem:[#allocation2 + $0xe8] sm:$0xff]  ;;  %1196 = vst.msk [vmem:[%s2084_s3 + $0xd8] sm:$0xff] %vm26_vm1, %v1132_v60  ;;  %v1164_v1 = vsel %vm1036_vm10, %v972_v30, %v1100_v57  ;;  %876 = vst.msk [vmem:[#allocation2 + $0xf0] sm:$0xff] %vm26_vm1, %v811_v62 }
 0x12d   :  { %v152_v0 = vld [vmem:[#allocation2 + $0x1e8] sm:$0xff]  ;;  %v1130_v2 = vsel %vm1002_vm11, %v938_v34, %v1066_v58  ;;  %1228 = vst.msk [vmem:[%s2084_s3 + $0x1d8] sm:$0xff] %vm26_vm1, %v1164_v1  ;;  %908 = vst.msk [vmem:[#allocation2 + $0x1f0] sm:$0xff] %vm26_vm1, %v843_v3  ;;  %v810_v9 = vadd.f32 %v641_v55, %v120_v63 }
 0x12e   :  { %1194 = vst.msk [vmem:[%s2084_s3 + $0xc8] sm:$0xff] %vm26_vm1, %v1130_v2  ;;  %v1162_v5 = vsel %vm1034_vm12, %v970_v41, %v1098_v61  ;;  %874 = vst.msk [vmem:[#allocation2 + $0xe0] sm:$0xff] %vm26_vm1, %v809_v4  ;;  %v842_v10 = vadd.f32 %v769_v59, %v152_v0 }
 0x12f   :  { %1226 = vst.msk [vmem:[%s2084_s3 + $0x1c8] sm:$0xff] %vm26_vm1, %v1162_v5  ;;  %906 = vst.msk [vmem:[#allocation2 + $0x1e0] sm:$0xff] %vm26_vm1, %v841_v6 }
 0x130   :  { %877 = vst.msk [vmem:[#allocation2 + $0xf8] sm:$0xff] %vm26_vm1, %v812_v7  ;;  %909 = vst.msk [vmem:[#allocation2 + $0x1f8] sm:$0xff] %vm26_vm1, %v844_v8 }
 0x131   :  { %875 = vst.msk [vmem:[#allocation2 + $0xe8] sm:$0xff] %vm26_vm1, %v810_v9  ;;  %907 = vst.msk [vmem:[#allocation2 + $0x1e8] sm:$0xff] %vm26_vm1, %v842_v10 }
 0x133   :  { %v943_v11 = vld [vmem:[#allocation2 + $0xf0] sm:$0xff] }
 0x134   :  { %vm1007_vm13 = vcmp.gt.f32.partialorder %v943_v11, 0.0  ;;  %v1071_v12 = vmul.f32 0.01, %v943_v11  ;;  %v975_v13 = vld [vmem:[#allocation2 + $0x1f0] sm:$0xff] }
 0x135   :  { %v941_v14 = vld [vmem:[#allocation2 + $0xe0] sm:$0xff]  ;;  %vm1039_vm14 = vcmp.gt.f32.partialorder %v975_v13, 0.0  ;;  %v1103_v15 = vmul.f32 0.01, %v975_v13 }
 0x136   :  { %vm1005_vm15 = vcmp.gt.f32.partialorder %v941_v14, 0.0  ;;  %v1069_v16 = vmul.f32 0.01, %v941_v14  ;;  %v1135_v17 = vsel %vm1007_vm13, %v943_v11, %v1071_v12  ;;  %v973_v18 = vld [vmem:[#allocation2 + $0x1e0] sm:$0xff] }
 0x137   :  { %v944_v19 = vld [vmem:[#allocation2 + $0xf8] sm:$0xff]  ;;  %1199 = vst.msk [vmem:[%s2084_s3 + $0xf0] sm:$0xff] %vm26_vm1, %v1135_v17  ;;  %v1167_v21 = vsel %vm1039_vm14, %v975_v13, %v1103_v15  ;;  %vm1037_vm0 = vcmp.gt.f32.partialorder %v973_v18, 0.0  ;;  %v1101_v23 = vmul.f32 0.01, %v973_v18 }
 0x138   :  { %v976_v20 = vld [vmem:[#allocation2 + $0x1f8] sm:$0xff]  ;;  %v1133_v22 = vsel %vm1005_vm15, %v941_v14, %v1069_v16  ;;  %v942_v24 = vld [vmem:[#allocation2 + $0xe8] sm:$0xff]  ;;  %1231 = vst.msk [vmem:[%s2084_s3 + $0x1f0] sm:$0xff] %vm26_vm1, %v1167_v21  ;;  %vm1008_vm2 = vcmp.gt.f32.partialorder %v944_v19, 0.0  ;;  %v1072_v26 = vmul.f32 0.01, %v944_v19 }
 0x139   :  { %v974_v25 = vld [vmem:[#allocation2 + $0x1e8] sm:$0xff]  ;;  %1197 = vst.msk [vmem:[%s2084_s3 + $0xe0] sm:$0xff] %vm26_vm1, %v1133_v22  ;;  %vm1040_vm3 = vcmp.gt.f32.partialorder %v976_v20, 0.0  ;;  %v1104_v27 = vmul.f32 0.01, %v976_v20  ;;  %v1165_v28 = vsel %vm1037_vm0, %v973_v18, %v1101_v23  ;;  %vm1006_vm4 = vcmp.gt.f32.partialorder %v942_v24, 0.0 }
 0x13a   :  { %v1070_v29 = vmul.f32 0.01, %v942_v24  ;;  %vm1038_vm5 = vcmp.gt.f32.partialorder %v974_v25, 0.0  ;;  %1229 = vst.msk [vmem:[%s2084_s3 + $0x1e0] sm:$0xff] %vm26_vm1, %v1165_v28  ;;  %v1136_v30 = vsel %vm1008_vm2, %v944_v19, %v1072_v26  ;;  %v1102_v32 = vmul.f32 0.01, %v974_v25 }
 0x13b   :  { %v1168_v31 = vsel %vm1040_vm3, %v976_v20, %v1104_v27  ;;  %1200 = vst.msk [vmem:[%s2084_s3 + $0xf8] sm:$0xff] %vm26_vm1, %v1136_v30 }
 0x13c   :  { %1232 = vst.msk [vmem:[%s2084_s3 + $0x1f8] sm:$0xff] %vm26_vm1, %v1168_v31  ;;  %v1134_v33 = vsel %vm1006_vm4, %v942_v24, %v1070_v29  ;;  %v1166_v34 = vsel %vm1038_vm5, %v974_v25, %v1102_v32 }
 0x13d   :  { %1198 = vst.msk [vmem:[%s2084_s3 + $0xe8] sm:$0xff] %vm26_vm1, %v1134_v33  ;;  %1230 = vst.msk [vmem:[%s2084_s3 + $0x1e8] sm:$0xff] %vm26_vm1, %v1166_v34 }

// kernel: msca_forward.14
= control target key start
LH: loop header
LB: loop body
LE: loop exit
PB: predicated region body
PF: predicated region fallthrough
CT: control target
= control target key end

     0   :  { %vm415_vm0 = vcmask 588800   ;;  %vm512_vm1 = vcmask 1043456   ;;  %vm26_vm2 = vcmask 64512   ;;  %s2149_s1 = inlined_call_operand.vmem [shape: bf16[72,8], index: 1, kind: input, shape index: {}]   ;;  %s2150_s0 = inlined_call_operand.vmem [shape: bf16[512,72], index: 0, kind: input, shape index: {}]   ;;  %s2151_s2 = inlined_call_operand.vmem [shape: f32[1,8], index: 2, kind: input, shape index: {}]   ;;  %s2152_s3 = inlined_call_operand.vmem [shape: f32[512,8], index: 3, kind: output, shape index: {}]  }
   0x1   :  { %v1454_v0 = vld [vmem:[%s2149_s1] sm:$0xff]   ;;  %v1455_v1 = vld [vmem:[%s2149_s1 + $0x8] sm:$0xff]   ;;  %v1456_v2 = vld [vmem:[%s2149_s1 + $0x10] sm:$0xff]  }
   0x2   :  { %1368 = vmatprep.subr.bf16.mxu0 %v1454_v0  ;;  %1442 = vmatprep.subr.bf16.mxu1 %v1454_v0  ;;  %v1459_v3 = vld [vmem:[%s2150_s0] sm:$0xff]   ;;  %v1457_v5 = vld [vmem:[%s2149_s1 + $0x18] sm:$0xff]   ;;  %v1461_v8 = vld [vmem:[%s2150_s0 + $0x8] sm:$0xff]  }
   0x3   :  { %1369 = vmatpush3.bf16.msra.mxu0 %v1454_v0  ;;  %1447 = vmatpush3.bf16.msra.mxu1 %v1454_v0  ;;  %v1460_v4 = vld [vmem:[%s2150_s0 + $0x80] sm:$0xff]   ;;  %v1462_v9 = vld [vmem:[%s2150_s0 + $0x88] sm:$0xff]   ;;  %v1463_v10 = vld [vmem:[%s2150_s0 + $0x10] sm:$0xff]  }
   0x4   :  { %1370 = vmatprep.subr.bf16.mxu0 %v1455_v1  ;;  %1443 = vmatprep.subr.bf16.mxu1 %v1455_v1  ;;  %v1458_v6 = vld [vmem:[%s2149_s1 + $0x20] ss:$0 sps:$4 sm:$0xff]   ;;  %v1464_v11 = vld [vmem:[%s2150_s0 + $0x90] sm:$0xff]   ;;  %v1465_v12 = vld [vmem:[%s2150_s0 + $0x18] sm:$0xff]  }
   0x5   :  { %1378 = vmatprep.mubr.msk.bf16.mxu0 %vm415_vm0, %v1459_v3  ;;  %1410 = vmatprep.mubr.msk.bf16.mxu1 %vm415_vm0, %v1460_v4  ;;  %v514_v7 = vsel %vm512_vm1, %v1458_v6, 0  ;;  %v1466_v13 = vld [vmem:[%s2150_s0 + $0x98] sm:$0xff]   ;;  %v1467_v14 = vld [vmem:[%s2150_s0 + $0x20] sm:$0xff]   ;;  %v1569_v16 = vld [vmem:[%s2150_s0 + $0x28] sm:$0xff]  }
   0x6   :  { %v1468_v15 = vld [vmem:[%s2150_s0 + $0xa0] sm:$0xff]   ;;  %v1574_v17 = vld [vmem:[%s2150_s0 + $0xa8] sm:$0xff]   ;;  %v1579_v18 = vld [vmem:[%s2150_s0 + $0x30] sm:$0xff]  }
   0x7   :  { %1371 = vmatpush3.bf16.msra.mxu0 %v1455_v1  ;;  %1448 = vmatpush3.bf16.msra.mxu1 %v1455_v1  ;;  %v1584_v19 = vld [vmem:[%s2150_s0 + $0xb0] sm:$0xff]   ;;  %v1589_v20 = vld [vmem:[%s2151_s2] ss:$0 sm:$0xff]  ;;  %v1473_v21 = vld [vmem:[%s2150_s0 + $0x38] sm:$0xff]  }
   0x8   :  { %1372 = vmatprep.subr.bf16.mxu0 %v1456_v2  ;;  %1444 = vmatprep.subr.bf16.mxu1 %v1456_v2  ;;  %29 = vst.msk [vmem:[#allocation2 + $0x10] sm:$0xff] %vm26_vm2, %v1589_v20  ;;  %27 = vst.msk [vmem:[#allocation2] sm:$0xff] %vm26_vm2, %v1589_v20  ;;  %v1474_v22 = vld [vmem:[%s2150_s0 + $0xb8] sm:$0xff]   ;;  %v1475_v23 = vld [vmem:[%s2150_s0 + $0x40] sm:$0xff]  }
   0x9   :  { %28 = vst.msk [vmem:[#allocation2 + $0x8] sm:$0xff] %vm26_vm2, %v1589_v20  ;;  %30 = vst.msk [vmem:[#allocation2 + $0x18] sm:$0xff] %vm26_vm2, %v1589_v20  ;;  %v1476_v24 = vld [vmem:[%s2150_s0 + $0xc0] sm:$0xff]   ;;  %v1477_v25 = vld [vmem:[%s2150_s0 + $0x48] sm:$0xff]  }
   0xa   :  { %31 = vst.msk [vmem:[#allocation2 + $0x20] sm:$0xff] %vm26_vm2, %v1589_v20  ;;  %32 = vst.msk [vmem:[#allocation2 + $0x28] sm:$0xff] %vm26_vm2, %v1589_v20  ;;  %v1478_v26 = vld [vmem:[%s2150_s0 + $0xc8] sm:$0xff]   ;;  %v1479_v27 = vld [vmem:[%s2150_s0 + $0x50] sm:$0xff]  }
   0xb   :  { %1373 = vmatpush3.bf16.msra.mxu0 %v1456_v2  ;;  %1449 = vmatpush3.bf16.msra.mxu1 %v1456_v2  ;;  %33 = vst.msk [vmem:[#allocation2 + $0x30] sm:$0xff] %vm26_vm2, %v1589_v20  ;;  %34 = vst.msk [vmem:[#allocation2 + $0x38] sm:$0xff] %vm26_vm2, %v1589_v20  ;;  %v1480_v28 = vld [vmem:[%s2150_s0 + $0xd0] sm:$0xff]   ;;  %v1481_v29 = vld [vmem:[%s2150_s0 + $0x58] sm:$0xff]  }
   0xc   :  { %1374 = vmatprep.subr.bf16.mxu0 %v1457_v5  ;;  %1445 = vmatprep.subr.bf16.mxu1 %v1457_v5  ;;  %35 = vst.msk [vmem:[#allocation2 + $0x40] sm:$0xff] %vm26_vm2, %v1589_v20  ;;  %36 = vst.msk [vmem:[#allocation2 + $0x48] sm:$0xff] %vm26_vm2, %v1589_v20  ;;  %v1482_v30 = vld [vmem:[%s2150_s0 + $0xd8] sm:$0xff]   ;;  %v1483_v31 = vld [vmem:[%s2150_s0 + $0x60] sm:$0xff]  }
   0xd   :  { %37 = vst.msk [vmem:[#allocation2 + $0x50] sm:$0xff] %vm26_vm2, %v1589_v20  ;;  %38 = vst.msk [vmem:[#allocation2 + $0x58] sm:$0xff] %vm26_vm2, %v1589_v20  ;;  %v1484_v32 = vld [vmem:[%s2150_s0 + $0xe0] sm:$0xff]   ;;  %v1485_v33 = vld [vmem:[%s2150_s0 + $0x68] sm:$0xff]  }
   0xe   :  { %39 = vst.msk [vmem:[#allocation2 + $0x60] sm:$0xff] %vm26_vm2, %v1589_v20  ;;  %40 = vst.msk [vmem:[#allocation2 + $0x68] sm:$0xff] %vm26_vm2, %v1589_v20  ;;  %v1486_v34 = vld [vmem:[%s2150_s0 + $0xe8] sm:$0xff]   ;;  %v1487_v35 = vld [vmem:[%s2150_s0 + $0x70] sm:$0xff]  }
   0xf   :  { %1375 = vmatpush3.bf16.msra.mxu0 %v1457_v5  ;;  %1450 = vmatpush3.bf16.msra.mxu1 %v1457_v5  ;;  %41 = vst.msk [vmem:[#allocation2 + $0x70] sm:$0xff] %vm26_vm2, %v1589_v20  ;;  %42 = vst.msk [vmem:[#allocation2 + $0x78] sm:$0xff] %vm26_vm2, %v1589_v20  ;;  %v1488_v36 = vld [vmem:[%s2150_s0 + $0xf0] sm:$0xff]   ;;  %v1489_v37 = vld [vmem:[%s2150_s0 + $0x78] sm:$0xff]  }
  0x10   :  { %1452 = vmatprep.subr.msk.bf16.mxu0 %vm512_vm1, %v1458_v6  ;;  %1453 = vmatprep.subr.msk.bf16.mxu1 %vm512_vm1, %v1458_v6  ;;  %43 = vst.msk [vmem:[#allocation2 + $0x80] sm:$0xff] %vm26_vm2, %v1589_v20  ;;  %44 = vst.msk [vmem:[#allocation2 + $0x88] sm:$0xff] %vm26_vm2, %v1589_v20  ;;  %v1490_v38 = vld [vmem:[%s2150_s0 + $0xf8] sm:$0xff]   ;;  %v93_v39 = vld [vmem:[#allocation2 + $0x10] sm:$0xff] }
  0x11   :  { %45 = vst.msk [vmem:[#allocation2 + $0x90] sm:$0xff] %vm26_vm2, %v1589_v20  ;;  %46 = vst.msk [vmem:[#allocation2 + $0x98] sm:$0xff] %vm26_vm2, %v1589_v20  ;;  %v91_v41 = vld [vmem:[#allocation2] sm:$0xff]  ;;  %v94_v45 = vld [vmem:[#allocation2 + $0x18] sm:$0xff] }
  0x12   :  { %47 = vst.msk [vmem:[#allocation2 + $0xa0] sm:$0xff] %vm26_vm2, %v1589_v20  ;;  %48 = vst.msk [vmem:[#allocation2 + $0xa8] sm:$0xff] %vm26_vm2, %v1589_v20  ;;  %v92_v51 = vld [vmem:[#allocation2 + $0x8] sm:$0xff]  ;;  %v97_v63 = vld [vmem:[#allocation2 + $0x30] sm:$0xff] }
  0x13   :  { %1377 = vmatpush3.bf16.msra.mxu0 %v514_v7  ;;  %1451 = vmatpush3.bf16.msra.mxu1 %v514_v7  ;;  %49 = vst.msk [vmem:[#allocation2 + $0xb0] sm:$0xff] %vm26_vm2, %v1589_v20  ;;  %50 = vst.msk [vmem:[#allocation2 + $0xb8] sm:$0xff] %vm26_vm2, %v1589_v20  ;;  %v95_v1 = vld [vmem:[#allocation2 + $0x20] sm:$0xff] }
  0x14   :  { %51 = vst.msk [vmem:[#allocation2 + $0xc0] sm:$0xff] %vm26_vm2, %v1589_v20  ;;  %52 = vst.msk [vmem:[#allocation2 + $0xc8] sm:$0xff] %vm26_vm2, %v1589_v20 }
  0x15   :  { %53 = vst.msk [vmem:[#allocation2 + $0xd0] sm:$0xff] %vm26_vm2, %v1589_v20  ;;  %54 = vst.msk [vmem:[#allocation2 + $0xd8] sm:$0xff] %vm26_vm2, %v1589_v20 }
  0x16   :  { %1379 = vmatmul.mubr.msk.bf16.vlgmr.msra.gmra.mrb[0].mxu0 %vm415_vm0, %v1461_v8  ;;  %1411 = vmatmul.mubr.msk.bf16.vlgmr.msra.gmra.mrb[0].mxu1 %vm415_vm0, %v1462_v9  ;;  %55 = vst.msk [vmem:[#allocation2 + $0xe0] sm:$0xff] %vm26_vm2, %v1589_v20  ;;  %56 = vst.msk [vmem:[#allocation2 + $0xe8] sm:$0xff] %vm26_vm2, %v1589_v20  ;;  %v98_v9 = vld [vmem:[#allocation2 + $0x38] sm:$0xff] }
  0x17   :  { %1382 = vmatprep.mubr.msk.bf16.mxu0 %vm415_vm0, %v1463_v10  ;;  %1414 = vmatprep.mubr.msk.bf16.mxu1 %vm415_vm0, %v1464_v11  ;;  %57 = vst.msk [vmem:[#allocation2 + $0xf0] sm:$0xff] %vm26_vm2, %v1589_v20  ;;  %58 = vst.msk [vmem:[#allocation2 + $0xf8] sm:$0xff] %vm26_vm2, %v1589_v20 }
  0x18   :  { %59 = vst.msk [vmem:[#allocation2 + $0x100] sm:$0xff] %vm26_vm2, %v1589_v20  ;;  %60 = vst.msk [vmem:[#allocation2 + $0x108] sm:$0xff] %vm26_vm2, %v1589_v20 }
  0x19   :  { %61 = vst.msk [vmem:[#allocation2 + $0x110] sm:$0xff] %vm26_vm2, %v1589_v20  ;;  %62 = vst.msk [vmem:[#allocation2 + $0x118] sm:$0xff] %vm26_vm2, %v1589_v20 }
  0x1a   :  { %63 = vst.msk [vmem:[#allocation2 + $0x120] sm:$0xff] %vm26_vm2, %v1589_v20  ;;  %64 = vst.msk [vmem:[#allocation2 + $0x128] sm:$0xff] %vm26_vm2, %v1589_v20 }
  0x1b   :  { %65 = vst.msk [vmem:[#allocation2 + $0x130] sm:$0xff] %vm26_vm2, %v1589_v20  ;;  %66 = vst.msk [vmem:[#allocation2 + $0x138] sm:$0xff] %vm26_vm2, %v1589_v20 }
  0x1c   :  { %67 = vst.msk [vmem:[#allocation2 + $0x140] sm:$0xff] %vm26_vm2, %v1589_v20  ;;  %68 = vst.msk [vmem:[#allocation2 + $0x148] sm:$0xff] %vm26_vm2, %v1589_v20 }
  0x1d   :  { %69 = vst.msk [vmem:[#allocation2 + $0x150] sm:$0xff] %vm26_vm2, %v1589_v20  ;;  %70 = vst.msk [vmem:[#allocation2 + $0x158] sm:$0xff] %vm26_vm2, %v1589_v20 }
  0x1e   :  { %1383 = vmatmul.mubr.msk.bf16.gmra.mrb[4].mxu0 %vm415_vm0, %v1465_v12  ;;  %1415 = vmatmul.mubr.msk.bf16.gmra.mrb[4].mxu1 %vm415_vm0, %v1466_v13  ;;  %71 = vst.msk [vmem:[#allocation2 + $0x160] sm:$0xff] %vm26_vm2, %v1589_v20  ;;  %72 = vst.msk [vmem:[#allocation2 + $0x168] sm:$0xff] %vm26_vm2, %v1589_v20 }
  0x1f   :  { %1386 = vmatprep.mubr.msk.bf16.mxu0 %vm415_vm0, %v1467_v14  ;;  %1418 = vmatprep.mubr.msk.bf16.mxu1 %vm415_vm0, %v1468_v15  ;;  %73 = vst.msk [vmem:[#allocation2 + $0x170] sm:$0xff] %vm26_vm2, %v1589_v20  ;;  %74 = vst.msk [vmem:[#allocation2 + $0x178] sm:$0xff] %vm26_vm2, %v1589_v20  ;;  %v123_v42 = vld [vmem:[#allocation2 + $0x100] sm:$0xff]  ;;  %v124_v52 = vld [vmem:[#allocation2 + $0x108] sm:$0xff] }
  0x20   :  { %75 = vst.msk [vmem:[#allocation2 + $0x180] sm:$0xff] %vm26_vm2, %v1589_v20  ;;  %76 = vst.msk [vmem:[#allocation2 + $0x188] sm:$0xff] %vm26_vm2, %v1589_v20  ;;  %v125_v40 = vld [vmem:[#allocation2 + $0x110] sm:$0xff]  ;;  %v126_v46 = vld [vmem:[#allocation2 + $0x118] sm:$0xff] }
  0x21   :  { %77 = vst.msk [vmem:[#allocation2 + $0x190] sm:$0xff] %vm26_vm2, %v1589_v20  ;;  %78 = vst.msk [vmem:[#allocation2 + $0x198] sm:$0xff] %vm26_vm2, %v1589_v20  ;;  %v127_v2 = vld [vmem:[#allocation2 + $0x120] sm:$0xff] }
  0x22   :  { %79 = vst.msk [vmem:[#allocation2 + $0x1a0] sm:$0xff] %vm26_vm2, %v1589_v20  ;;  %80 = vst.msk [vmem:[#allocation2 + $0x1a8] sm:$0xff] %vm26_vm2, %v1589_v20  ;;  %v129_v0 = vld [vmem:[#allocation2 + $0x130] sm:$0xff]  ;;  %v130_v10 = vld [vmem:[#allocation2 + $0x138] sm:$0xff] }
  0x23   :  { %81 = vst.msk [vmem:[#allocation2 + $0x1b0] sm:$0xff] %vm26_vm2, %v1589_v20  ;;  %82 = vst.msk [vmem:[#allocation2 + $0x1b8] sm:$0xff] %vm26_vm2, %v1589_v20 }
  0x24   :  { %83 = vst.msk [vmem:[#allocation2 + $0x1c0] sm:$0xff] %vm26_vm2, %v1589_v20  ;;  %84 = vst.msk [vmem:[#allocation2 + $0x1c8] sm:$0xff] %vm26_vm2, %v1589_v20 }
  0x25   :  { %85 = vst.msk [vmem:[#allocation2 + $0x1d0] sm:$0xff] %vm26_vm2, %v1589_v20  ;;  %86 = vst.msk [vmem:[#allocation2 + $0x1d8] sm:$0xff] %vm26_vm2, %v1589_v20 }
  0x26   :  { %87 = vst.msk [vmem:[#allocation2 + $0x1e0] sm:$0xff] %vm26_vm2, %v1589_v20  ;;  %88 = vst.msk [vmem:[#allocation2 + $0x1e8] sm:$0xff] %vm26_vm2, %v1589_v20  ;;  %1387 = vmatmul.mubr.msk.bf16.gmra.mrb[8].mxu0 %vm415_vm0, %v1569_v16  ;;  %1419 = vmatmul.mubr.msk.bf16.gmra.mrb[8].mxu1 %vm415_vm0, %v1574_v17 }
  0x27   :  { %89 = vst.msk [vmem:[#allocation2 + $0x1f0] sm:$0xff] %vm26_vm2, %v1589_v20  ;;  %90 = vst.msk [vmem:[#allocation2 + $0x1f8] sm:$0xff] %vm26_vm2, %v1589_v20  ;;  %1390 = vmatprep.mubr.msk.bf16.mxu0 %vm415_vm0, %v1579_v18  ;;  %1422 = vmatprep.mubr.msk.bf16.mxu1 %vm415_vm0, %v1584_v19 }
  0x2e   :  { %1391 = vmatmul.mubr.msk.bf16.gmra.mrb[12].mxu0 %vm415_vm0, %v1473_v21  ;;  %1423 = vmatmul.mubr.msk.bf16.gmra.mrb[12].mxu1 %vm415_vm0, %v1474_v22 }
  0x2f   :  { %1394 = vmatprep.mubr.msk.bf16.mxu0 %vm415_vm0, %v1475_v23  ;;  %1426 = vmatprep.mubr.msk.bf16.mxu1 %vm415_vm0, %v1476_v24  ;;  %v96_v24 = vld [vmem:[#allocation2 + $0x28] sm:$0xff] }
  0x36   :  { %1395 = vmatmul.mubr.msk.bf16.gmra.mrb[16].mxu0 %vm415_vm0, %v1477_v25  ;;  %1427 = vmatmul.mubr.msk.bf16.gmra.mrb[16].mxu1 %vm415_vm0, %v1478_v26  ;;  %v128_v26 = vld [vmem:[#allocation2 + $0x128] sm:$0xff] }
  0x37   :  { %1398 = vmatprep.mubr.msk.bf16.mxu0 %vm415_vm0, %v1479_v27  ;;  %1430 = vmatprep.mubr.msk.bf16.mxu1 %vm415_vm0, %v1480_v28 }
  0x3e   :  { %1399 = vmatmul.mubr.msk.bf16.gmra.mrb[20].mxu0 %vm415_vm0, %v1481_v29  ;;  %1431 = vmatmul.mubr.msk.bf16.gmra.mrb[20].mxu1 %vm415_vm0, %v1482_v30 }
  0x3f   :  { %1402 = vmatprep.mubr.msk.bf16.mxu0 %vm415_vm0, %v1483_v31  ;;  %1434 = vmatprep.mubr.msk.bf16.mxu1 %vm415_vm0, %v1484_v32 }
  0x46   :  { %1403 = vmatmul.mubr.msk.bf16.gmra.mrb[24].mxu0 %vm415_vm0, %v1485_v33  ;;  %1435 = vmatmul.mubr.msk.bf16.gmra.mrb[24].mxu1 %vm415_vm0, %v1486_v34  ;;  %v101_v34 = vld [vmem:[#allocation2 + $0x50] sm:$0xff] }
  0x47   :  { %1406 = vmatprep.mubr.msk.bf16.mxu0 %vm415_vm0, %v1487_v35  ;;  %1438 = vmatprep.mubr.msk.bf16.mxu1 %vm415_vm0, %v1488_v36 }
  0x4e   :  { %1407 = vmatmul.mubr.msk.bf16.gmra.mrb[28].mxu0 %vm415_vm0, %v1489_v37  ;;  %1439 = vmatmul.mubr.msk.bf16.gmra.mrb[28].mxu1 %vm415_vm0, %v1490_v38 }
  0xe9   :  { %v1380_v43 = vpop.f32.mrb[0].mxu0  ;;  %v1412_v44 = vpop.f32.mrb[0].mxu1 }
  0xea   :  { %v807_v47 = vadd.f32 %v1380_v43, %v93_v39  ;;  %v839_v48 = vadd.f32 %v1412_v44, %v125_v40  ;;  %v550_v49 = vpop.f32.mrb[1].mxu0  ;;  %v678_v50 = vpop.f32.mrb[1].mxu1  ;;  %v133_v39 = vld [vmem:[#allocation2 + $0x150] sm:$0xff]  ;;  %v99_v40 = vld [vmem:[#allocation2 + $0x40] sm:$0xff] }
  0xeb   :  { %v805_v53 = vadd.f32 %v550_v49, %v91_v41  ;;  %v837_v54 = vadd.f32 %v678_v50, %v123_v42  ;;  %v1381_v55 = vpop.f32.mrb[2].mxu0  ;;  %v1413_v56 = vpop.f32.mrb[2].mxu1 }
  0xec   :  { %872 = vst.msk [vmem:[#allocation2 + $0x10] sm:$0xff] %vm26_vm2, %v807_v47  ;;  %904 = vst.msk [vmem:[#allocation2 + $0x110] sm:$0xff] %vm26_vm2, %v839_v48  ;;  %v808_v57 = vadd.f32 %v1381_v55, %v94_v45  ;;  %v840_v58 = vadd.f32 %v1413_v56, %v126_v46  ;;  %v553_v59 = vpop.f32.mrb[3].mxu0  ;;  %v681_v60 = vpop.f32.mrb[3].mxu1 }
  0xed   :  { %870 = vst.msk [vmem:[#allocation2] sm:$0xff] %vm26_vm2, %v805_v53  ;;  %902 = vst.msk [vmem:[#allocation2 + $0x100] sm:$0xff] %vm26_vm2, %v837_v54  ;;  %v806_v61 = vadd.f32 %v553_v59, %v92_v51  ;;  %v838_v62 = vadd.f32 %v681_v60, %v124_v52  ;;  %v131_v51 = vld [vmem:[#allocation2 + $0x140] sm:$0xff]  ;;  %v102_v53 = vld [vmem:[#allocation2 + $0x58] sm:$0xff] }
  0xee   :  { %873 = vst.msk [vmem:[#allocation2 + $0x18] sm:$0xff] %vm26_vm2, %v808_v57  ;;  %905 = vst.msk [vmem:[#allocation2 + $0x118] sm:$0xff] %vm26_vm2, %v840_v58 }
  0xef   :  { %871 = vst.msk [vmem:[#allocation2 + $0x8] sm:$0xff] %vm26_vm2, %v806_v61  ;;  %903 = vst.msk [vmem:[#allocation2 + $0x108] sm:$0xff] %vm26_vm2, %v838_v62  ;;  %v134_v61 = vld [vmem:[#allocation2 + $0x158] sm:$0xff] }
  0xf1   :  { %v1384_v3 = vpop.f32.mrb[4].mxu0  ;;  %v1416_v4 = vpop.f32.mrb[4].mxu1 }
  0xf2   :  { %v811_v5 = vadd.f32 %v1384_v3, %v97_v63  ;;  %v843_v6 = vadd.f32 %v1416_v4, %v129_v0  ;;  %v566_v7 = vpop.f32.mrb[5].mxu0  ;;  %v694_v8 = vpop.f32.mrb[5].mxu1  ;;  %v100_v3 = vld [vmem:[#allocation2 + $0x48] sm:$0xff] }
  0xf3   :  { %v939_v11 = vld [vmem:[#allocation2 + $0x10] sm:$0xff]  ;;  %v809_v13 = vadd.f32 %v566_v7, %v95_v1  ;;  %v841_v14 = vadd.f32 %v694_v8, %v127_v2  ;;  %v1385_v15 = vpop.f32.mrb[6].mxu0  ;;  %v1417_v16 = vpop.f32.mrb[6].mxu1  ;;  %v132_v4 = vld [vmem:[#allocation2 + $0x148] sm:$0xff] }
  0xf4   :  { %v971_v12 = vld [vmem:[#allocation2 + $0x110] sm:$0xff]  ;;  %vm1003_vm3 = vcmp.gt.f32.partialorder %v939_v11, 0.0  ;;  %v1067_v17 = vmul.f32 0.01, %v939_v11  ;;  %876 = vst.msk [vmem:[#allocation2 + $0x30] sm:$0xff] %vm26_vm2, %v811_v5  ;;  %908 = vst.msk [vmem:[#allocation2 + $0x130] sm:$0xff] %vm26_vm2, %v843_v6  ;;  %v812_v22 = vadd.f32 %v1385_v15, %v98_v9  ;;  %v844_v23 = vadd.f32 %v1417_v16, %v130_v10 }
  0xf5   :  { %vm1035_vm4 = vcmp.gt.f32.partialorder %v971_v12, 0.0  ;;  %v1099_v18 = vmul.f32 0.01, %v971_v12  ;;  %v937_v19 = vld [vmem:[#allocation2] sm:$0xff]  ;;  %v940_v21 = vld [vmem:[#allocation2 + $0x18] sm:$0xff]  ;;  %874 = vst.msk [vmem:[#allocation2 + $0x20] sm:$0xff] %vm26_vm2, %v809_v13 }
  0xf6   :  { %v969_v20 = vld [vmem:[#allocation2 + $0x100] sm:$0xff]  ;;  %906 = vst.msk [vmem:[#allocation2 + $0x120] sm:$0xff] %vm26_vm2, %v841_v14  ;;  %v569_v25 = vpop.f32.mrb[7].mxu0  ;;  %v697_v27 = vpop.f32.mrb[7].mxu1  ;;  %v1131_v28 = vsel %vm1003_vm3, %v939_v11, %v1067_v17  ;;  %vm1001_vm5 = vcmp.gt.f32.partialorder %v937_v19, 0.0  ;;  %v972_v31 = vld [vmem:[#allocation2 + $0x118] sm:$0xff] }
  0xf7   :  { %v1163_v29 = vsel %vm1035_vm4, %v971_v12, %v1099_v18  ;;  %v1065_v30 = vmul.f32 0.01, %v937_v19  ;;  %v938_v32 = vld [vmem:[#allocation2 + $0x8] sm:$0xff]  ;;  %1195 = vst.msk [vmem:[%s2152_s3 + $0x10] sm:$0xff] %vm26_vm2, %v1131_v28  ;;  %vm1033_vm6 = vcmp.gt.f32.partialorder %v969_v20, 0.0  ;;  %vm1004_vm7 = vcmp.gt.f32.partialorder %v940_v21, 0.0 }
  0xf8   :  { %v970_v33 = vld [vmem:[#allocation2 + $0x108] sm:$0xff]  ;;  %1227 = vst.msk [vmem:[%s2152_s3 + $0x110] sm:$0xff] %vm26_vm2, %v1163_v29  ;;  %v1097_v35 = vmul.f32 0.01, %v969_v20  ;;  %v1068_v36 = vmul.f32 0.01, %v940_v21  ;;  %v810_v48 = vadd.f32 %v569_v25, %v96_v24  ;;  %v842_v49 = vadd.f32 %v697_v27, %v128_v26 }
  0xf9   :  { %877 = vst.msk [vmem:[#allocation2 + $0x38] sm:$0xff] %vm26_vm2, %v812_v22  ;;  %909 = vst.msk [vmem:[#allocation2 + $0x138] sm:$0xff] %vm26_vm2, %v844_v23  ;;  %v1129_v37 = vsel %vm1001_vm5, %v937_v19, %v1065_v30  ;;  %vm1036_vm8 = vcmp.gt.f32.partialorder %v972_v31, 0.0  ;;  %v1100_v38 = vmul.f32 0.01, %v972_v31  ;;  %vm1002_vm9 = vcmp.gt.f32.partialorder %v938_v32, 0.0 }
  0xfa   :  { %1193 = vst.msk [vmem:[%s2152_s3] sm:$0xff] %vm26_vm2, %v1129_v37  ;;  %v1161_v41 = vsel %vm1033_vm6, %v969_v20, %v1097_v35  ;;  %v1132_v42 = vsel %vm1004_vm7, %v940_v21, %v1068_v36  ;;  %v1066_v43 = vmul.f32 0.01, %v938_v32  ;;  %vm1034_vm10 = vcmp.gt.f32.partialorder %v970_v33, 0.0  ;;  %v1388_v44 = vpop.f32.mrb[8].mxu0  ;;  %v1420_v45 = vpop.f32.mrb[8].mxu1 }
  0xfb   :  { %1225 = vst.msk [vmem:[%s2152_s3 + $0x100] sm:$0xff] %vm26_vm2, %v1161_v41  ;;  %1196 = vst.msk [vmem:[%s2152_s3 + $0x18] sm:$0xff] %vm26_vm2, %v1132_v42  ;;  %v1164_v46 = vsel %vm1036_vm8, %v972_v31, %v1100_v38  ;;  %v1098_v47 = vmul.f32 0.01, %v970_v33  ;;  %v582_v50 = vpop.f32.mrb[9].mxu0  ;;  %v710_v52 = vpop.f32.mrb[9].mxu1  ;;  %v815_v57 = vadd.f32 %v1388_v44, %v101_v34  ;;  %v847_v58 = vadd.f32 %v1420_v45, %v133_v39 }
  0xfc   :  { %1228 = vst.msk [vmem:[%s2152_s3 + $0x118] sm:$0xff] %vm26_vm2, %v1164_v46  ;;  %v1130_v54 = vsel %vm1002_vm9, %v938_v32, %v1066_v43  ;;  %v943_v55 = vld [vmem:[#allocation2 + $0x30] sm:$0xff]  ;;  %v813_v59 = vadd.f32 %v582_v50, %v99_v40  ;;  %v1389_v60 = vpop.f32.mrb[10].mxu0  ;;  %v1421_v62 = vpop.f32.mrb[10].mxu1  ;;  %v941_v1 = vld [vmem:[#allocation2 + $0x20] sm:$0xff]  ;;  %875 = vst.msk [vmem:[#allocation2 + $0x28] sm:$0xff] %vm26_vm2, %v810_v48  ;;  %v845_v11 = vadd.f32 %v710_v52, %v131_v51 }
  0xfd   :  { %v975_v56 = vld [vmem:[#allocation2 + $0x130] sm:$0xff]  ;;  %1194 = vst.msk [vmem:[%s2152_s3 + $0x8] sm:$0xff] %vm26_vm2, %v1130_v54  ;;  %v1162_v63 = vsel %vm1034_vm10, %v970_v33, %v1098_v47  ;;  %vm1007_vm11 = vcmp.gt.f32.partialorder %v943_v55, 0.0  ;;  %v1071_v0 = vmul.f32 0.01, %v943_v55  ;;  %v973_v2 = vld [vmem:[#allocation2 + $0x120] sm:$0xff]  ;;  %v816_v12 = vadd.f32 %v1389_v60, %v102_v53 }
  0xfe   :  { %vm1039_vm12 = vcmp.gt.f32.partialorder %v975_v56, 0.0  ;;  %907 = vst.msk [vmem:[#allocation2 + $0x128] sm:$0xff] %vm26_vm2, %v842_v49  ;;  %1226 = vst.msk [vmem:[%s2152_s3 + $0x108] sm:$0xff] %vm26_vm2, %v1162_v63  ;;  %v1103_v5 = vmul.f32 0.01, %v975_v56  ;;  %vm1005_vm13 = vcmp.gt.f32.partialorder %v941_v1, 0.0  ;;  %v848_v22 = vadd.f32 %v1421_v62, %v134_v61 }
  0xff   :  { %v1069_v6 = vmul.f32 0.01, %v941_v1  ;;  %vm1037_vm14 = vcmp.gt.f32.partialorder %v973_v2, 0.0  ;;  %880 = vst.msk [vmem:[#allocation2 + $0x50] sm:$0xff] %vm26_vm2, %v815_v57  ;;  %912 = vst.msk [vmem:[#allocation2 + $0x150] sm:$0xff] %vm26_vm2, %v847_v58  ;;  %v1135_v7 = vsel %vm1007_vm11, %v943_v55, %v1071_v0  ;;  %v585_v13 = vpop.f32.mrb[11].mxu0 }
 0x100   :  { %878 = vst.msk [vmem:[#allocation2 + $0x40] sm:$0xff] %vm26_vm2, %v813_v59  ;;  %v1101_v8 = vmul.f32 0.01, %v973_v2  ;;  %v944_v9 = vld [vmem:[#allocation2 + $0x38] sm:$0xff]  ;;  %v713_v14 = vpop.f32.mrb[11].mxu1  ;;  %1199 = vst.msk [vmem:[%s2152_s3 + $0x30] sm:$0xff] %vm26_vm2, %v1135_v7  ;;  %v1167_v15 = vsel %vm1039_vm12, %v975_v56, %v1103_v5  ;;  %v814_v26 = vadd.f32 %v585_v13, %v100_v3 }
 0x101   :  { %v976_v10 = vld [vmem:[#allocation2 + $0x138] sm:$0xff]  ;;  %v1133_v16 = vsel %vm1005_vm13, %v941_v1, %v1069_v6  ;;  %vm1008_vm15 = vcmp.gt.f32.partialorder %v944_v9, 0.0  ;;  %v1072_v17 = vmul.f32 0.01, %v944_v9  ;;  %v105_v18 = vld [vmem:[#allocation2 + $0x70] sm:$0xff]  ;;  %1231 = vst.msk [vmem:[%s2152_s3 + $0x130] sm:$0xff] %vm26_vm2, %v1167_v15  ;;  %v846_v27 = vadd.f32 %v713_v14, %v132_v4 }
 0x102   :  { %v137_v19 = vld [vmem:[#allocation2 + $0x170] sm:$0xff]  ;;  %1197 = vst.msk [vmem:[%s2152_s3 + $0x20] sm:$0xff] %vm26_vm2, %v1133_v16  ;;  %v1165_v20 = vsel %vm1037_vm14, %v973_v2, %v1101_v8  ;;  %vm1040_vm0 = vcmp.gt.f32.partialorder %v976_v10, 0.0  ;;  %v1104_v21 = vmul.f32 0.01, %v976_v10  ;;  %910 = vst.msk [vmem:[#allocation2 + $0x140] sm:$0xff] %vm26_vm2, %v845_v11 }
 0x103   :  { %881 = vst.msk [vmem:[#allocation2 + $0x58] sm:$0xff] %vm26_vm2, %v816_v12  ;;  %v103_v23 = vld [vmem:[#allocation2 + $0x60] sm:$0xff]  ;;  %1229 = vst.msk [vmem:[%s2152_s3 + $0x120] sm:$0xff] %vm26_vm2, %v1165_v20  ;;  %v1136_v25 = vsel %vm1008_vm15, %v944_v9, %v1072_v17  ;;  %v1392_v28 = vpop.f32.mrb[12].mxu0  ;;  %v1424_v29 = vpop.f32.mrb[12].mxu1  ;;  %v106_v35 = vld [vmem:[#allocation2 + $0x78] sm:$0xff] }
 0x104   :  { %v135_v24 = vld [vmem:[#allocation2 + $0x160] sm:$0xff]  ;;  %1200 = vst.msk [vmem:[%s2152_s3 + $0x38] sm:$0xff] %vm26_vm2, %v1136_v25  ;;  %v1168_v30 = vsel %vm1040_vm0, %v976_v10, %v1104_v21  ;;  %913 = vst.msk [vmem:[#allocation2 + $0x158] sm:$0xff] %vm26_vm2, %v848_v22  ;;  %v819_v31 = vadd.f32 %v1392_v28, %v105_v18  ;;  %v851_v32 = vadd.f32 %v1424_v29, %v137_v19  ;;  %v598_v33 = vpop.f32.mrb[13].mxu0  ;;  %v726_v34 = vpop.f32.mrb[13].mxu1  ;;  %v138_v36 = vld [vmem:[#allocation2 + $0x178] sm:$0xff] }
 0x105   :  { %1232 = vst.msk [vmem:[%s2152_s3 + $0x138] sm:$0xff] %vm26_vm2, %v1168_v30  ;;  %v942_v37 = vld [vmem:[#allocation2 + $0x28] sm:$0xff]  ;;  %879 = vst.msk [vmem:[#allocation2 + $0x48] sm:$0xff] %vm26_vm2, %v814_v26  ;;  %v817_v39 = vadd.f32 %v598_v33, %v103_v23  ;;  %v849_v40 = vadd.f32 %v726_v34, %v135_v24  ;;  %v1393_v41 = vpop.f32.mrb[14].mxu0  ;;  %v1425_v42 = vpop.f32.mrb[14].mxu1  ;;  %v109_v57 = vld [vmem:[#allocation2 + $0x90] sm:$0xff] }
 0x106   :  { %v974_v38 = vld [vmem:[#allocation2 + $0x128] sm:$0xff]  ;;  %911 = vst.msk [vmem:[#allocation2 + $0x148] sm:$0xff] %vm26_vm2, %v846_v27  ;;  %vm1006_vm1 = vcmp.gt.f32.partialorder %v942_v37, 0.0  ;;  %v1070_v45 = vmul.f32 0.01, %v942_v37  ;;  %884 = vst.msk [vmem:[#allocation2 + $0x70] sm:$0xff] %vm26_vm2, %v819_v31  ;;  %v820_v50 = vadd.f32 %v1393_v41, %v106_v35  ;;  %v852_v51 = vadd.f32 %v1425_v42, %v138_v36 }
 0x107   :  { %v104_v43 = vld [vmem:[#allocation2 + $0x68] sm:$0xff]  ;;  %vm1038_vm3 = vcmp.gt.f32.partialorder %v974_v38, 0.0  ;;  %v1102_v46 = vmul.f32 0.01, %v974_v38  ;;  %916 = vst.msk [vmem:[#allocation2 + $0x170] sm:$0xff] %vm26_vm2, %v851_v32  ;;  %v947_v47 = vld [vmem:[#allocation2 + $0x50] sm:$0xff] }
 0x108   :  { %v136_v44 = vld [vmem:[#allocation2 + $0x168] sm:$0xff]  ;;  %v979_v48 = vld [vmem:[#allocation2 + $0x150] sm:$0xff]  ;;  %v945_v49 = vld [vmem:[#allocation2 + $0x40] sm:$0xff]  ;;  %882 = vst.msk [vmem:[#allocation2 + $0x60] sm:$0xff] %vm26_vm2, %v817_v39  ;;  %v601_v52 = vpop.f32.mrb[15].mxu0  ;;  %v729_v53 = vpop.f32.mrb[15].mxu1  ;;  %v1134_v54 = vsel %vm1006_vm1, %v942_v37, %v1070_v45 }
 0x109   :  { %914 = vst.msk [vmem:[#allocation2 + $0x160] sm:$0xff] %vm26_vm2, %v849_v40  ;;  %v1166_v55 = vsel %vm1038_vm3, %v974_v38, %v1102_v46  ;;  %vm1011_vm4 = vcmp.gt.f32.partialorder %v947_v47, 0.0  ;;  %v1075_v56 = vmul.f32 0.01, %v947_v47  ;;  %1198 = vst.msk [vmem:[%s2152_s3 + $0x28] sm:$0xff] %vm26_vm2, %v1134_v54  ;;  %vm1043_vm5 = vcmp.gt.f32.partialorder %v979_v48, 0.0 }
 0x10a   :  { %1230 = vst.msk [vmem:[%s2152_s3 + $0x128] sm:$0xff] %vm26_vm2, %v1166_v55  ;;  %v1107_v58 = vmul.f32 0.01, %v979_v48  ;;  %vm1009_vm6 = vcmp.gt.f32.partialorder %v945_v49, 0.0  ;;  %v1073_v59 = vmul.f32 0.01, %v945_v49  ;;  %v818_v63 = vadd.f32 %v601_v52, %v104_v43 }
 0x10b   :  { %885 = vst.msk [vmem:[#allocation2 + $0x78] sm:$0xff] %vm26_vm2, %v820_v50  ;;  %917 = vst.msk [vmem:[#allocation2 + $0x178] sm:$0xff] %vm26_vm2, %v852_v51  ;;  %v1139_v60 = vsel %vm1011_vm4, %v947_v47, %v1075_v56  ;;  %v977_v61 = vld [vmem:[#allocation2 + $0x140] sm:$0xff]  ;;  %v948_v62 = vld [vmem:[#allocation2 + $0x58] sm:$0xff]  ;;  %v850_v0 = vadd.f32 %v729_v53, %v136_v44  ;;  %v1396_v6 = vpop.f32.mrb[16].mxu0  ;;  %v1428_v7 = vpop.f32.mrb[16].mxu1 }
 0x10c   :  { %v141_v1 = vld [vmem:[#allocation2 + $0x190] sm:$0xff]  ;;  %1203 = vst.msk [vmem:[%s2152_s3 + $0x50] sm:$0xff] %vm26_vm2, %v1139_v60  ;;  %v1171_v2 = vsel %vm1043_vm5, %v979_v48, %v1107_v58  ;;  %v1137_v3 = vsel %vm1009_vm6, %v945_v49, %v1073_v59  ;;  %vm1041_vm7 = vcmp.gt.f32.partialorder %v977_v61, 0.0  ;;  %v1105_v4 = vmul.f32 0.01, %v977_v61  ;;  %v980_v5 = vld [vmem:[#allocation2 + $0x158] sm:$0xff] }
 0x10d   :  { %1235 = vst.msk [vmem:[%s2152_s3 + $0x150] sm:$0xff] %vm26_vm2, %v1171_v2  ;;  %1201 = vst.msk [vmem:[%s2152_s3 + $0x40] sm:$0xff] %vm26_vm2, %v1137_v3  ;;  %vm1012_vm8 = vcmp.gt.f32.partialorder %v948_v62, 0.0  ;;  %v1076_v8 = vmul.f32 0.01, %v948_v62  ;;  %vm1044_vm9 = vcmp.gt.f32.partialorder %v980_v5, 0.0  ;;  %v823_v14 = vadd.f32 %v1396_v6, %v109_v57 }
 0x10e   :  { %v1108_v9 = vmul.f32 0.01, %v980_v5  ;;  %883 = vst.msk [vmem:[#allocation2 + $0x68] sm:$0xff] %vm26_vm2, %v818_v63  ;;  %915 = vst.msk [vmem:[#allocation2 + $0x168] sm:$0xff] %vm26_vm2, %v850_v0  ;;  %v1169_v10 = vsel %vm1041_vm7, %v977_v61, %v1105_v4  ;;  %v946_v11 = vld [vmem:[#allocation2 + $0x48] sm:$0xff]  ;;  %v951_v13 = vld [vmem:[#allocation2 + $0x70] sm:$0xff]  ;;  %v855_v15 = vadd.f32 %v1428_v7, %v141_v1 }
 0x10f   :  { %v978_v12 = vld [vmem:[#allocation2 + $0x148] sm:$0xff]  ;;  %v614_v16 = vpop.f32.mrb[17].mxu0  ;;  %v1915_v17 = vpop.f32.mrb[17].mxu1  ;;  %1233 = vst.msk [vmem:[%s2152_s3 + $0x140] sm:$0xff] %vm26_vm2, %v1169_v10  ;;  %v1140_v18 = vsel %vm1012_vm8, %v948_v62, %v1076_v8  ;;  %vm1010_vm10 = vcmp.gt.f32.partialorder %v946_v11, 0.0  ;;  %v983_v21 = vld [vmem:[#allocation2 + $0x170] sm:$0xff] }
 0x110   :  { %v1172_v19 = vsel %vm1044_vm9, %v980_v5, %v1108_v9  ;;  %v1074_v20 = vmul.f32 0.01, %v946_v11  ;;  %v949_v22 = vld [vmem:[#allocation2 + $0x60] sm:$0xff]  ;;  %1204 = vst.msk [vmem:[%s2152_s3 + $0x58] sm:$0xff] %vm26_vm2, %v1140_v18  ;;  %vm1042_vm11 = vcmp.gt.f32.partialorder %v978_v12, 0.0  ;;  %vm1015_vm12 = vcmp.gt.f32.partialorder %v951_v13, 0.0 }
 0x111   :  { %v981_v23 = vld [vmem:[#allocation2 + $0x160] sm:$0xff]  ;;  %1236 = vst.msk [vmem:[%s2152_s3 + $0x158] sm:$0xff] %vm26_vm2, %v1172_v19  ;;  %v1106_v25 = vmul.f32 0.01, %v978_v12  ;;  %v1079_v26 = vmul.f32 0.01, %v951_v13 }
 0x112   :  { %v107_v24 = vld [vmem:[#allocation2 + $0x80] sm:$0xff]  ;;  %888 = vst.msk [vmem:[#allocation2 + $0x90] sm:$0xff] %vm26_vm2, %v823_v14  ;;  %920 = vst.msk [vmem:[#allocation2 + $0x190] sm:$0xff] %vm26_vm2, %v855_v15  ;;  %v1138_v27 = vsel %vm1010_vm10, %v946_v11, %v1074_v20  ;;  %vm1047_vm13 = vcmp.gt.f32.partialorder %v983_v21, 0.0  ;;  %v1111_v28 = vmul.f32 0.01, %v983_v21 }
 0x113   :  { %vm1013_vm14 = vcmp.gt.f32.partialorder %v949_v22, 0.0  ;;  %v952_v29 = vld [vmem:[#allocation2 + $0x78] sm:$0xff]  ;;  %v139_v31 = vld [vmem:[#allocation2 + $0x180] sm:$0xff]  ;;  %1202 = vst.msk [vmem:[%s2152_s3 + $0x48] sm:$0xff] %vm26_vm2, %v1138_v27  ;;  %v1170_v32 = vsel %vm1042_vm11, %v978_v12, %v1106_v25  ;;  %v1143_v33 = vsel %vm1015_vm12, %v951_v13, %v1079_v26  ;;  %v1077_v34 = vmul.f32 0.01, %v949_v22 }
 0x114   :  { %v984_v30 = vld [vmem:[#allocation2 + $0x178] sm:$0xff]  ;;  %vm1045_vm15 = vcmp.gt.f32.partialorder %v981_v23, 0.0  ;;  %v1397_v36 = vpop.f32.mrb[18].mxu0  ;;  %v1429_v38 = vpop.f32.mrb[18].mxu1  ;;  %v108_v39 = vld [vmem:[#allocation2 + $0x88] sm:$0xff]  ;;  %1234 = vst.msk [vmem:[%s2152_s3 + $0x148] sm:$0xff] %vm26_vm2, %v1170_v32  ;;  %v1175_v40 = vsel %vm1047_vm13, %v983_v21, %v1111_v28  ;;  %v821_v48 = vadd.f32 %v614_v16, %v107_v24  ;;  %v853_v63 = vadd.f32 %v1915_v17, %v139_v31 }
 0x115   :  { %v110_v35 = vld [vmem:[#allocation2 + $0x98] sm:$0xff]  ;;  %1207 = vst.msk [vmem:[%s2152_s3 + $0x70] sm:$0xff] %vm26_vm2, %v1143_v33  ;;  %v1109_v41 = vmul.f32 0.01, %v981_v23  ;;  %vm1016_vm0 = vcmp.gt.f32.partialorder %v952_v29, 0.0  ;;  %v617_v43 = vpop.f32.mrb[19].mxu0  ;;  %v1141_v44 = vsel %vm1013_vm14, %v949_v22, %v1077_v34 }
 0x116   :  { %v142_v37 = vld [vmem:[#allocation2 + $0x198] sm:$0xff]  ;;  %v1080_v42 = vmul.f32 0.01, %v952_v29  ;;  %1239 = vst.msk [vmem:[%s2152_s3 + $0x170] sm:$0xff] %vm26_vm2, %v1175_v40  ;;  %vm1048_vm1 = vcmp.gt.f32.partialorder %v984_v30, 0.0  ;;  %v950_v46 = vld [vmem:[#allocation2 + $0x68] sm:$0xff]  ;;  %v824_v7 = vadd.f32 %v1397_v36, %v110_v35  ;;  %v822_v9 = vadd.f32 %v617_v43, %v108_v39 }
 0x117   :  { %v1112_v45 = vmul.f32 0.01, %v984_v30  ;;  %v982_v47 = vld [vmem:[#allocation2 + $0x168] sm:$0xff]  ;;  %v745_v50 = vpop.f32.mrb[19].mxu1  ;;  %v113_v51 = vld [vmem:[#allocation2 + $0xb0] sm:$0xff]  ;;  %1205 = vst.msk [vmem:[%s2152_s3 + $0x60] sm:$0xff] %vm26_vm2, %v1141_v44  ;;  %v1173_v53 = vsel %vm1045_vm15, %v981_v23, %v1109_v41  ;;  %v856_v8 = vadd.f32 %v1429_v38, %v142_v37 }
 0x118   :  { %v140_v49 = vld [vmem:[#allocation2 + $0x188] sm:$0xff]  ;;  %v145_v52 = vld [vmem:[#allocation2 + $0x1b0] sm:$0xff]  ;;  %v1144_v54 = vsel %vm1016_vm0, %v952_v29, %v1080_v42  ;;  %vm1014_vm3 = vcmp.gt.f32.partialorder %v950_v46, 0.0  ;;  %v1078_v55 = vmul.f32 0.01, %v950_v46  ;;  %v1400_v56 = vpop.f32.mrb[20].mxu0 }
 0x119   :  { %v1432_v57 = vpop.f32.mrb[20].mxu1  ;;  %v111_v58 = vld [vmem:[#allocation2 + $0xa0] sm:$0xff]  ;;  %v114_v60 = vld [vmem:[#allocation2 + $0xb8] sm:$0xff]  ;;  %1237 = vst.msk [vmem:[%s2152_s3 + $0x160] sm:$0xff] %vm26_vm2, %v1173_v53  ;;  %1208 = vst.msk [vmem:[%s2152_s3 + $0x78] sm:$0xff] %vm26_vm2, %v1144_v54  ;;  %v1176_v61 = vsel %vm1048_vm1, %v984_v30, %v1112_v45  ;;  %vm1046_vm4 = vcmp.gt.f32.partialorder %v982_v47, 0.0  ;;  %v854_v18 = vadd.f32 %v745_v50, %v140_v49  ;;  %v827_v19 = vadd.f32 %v1400_v56, %v113_v51 }
 0x11a   :  { %v143_v59 = vld [vmem:[#allocation2 + $0x1a0] sm:$0xff]  ;;  %v1110_v62 = vmul.f32 0.01, %v982_v47  ;;  %886 = vst.msk [vmem:[#allocation2 + $0x80] sm:$0xff] %vm26_vm2, %v821_v48  ;;  %v630_v0 = vpop.f32.mrb[21].mxu0  ;;  %v758_v1 = vpop.f32.mrb[21].mxu1  ;;  %v1142_v4 = vsel %vm1014_vm3, %v950_v46, %v1078_v55  ;;  %v859_v20 = vadd.f32 %v1432_v57, %v145_v52 }
 0x11b   :  { %v146_v2 = vld [vmem:[#allocation2 + $0x1b8] sm:$0xff]  ;;  %v112_v3 = vld [vmem:[#allocation2 + $0xa8] sm:$0xff]  ;;  %1240 = vst.msk [vmem:[%s2152_s3 + $0x178] sm:$0xff] %vm26_vm2, %v1176_v61  ;;  %v955_v5 = vld [vmem:[#allocation2 + $0x90] sm:$0xff]  ;;  %v1401_v10 = vpop.f32.mrb[22].mxu0  ;;  %v1433_v11 = vpop.f32.mrb[22].mxu1  ;;  %v825_v22 = vadd.f32 %v630_v0, %v111_v58  ;;  %v857_v23 = vadd.f32 %v758_v1, %v143_v59 }
 0x11c   :  { %v987_v6 = vld [vmem:[#allocation2 + $0x190] sm:$0xff]  ;;  %v144_v12 = vld [vmem:[#allocation2 + $0x1a8] sm:$0xff]  ;;  %1206 = vst.msk [vmem:[%s2152_s3 + $0x68] sm:$0xff] %vm26_vm2, %v1142_v4  ;;  %v1174_v13 = vsel %vm1046_vm4, %v982_v47, %v1110_v62  ;;  %vm1019_vm5 = vcmp.gt.f32.partialorder %v955_v5, 0.0  ;;  %v1083_v14 = vmul.f32 0.01, %v955_v5  ;;  %v828_v24 = vadd.f32 %v1401_v10, %v114_v60 }
 0x11d   :  { %vm1051_vm6 = vcmp.gt.f32.partialorder %v987_v6, 0.0  ;;  %918 = vst.msk [vmem:[#allocation2 + $0x180] sm:$0xff] %vm26_vm2, %v853_v63  ;;  %v633_v15 = vpop.f32.mrb[23].mxu0  ;;  %v761_v16 = vpop.f32.mrb[23].mxu1  ;;  %1238 = vst.msk [vmem:[%s2152_s3 + $0x168] sm:$0xff] %vm26_vm2, %v1174_v13  ;;  %v117_v25 = vld [vmem:[#allocation2 + $0xd0] sm:$0xff]  ;;  %v860_v28 = vadd.f32 %v1433_v11, %v146_v2 }
 0x11e   :  { %v1115_v17 = vmul.f32 0.01, %v987_v6  ;;  %889 = vst.msk [vmem:[#allocation2 + $0x98] sm:$0xff] %vm26_vm2, %v824_v7  ;;  %921 = vst.msk [vmem:[#allocation2 + $0x198] sm:$0xff] %vm26_vm2, %v856_v8  ;;  %v1147_v21 = vsel %vm1019_vm5, %v955_v5, %v1083_v14  ;;  %v149_v26 = vld [vmem:[#allocation2 + $0x1d0] sm:$0xff]  ;;  %v826_v29 = vadd.f32 %v633_v15, %v112_v3  ;;  %v858_v30 = vadd.f32 %v761_v16, %v144_v12  ;;  %v115_v31 = vld [vmem:[#allocation2 + $0xc0] sm:$0xff] }
 0x11f   :  { %887 = vst.msk [vmem:[#allocation2 + $0x88] sm:$0xff] %vm26_vm2, %v822_v9  ;;  %1211 = vst.msk [vmem:[%s2152_s3 + $0x90] sm:$0xff] %vm26_vm2, %v1147_v21  ;;  %v147_v32 = vld [vmem:[#allocation2 + $0x1c0] sm:$0xff]  ;;  %v1404_v33 = vpop.f32.mrb[24].mxu0  ;;  %v1436_v34 = vpop.f32.mrb[24].mxu1  ;;  %v118_v35 = vld [vmem:[#allocation2 + $0xd8] sm:$0xff] }
 0x120   :  { %v1179_v27 = vsel %vm1051_vm6, %v987_v6, %v1115_v17  ;;  %919 = vst.msk [vmem:[#allocation2 + $0x188] sm:$0xff] %vm26_vm2, %v854_v18  ;;  %892 = vst.msk [vmem:[#allocation2 + $0xb0] sm:$0xff] %vm26_vm2, %v827_v19  ;;  %v150_v36 = vld [vmem:[#allocation2 + $0x1d8] sm:$0xff]  ;;  %v831_v38 = vadd.f32 %v1404_v33, %v117_v25  ;;  %v863_v39 = vadd.f32 %v1436_v34, %v149_v26  ;;  %v646_v40 = vpop.f32.mrb[25].mxu0  ;;  %v774_v41 = vpop.f32.mrb[25].mxu1  ;;  %v116_v42 = vld [vmem:[#allocation2 + $0xc8] sm:$0xff] }
 0x121   :  { %924 = vst.msk [vmem:[#allocation2 + $0x1b0] sm:$0xff] %vm26_vm2, %v859_v20  ;;  %1243 = vst.msk [vmem:[%s2152_s3 + $0x190] sm:$0xff] %vm26_vm2, %v1179_v27  ;;  %v953_v37 = vld [vmem:[#allocation2 + $0x80] sm:$0xff]  ;;  %v829_v44 = vadd.f32 %v646_v40, %v115_v31  ;;  %v861_v45 = vadd.f32 %v774_v41, %v147_v32  ;;  %v1405_v46 = vpop.f32.mrb[26].mxu0  ;;  %v1437_v47 = vpop.f32.mrb[26].mxu1  ;;  %v148_v52 = vld [vmem:[#allocation2 + $0x1c8] sm:$0xff] }
 0x122   :  { %890 = vst.msk [vmem:[#allocation2 + $0xa0] sm:$0xff] %vm26_vm2, %v825_v22  ;;  %922 = vst.msk [vmem:[#allocation2 + $0x1a0] sm:$0xff] %vm26_vm2, %v857_v23  ;;  %vm1017_vm7 = vcmp.gt.f32.partialorder %v953_v37, 0.0  ;;  %v1081_v43 = vmul.f32 0.01, %v953_v37  ;;  %v832_v49 = vadd.f32 %v1405_v46, %v118_v35  ;;  %v864_v50 = vadd.f32 %v1437_v47, %v150_v36  ;;  %v649_v51 = vpop.f32.mrb[27].mxu0 }
 0x123   :  { %893 = vst.msk [vmem:[#allocation2 + $0xb8] sm:$0xff] %vm26_vm2, %v828_v24  ;;  %925 = vst.msk [vmem:[#allocation2 + $0x1b8] sm:$0xff] %vm26_vm2, %v860_v28  ;;  %v777_v53 = vpop.f32.mrb[27].mxu1  ;;  %v830_v59 = vadd.f32 %v649_v51, %v116_v42  ;;  %v1408_v26 = vpop.f32.mrb[28].mxu0  ;;  %v153_v46 = vld [vmem:[#allocation2 + $0x1f0] sm:$0xff]  ;;  %v119_v47 = vld [vmem:[#allocation2 + $0xe0] sm:$0xff] }
 0x124   :  { %891 = vst.msk [vmem:[#allocation2 + $0xa8] sm:$0xff] %vm26_vm2, %v826_v29  ;;  %923 = vst.msk [vmem:[#allocation2 + $0x1a8] sm:$0xff] %vm26_vm2, %v858_v30  ;;  %v985_v48 = vld [vmem:[#allocation2 + $0x180] sm:$0xff]  ;;  %v1145_v54 = vsel %vm1017_vm7, %v953_v37, %v1081_v43  ;;  %v862_v3 = vadd.f32 %v777_v53, %v148_v52  ;;  %v1440_v40 = vpop.f32.mrb[28].mxu1  ;;  %v662_v41 = vpop.f32.mrb[29].mxu0  ;;  %v122_v52 = vld [vmem:[#allocation2 + $0xf8] sm:$0xff] }
 0x125   :  { %896 = vst.msk [vmem:[#allocation2 + $0xd0] sm:$0xff] %vm26_vm2, %v831_v38  ;;  %928 = vst.msk [vmem:[#allocation2 + $0x1d0] sm:$0xff] %vm26_vm2, %v863_v39  ;;  %vm1049_vm8 = vcmp.gt.f32.partialorder %v985_v48, 0.0  ;;  %v1113_v55 = vmul.f32 0.01, %v985_v48  ;;  %v956_v56 = vld [vmem:[#allocation2 + $0x98] sm:$0xff] }
 0x126   :  { %v988_v57 = vld [vmem:[#allocation2 + $0x198] sm:$0xff]  ;;  %v954_v58 = vld [vmem:[#allocation2 + $0x88] sm:$0xff]  ;;  %894 = vst.msk [vmem:[#allocation2 + $0xc0] sm:$0xff] %vm26_vm2, %v829_v44  ;;  %926 = vst.msk [vmem:[#allocation2 + $0x1c0] sm:$0xff] %vm26_vm2, %v861_v45  ;;  %vm1020_vm9 = vcmp.gt.f32.partialorder %v956_v56, 0.0  ;;  %v790_v51 = vpop.f32.mrb[29].mxu1 }
 0x127   :  { %1209 = vst.msk [vmem:[%s2152_s3 + $0x80] sm:$0xff] %vm26_vm2, %v1145_v54  ;;  %v1084_v60 = vmul.f32 0.01, %v956_v56  ;;  %vm1052_vm10 = vcmp.gt.f32.partialorder %v988_v57, 0.0  ;;  %v1116_v61 = vmul.f32 0.01, %v988_v57  ;;  %v1177_v62 = vsel %vm1049_vm8, %v985_v48, %v1113_v55 }
 0x128   :  { %897 = vst.msk [vmem:[#allocation2 + $0xd8] sm:$0xff] %vm26_vm2, %v832_v49  ;;  %929 = vst.msk [vmem:[#allocation2 + $0x1d8] sm:$0xff] %vm26_vm2, %v864_v50  ;;  %vm1018_vm11 = vcmp.gt.f32.partialorder %v954_v58, 0.0  ;;  %v1082_v63 = vmul.f32 0.01, %v954_v58  ;;  %v986_v0 = vld [vmem:[#allocation2 + $0x188] sm:$0xff] }
 0x129   :  { %v959_v1 = vld [vmem:[#allocation2 + $0xb0] sm:$0xff]  ;;  %895 = vst.msk [vmem:[#allocation2 + $0xc8] sm:$0xff] %vm26_vm2, %v830_v59  ;;  %1241 = vst.msk [vmem:[%s2152_s3 + $0x180] sm:$0xff] %vm26_vm2, %v1177_v62  ;;  %v1148_v4 = vsel %vm1020_vm9, %v956_v56, %v1084_v60  ;;  %v1180_v5 = vsel %vm1052_vm10, %v988_v57, %v1116_v61  ;;  %vm1050_vm12 = vcmp.gt.f32.partialorder %v986_v0, 0.0  ;;  %v1114_v6 = vmul.f32 0.01, %v986_v0 }
 0x12a   :  { %v991_v2 = vld [vmem:[#allocation2 + $0x1b0] sm:$0xff]  ;;  %v957_v7 = vld [vmem:[#allocation2 + $0xa0] sm:$0xff]  ;;  %v960_v9 = vld [vmem:[#allocation2 + $0xb8] sm:$0xff]  ;;  %1212 = vst.msk [vmem:[%s2152_s3 + $0x98] sm:$0xff] %vm26_vm2, %v1148_v4  ;;  %v1146_v10 = vsel %vm1018_vm11, %v954_v58, %v1082_v63  ;;  %vm1023_vm13 = vcmp.gt.f32.partialorder %v959_v1, 0.0  ;;  %v1409_v53 = vpop.f32.mrb[30].mxu0 }
 0x12b   :  { %v989_v8 = vld [vmem:[#allocation2 + $0x1a0] sm:$0xff]  ;;  %1244 = vst.msk [vmem:[%s2152_s3 + $0x198] sm:$0xff] %vm26_vm2, %v1180_v5  ;;  %v1087_v11 = vmul.f32 0.01, %v959_v1  ;;  %vm1055_vm14 = vcmp.gt.f32.partialorder %v991_v2, 0.0  ;;  %v992_v12 = vld [vmem:[#allocation2 + $0x1b8] sm:$0xff]  ;;  %v1178_v13 = vsel %vm1050_vm12, %v986_v0, %v1114_v6 }
 0x12c   :  { %927 = vst.msk [vmem:[#allocation2 + $0x1c8] sm:$0xff] %vm26_vm2, %v862_v3  ;;  %1210 = vst.msk [vmem:[%s2152_s3 + $0x88] sm:$0xff] %vm26_vm2, %v1146_v10  ;;  %v1119_v14 = vmul.f32 0.01, %v991_v2  ;;  %vm1021_vm15 = vcmp.gt.f32.partialorder %v957_v7, 0.0  ;;  %v958_v16 = vld [vmem:[#allocation2 + $0xa8] sm:$0xff] }
 0x12d   :  { %v1085_v15 = vmul.f32 0.01, %v957_v7  ;;  %1242 = vst.msk [vmem:[%s2152_s3 + $0x188] sm:$0xff] %vm26_vm2, %v1178_v13  ;;  %v1151_v17 = vsel %vm1023_vm13, %v959_v1, %v1087_v11  ;;  %vm1053_vm0 = vcmp.gt.f32.partialorder %v989_v8, 0.0  ;;  %v1117_v18 = vmul.f32 0.01, %v989_v8 }
 0x12e   :  { %vm1024_vm1 = vcmp.gt.f32.partialorder %v960_v9, 0.0  ;;  %v990_v19 = vld [vmem:[#allocation2 + $0x1a8] sm:$0xff]  ;;  %v963_v20 = vld [vmem:[#allocation2 + $0xd0] sm:$0xff]  ;;  %1215 = vst.msk [vmem:[%s2152_s3 + $0xb0] sm:$0xff] %vm26_vm2, %v1151_v17  ;;  %v1183_v21 = vsel %vm1055_vm14, %v991_v2, %v1119_v14  ;;  %v1088_v23 = vmul.f32 0.01, %v960_v9  ;;  %v836_v11 = vadd.f32 %v1409_v53, %v122_v52 }
 0x12f   :  { %v1149_v22 = vsel %vm1021_vm15, %v957_v7, %v1085_v15  ;;  %vm1056_vm3 = vcmp.gt.f32.partialorder %v992_v12, 0.0  ;;  %v995_v24 = vld [vmem:[#allocation2 + $0x1d0] sm:$0xff]  ;;  %v961_v25 = vld [vmem:[#allocation2 + $0xc0] sm:$0xff]  ;;  %1247 = vst.msk [vmem:[%s2152_s3 + $0x1b0] sm:$0xff] %vm26_vm2, %v1183_v21  ;;  %v1181_v27 = vsel %vm1053_vm0, %v989_v8, %v1117_v18  ;;  %v1120_v28 = vmul.f32 0.01, %v992_v12 }
 0x130   :  { %1213 = vst.msk [vmem:[%s2152_s3 + $0xa0] sm:$0xff] %vm26_vm2, %v1149_v22  ;;  %vm1022_vm4 = vcmp.gt.f32.partialorder %v958_v16, 0.0  ;;  %v1086_v29 = vmul.f32 0.01, %v958_v16  ;;  %v993_v30 = vld [vmem:[#allocation2 + $0x1c0] sm:$0xff]  ;;  %1245 = vst.msk [vmem:[%s2152_s3 + $0x1a0] sm:$0xff] %vm26_vm2, %v1181_v27  ;;  %v1152_v31 = vsel %vm1024_vm1, %v960_v9, %v1088_v23  ;;  %v867_v7 = vadd.f32 %v1440_v40, %v153_v46 }
 0x131   :  { %vm1054_vm5 = vcmp.gt.f32.partialorder %v990_v19, 0.0  ;;  %v1118_v32 = vmul.f32 0.01, %v990_v19  ;;  %vm1027_vm6 = vcmp.gt.f32.partialorder %v963_v20, 0.0  ;;  %v964_v33 = vld [vmem:[#allocation2 + $0xd8] sm:$0xff]  ;;  %1216 = vst.msk [vmem:[%s2152_s3 + $0xb8] sm:$0xff] %vm26_vm2, %v1152_v31  ;;  %v1184_v35 = vsel %vm1056_vm3, %v992_v12, %v1120_v28 }
 0x132   :  { %v996_v34 = vld [vmem:[#allocation2 + $0x1d8] sm:$0xff]  ;;  %v1150_v36 = vsel %vm1022_vm4, %v958_v16, %v1086_v29  ;;  %v1091_v37 = vmul.f32 0.01, %v963_v20  ;;  %vm1059_vm7 = vcmp.gt.f32.partialorder %v995_v24, 0.0  ;;  %v962_v38 = vld [vmem:[#allocation2 + $0xc8] sm:$0xff]  ;;  %v121_v39 = vld [vmem:[#allocation2 + $0xf0] sm:$0xff]  ;;  %v833_v8 = vadd.f32 %v662_v41, %v119_v47 }
 0x133   :  { %1248 = vst.msk [vmem:[%s2152_s3 + $0x1b8] sm:$0xff] %vm26_vm2, %v1184_v35  ;;  %1214 = vst.msk [vmem:[%s2152_s3 + $0xa8] sm:$0xff] %vm26_vm2, %v1150_v36  ;;  %v1182_v42 = vsel %vm1054_vm5, %v990_v19, %v1118_v32  ;;  %v1123_v43 = vmul.f32 0.01, %v995_v24  ;;  %vm1025_vm8 = vcmp.gt.f32.partialorder %v961_v25, 0.0  ;;  %v994_v45 = vld [vmem:[#allocation2 + $0x1c8] sm:$0xff]  ;;  %v835_v2 = vadd.f32 %v1408_v26, %v121_v39 }
 0x134   :  { %v1089_v44 = vmul.f32 0.01, %v961_v25  ;;  %1246 = vst.msk [vmem:[%s2152_s3 + $0x1a8] sm:$0xff] %vm26_vm2, %v1182_v42  ;;  %v1155_v48 = vsel %vm1027_vm6, %v963_v20, %v1091_v37  ;;  %vm1057_vm9 = vcmp.gt.f32.partialorder %v993_v30, 0.0  ;;  %v1121_v49 = vmul.f32 0.01, %v993_v30 }
 0x135   :  { %vm1028_vm10 = vcmp.gt.f32.partialorder %v964_v33, 0.0  ;;  %v151_v50 = vld [vmem:[#allocation2 + $0x1e0] sm:$0xff]  ;;  %1219 = vst.msk [vmem:[%s2152_s3 + $0xd0] sm:$0xff] %vm26_vm2, %v1155_v48  ;;  %v1187_v54 = vsel %vm1059_vm7, %v995_v24, %v1123_v43  ;;  %v1092_v56 = vmul.f32 0.01, %v964_v33  ;;  %vm1060_vm11 = vcmp.gt.f32.partialorder %v996_v34, 0.0 }
 0x136   :  { %v1153_v55 = vsel %vm1025_vm8, %v961_v25, %v1089_v44  ;;  %v154_v57 = vld [vmem:[#allocation2 + $0x1f8] sm:$0xff]  ;;  %v1441_v58 = vpop.f32.mrb[30].mxu1  ;;  %v665_v59 = vpop.f32.mrb[31].mxu0  ;;  %1251 = vst.msk [vmem:[%s2152_s3 + $0x1d0] sm:$0xff] %vm26_vm2, %v1187_v54  ;;  %v1185_v60 = vsel %vm1057_vm9, %v993_v30, %v1121_v49  ;;  %v1124_v61 = vmul.f32 0.01, %v996_v34  ;;  %v865_v10 = vadd.f32 %v790_v51, %v151_v50 }
 0x137   :  { %1217 = vst.msk [vmem:[%s2152_s3 + $0xc0] sm:$0xff] %vm26_vm2, %v1153_v55  ;;  %vm1026_vm12 = vcmp.gt.f32.partialorder %v962_v38, 0.0  ;;  %v1090_v62 = vmul.f32 0.01, %v962_v38  ;;  %v793_v63 = vpop.f32.mrb[31].mxu1  ;;  %1249 = vst.msk [vmem:[%s2152_s3 + $0x1c0] sm:$0xff] %vm26_vm2, %v1185_v60  ;;  %v1156_v0 = vsel %vm1028_vm10, %v964_v33, %v1092_v56  ;;  %v868_v12 = vadd.f32 %v1441_v58, %v154_v57 }
 0x138   :  { %vm1058_vm13 = vcmp.gt.f32.partialorder %v994_v45, 0.0  ;;  %v1122_v1 = vmul.f32 0.01, %v994_v45  ;;  %v120_v3 = vld [vmem:[#allocation2 + $0xe8] sm:$0xff]  ;;  %1220 = vst.msk [vmem:[%s2152_s3 + $0xd8] sm:$0xff] %vm26_vm2, %v1156_v0  ;;  %v1188_v5 = vsel %vm1060_vm11, %v996_v34, %v1124_v61  ;;  %900 = vst.msk [vmem:[#allocation2 + $0xf0] sm:$0xff] %vm26_vm2, %v835_v2 }
 0x139   :  { %v152_v4 = vld [vmem:[#allocation2 + $0x1e8] sm:$0xff]  ;;  %v1154_v6 = vsel %vm1026_vm12, %v962_v38, %v1090_v62  ;;  %1252 = vst.msk [vmem:[%s2152_s3 + $0x1d8] sm:$0xff] %vm26_vm2, %v1188_v5  ;;  %932 = vst.msk [vmem:[#allocation2 + $0x1f0] sm:$0xff] %vm26_vm2, %v867_v7  ;;  %v834_v13 = vadd.f32 %v665_v59, %v120_v3 }
 0x13a   :  { %1218 = vst.msk [vmem:[%s2152_s3 + $0xc8] sm:$0xff] %vm26_vm2, %v1154_v6  ;;  %v1186_v9 = vsel %vm1058_vm13, %v994_v45, %v1122_v1  ;;  %898 = vst.msk [vmem:[#allocation2 + $0xe0] sm:$0xff] %vm26_vm2, %v833_v8  ;;  %v866_v14 = vadd.f32 %v793_v63, %v152_v4 }
 0x13b   :  { %1250 = vst.msk [vmem:[%s2152_s3 + $0x1c8] sm:$0xff] %vm26_vm2, %v1186_v9  ;;  %930 = vst.msk [vmem:[#allocation2 + $0x1e0] sm:$0xff] %vm26_vm2, %v865_v10 }
 0x13c   :  { %901 = vst.msk [vmem:[#allocation2 + $0xf8] sm:$0xff] %vm26_vm2, %v836_v11  ;;  %933 = vst.msk [vmem:[#allocation2 + $0x1f8] sm:$0xff] %vm26_vm2, %v868_v12 }
 0x13d   :  { %899 = vst.msk [vmem:[#allocation2 + $0xe8] sm:$0xff] %vm26_vm2, %v834_v13  ;;  %931 = vst.msk [vmem:[#allocation2 + $0x1e8] sm:$0xff] %vm26_vm2, %v866_v14 }
 0x13f   :  { %v967_v15 = vld [vmem:[#allocation2 + $0xf0] sm:$0xff] }
 0x140   :  { %vm1031_vm14 = vcmp.gt.f32.partialorder %v967_v15, 0.0  ;;  %v1095_v16 = vmul.f32 0.01, %v967_v15  ;;  %v999_v17 = vld [vmem:[#allocation2 + $0x1f0] sm:$0xff] }
 0x141   :  { %v965_v18 = vld [vmem:[#allocation2 + $0xe0] sm:$0xff]  ;;  %vm1063_vm15 = vcmp.gt.f32.partialorder %v999_v17, 0.0  ;;  %v1127_v19 = vmul.f32 0.01, %v999_v17 }
 0x142   :  { %vm1029_vm0 = vcmp.gt.f32.partialorder %v965_v18, 0.0  ;;  %v1093_v20 = vmul.f32 0.01, %v965_v18  ;;  %v1159_v21 = vsel %vm1031_vm14, %v967_v15, %v1095_v16  ;;  %v997_v22 = vld [vmem:[#allocation2 + $0x1e0] sm:$0xff] }
 0x143   :  { %v968_v23 = vld [vmem:[#allocation2 + $0xf8] sm:$0xff]  ;;  %1223 = vst.msk [vmem:[%s2152_s3 + $0xf0] sm:$0xff] %vm26_vm2, %v1159_v21  ;;  %v1191_v25 = vsel %vm1063_vm15, %v999_v17, %v1127_v19  ;;  %vm1061_vm1 = vcmp.gt.f32.partialorder %v997_v22, 0.0  ;;  %v1125_v27 = vmul.f32 0.01, %v997_v22 }
 0x144   :  { %v1000_v24 = vld [vmem:[#allocation2 + $0x1f8] sm:$0xff]  ;;  %v1157_v26 = vsel %vm1029_vm0, %v965_v18, %v1093_v20  ;;  %v966_v28 = vld [vmem:[#allocation2 + $0xe8] sm:$0xff]  ;;  %1255 = vst.msk [vmem:[%s2152_s3 + $0x1f0] sm:$0xff] %vm26_vm2, %v1191_v25  ;;  %vm1032_vm3 = vcmp.gt.f32.partialorder %v968_v23, 0.0  ;;  %v1096_v30 = vmul.f32 0.01, %v968_v23 }
 0x145   :  { %v998_v29 = vld [vmem:[#allocation2 + $0x1e8] sm:$0xff]  ;;  %1221 = vst.msk [vmem:[%s2152_s3 + $0xe0] sm:$0xff] %vm26_vm2, %v1157_v26  ;;  %vm1064_vm4 = vcmp.gt.f32.partialorder %v1000_v24, 0.0  ;;  %v1128_v31 = vmul.f32 0.01, %v1000_v24  ;;  %v1189_v32 = vsel %vm1061_vm1, %v997_v22, %v1125_v27  ;;  %vm1030_vm5 = vcmp.gt.f32.partialorder %v966_v28, 0.0 }
 0x146   :  { %v1094_v33 = vmul.f32 0.01, %v966_v28  ;;  %vm1062_vm6 = vcmp.gt.f32.partialorder %v998_v29, 0.0  ;;  %1253 = vst.msk [vmem:[%s2152_s3 + $0x1e0] sm:$0xff] %vm26_vm2, %v1189_v32  ;;  %v1160_v34 = vsel %vm1032_vm3, %v968_v23, %v1096_v30  ;;  %v1126_v36 = vmul.f32 0.01, %v998_v29 }
 0x147   :  { %v1192_v35 = vsel %vm1064_vm4, %v1000_v24, %v1128_v31  ;;  %1224 = vst.msk [vmem:[%s2152_s3 + $0xf8] sm:$0xff] %vm26_vm2, %v1160_v34 }
 0x148   :  { %1256 = vst.msk [vmem:[%s2152_s3 + $0x1f8] sm:$0xff] %vm26_vm2, %v1192_v35  ;;  %v1158_v37 = vsel %vm1030_vm5, %v966_v28, %v1094_v33  ;;  %v1190_v38 = vsel %vm1062_vm6, %v998_v29, %v1126_v36 }
 0x149   :  { %1222 = vst.msk [vmem:[%s2152_s3 + $0xe8] sm:$0xff] %vm26_vm2, %v1158_v37  ;;  %1254 = vst.msk [vmem:[%s2152_s3 + $0x1e8] sm:$0xff] %vm26_vm2, %v1190_v38 }

// kernel: msca_forward.16
= control target key start
LH: loop header
LB: loop body
LE: loop exit
PB: predicated region body
PF: predicated region fallthrough
CT: control target
= control target key end

     0   :  { %v1699_v0 = vmov 0   ;;  %vm607_vm0 = vcmask 588800   ;;  %vm704_vm1 = vcmask 1043456   ;;  %vm26_vm2 = vcmask 64512   ;;  %s2462_s1 = inlined_call_operand.vmem [shape: bf16[200,8], index: 1, kind: input, shape index: {}]   ;;  %s2463_s0 = inlined_call_operand.vmem [shape: bf16[512,200], index: 0, kind: input, shape index: {}]   ;;  %s2464_s2 = inlined_call_operand.vmem [shape: f32[1,8], index: 2, kind: input, shape index: {}]   ;;  %s2465_s3 = inlined_call_operand.vmem [shape: f32[512,8], index: 3, kind: output, shape index: {}]  }
   0x1   :  { %708 = vmatprep.subr.bf16.mxu0 %v1699_v0  ;;  %1563 = vmatprep.subr.bf16.mxu1 %v1699_v0  ;;  %v1590_v1 = vld [vmem:[%s2462_s1] sm:$0xff]   ;;  %v1591_v2 = vld [vmem:[%s2462_s1 + $0x8] sm:$0xff]   ;;  %v1592_v3 = vld [vmem:[%s2462_s1 + $0x10] sm:$0xff]  }
   0x2   :  { %709 = vmatpush1.bf16.msra.mxu0 %v1590_v1  ;;  %1576 = vmatpush1.bf16.msra.mxu1 %v1590_v1  ;;  %v1593_v4 = vld [vmem:[%s2462_s1 + $0x18] sm:$0xff]   ;;  %v1605_v5 = vld [vmem:[%s2463_s0 + $0x4] ss:$8 sps:$4 sm:$0xff]   ;;  %v1596_v9 = vld [vmem:[%s2462_s1 + $0x30] sm:$0xff]  }
   0x3   :  { %710 = vmatprep.subr.bf16.mxu0 %v1699_v0  ;;  %1564 = vmatprep.subr.bf16.mxu1 %v1699_v0  ;;  %v1594_v6 = vld [vmem:[%s2462_s1 + $0x20] sm:$0xff]   ;;  %v1595_v8 = vld [vmem:[%s2462_s1 + $0x28] sm:$0xff]   ;;  %v1597_v10 = vld [vmem:[%s2462_s1 + $0x38] sm:$0xff]  }
   0x4   :  { %v1608_v7 = vld [vmem:[%s2463_s0 + $0x104] ss:$8 sps:$4 sm:$0xff]   ;;  %1531 = vmatprep.mubr.msk.bf16.mxu0 %vm607_vm0, %v1605_v5  ;;  %v1600_v13 = vld [vmem:[%s2462_s1 + $0x50] sm:$0xff]   ;;  %v1601_v14 = vld [vmem:[%s2462_s1 + $0x58] sm:$0xff]  }
   0x5   :  { %1547 = vmatprep.mubr.msk.bf16.mxu1 %vm607_vm0, %v1608_v7  ;;  %v1598_v11 = vld [vmem:[%s2462_s1 + $0x40] sm:$0xff]   ;;  %v1599_v12 = vld [vmem:[%s2462_s1 + $0x48] sm:$0xff]   ;;  %v1609_v19 = vld [vmem:[%s2463_s0 + $0x14] ss:$8 sps:$4 sm:$0xff]  }
   0x6   :  { %711 = vmatpush1.bf16.msra.mxu0 %v1591_v2  ;;  %1577 = vmatpush1.bf16.msra.mxu1 %v1591_v2  ;;  %v1602_v15 = vld [vmem:[%s2462_s1 + $0x60] ss:$0 sps:$4 sm:$0xff]   ;;  %v1611_v20 = vld [vmem:[%s2463_s0 + $0x114] ss:$8 sps:$4 sm:$0xff]   ;;  %v1613_v22 = vld [vmem:[%s2463_s0 + $0x10] ss:$8 sps:$4 sm:$0xff]  }
   0x7   :  { %712 = vmatprep.subr.bf16.mxu0 %v1699_v0  ;;  %1565 = vmatprep.subr.bf16.mxu1 %v1699_v0  ;;  %v706_v16 = vsel %vm704_vm1, %v1602_v15, 0  ;;  %v1603_v17 = vld [vmem:[%s2463_s0] ss:$8 sps:$4 sm:$0xff]   ;;  %v1614_v23 = vld [vmem:[%s2463_s0 + $0x110] ss:$8 sps:$4 sm:$0xff]  }
   0x8   :  { %v1606_v18 = vld [vmem:[%s2463_s0 + $0x100] ss:$8 sps:$4 sm:$0xff]   ;;  %v1615_v24 = vld [vmem:[%s2463_s0 + $0x24] ss:$8 sps:$4 sm:$0xff]   ;;  %v1621_v28 = vld [vmem:[%s2463_s0 + $0x34] ss:$8 sps:$4 sm:$0xff]  }
   0x9   :  { %v1810_v21 = vld [vmem:[%s2464_s2] ss:$0 sm:$0xff]  ;;  %v1617_v25 = vld [vmem:[%s2463_s0 + $0x124] ss:$8 sps:$4 sm:$0xff]   ;;  %v1623_v29 = vld [vmem:[%s2463_s0 + $0x134] ss:$8 sps:$4 sm:$0xff]  }
   0xa   :  { %713 = vmatpush1.bf16.msra.mxu0 %v1592_v3  ;;  %1578 = vmatpush1.bf16.msra.mxu1 %v1592_v3  ;;  %27 = vst.msk [vmem:[#allocation2] sm:$0xff] %vm26_vm2, %v1810_v21  ;;  %28 = vst.msk [vmem:[#allocation2 + $0x8] sm:$0xff] %vm26_vm2, %v1810_v21  ;;  %v1619_v26 = vld [vmem:[%s2463_s0 + $0x20] ss:$8 sps:$4 sm:$0xff]   ;;  %v1625_v30 = vld [vmem:[%s2463_s0 + $0x30] ss:$8 sps:$4 sm:$0xff]  }
   0xb   :  { %714 = vmatprep.subr.bf16.mxu0 %v1699_v0  ;;  %1566 = vmatprep.subr.bf16.mxu1 %v1699_v0  ;;  %29 = vst.msk [vmem:[#allocation2 + $0x10] sm:$0xff] %vm26_vm2, %v1810_v21  ;;  %30 = vst.msk [vmem:[#allocation2 + $0x18] sm:$0xff] %vm26_vm2, %v1810_v21  ;;  %v1620_v27 = vld [vmem:[%s2463_s0 + $0x120] ss:$8 sps:$4 sm:$0xff]   ;;  %v1626_v31 = vld [vmem:[%s2463_s0 + $0x130] ss:$8 sps:$4 sm:$0xff]  }
   0xc   :  { %31 = vst.msk [vmem:[#allocation2 + $0x20] sm:$0xff] %vm26_vm2, %v1810_v21  ;;  %32 = vst.msk [vmem:[#allocation2 + $0x28] sm:$0xff] %vm26_vm2, %v1810_v21  ;;  %v1627_v32 = vld [vmem:[%s2463_s0 + $0x44] ss:$8 sps:$4 sm:$0xff]   ;;  %v1631_v34 = vld [vmem:[%s2463_s0 + $0x40] ss:$8 sps:$4 sm:$0xff]  }
   0xd   :  { %33 = vst.msk [vmem:[#allocation2 + $0x30] sm:$0xff] %vm26_vm2, %v1810_v21  ;;  %34 = vst.msk [vmem:[#allocation2 + $0x38] sm:$0xff] %vm26_vm2, %v1810_v21  ;;  %v1629_v33 = vld [vmem:[%s2463_s0 + $0x144] ss:$8 sps:$4 sm:$0xff]   ;;  %v1632_v35 = vld [vmem:[%s2463_s0 + $0x140] ss:$8 sps:$4 sm:$0xff]  }
   0xe   :  { %715 = vmatpush1.bf16.msra.mxu0 %v1593_v4  ;;  %1579 = vmatpush1.bf16.msra.mxu1 %v1593_v4  ;;  %35 = vst.msk [vmem:[#allocation2 + $0x40] sm:$0xff] %vm26_vm2, %v1810_v21  ;;  %36 = vst.msk [vmem:[#allocation2 + $0x48] sm:$0xff] %vm26_vm2, %v1810_v21  ;;  %v1633_v36 = vld [vmem:[%s2463_s0 + $0x54] ss:$8 sps:$4 sm:$0xff]   ;;  %v1637_v38 = vld [vmem:[%s2463_s0 + $0x50] ss:$8 sps:$4 sm:$0xff]  }
   0xf   :  { %716 = vmatprep.subr.bf16.mxu0 %v1699_v0  ;;  %1567 = vmatprep.subr.bf16.mxu1 %v1699_v0  ;;  %37 = vst.msk [vmem:[#allocation2 + $0x50] sm:$0xff] %vm26_vm2, %v1810_v21  ;;  %38 = vst.msk [vmem:[#allocation2 + $0x58] sm:$0xff] %vm26_vm2, %v1810_v21  ;;  %v1635_v37 = vld [vmem:[%s2463_s0 + $0x154] ss:$8 sps:$4 sm:$0xff]   ;;  %v1638_v39 = vld [vmem:[%s2463_s0 + $0x150] ss:$8 sps:$4 sm:$0xff]  }
  0x10   :  { %39 = vst.msk [vmem:[#allocation2 + $0x60] sm:$0xff] %vm26_vm2, %v1810_v21  ;;  %40 = vst.msk [vmem:[#allocation2 + $0x68] sm:$0xff] %vm26_vm2, %v1810_v21  ;;  %v1639_v40 = vld [vmem:[%s2463_s0 + $0x64] ss:$8 sps:$4 sm:$0xff]   ;;  %v1643_v42 = vld [vmem:[%s2463_s0 + $0x60] ss:$8 sps:$4 sm:$0xff]  }
  0x11   :  { %41 = vst.msk [vmem:[#allocation2 + $0x70] sm:$0xff] %vm26_vm2, %v1810_v21  ;;  %42 = vst.msk [vmem:[#allocation2 + $0x78] sm:$0xff] %vm26_vm2, %v1810_v21  ;;  %v1641_v41 = vld [vmem:[%s2463_s0 + $0x164] ss:$8 sps:$4 sm:$0xff]   ;;  %v1644_v43 = vld [vmem:[%s2463_s0 + $0x160] ss:$8 sps:$4 sm:$0xff]  }
  0x12   :  { %717 = vmatpush1.bf16.msra.mxu0 %v1594_v6  ;;  %1580 = vmatpush1.bf16.msra.mxu1 %v1594_v6  ;;  %43 = vst.msk [vmem:[#allocation2 + $0x80] sm:$0xff] %vm26_vm2, %v1810_v21  ;;  %44 = vst.msk [vmem:[#allocation2 + $0x88] sm:$0xff] %vm26_vm2, %v1810_v21  ;;  %v1645_v44 = vld [vmem:[%s2463_s0 + $0x74] ss:$8 sps:$4 sm:$0xff]   ;;  %v1649_v46 = vld [vmem:[%s2463_s0 + $0x70] ss:$8 sps:$4 sm:$0xff]  }
  0x13   :  { %718 = vmatprep.subr.bf16.mxu0 %v1699_v0  ;;  %1568 = vmatprep.subr.bf16.mxu1 %v1699_v0  ;;  %45 = vst.msk [vmem:[#allocation2 + $0x90] sm:$0xff] %vm26_vm2, %v1810_v21  ;;  %46 = vst.msk [vmem:[#allocation2 + $0x98] sm:$0xff] %vm26_vm2, %v1810_v21  ;;  %v1647_v45 = vld [vmem:[%s2463_s0 + $0x174] ss:$8 sps:$4 sm:$0xff]   ;;  %v1650_v47 = vld [vmem:[%s2463_s0 + $0x170] ss:$8 sps:$4 sm:$0xff]  }
  0x14   :  { %47 = vst.msk [vmem:[#allocation2 + $0xa0] sm:$0xff] %vm26_vm2, %v1810_v21  ;;  %48 = vst.msk [vmem:[#allocation2 + $0xa8] sm:$0xff] %vm26_vm2, %v1810_v21  ;;  %v1651_v48 = vld [vmem:[%s2463_s0 + $0x84] ss:$8 sps:$4 sm:$0xff]   ;;  %v1655_v50 = vld [vmem:[%s2463_s0 + $0x80] ss:$8 sps:$4 sm:$0xff]  }
  0x15   :  { %49 = vst.msk [vmem:[#allocation2 + $0xb0] sm:$0xff] %vm26_vm2, %v1810_v21  ;;  %50 = vst.msk [vmem:[#allocation2 + $0xb8] sm:$0xff] %vm26_vm2, %v1810_v21  ;;  %v1653_v49 = vld [vmem:[%s2463_s0 + $0x184] ss:$8 sps:$4 sm:$0xff]   ;;  %v1656_v51 = vld [vmem:[%s2463_s0 + $0x180] ss:$8 sps:$4 sm:$0xff]  }
  0x16   :  { %719 = vmatpush1.bf16.msra.mxu0 %v1595_v8  ;;  %1581 = vmatpush1.bf16.msra.mxu1 %v1595_v8  ;;  %51 = vst.msk [vmem:[#allocation2 + $0xc0] sm:$0xff] %vm26_vm2, %v1810_v21  ;;  %52 = vst.msk [vmem:[#allocation2 + $0xc8] sm:$0xff] %vm26_vm2, %v1810_v21  ;;  %v1657_v52 = vld [vmem:[%s2463_s0 + $0x94] ss:$8 sps:$4 sm:$0xff]   ;;  %v1661_v54 = vld [vmem:[%s2463_s0 + $0x90] ss:$8 sps:$4 sm:$0xff]  }
  0x17   :  { %720 = vmatprep.subr.bf16.mxu0 %v1699_v0  ;;  %1569 = vmatprep.subr.bf16.mxu1 %v1699_v0  ;;  %53 = vst.msk [vmem:[#allocation2 + $0xd0] sm:$0xff] %vm26_vm2, %v1810_v21  ;;  %54 = vst.msk [vmem:[#allocation2 + $0xd8] sm:$0xff] %vm26_vm2, %v1810_v21  ;;  %v1659_v53 = vld [vmem:[%s2463_s0 + $0x194] ss:$8 sps:$4 sm:$0xff]   ;;  %v1662_v55 = vld [vmem:[%s2463_s0 + $0x190] ss:$8 sps:$4 sm:$0xff]  }
  0x18   :  { %55 = vst.msk [vmem:[#allocation2 + $0xe0] sm:$0xff] %vm26_vm2, %v1810_v21  ;;  %56 = vst.msk [vmem:[#allocation2 + $0xe8] sm:$0xff] %vm26_vm2, %v1810_v21  ;;  %v1663_v56 = vld [vmem:[%s2463_s0 + $0xa4] ss:$8 sps:$4 sm:$0xff]   ;;  %v1667_v58 = vld [vmem:[%s2463_s0 + $0xa0] ss:$8 sps:$4 sm:$0xff]  }
  0x19   :  { %57 = vst.msk [vmem:[#allocation2 + $0xf0] sm:$0xff] %vm26_vm2, %v1810_v21  ;;  %58 = vst.msk [vmem:[#allocation2 + $0xf8] sm:$0xff] %vm26_vm2, %v1810_v21  ;;  %v1665_v57 = vld [vmem:[%s2463_s0 + $0x1a4] ss:$8 sps:$4 sm:$0xff]   ;;  %v1668_v59 = vld [vmem:[%s2463_s0 + $0x1a0] ss:$8 sps:$4 sm:$0xff]  }
  0x1a   :  { %721 = vmatpush1.bf16.msra.mxu0 %v1596_v9  ;;  %1582 = vmatpush1.bf16.msra.mxu1 %v1596_v9  ;;  %59 = vst.msk [vmem:[#allocation2 + $0x100] sm:$0xff] %vm26_vm2, %v1810_v21  ;;  %60 = vst.msk [vmem:[#allocation2 + $0x108] sm:$0xff] %vm26_vm2, %v1810_v21  ;;  %v1669_v60 = vld [vmem:[%s2463_s0 + $0xb4] ss:$8 sps:$4 sm:$0xff]   ;;  %v1673_v62 = vld [vmem:[%s2463_s0 + $0xb0] ss:$8 sps:$4 sm:$0xff]  }
  0x1b   :  { %722 = vmatprep.subr.bf16.mxu0 %v1699_v0  ;;  %1570 = vmatprep.subr.bf16.mxu1 %v1699_v0  ;;  %61 = vst.msk [vmem:[#allocation2 + $0x110] sm:$0xff] %vm26_vm2, %v1810_v21  ;;  %62 = vst.msk [vmem:[#allocation2 + $0x118] sm:$0xff] %vm26_vm2, %v1810_v21  ;;  %v1671_v61 = vld [vmem:[%s2463_s0 + $0x1b4] ss:$8 sps:$4 sm:$0xff]   ;;  %v1674_v63 = vld [vmem:[%s2463_s0 + $0x1b0] ss:$8 sps:$4 sm:$0xff]  }
  0x1c   :  { %63 = vst.msk [vmem:[#allocation2 + $0x120] sm:$0xff] %vm26_vm2, %v1810_v21  ;;  %64 = vst.msk [vmem:[#allocation2 + $0x128] sm:$0xff] %vm26_vm2, %v1810_v21  ;;  %v1677_v1 = vld [vmem:[%s2463_s0 + $0x1c4] ss:$8 sps:$4 sm:$0xff]   ;;  %v1679_v2 = vld [vmem:[%s2463_s0 + $0xc0] ss:$8 sps:$4 sm:$0xff]  }
  0x1d   :  { %65 = vst.msk [vmem:[#allocation2 + $0x130] sm:$0xff] %vm26_vm2, %v1810_v21  ;;  %66 = vst.msk [vmem:[#allocation2 + $0x138] sm:$0xff] %vm26_vm2, %v1810_v21  ;;  %v1680_v3 = vld [vmem:[%s2463_s0 + $0x1c0] ss:$8 sps:$4 sm:$0xff]   ;;  %v1681_v4 = vld [vmem:[%s2463_s0 + $0xd4] ss:$8 sps:$4 sm:$0xff]  }
  0x1e   :  { %723 = vmatpush1.bf16.msra.mxu0 %v1597_v10  ;;  %1583 = vmatpush1.bf16.msra.mxu1 %v1597_v10  ;;  %67 = vst.msk [vmem:[#allocation2 + $0x140] sm:$0xff] %vm26_vm2, %v1810_v21  ;;  %68 = vst.msk [vmem:[#allocation2 + $0x148] sm:$0xff] %vm26_vm2, %v1810_v21  ;;  %v1683_v5 = vld [vmem:[%s2463_s0 + $0x1d4] ss:$8 sps:$4 sm:$0xff]   ;;  %v1685_v6 = vld [vmem:[%s2463_s0 + $0xd0] ss:$8 sps:$4 sm:$0xff]  }
  0x1f   :  { %724 = vmatprep.subr.bf16.mxu0 %v1699_v0  ;;  %1571 = vmatprep.subr.bf16.mxu1 %v1699_v0  ;;  %69 = vst.msk [vmem:[#allocation2 + $0x150] sm:$0xff] %vm26_vm2, %v1810_v21  ;;  %70 = vst.msk [vmem:[#allocation2 + $0x158] sm:$0xff] %vm26_vm2, %v1810_v21  ;;  %v1686_v7 = vld [vmem:[%s2463_s0 + $0x1d0] ss:$8 sps:$4 sm:$0xff]   ;;  %v1687_v8 = vld [vmem:[%s2463_s0 + $0xe4] ss:$8 sps:$4 sm:$0xff]  }
  0x20   :  { %71 = vst.msk [vmem:[#allocation2 + $0x160] sm:$0xff] %vm26_vm2, %v1810_v21  ;;  %72 = vst.msk [vmem:[#allocation2 + $0x168] sm:$0xff] %vm26_vm2, %v1810_v21  ;;  %v1689_v9 = vld [vmem:[%s2463_s0 + $0x1e4] ss:$8 sps:$4 sm:$0xff]   ;;  %v1691_v10 = vld [vmem:[%s2463_s0 + $0xe0] ss:$8 sps:$4 sm:$0xff]  }
  0x21   :  { %73 = vst.msk [vmem:[#allocation2 + $0x170] sm:$0xff] %vm26_vm2, %v1810_v21  ;;  %74 = vst.msk [vmem:[#allocation2 + $0x178] sm:$0xff] %vm26_vm2, %v1810_v21  ;;  %v1698_v15 = vld [vmem:[%s2463_s0 + $0x1f0] ss:$8 sps:$4 sm:$0xff]  }
  0x22   :  { %725 = vmatpush1.bf16.msra.mxu0 %v1598_v11  ;;  %1584 = vmatpush1.bf16.msra.mxu1 %v1598_v11  ;;  %75 = vst.msk [vmem:[#allocation2 + $0x180] sm:$0xff] %vm26_vm2, %v1810_v21  ;;  %76 = vst.msk [vmem:[#allocation2 + $0x188] sm:$0xff] %vm26_vm2, %v1810_v21  ;;  %v1692_v11 = vld [vmem:[%s2463_s0 + $0x1e0] ss:$8 sps:$4 sm:$0xff]  }
  0x23   :  { %726 = vmatprep.subr.bf16.mxu0 %v1699_v0  ;;  %1572 = vmatprep.subr.bf16.mxu1 %v1699_v0  ;;  %77 = vst.msk [vmem:[#allocation2 + $0x190] sm:$0xff] %vm26_vm2, %v1810_v21  ;;  %78 = vst.msk [vmem:[#allocation2 + $0x198] sm:$0xff] %vm26_vm2, %v1810_v21 }
  0x24   :  { %79 = vst.msk [vmem:[#allocation2 + $0x1a0] sm:$0xff] %vm26_vm2, %v1810_v21  ;;  %80 = vst.msk [vmem:[#allocation2 + $0x1a8] sm:$0xff] %vm26_vm2, %v1810_v21 }
  0x25   :  { %81 = vst.msk [vmem:[#allocation2 + $0x1b0] sm:$0xff] %vm26_vm2, %v1810_v21  ;;  %82 = vst.msk [vmem:[#allocation2 + $0x1b8] sm:$0xff] %vm26_vm2, %v1810_v21 }
  0x26   :  { %727 = vmatpush1.bf16.msra.mxu0 %v1599_v12  ;;  %1585 = vmatpush1.bf16.msra.mxu1 %v1599_v12  ;;  %83 = vst.msk [vmem:[#allocation2 + $0x1c0] sm:$0xff] %vm26_vm2, %v1810_v21  ;;  %84 = vst.msk [vmem:[#allocation2 + $0x1c8] sm:$0xff] %vm26_vm2, %v1810_v21  ;;  %v1693_v12 = vld [vmem:[%s2463_s0 + $0xf4] ss:$8 sps:$4 sm:$0xff]  }
  0x27   :  { %728 = vmatprep.subr.bf16.mxu0 %v1699_v0  ;;  %1573 = vmatprep.subr.bf16.mxu1 %v1699_v0  ;;  %85 = vst.msk [vmem:[#allocation2 + $0x1d0] sm:$0xff] %vm26_vm2, %v1810_v21  ;;  %86 = vst.msk [vmem:[#allocation2 + $0x1d8] sm:$0xff] %vm26_vm2, %v1810_v21 }
  0x28   :  { %87 = vst.msk [vmem:[#allocation2 + $0x1e0] sm:$0xff] %vm26_vm2, %v1810_v21  ;;  %88 = vst.msk [vmem:[#allocation2 + $0x1e8] sm:$0xff] %vm26_vm2, %v1810_v21 }
  0x29   :  { %89 = vst.msk [vmem:[#allocation2 + $0x1f0] sm:$0xff] %vm26_vm2, %v1810_v21  ;;  %90 = vst.msk [vmem:[#allocation2 + $0x1f8] sm:$0xff] %vm26_vm2, %v1810_v21  ;;  %v124_v21 = vld [vmem:[#allocation2 + $0x108] sm:$0xff] }
  0x2a   :  { %729 = vmatpush1.bf16.msra.mxu0 %v1600_v13  ;;  %1586 = vmatpush1.bf16.msra.mxu1 %v1600_v13  ;;  %v1695_v13 = vld [vmem:[%s2463_s0 + $0x1f4] ss:$8 sps:$4 sm:$0xff]  }
  0x2b   :  { %730 = vmatprep.subr.bf16.mxu0 %v1699_v0  ;;  %1574 = vmatprep.subr.bf16.mxu1 %v1699_v0 }
  0x2e   :  { %731 = vmatpush1.bf16.msra.mxu0 %v1601_v14  ;;  %1587 = vmatpush1.bf16.msra.mxu1 %v1601_v14  ;;  %v1697_v14 = vld [vmem:[%s2463_s0 + $0xf0] ss:$8 sps:$4 sm:$0xff]  }
  0x2f   :  { %732 = vmatprep.subr.bf16.mxu0 %v1699_v0  ;;  %1575 = vmatprep.subr.bf16.mxu1 %v1699_v0  ;;  %v1675_v0 = vld [vmem:[%s2463_s0 + $0xc4] ss:$8 sps:$4 sm:$0xff]  }
  0x32   :  { %733 = vmatpush1.bf16.msra.mxu0 %v706_v16  ;;  %1588 = vmatpush1.bf16.msra.mxu1 %v706_v16  ;;  %v91_v16 = vld [vmem:[#allocation2] sm:$0xff] }
  0x35   :  { %741 = vmatmul.mubr.bf16.vlgmr.msra.gmra.mrb[0].mxu0 %v1603_v17  ;;  %869 = vmatmul.mubr.bf16.vlgmr.msra.gmra.mrb[0].mxu1 %v1606_v18  ;;  %v123_v17 = vld [vmem:[#allocation2 + $0x100] sm:$0xff] }
  0x36   :  { %1532 = vmatprep.mubr.msk.bf16.mxu0 %vm607_vm0, %v1609_v19  ;;  %1548 = vmatprep.mubr.msk.bf16.mxu1 %vm607_vm0, %v1611_v20  ;;  %v92_v20 = vld [vmem:[#allocation2 + $0x8] sm:$0xff] }
  0x3d   :  { %749 = vmatmul.mubr.bf16.gmra.mrb[4].mxu0 %v1613_v22  ;;  %877 = vmatmul.mubr.bf16.gmra.mrb[4].mxu1 %v1614_v23 }
  0x3e   :  { %1533 = vmatprep.mubr.msk.bf16.mxu0 %vm607_vm0, %v1615_v24  ;;  %1549 = vmatprep.mubr.msk.bf16.mxu1 %vm607_vm0, %v1617_v25 }
  0x45   :  { %757 = vmatmul.mubr.bf16.gmra.mrb[8].mxu0 %v1619_v26  ;;  %885 = vmatmul.mubr.bf16.gmra.mrb[8].mxu1 %v1620_v27 }
  0x46   :  { %1534 = vmatprep.mubr.msk.bf16.mxu0 %vm607_vm0, %v1621_v28  ;;  %1550 = vmatprep.mubr.msk.bf16.mxu1 %vm607_vm0, %v1623_v29 }
  0x4d   :  { %765 = vmatmul.mubr.bf16.gmra.mrb[12].mxu0 %v1625_v30  ;;  %893 = vmatmul.mubr.bf16.gmra.mrb[12].mxu1 %v1626_v31 }
  0x4e   :  { %1535 = vmatprep.mubr.msk.bf16.mxu0 %vm607_vm0, %v1627_v32  ;;  %1551 = vmatprep.mubr.msk.bf16.mxu1 %vm607_vm0, %v1629_v33  ;;  %v93_v32 = vld [vmem:[#allocation2 + $0x10] sm:$0xff] }
  0x4f   :  { %v125_v33 = vld [vmem:[#allocation2 + $0x110] sm:$0xff] }
  0x55   :  { %773 = vmatmul.mubr.bf16.gmra.mrb[16].mxu0 %v1631_v34  ;;  %901 = vmatmul.mubr.bf16.gmra.mrb[16].mxu1 %v1632_v35 }
  0x56   :  { %1536 = vmatprep.mubr.msk.bf16.mxu0 %vm607_vm0, %v1633_v36  ;;  %1552 = vmatprep.mubr.msk.bf16.mxu1 %vm607_vm0, %v1635_v37 }
  0x5d   :  { %781 = vmatmul.mubr.bf16.gmra.mrb[20].mxu0 %v1637_v38  ;;  %909 = vmatmul.mubr.bf16.gmra.mrb[20].mxu1 %v1638_v39 }
  0x5e   :  { %1537 = vmatprep.mubr.msk.bf16.mxu0 %vm607_vm0, %v1639_v40  ;;  %1553 = vmatprep.mubr.msk.bf16.mxu1 %vm607_vm0, %v1641_v41  ;;  %v94_v40 = vld [vmem:[#allocation2 + $0x18] sm:$0xff] }
  0x5f   :  { %v126_v41 = vld [vmem:[#allocation2 + $0x118] sm:$0xff] }
  0x65   :  { %789 = vmatmul.mubr.bf16.gmra.mrb[24].mxu0 %v1643_v42  ;;  %917 = vmatmul.mubr.bf16.gmra.mrb[24].mxu1 %v1644_v43 }
  0x66   :  { %1538 = vmatprep.mubr.msk.bf16.mxu0 %vm607_vm0, %v1645_v44  ;;  %1554 = vmatprep.mubr.msk.bf16.mxu1 %vm607_vm0, %v1647_v45 }
  0x6d   :  { %797 = vmatmul.mubr.bf16.gmra.mrb[28].mxu0 %v1649_v46  ;;  %925 = vmatmul.mubr.bf16.gmra.mrb[28].mxu1 %v1650_v47 }
  0x6e   :  { %1539 = vmatprep.mubr.msk.bf16.mxu0 %vm607_vm0, %v1651_v48  ;;  %1555 = vmatprep.mubr.msk.bf16.mxu1 %vm607_vm0, %v1653_v49 }
  0x75   :  { %805 = vmatmul.mubr.bf16.gmra.mrb[32].mxu0 %v1655_v50  ;;  %933 = vmatmul.mubr.bf16.gmra.mrb[32].mxu1 %v1656_v51 }
  0x76   :  { %1540 = vmatprep.mubr.msk.bf16.mxu0 %vm607_vm0, %v1657_v52  ;;  %1556 = vmatprep.mubr.msk.bf16.mxu1 %vm607_vm0, %v1659_v53 }
  0x7d   :  { %813 = vmatmul.mubr.bf16.gmra.mrb[36].mxu0 %v1661_v54  ;;  %941 = vmatmul.mubr.bf16.gmra.mrb[36].mxu1 %v1662_v55 }
  0x7e   :  { %1541 = vmatprep.mubr.msk.bf16.mxu0 %vm607_vm0, %v1663_v56  ;;  %1557 = vmatprep.mubr.msk.bf16.mxu1 %vm607_vm0, %v1665_v57 }
  0x85   :  { %821 = vmatmul.mubr.bf16.gmra.mrb[40].mxu0 %v1667_v58  ;;  %949 = vmatmul.mubr.bf16.gmra.mrb[40].mxu1 %v1668_v59  ;;  %v95_v58 = vld [vmem:[#allocation2 + $0x20] sm:$0xff] }
  0x86   :  { %1542 = vmatprep.mubr.msk.bf16.mxu0 %vm607_vm0, %v1669_v60  ;;  %1558 = vmatprep.mubr.msk.bf16.mxu1 %vm607_vm0, %v1671_v61  ;;  %v127_v59 = vld [vmem:[#allocation2 + $0x120] sm:$0xff] }
  0x8d   :  { %829 = vmatmul.mubr.bf16.gmra.mrb[44].mxu0 %v1673_v62  ;;  %957 = vmatmul.mubr.bf16.gmra.mrb[44].mxu1 %v1674_v63 }
  0x8e   :  { %1543 = vmatprep.mubr.msk.bf16.mxu0 %vm607_vm0, %v1675_v0  ;;  %1559 = vmatprep.mubr.msk.bf16.mxu1 %vm607_vm0, %v1677_v1 }
  0x95   :  { %837 = vmatmul.mubr.bf16.gmra.mrb[48].mxu0 %v1679_v2  ;;  %965 = vmatmul.mubr.bf16.gmra.mrb[48].mxu1 %v1680_v3 }
  0x96   :  { %1544 = vmatprep.mubr.msk.bf16.mxu0 %vm607_vm0, %v1681_v4  ;;  %1560 = vmatprep.mubr.msk.bf16.mxu1 %vm607_vm0, %v1683_v5  ;;  %v96_v4 = vld [vmem:[#allocation2 + $0x28] sm:$0xff] }
  0x97   :  { %v128_v5 = vld [vmem:[#allocation2 + $0x128] sm:$0xff] }
  0x9d   :  { %845 = vmatmul.mubr.bf16.gmra.mrb[52].mxu0 %v1685_v6  ;;  %973 = vmatmul.mubr.bf16.gmra.mrb[52].mxu1 %v1686_v7 }
  0x9e   :  { %1545 = vmatprep.mubr.msk.bf16.mxu0 %vm607_vm0, %v1687_v8  ;;  %1561 = vmatprep.mubr.msk.bf16.mxu1 %vm607_vm0, %v1689_v9 }
  0xa5   :  { %853 = vmatmul.mubr.bf16.gmra.mrb[56].mxu0 %v1691_v10  ;;  %981 = vmatmul.mubr.bf16.gmra.mrb[56].mxu1 %v1692_v11 }
  0xa6   :  { %1546 = vmatprep.mubr.msk.bf16.mxu0 %vm607_vm0, %v1693_v12  ;;  %1562 = vmatprep.mubr.msk.bf16.mxu1 %vm607_vm0, %v1695_v13 }
  0xad   :  { %861 = vmatmul.mubr.bf16.gmra.mrb[60].mxu0 %v1697_v14  ;;  %989 = vmatmul.mubr.bf16.gmra.mrb[60].mxu1 %v1698_v15 }
 0x108   :  { %v742_v18 = vpop.f32.mrb[0].mxu0  ;;  %v870_v19 = vpop.f32.mrb[0].mxu1 }
 0x109   :  { %v997_v22 = vadd.f32 %v742_v18, %v91_v16  ;;  %v1029_v23 = vadd.f32 %v870_v19, %v123_v17  ;;  %v744_v24 = vpop.f32.mrb[1].mxu0  ;;  %v872_v25 = vpop.f32.mrb[1].mxu1  ;;  %v97_v16 = vld [vmem:[#allocation2 + $0x30] sm:$0xff] }
 0x10a   :  { %v745_v26 = vpop.f32.mrb[2].mxu0  ;;  %v873_v27 = vpop.f32.mrb[2].mxu1 }
 0x10b   :  { %1062 = vst.msk [vmem:[#allocation2] sm:$0xff] %vm26_vm2, %v997_v22  ;;  %1094 = vst.msk [vmem:[#allocation2 + $0x100] sm:$0xff] %vm26_vm2, %v1029_v23  ;;  %v998_v28 = vadd.f32 %v745_v26, %v92_v20  ;;  %v1030_v29 = vadd.f32 %v873_v27, %v124_v21  ;;  %v747_v30 = vpop.f32.mrb[3].mxu0  ;;  %v875_v31 = vpop.f32.mrb[3].mxu1  ;;  %v129_v21 = vld [vmem:[#allocation2 + $0x130] sm:$0xff] }
 0x10d   :  { %1063 = vst.msk [vmem:[#allocation2 + $0x8] sm:$0xff] %vm26_vm2, %v998_v28  ;;  %1095 = vst.msk [vmem:[#allocation2 + $0x108] sm:$0xff] %vm26_vm2, %v1030_v29 }
 0x110   :  { %v750_v34 = vpop.f32.mrb[4].mxu0  ;;  %v878_v35 = vpop.f32.mrb[4].mxu1 }
 0x111   :  { %v999_v36 = vadd.f32 %v750_v34, %v93_v32  ;;  %v1031_v37 = vadd.f32 %v878_v35, %v125_v33  ;;  %v752_v38 = vpop.f32.mrb[5].mxu0  ;;  %v880_v39 = vpop.f32.mrb[5].mxu1  ;;  %v98_v32 = vld [vmem:[#allocation2 + $0x38] sm:$0xff] }
 0x112   :  { %v1129_v42 = vld [vmem:[#allocation2] sm:$0xff]  ;;  %v753_v44 = vpop.f32.mrb[6].mxu0  ;;  %v881_v45 = vpop.f32.mrb[6].mxu1  ;;  %v130_v33 = vld [vmem:[#allocation2 + $0x138] sm:$0xff] }
 0x113   :  { %v1161_v43 = vld [vmem:[#allocation2 + $0x100] sm:$0xff]  ;;  %vm1193_vm3 = vcmp.gt.f32.partialorder %v1129_v42, 0.0  ;;  %v1257_v46 = vmul.f32 0.01, %v1129_v42  ;;  %1064 = vst.msk [vmem:[#allocation2 + $0x10] sm:$0xff] %vm26_vm2, %v999_v36  ;;  %1096 = vst.msk [vmem:[#allocation2 + $0x110] sm:$0xff] %vm26_vm2, %v1031_v37  ;;  %v1000_v50 = vadd.f32 %v753_v44, %v94_v40  ;;  %v1032_v51 = vadd.f32 %v881_v45, %v126_v41 }
 0x114   :  { %vm1225_vm4 = vcmp.gt.f32.partialorder %v1161_v43, 0.0  ;;  %v1289_v47 = vmul.f32 0.01, %v1161_v43  ;;  %v1130_v48 = vld [vmem:[#allocation2 + $0x8] sm:$0xff]  ;;  %v755_v52 = vpop.f32.mrb[7].mxu0  ;;  %v883_v53 = vpop.f32.mrb[7].mxu1 }
 0x115   :  { %v1162_v49 = vld [vmem:[#allocation2 + $0x108] sm:$0xff]  ;;  %v1321_v54 = vsel %vm1193_vm3, %v1129_v42, %v1257_v46  ;;  %vm1194_vm5 = vcmp.gt.f32.partialorder %v1130_v48, 0.0  ;;  %v1258_v56 = vmul.f32 0.01, %v1130_v48  ;;  %1065 = vst.msk [vmem:[#allocation2 + $0x18] sm:$0xff] %vm26_vm2, %v1000_v50  ;;  %1097 = vst.msk [vmem:[#allocation2 + $0x118] sm:$0xff] %vm26_vm2, %v1032_v51 }
 0x116   :  { %v1353_v55 = vsel %vm1225_vm4, %v1161_v43, %v1289_v47  ;;  %1385 = vst.msk [vmem:[%s2465_s3] sm:$0xff] %vm26_vm2, %v1321_v54  ;;  %vm1226_vm6 = vcmp.gt.f32.partialorder %v1162_v49, 0.0  ;;  %v1290_v57 = vmul.f32 0.01, %v1162_v49  ;;  %v99_v44 = vld [vmem:[#allocation2 + $0x40] sm:$0xff] }
 0x117   :  { %1417 = vst.msk [vmem:[%s2465_s3 + $0x100] sm:$0xff] %vm26_vm2, %v1353_v55  ;;  %v1322_v60 = vsel %vm1194_vm5, %v1130_v48, %v1258_v56 }
 0x118   :  { %1386 = vst.msk [vmem:[%s2465_s3 + $0x8] sm:$0xff] %vm26_vm2, %v1322_v60  ;;  %v1354_v61 = vsel %vm1226_vm6, %v1162_v49, %v1290_v57  ;;  %v758_v62 = vpop.f32.mrb[8].mxu0  ;;  %v886_v63 = vpop.f32.mrb[8].mxu1  ;;  %v131_v49 = vld [vmem:[#allocation2 + $0x140] sm:$0xff]  ;;  %v100_v60 = vld [vmem:[#allocation2 + $0x48] sm:$0xff] }
 0x119   :  { %1418 = vst.msk [vmem:[%s2465_s3 + $0x108] sm:$0xff] %vm26_vm2, %v1354_v61  ;;  %v1001_v0 = vadd.f32 %v758_v62, %v95_v58  ;;  %v1033_v1 = vadd.f32 %v886_v63, %v127_v59  ;;  %v760_v2 = vpop.f32.mrb[9].mxu0  ;;  %v888_v3 = vpop.f32.mrb[9].mxu1  ;;  %v132_v61 = vld [vmem:[#allocation2 + $0x148] sm:$0xff] }
 0x11a   :  { %v1131_v6 = vld [vmem:[#allocation2 + $0x10] sm:$0xff]  ;;  %v761_v8 = vpop.f32.mrb[10].mxu0  ;;  %v889_v9 = vpop.f32.mrb[10].mxu1 }
 0x11b   :  { %v1163_v7 = vld [vmem:[#allocation2 + $0x110] sm:$0xff]  ;;  %vm1195_vm7 = vcmp.gt.f32.partialorder %v1131_v6, 0.0  ;;  %v1259_v10 = vmul.f32 0.01, %v1131_v6  ;;  %1066 = vst.msk [vmem:[#allocation2 + $0x20] sm:$0xff] %vm26_vm2, %v1001_v0  ;;  %1098 = vst.msk [vmem:[#allocation2 + $0x120] sm:$0xff] %vm26_vm2, %v1033_v1  ;;  %v1002_v12 = vadd.f32 %v761_v8, %v96_v4  ;;  %v1034_v13 = vadd.f32 %v889_v9, %v128_v5 }
 0x11c   :  { %vm1227_vm8 = vcmp.gt.f32.partialorder %v1163_v7, 0.0  ;;  %v1291_v11 = vmul.f32 0.01, %v1163_v7  ;;  %v763_v14 = vpop.f32.mrb[11].mxu0  ;;  %v891_v15 = vpop.f32.mrb[11].mxu1  ;;  %v1132_v19 = vld [vmem:[#allocation2 + $0x18] sm:$0xff] }
 0x11d   :  { %v1323_v17 = vsel %vm1195_vm7, %v1131_v6, %v1259_v10  ;;  %v1164_v20 = vld [vmem:[#allocation2 + $0x118] sm:$0xff]  ;;  %vm1196_vm9 = vcmp.gt.f32.partialorder %v1132_v19, 0.0  ;;  %v1260_v22 = vmul.f32 0.01, %v1132_v19  ;;  %1067 = vst.msk [vmem:[#allocation2 + $0x28] sm:$0xff] %vm26_vm2, %v1002_v12  ;;  %1099 = vst.msk [vmem:[#allocation2 + $0x128] sm:$0xff] %vm26_vm2, %v1034_v13 }
 0x11e   :  { %v1355_v18 = vsel %vm1227_vm8, %v1163_v7, %v1291_v11  ;;  %1387 = vst.msk [vmem:[%s2465_s3 + $0x10] sm:$0xff] %vm26_vm2, %v1323_v17  ;;  %vm1228_vm10 = vcmp.gt.f32.partialorder %v1164_v20, 0.0  ;;  %v1292_v23 = vmul.f32 0.01, %v1164_v20  ;;  %v101_v8 = vld [vmem:[#allocation2 + $0x50] sm:$0xff] }
 0x11f   :  { %1419 = vst.msk [vmem:[%s2465_s3 + $0x110] sm:$0xff] %vm26_vm2, %v1355_v18  ;;  %v1324_v24 = vsel %vm1196_vm9, %v1132_v19, %v1260_v22  ;;  %v133_v13 = vld [vmem:[#allocation2 + $0x150] sm:$0xff] }
 0x120   :  { %v1356_v25 = vsel %vm1228_vm10, %v1164_v20, %v1292_v23  ;;  %v766_v26 = vpop.f32.mrb[12].mxu0  ;;  %v894_v27 = vpop.f32.mrb[12].mxu1  ;;  %1388 = vst.msk [vmem:[%s2465_s3 + $0x18] sm:$0xff] %vm26_vm2, %v1324_v24  ;;  %v102_v24 = vld [vmem:[#allocation2 + $0x58] sm:$0xff] }
 0x121   :  { %1420 = vst.msk [vmem:[%s2465_s3 + $0x118] sm:$0xff] %vm26_vm2, %v1356_v25  ;;  %v1003_v28 = vadd.f32 %v766_v26, %v97_v16  ;;  %v1035_v29 = vadd.f32 %v894_v27, %v129_v21  ;;  %v768_v30 = vpop.f32.mrb[13].mxu0  ;;  %v896_v31 = vpop.f32.mrb[13].mxu1  ;;  %v134_v25 = vld [vmem:[#allocation2 + $0x158] sm:$0xff] }
 0x122   :  { %v1133_v34 = vld [vmem:[#allocation2 + $0x20] sm:$0xff]  ;;  %v769_v36 = vpop.f32.mrb[14].mxu0  ;;  %v897_v37 = vpop.f32.mrb[14].mxu1 }
 0x123   :  { %v1165_v35 = vld [vmem:[#allocation2 + $0x120] sm:$0xff]  ;;  %vm1197_vm11 = vcmp.gt.f32.partialorder %v1133_v34, 0.0  ;;  %v1261_v38 = vmul.f32 0.01, %v1133_v34  ;;  %1068 = vst.msk [vmem:[#allocation2 + $0x30] sm:$0xff] %vm26_vm2, %v1003_v28  ;;  %1100 = vst.msk [vmem:[#allocation2 + $0x130] sm:$0xff] %vm26_vm2, %v1035_v29  ;;  %v1004_v40 = vadd.f32 %v769_v36, %v98_v32  ;;  %v1036_v41 = vadd.f32 %v897_v37, %v130_v33 }
 0x124   :  { %vm1229_vm12 = vcmp.gt.f32.partialorder %v1165_v35, 0.0  ;;  %v1293_v39 = vmul.f32 0.01, %v1165_v35  ;;  %v771_v42 = vpop.f32.mrb[15].mxu0  ;;  %v899_v43 = vpop.f32.mrb[15].mxu1  ;;  %v1134_v47 = vld [vmem:[#allocation2 + $0x28] sm:$0xff] }
 0x125   :  { %v1325_v45 = vsel %vm1197_vm11, %v1133_v34, %v1261_v38  ;;  %v1166_v48 = vld [vmem:[#allocation2 + $0x128] sm:$0xff]  ;;  %vm1198_vm13 = vcmp.gt.f32.partialorder %v1134_v47, 0.0  ;;  %v1262_v50 = vmul.f32 0.01, %v1134_v47  ;;  %1069 = vst.msk [vmem:[#allocation2 + $0x38] sm:$0xff] %vm26_vm2, %v1004_v40  ;;  %1101 = vst.msk [vmem:[#allocation2 + $0x138] sm:$0xff] %vm26_vm2, %v1036_v41 }
 0x126   :  { %v1357_v46 = vsel %vm1229_vm12, %v1165_v35, %v1293_v39  ;;  %1389 = vst.msk [vmem:[%s2465_s3 + $0x20] sm:$0xff] %vm26_vm2, %v1325_v45  ;;  %vm1230_vm14 = vcmp.gt.f32.partialorder %v1166_v48, 0.0  ;;  %v1294_v51 = vmul.f32 0.01, %v1166_v48  ;;  %v103_v36 = vld [vmem:[#allocation2 + $0x60] sm:$0xff] }
 0x127   :  { %1421 = vst.msk [vmem:[%s2465_s3 + $0x120] sm:$0xff] %vm26_vm2, %v1357_v46  ;;  %v1326_v52 = vsel %vm1198_vm13, %v1134_v47, %v1262_v50  ;;  %v135_v41 = vld [vmem:[#allocation2 + $0x160] sm:$0xff] }
 0x128   :  { %v1358_v53 = vsel %vm1230_vm14, %v1166_v48, %v1294_v51  ;;  %v774_v54 = vpop.f32.mrb[16].mxu0  ;;  %v902_v55 = vpop.f32.mrb[16].mxu1  ;;  %1390 = vst.msk [vmem:[%s2465_s3 + $0x28] sm:$0xff] %vm26_vm2, %v1326_v52  ;;  %v104_v52 = vld [vmem:[#allocation2 + $0x68] sm:$0xff] }
 0x129   :  { %1422 = vst.msk [vmem:[%s2465_s3 + $0x128] sm:$0xff] %vm26_vm2, %v1358_v53  ;;  %v1005_v56 = vadd.f32 %v774_v54, %v99_v44  ;;  %v1037_v57 = vadd.f32 %v902_v55, %v131_v49  ;;  %v776_v58 = vpop.f32.mrb[17].mxu0  ;;  %v904_v59 = vpop.f32.mrb[17].mxu1  ;;  %v136_v53 = vld [vmem:[#allocation2 + $0x168] sm:$0xff] }
 0x12a   :  { %v1135_v62 = vld [vmem:[#allocation2 + $0x30] sm:$0xff]  ;;  %v777_v0 = vpop.f32.mrb[18].mxu0  ;;  %v905_v1 = vpop.f32.mrb[18].mxu1 }
 0x12b   :  { %v1167_v63 = vld [vmem:[#allocation2 + $0x130] sm:$0xff]  ;;  %vm1199_vm15 = vcmp.gt.f32.partialorder %v1135_v62, 0.0  ;;  %v1263_v2 = vmul.f32 0.01, %v1135_v62  ;;  %1070 = vst.msk [vmem:[#allocation2 + $0x40] sm:$0xff] %vm26_vm2, %v1005_v56  ;;  %1102 = vst.msk [vmem:[#allocation2 + $0x140] sm:$0xff] %vm26_vm2, %v1037_v57  ;;  %v1006_v4 = vadd.f32 %v777_v0, %v100_v60  ;;  %v1038_v5 = vadd.f32 %v905_v1, %v132_v61 }
 0x12c   :  { %vm1231_vm0 = vcmp.gt.f32.partialorder %v1167_v63, 0.0  ;;  %v1295_v3 = vmul.f32 0.01, %v1167_v63  ;;  %v779_v6 = vpop.f32.mrb[19].mxu0  ;;  %v907_v7 = vpop.f32.mrb[19].mxu1  ;;  %v1136_v11 = vld [vmem:[#allocation2 + $0x38] sm:$0xff] }
 0x12d   :  { %v1327_v9 = vsel %vm1199_vm15, %v1135_v62, %v1263_v2  ;;  %v1168_v12 = vld [vmem:[#allocation2 + $0x138] sm:$0xff]  ;;  %vm1200_vm1 = vcmp.gt.f32.partialorder %v1136_v11, 0.0  ;;  %v1264_v14 = vmul.f32 0.01, %v1136_v11  ;;  %1071 = vst.msk [vmem:[#allocation2 + $0x48] sm:$0xff] %vm26_vm2, %v1006_v4  ;;  %1103 = vst.msk [vmem:[#allocation2 + $0x148] sm:$0xff] %vm26_vm2, %v1038_v5 }
 0x12e   :  { %v1359_v10 = vsel %vm1231_vm0, %v1167_v63, %v1295_v3  ;;  %1391 = vst.msk [vmem:[%s2465_s3 + $0x30] sm:$0xff] %vm26_vm2, %v1327_v9  ;;  %vm1232_vm3 = vcmp.gt.f32.partialorder %v1168_v12, 0.0  ;;  %v1296_v15 = vmul.f32 0.01, %v1168_v12  ;;  %v105_v0 = vld [vmem:[#allocation2 + $0x70] sm:$0xff] }
 0x12f   :  { %1423 = vst.msk [vmem:[%s2465_s3 + $0x130] sm:$0xff] %vm26_vm2, %v1359_v10  ;;  %v1328_v16 = vsel %vm1200_vm1, %v1136_v11, %v1264_v14  ;;  %v137_v5 = vld [vmem:[#allocation2 + $0x170] sm:$0xff] }
 0x130   :  { %v1360_v17 = vsel %vm1232_vm3, %v1168_v12, %v1296_v15  ;;  %v782_v18 = vpop.f32.mrb[20].mxu0  ;;  %v910_v19 = vpop.f32.mrb[20].mxu1  ;;  %1392 = vst.msk [vmem:[%s2465_s3 + $0x38] sm:$0xff] %vm26_vm2, %v1328_v16  ;;  %v106_v16 = vld [vmem:[#allocation2 + $0x78] sm:$0xff] }
 0x131   :  { %1424 = vst.msk [vmem:[%s2465_s3 + $0x138] sm:$0xff] %vm26_vm2, %v1360_v17  ;;  %v1007_v20 = vadd.f32 %v782_v18, %v101_v8  ;;  %v1039_v21 = vadd.f32 %v910_v19, %v133_v13  ;;  %v784_v22 = vpop.f32.mrb[21].mxu0  ;;  %v912_v23 = vpop.f32.mrb[21].mxu1  ;;  %v138_v17 = vld [vmem:[#allocation2 + $0x178] sm:$0xff] }
 0x132   :  { %v1137_v26 = vld [vmem:[#allocation2 + $0x40] sm:$0xff]  ;;  %v785_v28 = vpop.f32.mrb[22].mxu0  ;;  %v913_v29 = vpop.f32.mrb[22].mxu1 }
 0x133   :  { %v1169_v27 = vld [vmem:[#allocation2 + $0x140] sm:$0xff]  ;;  %vm1201_vm4 = vcmp.gt.f32.partialorder %v1137_v26, 0.0  ;;  %v1265_v30 = vmul.f32 0.01, %v1137_v26  ;;  %1072 = vst.msk [vmem:[#allocation2 + $0x50] sm:$0xff] %vm26_vm2, %v1007_v20  ;;  %1104 = vst.msk [vmem:[#allocation2 + $0x150] sm:$0xff] %vm26_vm2, %v1039_v21  ;;  %v1008_v32 = vadd.f32 %v785_v28, %v102_v24  ;;  %v1040_v33 = vadd.f32 %v913_v29, %v134_v25 }
 0x134   :  { %vm1233_vm5 = vcmp.gt.f32.partialorder %v1169_v27, 0.0  ;;  %v1297_v31 = vmul.f32 0.01, %v1169_v27  ;;  %v787_v34 = vpop.f32.mrb[23].mxu0  ;;  %v915_v35 = vpop.f32.mrb[23].mxu1  ;;  %v1138_v39 = vld [vmem:[#allocation2 + $0x48] sm:$0xff] }
 0x135   :  { %v1329_v37 = vsel %vm1201_vm4, %v1137_v26, %v1265_v30  ;;  %v1170_v40 = vld [vmem:[#allocation2 + $0x148] sm:$0xff]  ;;  %vm1202_vm6 = vcmp.gt.f32.partialorder %v1138_v39, 0.0  ;;  %v1266_v42 = vmul.f32 0.01, %v1138_v39  ;;  %1073 = vst.msk [vmem:[#allocation2 + $0x58] sm:$0xff] %vm26_vm2, %v1008_v32  ;;  %1105 = vst.msk [vmem:[#allocation2 + $0x158] sm:$0xff] %vm26_vm2, %v1040_v33 }
 0x136   :  { %v1361_v38 = vsel %vm1233_vm5, %v1169_v27, %v1297_v31  ;;  %1393 = vst.msk [vmem:[%s2465_s3 + $0x40] sm:$0xff] %vm26_vm2, %v1329_v37  ;;  %vm1234_vm7 = vcmp.gt.f32.partialorder %v1170_v40, 0.0  ;;  %v1298_v43 = vmul.f32 0.01, %v1170_v40  ;;  %v107_v28 = vld [vmem:[#allocation2 + $0x80] sm:$0xff] }
 0x137   :  { %1425 = vst.msk [vmem:[%s2465_s3 + $0x140] sm:$0xff] %vm26_vm2, %v1361_v38  ;;  %v1330_v44 = vsel %vm1202_vm6, %v1138_v39, %v1266_v42  ;;  %v139_v33 = vld [vmem:[#allocation2 + $0x180] sm:$0xff] }
 0x138   :  { %v1362_v45 = vsel %vm1234_vm7, %v1170_v40, %v1298_v43  ;;  %v790_v46 = vpop.f32.mrb[24].mxu0  ;;  %v918_v47 = vpop.f32.mrb[24].mxu1  ;;  %1394 = vst.msk [vmem:[%s2465_s3 + $0x48] sm:$0xff] %vm26_vm2, %v1330_v44  ;;  %v108_v44 = vld [vmem:[#allocation2 + $0x88] sm:$0xff] }
 0x139   :  { %1426 = vst.msk [vmem:[%s2465_s3 + $0x148] sm:$0xff] %vm26_vm2, %v1362_v45  ;;  %v1009_v48 = vadd.f32 %v790_v46, %v103_v36  ;;  %v1041_v49 = vadd.f32 %v918_v47, %v135_v41  ;;  %v792_v50 = vpop.f32.mrb[25].mxu0  ;;  %v920_v51 = vpop.f32.mrb[25].mxu1  ;;  %v140_v45 = vld [vmem:[#allocation2 + $0x188] sm:$0xff] }
 0x13a   :  { %v1139_v54 = vld [vmem:[#allocation2 + $0x50] sm:$0xff]  ;;  %v793_v56 = vpop.f32.mrb[26].mxu0  ;;  %v921_v57 = vpop.f32.mrb[26].mxu1 }
 0x13b   :  { %v1171_v55 = vld [vmem:[#allocation2 + $0x150] sm:$0xff]  ;;  %vm1203_vm8 = vcmp.gt.f32.partialorder %v1139_v54, 0.0  ;;  %v1267_v58 = vmul.f32 0.01, %v1139_v54  ;;  %1074 = vst.msk [vmem:[#allocation2 + $0x60] sm:$0xff] %vm26_vm2, %v1009_v48  ;;  %1106 = vst.msk [vmem:[#allocation2 + $0x160] sm:$0xff] %vm26_vm2, %v1041_v49  ;;  %v1010_v60 = vadd.f32 %v793_v56, %v104_v52  ;;  %v1042_v61 = vadd.f32 %v921_v57, %v136_v53 }
 0x13c   :  { %vm1235_vm9 = vcmp.gt.f32.partialorder %v1171_v55, 0.0  ;;  %v1299_v59 = vmul.f32 0.01, %v1171_v55  ;;  %v795_v62 = vpop.f32.mrb[27].mxu0  ;;  %v923_v63 = vpop.f32.mrb[27].mxu1  ;;  %v1140_v3 = vld [vmem:[#allocation2 + $0x58] sm:$0xff] }
 0x13d   :  { %v1331_v1 = vsel %vm1203_vm8, %v1139_v54, %v1267_v58  ;;  %v1172_v4 = vld [vmem:[#allocation2 + $0x158] sm:$0xff]  ;;  %vm1204_vm10 = vcmp.gt.f32.partialorder %v1140_v3, 0.0  ;;  %v1268_v6 = vmul.f32 0.01, %v1140_v3  ;;  %1075 = vst.msk [vmem:[#allocation2 + $0x68] sm:$0xff] %vm26_vm2, %v1010_v60  ;;  %1107 = vst.msk [vmem:[#allocation2 + $0x168] sm:$0xff] %vm26_vm2, %v1042_v61 }
 0x13e   :  { %v1363_v2 = vsel %vm1235_vm9, %v1171_v55, %v1299_v59  ;;  %1395 = vst.msk [vmem:[%s2465_s3 + $0x50] sm:$0xff] %vm26_vm2, %v1331_v1  ;;  %vm1236_vm11 = vcmp.gt.f32.partialorder %v1172_v4, 0.0  ;;  %v1300_v7 = vmul.f32 0.01, %v1172_v4  ;;  %v109_v56 = vld [vmem:[#allocation2 + $0x90] sm:$0xff] }
 0x13f   :  { %1427 = vst.msk [vmem:[%s2465_s3 + $0x150] sm:$0xff] %vm26_vm2, %v1363_v2  ;;  %v1332_v8 = vsel %vm1204_vm10, %v1140_v3, %v1268_v6  ;;  %v141_v61 = vld [vmem:[#allocation2 + $0x190] sm:$0xff] }
 0x140   :  { %v1364_v9 = vsel %vm1236_vm11, %v1172_v4, %v1300_v7  ;;  %v798_v10 = vpop.f32.mrb[28].mxu0  ;;  %v926_v11 = vpop.f32.mrb[28].mxu1  ;;  %1396 = vst.msk [vmem:[%s2465_s3 + $0x58] sm:$0xff] %vm26_vm2, %v1332_v8  ;;  %v110_v8 = vld [vmem:[#allocation2 + $0x98] sm:$0xff] }
 0x141   :  { %1428 = vst.msk [vmem:[%s2465_s3 + $0x158] sm:$0xff] %vm26_vm2, %v1364_v9  ;;  %v1011_v12 = vadd.f32 %v798_v10, %v105_v0  ;;  %v1043_v13 = vadd.f32 %v926_v11, %v137_v5  ;;  %v800_v14 = vpop.f32.mrb[29].mxu0  ;;  %v928_v15 = vpop.f32.mrb[29].mxu1  ;;  %v142_v9 = vld [vmem:[#allocation2 + $0x198] sm:$0xff] }
 0x142   :  { %v1141_v18 = vld [vmem:[#allocation2 + $0x60] sm:$0xff]  ;;  %v801_v20 = vpop.f32.mrb[30].mxu0  ;;  %v929_v21 = vpop.f32.mrb[30].mxu1 }
 0x143   :  { %v1173_v19 = vld [vmem:[#allocation2 + $0x160] sm:$0xff]  ;;  %vm1205_vm12 = vcmp.gt.f32.partialorder %v1141_v18, 0.0  ;;  %v1269_v22 = vmul.f32 0.01, %v1141_v18  ;;  %1076 = vst.msk [vmem:[#allocation2 + $0x70] sm:$0xff] %vm26_vm2, %v1011_v12  ;;  %1108 = vst.msk [vmem:[#allocation2 + $0x170] sm:$0xff] %vm26_vm2, %v1043_v13  ;;  %v1012_v24 = vadd.f32 %v801_v20, %v106_v16  ;;  %v1044_v25 = vadd.f32 %v929_v21, %v138_v17 }
 0x144   :  { %vm1237_vm13 = vcmp.gt.f32.partialorder %v1173_v19, 0.0  ;;  %v1301_v23 = vmul.f32 0.01, %v1173_v19  ;;  %v803_v26 = vpop.f32.mrb[31].mxu0  ;;  %v931_v27 = vpop.f32.mrb[31].mxu1  ;;  %v1142_v31 = vld [vmem:[#allocation2 + $0x68] sm:$0xff] }
 0x145   :  { %v1333_v29 = vsel %vm1205_vm12, %v1141_v18, %v1269_v22  ;;  %v1174_v32 = vld [vmem:[#allocation2 + $0x168] sm:$0xff]  ;;  %vm1206_vm14 = vcmp.gt.f32.partialorder %v1142_v31, 0.0  ;;  %v1270_v34 = vmul.f32 0.01, %v1142_v31  ;;  %1077 = vst.msk [vmem:[#allocation2 + $0x78] sm:$0xff] %vm26_vm2, %v1012_v24  ;;  %1109 = vst.msk [vmem:[#allocation2 + $0x178] sm:$0xff] %vm26_vm2, %v1044_v25 }
 0x146   :  { %v1365_v30 = vsel %vm1237_vm13, %v1173_v19, %v1301_v23  ;;  %1397 = vst.msk [vmem:[%s2465_s3 + $0x60] sm:$0xff] %vm26_vm2, %v1333_v29  ;;  %vm1238_vm15 = vcmp.gt.f32.partialorder %v1174_v32, 0.0  ;;  %v1302_v35 = vmul.f32 0.01, %v1174_v32  ;;  %v111_v20 = vld [vmem:[#allocation2 + $0xa0] sm:$0xff] }
 0x147   :  { %1429 = vst.msk [vmem:[%s2465_s3 + $0x160] sm:$0xff] %vm26_vm2, %v1365_v30  ;;  %v1334_v36 = vsel %vm1206_vm14, %v1142_v31, %v1270_v34  ;;  %v143_v25 = vld [vmem:[#allocation2 + $0x1a0] sm:$0xff] }
 0x148   :  { %v1366_v37 = vsel %vm1238_vm15, %v1174_v32, %v1302_v35  ;;  %v806_v38 = vpop.f32.mrb[32].mxu0  ;;  %v934_v39 = vpop.f32.mrb[32].mxu1  ;;  %1398 = vst.msk [vmem:[%s2465_s3 + $0x68] sm:$0xff] %vm26_vm2, %v1334_v36  ;;  %v112_v36 = vld [vmem:[#allocation2 + $0xa8] sm:$0xff] }
 0x149   :  { %1430 = vst.msk [vmem:[%s2465_s3 + $0x168] sm:$0xff] %vm26_vm2, %v1366_v37  ;;  %v1013_v40 = vadd.f32 %v806_v38, %v107_v28  ;;  %v1045_v41 = vadd.f32 %v934_v39, %v139_v33  ;;  %v808_v42 = vpop.f32.mrb[33].mxu0  ;;  %v936_v43 = vpop.f32.mrb[33].mxu1  ;;  %v144_v37 = vld [vmem:[#allocation2 + $0x1a8] sm:$0xff] }
 0x14a   :  { %v1143_v46 = vld [vmem:[#allocation2 + $0x70] sm:$0xff]  ;;  %v809_v48 = vpop.f32.mrb[34].mxu0  ;;  %v937_v49 = vpop.f32.mrb[34].mxu1 }
 0x14b   :  { %v1175_v47 = vld [vmem:[#allocation2 + $0x170] sm:$0xff]  ;;  %vm1207_vm0 = vcmp.gt.f32.partialorder %v1143_v46, 0.0  ;;  %v1271_v50 = vmul.f32 0.01, %v1143_v46  ;;  %1078 = vst.msk [vmem:[#allocation2 + $0x80] sm:$0xff] %vm26_vm2, %v1013_v40  ;;  %1110 = vst.msk [vmem:[#allocation2 + $0x180] sm:$0xff] %vm26_vm2, %v1045_v41  ;;  %v1014_v52 = vadd.f32 %v809_v48, %v108_v44  ;;  %v1046_v53 = vadd.f32 %v937_v49, %v140_v45 }
 0x14c   :  { %vm1239_vm1 = vcmp.gt.f32.partialorder %v1175_v47, 0.0  ;;  %v1303_v51 = vmul.f32 0.01, %v1175_v47  ;;  %v811_v54 = vpop.f32.mrb[35].mxu0  ;;  %v939_v55 = vpop.f32.mrb[35].mxu1  ;;  %v1144_v59 = vld [vmem:[#allocation2 + $0x78] sm:$0xff] }
 0x14d   :  { %v1335_v57 = vsel %vm1207_vm0, %v1143_v46, %v1271_v50  ;;  %v1176_v60 = vld [vmem:[#allocation2 + $0x178] sm:$0xff]  ;;  %vm1208_vm3 = vcmp.gt.f32.partialorder %v1144_v59, 0.0  ;;  %v1272_v62 = vmul.f32 0.01, %v1144_v59  ;;  %1079 = vst.msk [vmem:[#allocation2 + $0x88] sm:$0xff] %vm26_vm2, %v1014_v52  ;;  %1111 = vst.msk [vmem:[#allocation2 + $0x188] sm:$0xff] %vm26_vm2, %v1046_v53 }
 0x14e   :  { %v1367_v58 = vsel %vm1239_vm1, %v1175_v47, %v1303_v51  ;;  %1399 = vst.msk [vmem:[%s2465_s3 + $0x70] sm:$0xff] %vm26_vm2, %v1335_v57  ;;  %vm1240_vm4 = vcmp.gt.f32.partialorder %v1176_v60, 0.0  ;;  %v1304_v63 = vmul.f32 0.01, %v1176_v60  ;;  %v113_v48 = vld [vmem:[#allocation2 + $0xb0] sm:$0xff] }
 0x14f   :  { %1431 = vst.msk [vmem:[%s2465_s3 + $0x170] sm:$0xff] %vm26_vm2, %v1367_v58  ;;  %v1336_v0 = vsel %vm1208_vm3, %v1144_v59, %v1272_v62  ;;  %v145_v53 = vld [vmem:[#allocation2 + $0x1b0] sm:$0xff] }
 0x150   :  { %v1368_v1 = vsel %vm1240_vm4, %v1176_v60, %v1304_v63  ;;  %v814_v2 = vpop.f32.mrb[36].mxu0  ;;  %v942_v3 = vpop.f32.mrb[36].mxu1  ;;  %1400 = vst.msk [vmem:[%s2465_s3 + $0x78] sm:$0xff] %vm26_vm2, %v1336_v0  ;;  %v114_v0 = vld [vmem:[#allocation2 + $0xb8] sm:$0xff] }
 0x151   :  { %1432 = vst.msk [vmem:[%s2465_s3 + $0x178] sm:$0xff] %vm26_vm2, %v1368_v1  ;;  %v1015_v4 = vadd.f32 %v814_v2, %v109_v56  ;;  %v1047_v5 = vadd.f32 %v942_v3, %v141_v61  ;;  %v816_v6 = vpop.f32.mrb[37].mxu0  ;;  %v944_v7 = vpop.f32.mrb[37].mxu1  ;;  %v146_v1 = vld [vmem:[#allocation2 + $0x1b8] sm:$0xff] }
 0x152   :  { %v1145_v10 = vld [vmem:[#allocation2 + $0x80] sm:$0xff]  ;;  %v817_v12 = vpop.f32.mrb[38].mxu0  ;;  %v945_v13 = vpop.f32.mrb[38].mxu1 }
 0x153   :  { %v1177_v11 = vld [vmem:[#allocation2 + $0x180] sm:$0xff]  ;;  %vm1209_vm5 = vcmp.gt.f32.partialorder %v1145_v10, 0.0  ;;  %v1273_v14 = vmul.f32 0.01, %v1145_v10  ;;  %1080 = vst.msk [vmem:[#allocation2 + $0x90] sm:$0xff] %vm26_vm2, %v1015_v4  ;;  %1112 = vst.msk [vmem:[#allocation2 + $0x190] sm:$0xff] %vm26_vm2, %v1047_v5  ;;  %v1016_v16 = vadd.f32 %v817_v12, %v110_v8  ;;  %v1048_v17 = vadd.f32 %v945_v13, %v142_v9 }
 0x154   :  { %vm1241_vm6 = vcmp.gt.f32.partialorder %v1177_v11, 0.0  ;;  %v1305_v15 = vmul.f32 0.01, %v1177_v11  ;;  %v819_v18 = vpop.f32.mrb[39].mxu0  ;;  %v947_v19 = vpop.f32.mrb[39].mxu1  ;;  %v1146_v23 = vld [vmem:[#allocation2 + $0x88] sm:$0xff] }
 0x155   :  { %v1337_v21 = vsel %vm1209_vm5, %v1145_v10, %v1273_v14  ;;  %v1178_v24 = vld [vmem:[#allocation2 + $0x188] sm:$0xff]  ;;  %vm1210_vm7 = vcmp.gt.f32.partialorder %v1146_v23, 0.0  ;;  %v1274_v26 = vmul.f32 0.01, %v1146_v23  ;;  %1081 = vst.msk [vmem:[#allocation2 + $0x98] sm:$0xff] %vm26_vm2, %v1016_v16  ;;  %1113 = vst.msk [vmem:[#allocation2 + $0x198] sm:$0xff] %vm26_vm2, %v1048_v17 }
 0x156   :  { %v1369_v22 = vsel %vm1241_vm6, %v1177_v11, %v1305_v15  ;;  %1401 = vst.msk [vmem:[%s2465_s3 + $0x80] sm:$0xff] %vm26_vm2, %v1337_v21  ;;  %vm1242_vm8 = vcmp.gt.f32.partialorder %v1178_v24, 0.0  ;;  %v1306_v27 = vmul.f32 0.01, %v1178_v24  ;;  %v115_v12 = vld [vmem:[#allocation2 + $0xc0] sm:$0xff] }
 0x157   :  { %1433 = vst.msk [vmem:[%s2465_s3 + $0x180] sm:$0xff] %vm26_vm2, %v1369_v22  ;;  %v1338_v28 = vsel %vm1210_vm7, %v1146_v23, %v1274_v26  ;;  %v147_v17 = vld [vmem:[#allocation2 + $0x1c0] sm:$0xff] }
 0x158   :  { %v1370_v29 = vsel %vm1242_vm8, %v1178_v24, %v1306_v27  ;;  %v822_v30 = vpop.f32.mrb[40].mxu0  ;;  %v950_v31 = vpop.f32.mrb[40].mxu1  ;;  %1402 = vst.msk [vmem:[%s2465_s3 + $0x88] sm:$0xff] %vm26_vm2, %v1338_v28  ;;  %v116_v28 = vld [vmem:[#allocation2 + $0xc8] sm:$0xff] }
 0x159   :  { %1434 = vst.msk [vmem:[%s2465_s3 + $0x188] sm:$0xff] %vm26_vm2, %v1370_v29  ;;  %v1017_v32 = vadd.f32 %v822_v30, %v111_v20  ;;  %v1049_v33 = vadd.f32 %v950_v31, %v143_v25  ;;  %v824_v34 = vpop.f32.mrb[41].mxu0  ;;  %v952_v35 = vpop.f32.mrb[41].mxu1  ;;  %v148_v29 = vld [vmem:[#allocation2 + $0x1c8] sm:$0xff] }
 0x15a   :  { %v1147_v38 = vld [vmem:[#allocation2 + $0x90] sm:$0xff]  ;;  %v825_v40 = vpop.f32.mrb[42].mxu0  ;;  %v953_v41 = vpop.f32.mrb[42].mxu1 }
 0x15b   :  { %v1179_v39 = vld [vmem:[#allocation2 + $0x190] sm:$0xff]  ;;  %vm1211_vm9 = vcmp.gt.f32.partialorder %v1147_v38, 0.0  ;;  %v1275_v42 = vmul.f32 0.01, %v1147_v38  ;;  %1082 = vst.msk [vmem:[#allocation2 + $0xa0] sm:$0xff] %vm26_vm2, %v1017_v32  ;;  %1114 = vst.msk [vmem:[#allocation2 + $0x1a0] sm:$0xff] %vm26_vm2, %v1049_v33  ;;  %v1018_v44 = vadd.f32 %v825_v40, %v112_v36  ;;  %v1050_v45 = vadd.f32 %v953_v41, %v144_v37 }
 0x15c   :  { %vm1243_vm10 = vcmp.gt.f32.partialorder %v1179_v39, 0.0  ;;  %v1307_v43 = vmul.f32 0.01, %v1179_v39  ;;  %v827_v46 = vpop.f32.mrb[43].mxu0  ;;  %v955_v47 = vpop.f32.mrb[43].mxu1  ;;  %v1148_v51 = vld [vmem:[#allocation2 + $0x98] sm:$0xff] }
 0x15d   :  { %v1339_v49 = vsel %vm1211_vm9, %v1147_v38, %v1275_v42  ;;  %v1180_v52 = vld [vmem:[#allocation2 + $0x198] sm:$0xff]  ;;  %vm1212_vm11 = vcmp.gt.f32.partialorder %v1148_v51, 0.0  ;;  %v1276_v54 = vmul.f32 0.01, %v1148_v51  ;;  %1083 = vst.msk [vmem:[#allocation2 + $0xa8] sm:$0xff] %vm26_vm2, %v1018_v44  ;;  %1115 = vst.msk [vmem:[#allocation2 + $0x1a8] sm:$0xff] %vm26_vm2, %v1050_v45 }
 0x15e   :  { %v1371_v50 = vsel %vm1243_vm10, %v1179_v39, %v1307_v43  ;;  %1403 = vst.msk [vmem:[%s2465_s3 + $0x90] sm:$0xff] %vm26_vm2, %v1339_v49  ;;  %vm1244_vm12 = vcmp.gt.f32.partialorder %v1180_v52, 0.0  ;;  %v1308_v55 = vmul.f32 0.01, %v1180_v52  ;;  %v117_v40 = vld [vmem:[#allocation2 + $0xd0] sm:$0xff] }
 0x15f   :  { %1435 = vst.msk [vmem:[%s2465_s3 + $0x190] sm:$0xff] %vm26_vm2, %v1371_v50  ;;  %v1340_v56 = vsel %vm1212_vm11, %v1148_v51, %v1276_v54  ;;  %v149_v45 = vld [vmem:[#allocation2 + $0x1d0] sm:$0xff] }
 0x160   :  { %v1372_v57 = vsel %vm1244_vm12, %v1180_v52, %v1308_v55  ;;  %v830_v58 = vpop.f32.mrb[44].mxu0  ;;  %v958_v59 = vpop.f32.mrb[44].mxu1  ;;  %1404 = vst.msk [vmem:[%s2465_s3 + $0x98] sm:$0xff] %vm26_vm2, %v1340_v56  ;;  %v118_v56 = vld [vmem:[#allocation2 + $0xd8] sm:$0xff] }
 0x161   :  { %1436 = vst.msk [vmem:[%s2465_s3 + $0x198] sm:$0xff] %vm26_vm2, %v1372_v57  ;;  %v1019_v60 = vadd.f32 %v830_v58, %v113_v48  ;;  %v1051_v61 = vadd.f32 %v958_v59, %v145_v53  ;;  %v832_v62 = vpop.f32.mrb[45].mxu0  ;;  %v960_v63 = vpop.f32.mrb[45].mxu1  ;;  %v150_v57 = vld [vmem:[#allocation2 + $0x1d8] sm:$0xff] }
 0x162   :  { %v1149_v2 = vld [vmem:[#allocation2 + $0xa0] sm:$0xff]  ;;  %v833_v4 = vpop.f32.mrb[46].mxu0  ;;  %v961_v5 = vpop.f32.mrb[46].mxu1 }
 0x163   :  { %v1181_v3 = vld [vmem:[#allocation2 + $0x1a0] sm:$0xff]  ;;  %vm1213_vm13 = vcmp.gt.f32.partialorder %v1149_v2, 0.0  ;;  %v1277_v6 = vmul.f32 0.01, %v1149_v2  ;;  %1084 = vst.msk [vmem:[#allocation2 + $0xb0] sm:$0xff] %vm26_vm2, %v1019_v60  ;;  %1116 = vst.msk [vmem:[#allocation2 + $0x1b0] sm:$0xff] %vm26_vm2, %v1051_v61  ;;  %v1020_v8 = vadd.f32 %v833_v4, %v114_v0  ;;  %v1052_v9 = vadd.f32 %v961_v5, %v146_v1 }
 0x164   :  { %vm1245_vm14 = vcmp.gt.f32.partialorder %v1181_v3, 0.0  ;;  %v1309_v7 = vmul.f32 0.01, %v1181_v3  ;;  %v835_v10 = vpop.f32.mrb[47].mxu0  ;;  %v963_v11 = vpop.f32.mrb[47].mxu1  ;;  %v1150_v15 = vld [vmem:[#allocation2 + $0xa8] sm:$0xff] }
 0x165   :  { %v1341_v13 = vsel %vm1213_vm13, %v1149_v2, %v1277_v6  ;;  %v1182_v16 = vld [vmem:[#allocation2 + $0x1a8] sm:$0xff]  ;;  %vm1214_vm15 = vcmp.gt.f32.partialorder %v1150_v15, 0.0  ;;  %v1278_v18 = vmul.f32 0.01, %v1150_v15  ;;  %1085 = vst.msk [vmem:[#allocation2 + $0xb8] sm:$0xff] %vm26_vm2, %v1020_v8  ;;  %1117 = vst.msk [vmem:[#allocation2 + $0x1b8] sm:$0xff] %vm26_vm2, %v1052_v9 }
 0x166   :  { %v1373_v14 = vsel %vm1245_vm14, %v1181_v3, %v1309_v7  ;;  %1405 = vst.msk [vmem:[%s2465_s3 + $0xa0] sm:$0xff] %vm26_vm2, %v1341_v13  ;;  %vm1246_vm0 = vcmp.gt.f32.partialorder %v1182_v16, 0.0  ;;  %v1310_v19 = vmul.f32 0.01, %v1182_v16  ;;  %v119_v4 = vld [vmem:[#allocation2 + $0xe0] sm:$0xff] }
 0x167   :  { %1437 = vst.msk [vmem:[%s2465_s3 + $0x1a0] sm:$0xff] %vm26_vm2, %v1373_v14  ;;  %v1342_v20 = vsel %vm1214_vm15, %v1150_v15, %v1278_v18  ;;  %v151_v9 = vld [vmem:[#allocation2 + $0x1e0] sm:$0xff] }
 0x168   :  { %v1374_v21 = vsel %vm1246_vm0, %v1182_v16, %v1310_v19  ;;  %v838_v22 = vpop.f32.mrb[48].mxu0  ;;  %v966_v23 = vpop.f32.mrb[48].mxu1  ;;  %1406 = vst.msk [vmem:[%s2465_s3 + $0xa8] sm:$0xff] %vm26_vm2, %v1342_v20  ;;  %v120_v20 = vld [vmem:[#allocation2 + $0xe8] sm:$0xff] }
 0x169   :  { %1438 = vst.msk [vmem:[%s2465_s3 + $0x1a8] sm:$0xff] %vm26_vm2, %v1374_v21  ;;  %v1021_v24 = vadd.f32 %v838_v22, %v115_v12  ;;  %v1053_v25 = vadd.f32 %v966_v23, %v147_v17  ;;  %v840_v26 = vpop.f32.mrb[49].mxu0  ;;  %v968_v27 = vpop.f32.mrb[49].mxu1  ;;  %v152_v21 = vld [vmem:[#allocation2 + $0x1e8] sm:$0xff] }
 0x16a   :  { %v1151_v30 = vld [vmem:[#allocation2 + $0xb0] sm:$0xff]  ;;  %v841_v32 = vpop.f32.mrb[50].mxu0  ;;  %v969_v33 = vpop.f32.mrb[50].mxu1 }
 0x16b   :  { %v1183_v31 = vld [vmem:[#allocation2 + $0x1b0] sm:$0xff]  ;;  %vm1215_vm1 = vcmp.gt.f32.partialorder %v1151_v30, 0.0  ;;  %v1279_v34 = vmul.f32 0.01, %v1151_v30  ;;  %1086 = vst.msk [vmem:[#allocation2 + $0xc0] sm:$0xff] %vm26_vm2, %v1021_v24  ;;  %1118 = vst.msk [vmem:[#allocation2 + $0x1c0] sm:$0xff] %vm26_vm2, %v1053_v25  ;;  %v1022_v36 = vadd.f32 %v841_v32, %v116_v28  ;;  %v1054_v37 = vadd.f32 %v969_v33, %v148_v29 }
 0x16c   :  { %vm1247_vm3 = vcmp.gt.f32.partialorder %v1183_v31, 0.0  ;;  %v1311_v35 = vmul.f32 0.01, %v1183_v31  ;;  %v843_v38 = vpop.f32.mrb[51].mxu0  ;;  %v971_v39 = vpop.f32.mrb[51].mxu1  ;;  %v1152_v43 = vld [vmem:[#allocation2 + $0xb8] sm:$0xff] }
 0x16d   :  { %v1343_v41 = vsel %vm1215_vm1, %v1151_v30, %v1279_v34  ;;  %v1184_v44 = vld [vmem:[#allocation2 + $0x1b8] sm:$0xff]  ;;  %vm1216_vm4 = vcmp.gt.f32.partialorder %v1152_v43, 0.0  ;;  %v1280_v46 = vmul.f32 0.01, %v1152_v43  ;;  %1087 = vst.msk [vmem:[#allocation2 + $0xc8] sm:$0xff] %vm26_vm2, %v1022_v36  ;;  %1119 = vst.msk [vmem:[#allocation2 + $0x1c8] sm:$0xff] %vm26_vm2, %v1054_v37 }
 0x16e   :  { %v1375_v42 = vsel %vm1247_vm3, %v1183_v31, %v1311_v35  ;;  %1407 = vst.msk [vmem:[%s2465_s3 + $0xb0] sm:$0xff] %vm26_vm2, %v1343_v41  ;;  %vm1248_vm5 = vcmp.gt.f32.partialorder %v1184_v44, 0.0  ;;  %v1312_v47 = vmul.f32 0.01, %v1184_v44  ;;  %v121_v32 = vld [vmem:[#allocation2 + $0xf0] sm:$0xff] }
 0x16f   :  { %1439 = vst.msk [vmem:[%s2465_s3 + $0x1b0] sm:$0xff] %vm26_vm2, %v1375_v42  ;;  %v1344_v48 = vsel %vm1216_vm4, %v1152_v43, %v1280_v46  ;;  %v153_v37 = vld [vmem:[#allocation2 + $0x1f0] sm:$0xff] }
 0x170   :  { %v1376_v49 = vsel %vm1248_vm5, %v1184_v44, %v1312_v47  ;;  %v846_v50 = vpop.f32.mrb[52].mxu0  ;;  %v974_v51 = vpop.f32.mrb[52].mxu1  ;;  %1408 = vst.msk [vmem:[%s2465_s3 + $0xb8] sm:$0xff] %vm26_vm2, %v1344_v48  ;;  %v122_v48 = vld [vmem:[#allocation2 + $0xf8] sm:$0xff] }
 0x171   :  { %1440 = vst.msk [vmem:[%s2465_s3 + $0x1b8] sm:$0xff] %vm26_vm2, %v1376_v49  ;;  %v1023_v52 = vadd.f32 %v846_v50, %v117_v40  ;;  %v1055_v53 = vadd.f32 %v974_v51, %v149_v45  ;;  %v848_v54 = vpop.f32.mrb[53].mxu0  ;;  %v976_v55 = vpop.f32.mrb[53].mxu1  ;;  %v154_v49 = vld [vmem:[#allocation2 + $0x1f8] sm:$0xff] }
 0x172   :  { %v1153_v58 = vld [vmem:[#allocation2 + $0xc0] sm:$0xff]  ;;  %v849_v60 = vpop.f32.mrb[54].mxu0  ;;  %v977_v61 = vpop.f32.mrb[54].mxu1 }
 0x173   :  { %v1185_v59 = vld [vmem:[#allocation2 + $0x1c0] sm:$0xff]  ;;  %vm1217_vm6 = vcmp.gt.f32.partialorder %v1153_v58, 0.0  ;;  %v1281_v62 = vmul.f32 0.01, %v1153_v58  ;;  %1088 = vst.msk [vmem:[#allocation2 + $0xd0] sm:$0xff] %vm26_vm2, %v1023_v52  ;;  %1120 = vst.msk [vmem:[#allocation2 + $0x1d0] sm:$0xff] %vm26_vm2, %v1055_v53  ;;  %v1024_v0 = vadd.f32 %v849_v60, %v118_v56  ;;  %v1056_v1 = vadd.f32 %v977_v61, %v150_v57 }
 0x174   :  { %vm1249_vm7 = vcmp.gt.f32.partialorder %v1185_v59, 0.0  ;;  %v1313_v63 = vmul.f32 0.01, %v1185_v59  ;;  %v851_v2 = vpop.f32.mrb[55].mxu0  ;;  %v979_v3 = vpop.f32.mrb[55].mxu1  ;;  %v1154_v7 = vld [vmem:[#allocation2 + $0xc8] sm:$0xff] }
 0x175   :  { %v1345_v5 = vsel %vm1217_vm6, %v1153_v58, %v1281_v62  ;;  %v1186_v8 = vld [vmem:[#allocation2 + $0x1c8] sm:$0xff]  ;;  %vm1218_vm8 = vcmp.gt.f32.partialorder %v1154_v7, 0.0  ;;  %v1282_v10 = vmul.f32 0.01, %v1154_v7  ;;  %1089 = vst.msk [vmem:[#allocation2 + $0xd8] sm:$0xff] %vm26_vm2, %v1024_v0  ;;  %1121 = vst.msk [vmem:[#allocation2 + $0x1d8] sm:$0xff] %vm26_vm2, %v1056_v1 }
 0x176   :  { %v1377_v6 = vsel %vm1249_vm7, %v1185_v59, %v1313_v63  ;;  %1409 = vst.msk [vmem:[%s2465_s3 + $0xc0] sm:$0xff] %vm26_vm2, %v1345_v5  ;;  %vm1250_vm9 = vcmp.gt.f32.partialorder %v1186_v8, 0.0  ;;  %v1314_v11 = vmul.f32 0.01, %v1186_v8 }
 0x177   :  { %1441 = vst.msk [vmem:[%s2465_s3 + $0x1c0] sm:$0xff] %vm26_vm2, %v1377_v6  ;;  %v1346_v12 = vsel %vm1218_vm8, %v1154_v7, %v1282_v10 }
 0x178   :  { %v1378_v13 = vsel %vm1250_vm9, %v1186_v8, %v1314_v11  ;;  %v854_v14 = vpop.f32.mrb[56].mxu0  ;;  %v982_v15 = vpop.f32.mrb[56].mxu1  ;;  %1410 = vst.msk [vmem:[%s2465_s3 + $0xc8] sm:$0xff] %vm26_vm2, %v1346_v12 }
 0x179   :  { %1442 = vst.msk [vmem:[%s2465_s3 + $0x1c8] sm:$0xff] %vm26_vm2, %v1378_v13  ;;  %v1025_v16 = vadd.f32 %v854_v14, %v119_v4  ;;  %v1057_v17 = vadd.f32 %v982_v15, %v151_v9  ;;  %v856_v18 = vpop.f32.mrb[57].mxu0  ;;  %v984_v19 = vpop.f32.mrb[57].mxu1 }
 0x17a   :  { %v1155_v22 = vld [vmem:[#allocation2 + $0xd0] sm:$0xff]  ;;  %v857_v24 = vpop.f32.mrb[58].mxu0  ;;  %v985_v25 = vpop.f32.mrb[58].mxu1 }
 0x17b   :  { %v1187_v23 = vld [vmem:[#allocation2 + $0x1d0] sm:$0xff]  ;;  %vm1219_vm10 = vcmp.gt.f32.partialorder %v1155_v22, 0.0  ;;  %v1283_v26 = vmul.f32 0.01, %v1155_v22  ;;  %1090 = vst.msk [vmem:[#allocation2 + $0xe0] sm:$0xff] %vm26_vm2, %v1025_v16  ;;  %1122 = vst.msk [vmem:[#allocation2 + $0x1e0] sm:$0xff] %vm26_vm2, %v1057_v17  ;;  %v1026_v28 = vadd.f32 %v857_v24, %v120_v20  ;;  %v1058_v29 = vadd.f32 %v985_v25, %v152_v21 }
 0x17c   :  { %vm1251_vm11 = vcmp.gt.f32.partialorder %v1187_v23, 0.0  ;;  %v1315_v27 = vmul.f32 0.01, %v1187_v23  ;;  %v859_v30 = vpop.f32.mrb[59].mxu0  ;;  %v987_v31 = vpop.f32.mrb[59].mxu1  ;;  %v1156_v35 = vld [vmem:[#allocation2 + $0xd8] sm:$0xff] }
 0x17d   :  { %v1347_v33 = vsel %vm1219_vm10, %v1155_v22, %v1283_v26  ;;  %v1188_v36 = vld [vmem:[#allocation2 + $0x1d8] sm:$0xff]  ;;  %vm1220_vm12 = vcmp.gt.f32.partialorder %v1156_v35, 0.0  ;;  %v1284_v38 = vmul.f32 0.01, %v1156_v35  ;;  %1091 = vst.msk [vmem:[#allocation2 + $0xe8] sm:$0xff] %vm26_vm2, %v1026_v28  ;;  %1123 = vst.msk [vmem:[#allocation2 + $0x1e8] sm:$0xff] %vm26_vm2, %v1058_v29 }
 0x17e   :  { %v1379_v34 = vsel %vm1251_vm11, %v1187_v23, %v1315_v27  ;;  %1411 = vst.msk [vmem:[%s2465_s3 + $0xd0] sm:$0xff] %vm26_vm2, %v1347_v33  ;;  %vm1252_vm13 = vcmp.gt.f32.partialorder %v1188_v36, 0.0  ;;  %v1316_v39 = vmul.f32 0.01, %v1188_v36 }
 0x17f   :  { %1443 = vst.msk [vmem:[%s2465_s3 + $0x1d0] sm:$0xff] %vm26_vm2, %v1379_v34  ;;  %v1348_v40 = vsel %vm1220_vm12, %v1156_v35, %v1284_v38 }
 0x180   :  { %v1380_v41 = vsel %vm1252_vm13, %v1188_v36, %v1316_v39  ;;  %v862_v42 = vpop.f32.mrb[60].mxu0  ;;  %v990_v43 = vpop.f32.mrb[60].mxu1  ;;  %1412 = vst.msk [vmem:[%s2465_s3 + $0xd8] sm:$0xff] %vm26_vm2, %v1348_v40 }
 0x181   :  { %1444 = vst.msk [vmem:[%s2465_s3 + $0x1d8] sm:$0xff] %vm26_vm2, %v1380_v41  ;;  %v1027_v44 = vadd.f32 %v862_v42, %v121_v32  ;;  %v1059_v45 = vadd.f32 %v990_v43, %v153_v37  ;;  %v864_v46 = vpop.f32.mrb[61].mxu0  ;;  %v992_v47 = vpop.f32.mrb[61].mxu1 }
 0x182   :  { %v1157_v50 = vld [vmem:[#allocation2 + $0xe0] sm:$0xff]  ;;  %v865_v52 = vpop.f32.mrb[62].mxu0  ;;  %v993_v53 = vpop.f32.mrb[62].mxu1 }
 0x183   :  { %v1189_v51 = vld [vmem:[#allocation2 + $0x1e0] sm:$0xff]  ;;  %vm1221_vm14 = vcmp.gt.f32.partialorder %v1157_v50, 0.0  ;;  %v1285_v54 = vmul.f32 0.01, %v1157_v50  ;;  %1092 = vst.msk [vmem:[#allocation2 + $0xf0] sm:$0xff] %vm26_vm2, %v1027_v44  ;;  %1124 = vst.msk [vmem:[#allocation2 + $0x1f0] sm:$0xff] %vm26_vm2, %v1059_v45  ;;  %v1028_v56 = vadd.f32 %v865_v52, %v122_v48  ;;  %v1060_v57 = vadd.f32 %v993_v53, %v154_v49 }
 0x184   :  { %vm1253_vm15 = vcmp.gt.f32.partialorder %v1189_v51, 0.0  ;;  %v1317_v55 = vmul.f32 0.01, %v1189_v51  ;;  %v867_v58 = vpop.f32.mrb[63].mxu0  ;;  %v995_v59 = vpop.f32.mrb[63].mxu1  ;;  %v1158_v62 = vld [vmem:[#allocation2 + $0xe8] sm:$0xff] }
 0x185   :  { %v1349_v60 = vsel %vm1221_vm14, %v1157_v50, %v1285_v54  ;;  %v1190_v63 = vld [vmem:[#allocation2 + $0x1e8] sm:$0xff]  ;;  %vm1222_vm0 = vcmp.gt.f32.partialorder %v1158_v62, 0.0  ;;  %v1286_v0 = vmul.f32 0.01, %v1158_v62  ;;  %1093 = vst.msk [vmem:[#allocation2 + $0xf8] sm:$0xff] %vm26_vm2, %v1028_v56  ;;  %1125 = vst.msk [vmem:[#allocation2 + $0x1f8] sm:$0xff] %vm26_vm2, %v1060_v57 }
 0x186   :  { %v1381_v61 = vsel %vm1253_vm15, %v1189_v51, %v1317_v55  ;;  %1413 = vst.msk [vmem:[%s2465_s3 + $0xe0] sm:$0xff] %vm26_vm2, %v1349_v60  ;;  %vm1254_vm1 = vcmp.gt.f32.partialorder %v1190_v63, 0.0  ;;  %v1318_v1 = vmul.f32 0.01, %v1190_v63 }
 0x187   :  { %1445 = vst.msk [vmem:[%s2465_s3 + $0x1e0] sm:$0xff] %vm26_vm2, %v1381_v61  ;;  %v1350_v2 = vsel %vm1222_vm0, %v1158_v62, %v1286_v0 }
 0x188   :  { %v1382_v3 = vsel %vm1254_vm1, %v1190_v63, %v1318_v1  ;;  %1414 = vst.msk [vmem:[%s2465_s3 + $0xe8] sm:$0xff] %vm26_vm2, %v1350_v2 }
 0x189   :  { %1446 = vst.msk [vmem:[%s2465_s3 + $0x1e8] sm:$0xff] %vm26_vm2, %v1382_v3 }
 0x18a   :  { %v1159_v4 = vld [vmem:[#allocation2 + $0xf0] sm:$0xff] }
 0x18b   :  { %v1191_v5 = vld [vmem:[#allocation2 + $0x1f0] sm:$0xff]  ;;  %vm1223_vm3 = vcmp.gt.f32.partialorder %v1159_v4, 0.0  ;;  %v1287_v6 = vmul.f32 0.01, %v1159_v4 }
 0x18c   :  { %vm1255_vm4 = vcmp.gt.f32.partialorder %v1191_v5, 0.0  ;;  %v1319_v7 = vmul.f32 0.01, %v1191_v5  ;;  %v1160_v10 = vld [vmem:[#allocation2 + $0xf8] sm:$0xff] }
 0x18d   :  { %v1351_v8 = vsel %vm1223_vm3, %v1159_v4, %v1287_v6  ;;  %v1192_v11 = vld [vmem:[#allocation2 + $0x1f8] sm:$0xff]  ;;  %vm1224_vm5 = vcmp.gt.f32.partialorder %v1160_v10, 0.0  ;;  %v1288_v12 = vmul.f32 0.01, %v1160_v10 }
 0x18e   :  { %v1383_v9 = vsel %vm1255_vm4, %v1191_v5, %v1319_v7  ;;  %1415 = vst.msk [vmem:[%s2465_s3 + $0xf0] sm:$0xff] %vm26_vm2, %v1351_v8  ;;  %vm1256_vm6 = vcmp.gt.f32.partialorder %v1192_v11, 0.0  ;;  %v1320_v13 = vmul.f32 0.01, %v1192_v11 }
 0x18f   :  { %1447 = vst.msk [vmem:[%s2465_s3 + $0x1f0] sm:$0xff] %vm26_vm2, %v1383_v9  ;;  %v1352_v14 = vsel %vm1224_vm5, %v1160_v10, %v1288_v12 }
 0x190   :  { %v1384_v15 = vsel %vm1256_vm6, %v1192_v11, %v1320_v13  ;;  %1416 = vst.msk [vmem:[%s2465_s3 + $0xf8] sm:$0xff] %vm26_vm2, %v1352_v14 }
 0x191   :  { %1448 = vst.msk [vmem:[%s2465_s3 + $0x1f8] sm:$0xff] %vm26_vm2, %v1384_v15 }

// kernel: msca_forward.19
= control target key start
LH: loop header
LB: loop body
LE: loop exit
PB: predicated region body
PF: predicated region fallthrough
CT: control target
= control target key end

     0   :  { %vm26_vm0 = vcmask 261120   ;;  %s1858_s1 = inlined_call_operand.vmem [shape: bf16[32,32], index: 1, kind: input, shape index: {}]   ;;  %s1859_s0 = inlined_call_operand.vmem [shape: bf16[512,32], index: 0, kind: input, shape index: {}]   ;;  %s1860_s2 = inlined_call_operand.vmem [shape: f32[1,32], index: 2, kind: input, shape index: {}]   ;;  %s1861_s3 = inlined_call_operand.vmem [shape: f32[512,32], index: 3, kind: output, shape index: {}]  }
   0x1   :  { %v1217_v0 = vld [vmem:[%s1858_s1] sm:$0xff]   ;;  %v1218_v1 = vld [vmem:[%s1858_s1 + $0x8] sm:$0xff]   ;;  %v1223_v6 = vld [vmem:[%s1859_s0 + $0x10] sm:$0xff]  }
   0x2   :  { %1145 = vmatprep.subr.bf16.mxu0 %v1217_v0  ;;  %1213 = vmatprep.subr.bf16.mxu1 %v1217_v0  ;;  %v1219_v2 = vld [vmem:[%s1859_s0] sm:$0xff]   ;;  %v1221_v4 = vld [vmem:[%s1859_s0 + $0x8] sm:$0xff]   ;;  %v1224_v7 = vld [vmem:[%s1859_s0 + $0x90] sm:$0xff]  }
   0x3   :  { %1146 = vmatpush3.bf16.msra.mxu0 %v1217_v0  ;;  %1215 = vmatpush3.bf16.msra.mxu1 %v1217_v0  ;;  %v1220_v3 = vld [vmem:[%s1859_s0 + $0x80] sm:$0xff]   ;;  %v1222_v5 = vld [vmem:[%s1859_s0 + $0x88] sm:$0xff]   ;;  %v1225_v8 = vld [vmem:[%s1859_s0 + $0x18] sm:$0xff]  }
   0x4   :  { %1147 = vmatprep.subr.bf16.mxu0 %v1218_v1  ;;  %1214 = vmatprep.subr.bf16.mxu1 %v1218_v1  ;;  %v1226_v9 = vld [vmem:[%s1859_s0 + $0x98] sm:$0xff]   ;;  %v1227_v10 = vld [vmem:[%s1859_s0 + $0x20] sm:$0xff]   ;;  %v1229_v12 = vld [vmem:[%s1859_s0 + $0x28] sm:$0xff]  }
   0x5   :  { %1149 = vmatprep.mubr.msk.bf16.mxu0 %vm26_vm0, %v1219_v2  ;;  %1181 = vmatprep.mubr.msk.bf16.mxu1 %vm26_vm0, %v1220_v3  ;;  %v1228_v11 = vld [vmem:[%s1859_s0 + $0xa0] sm:$0xff]   ;;  %v1230_v13 = vld [vmem:[%s1859_s0 + $0xa8] sm:$0xff]   ;;  %v1231_v14 = vld [vmem:[%s1859_s0 + $0x30] sm:$0xff]  }
   0x6   :  { %v1232_v15 = vld [vmem:[%s1859_s0 + $0xb0] sm:$0xff]   ;;  %v1233_v16 = vld [vmem:[%s1859_s0 + $0x38] sm:$0xff]   ;;  %v1235_v18 = vld [vmem:[%s1859_s0 + $0x40] sm:$0xff]  }
   0x7   :  { %1148 = vmatpush3.bf16.msra.mxu0 %v1218_v1  ;;  %1216 = vmatpush3.bf16.msra.mxu1 %v1218_v1  ;;  %v1234_v17 = vld [vmem:[%s1859_s0 + $0xb8] sm:$0xff]   ;;  %v1236_v19 = vld [vmem:[%s1859_s0 + $0xc0] sm:$0xff]   ;;  %v1237_v21 = vld [vmem:[%s1859_s0 + $0x48] sm:$0xff]  }
   0x8   :  { %v1350_v20 = vld [vmem:[%s1860_s2] ss:$0 sm:$0xff]  ;;  %v1238_v22 = vld [vmem:[%s1859_s0 + $0xc8] sm:$0xff]   ;;  %v1239_v23 = vld [vmem:[%s1859_s0 + $0x50] sm:$0xff]  }
   0x9   :  { %29 = vst.msk [vmem:[#allocation2 + $0x10] sm:$0xff] %vm26_vm0, %v1350_v20  ;;  %27 = vst.msk [vmem:[#allocation2] sm:$0xff] %vm26_vm0, %v1350_v20  ;;  %v1240_v24 = vld [vmem:[%s1859_s0 + $0xd0] sm:$0xff]   ;;  %v1241_v25 = vld [vmem:[%s1859_s0 + $0x58] sm:$0xff]  }
   0xa   :  { %1150 = vmatmul.mubr.msk.bf16.vlgmr.msra.gmra.mrb[0].mxu0 %vm26_vm0, %v1221_v4  ;;  %1182 = vmatmul.mubr.msk.bf16.vlgmr.msra.gmra.mrb[0].mxu1 %vm26_vm0, %v1222_v5  ;;  %28 = vst.msk [vmem:[#allocation2 + $0x8] sm:$0xff] %vm26_vm0, %v1350_v20  ;;  %30 = vst.msk [vmem:[#allocation2 + $0x18] sm:$0xff] %vm26_vm0, %v1350_v20  ;;  %v1242_v26 = vld [vmem:[%s1859_s0 + $0xd8] sm:$0xff]   ;;  %v1243_v27 = vld [vmem:[%s1859_s0 + $0x60] sm:$0xff]  }
   0xb   :  { %1153 = vmatprep.mubr.msk.bf16.mxu0 %vm26_vm0, %v1223_v6  ;;  %1185 = vmatprep.mubr.msk.bf16.mxu1 %vm26_vm0, %v1224_v7  ;;  %31 = vst.msk [vmem:[#allocation2 + $0x20] sm:$0xff] %vm26_vm0, %v1350_v20  ;;  %32 = vst.msk [vmem:[#allocation2 + $0x28] sm:$0xff] %vm26_vm0, %v1350_v20  ;;  %v1244_v28 = vld [vmem:[%s1859_s0 + $0xe0] sm:$0xff]   ;;  %v1245_v29 = vld [vmem:[%s1859_s0 + $0x68] sm:$0xff]  }
   0xc   :  { %33 = vst.msk [vmem:[#allocation2 + $0x30] sm:$0xff] %vm26_vm0, %v1350_v20  ;;  %34 = vst.msk [vmem:[#allocation2 + $0x38] sm:$0xff] %vm26_vm0, %v1350_v20  ;;  %v1246_v30 = vld [vmem:[%s1859_s0 + $0xe8] sm:$0xff]   ;;  %v1247_v31 = vld [vmem:[%s1859_s0 + $0x70] sm:$0xff]  }
   0xd   :  { %35 = vst.msk [vmem:[#allocation2 + $0x40] sm:$0xff] %vm26_vm0, %v1350_v20  ;;  %36 = vst.msk [vmem:[#allocation2 + $0x48] sm:$0xff] %vm26_vm0, %v1350_v20  ;;  %v1248_v32 = vld [vmem:[%s1859_s0 + $0xf0] sm:$0xff]   ;;  %v1249_v33 = vld [vmem:[%s1859_s0 + $0x78] sm:$0xff]  }
   0xe   :  { %37 = vst.msk [vmem:[#allocation2 + $0x50] sm:$0xff] %vm26_vm0, %v1350_v20  ;;  %38 = vst.msk [vmem:[#allocation2 + $0x58] sm:$0xff] %vm26_vm0, %v1350_v20  ;;  %v1250_v34 = vld [vmem:[%s1859_s0 + $0xf8] sm:$0xff]  }
   0xf   :  { %39 = vst.msk [vmem:[#allocation2 + $0x60] sm:$0xff] %vm26_vm0, %v1350_v20  ;;  %40 = vst.msk [vmem:[#allocation2 + $0x68] sm:$0xff] %vm26_vm0, %v1350_v20 }
  0x10   :  { %41 = vst.msk [vmem:[#allocation2 + $0x70] sm:$0xff] %vm26_vm0, %v1350_v20  ;;  %42 = vst.msk [vmem:[#allocation2 + $0x78] sm:$0xff] %vm26_vm0, %v1350_v20  ;;  %v93_v35 = vld [vmem:[#allocation2 + $0x10] sm:$0xff]  ;;  %v91_v37 = vld [vmem:[#allocation2] sm:$0xff] }
  0x11   :  { %43 = vst.msk [vmem:[#allocation2 + $0x80] sm:$0xff] %vm26_vm0, %v1350_v20  ;;  %44 = vst.msk [vmem:[#allocation2 + $0x88] sm:$0xff] %vm26_vm0, %v1350_v20  ;;  %v94_v41 = vld [vmem:[#allocation2 + $0x18] sm:$0xff]  ;;  %v92_v47 = vld [vmem:[#allocation2 + $0x8] sm:$0xff] }
  0x12   :  { %1154 = vmatmul.mubr.msk.bf16.gmra.mrb[4].mxu0 %vm26_vm0, %v1225_v8  ;;  %1186 = vmatmul.mubr.msk.bf16.gmra.mrb[4].mxu1 %vm26_vm0, %v1226_v9  ;;  %45 = vst.msk [vmem:[#allocation2 + $0x90] sm:$0xff] %vm26_vm0, %v1350_v20  ;;  %46 = vst.msk [vmem:[#allocation2 + $0x98] sm:$0xff] %vm26_vm0, %v1350_v20  ;;  %v95_v61 = vld [vmem:[#allocation2 + $0x20] sm:$0xff]  ;;  %v96_v7 = vld [vmem:[#allocation2 + $0x28] sm:$0xff] }
  0x13   :  { %1157 = vmatprep.mubr.msk.bf16.mxu0 %vm26_vm0, %v1227_v10  ;;  %1189 = vmatprep.mubr.msk.bf16.mxu1 %vm26_vm0, %v1228_v11  ;;  %47 = vst.msk [vmem:[#allocation2 + $0xa0] sm:$0xff] %vm26_vm0, %v1350_v20  ;;  %48 = vst.msk [vmem:[#allocation2 + $0xa8] sm:$0xff] %vm26_vm0, %v1350_v20  ;;  %v97_v59 = vld [vmem:[#allocation2 + $0x30] sm:$0xff]  ;;  %v98_v1 = vld [vmem:[#allocation2 + $0x38] sm:$0xff] }
  0x14   :  { %49 = vst.msk [vmem:[#allocation2 + $0xb0] sm:$0xff] %vm26_vm0, %v1350_v20  ;;  %50 = vst.msk [vmem:[#allocation2 + $0xb8] sm:$0xff] %vm26_vm0, %v1350_v20 }
  0x15   :  { %51 = vst.msk [vmem:[#allocation2 + $0xc0] sm:$0xff] %vm26_vm0, %v1350_v20  ;;  %52 = vst.msk [vmem:[#allocation2 + $0xc8] sm:$0xff] %vm26_vm0, %v1350_v20 }
  0x16   :  { %53 = vst.msk [vmem:[#allocation2 + $0xd0] sm:$0xff] %vm26_vm0, %v1350_v20  ;;  %54 = vst.msk [vmem:[#allocation2 + $0xd8] sm:$0xff] %vm26_vm0, %v1350_v20 }
  0x17   :  { %55 = vst.msk [vmem:[#allocation2 + $0xe0] sm:$0xff] %vm26_vm0, %v1350_v20  ;;  %56 = vst.msk [vmem:[#allocation2 + $0xe8] sm:$0xff] %vm26_vm0, %v1350_v20 }
  0x18   :  { %57 = vst.msk [vmem:[#allocation2 + $0xf0] sm:$0xff] %vm26_vm0, %v1350_v20  ;;  %58 = vst.msk [vmem:[#allocation2 + $0xf8] sm:$0xff] %vm26_vm0, %v1350_v20 }
  0x19   :  { %59 = vst.msk [vmem:[#allocation2 + $0x100] sm:$0xff] %vm26_vm0, %v1350_v20  ;;  %60 = vst.msk [vmem:[#allocation2 + $0x108] sm:$0xff] %vm26_vm0, %v1350_v20 }
  0x1a   :  { %1158 = vmatmul.mubr.msk.bf16.gmra.mrb[8].mxu0 %vm26_vm0, %v1229_v12  ;;  %1190 = vmatmul.mubr.msk.bf16.gmra.mrb[8].mxu1 %vm26_vm0, %v1230_v13  ;;  %61 = vst.msk [vmem:[#allocation2 + $0x110] sm:$0xff] %vm26_vm0, %v1350_v20  ;;  %62 = vst.msk [vmem:[#allocation2 + $0x118] sm:$0xff] %vm26_vm0, %v1350_v20 }
  0x1b   :  { %1161 = vmatprep.mubr.msk.bf16.mxu0 %vm26_vm0, %v1231_v14  ;;  %1193 = vmatprep.mubr.msk.bf16.mxu1 %vm26_vm0, %v1232_v15  ;;  %63 = vst.msk [vmem:[#allocation2 + $0x120] sm:$0xff] %vm26_vm0, %v1350_v20  ;;  %64 = vst.msk [vmem:[#allocation2 + $0x128] sm:$0xff] %vm26_vm0, %v1350_v20 }
  0x1c   :  { %65 = vst.msk [vmem:[#allocation2 + $0x130] sm:$0xff] %vm26_vm0, %v1350_v20  ;;  %66 = vst.msk [vmem:[#allocation2 + $0x138] sm:$0xff] %vm26_vm0, %v1350_v20 }
  0x1d   :  { %67 = vst.msk [vmem:[#allocation2 + $0x140] sm:$0xff] %vm26_vm0, %v1350_v20  ;;  %68 = vst.msk [vmem:[#allocation2 + $0x148] sm:$0xff] %vm26_vm0, %v1350_v20 }
  0x1e   :  { %69 = vst.msk [vmem:[#allocation2 + $0x150] sm:$0xff] %vm26_vm0, %v1350_v20  ;;  %70 = vst.msk [vmem:[#allocation2 + $0x158] sm:$0xff] %vm26_vm0, %v1350_v20 }
  0x1f   :  { %71 = vst.msk [vmem:[#allocation2 + $0x160] sm:$0xff] %vm26_vm0, %v1350_v20  ;;  %72 = vst.msk [vmem:[#allocation2 + $0x168] sm:$0xff] %vm26_vm0, %v1350_v20 }
  0x20   :  { %73 = vst.msk [vmem:[#allocation2 + $0x170] sm:$0xff] %vm26_vm0, %v1350_v20  ;;  %74 = vst.msk [vmem:[#allocation2 + $0x178] sm:$0xff] %vm26_vm0, %v1350_v20  ;;  %v123_v38 = vld [vmem:[#allocation2 + $0x100] sm:$0xff]  ;;  %v124_v48 = vld [vmem:[#allocation2 + $0x108] sm:$0xff] }
  0x21   :  { %75 = vst.msk [vmem:[#allocation2 + $0x180] sm:$0xff] %vm26_vm0, %v1350_v20  ;;  %76 = vst.msk [vmem:[#allocation2 + $0x188] sm:$0xff] %vm26_vm0, %v1350_v20  ;;  %v125_v36 = vld [vmem:[#allocation2 + $0x110] sm:$0xff]  ;;  %v126_v42 = vld [vmem:[#allocation2 + $0x118] sm:$0xff] }
  0x22   :  { %1162 = vmatmul.mubr.msk.bf16.gmra.mrb[12].mxu0 %vm26_vm0, %v1233_v16  ;;  %1194 = vmatmul.mubr.msk.bf16.gmra.mrb[12].mxu1 %vm26_vm0, %v1234_v17  ;;  %77 = vst.msk [vmem:[#allocation2 + $0x190] sm:$0xff] %vm26_vm0, %v1350_v20  ;;  %78 = vst.msk [vmem:[#allocation2 + $0x198] sm:$0xff] %vm26_vm0, %v1350_v20  ;;  %v127_v62 = vld [vmem:[#allocation2 + $0x120] sm:$0xff]  ;;  %v128_v8 = vld [vmem:[#allocation2 + $0x128] sm:$0xff] }
  0x23   :  { %1165 = vmatprep.mubr.msk.bf16.mxu0 %vm26_vm0, %v1235_v18  ;;  %1197 = vmatprep.mubr.msk.bf16.mxu1 %vm26_vm0, %v1236_v19  ;;  %79 = vst.msk [vmem:[#allocation2 + $0x1a0] sm:$0xff] %vm26_vm0, %v1350_v20  ;;  %80 = vst.msk [vmem:[#allocation2 + $0x1a8] sm:$0xff] %vm26_vm0, %v1350_v20  ;;  %v129_v60 = vld [vmem:[#allocation2 + $0x130] sm:$0xff]  ;;  %v130_v2 = vld [vmem:[#allocation2 + $0x138] sm:$0xff] }
  0x24   :  { %81 = vst.msk [vmem:[#allocation2 + $0x1b0] sm:$0xff] %vm26_vm0, %v1350_v20  ;;  %82 = vst.msk [vmem:[#allocation2 + $0x1b8] sm:$0xff] %vm26_vm0, %v1350_v20 }
  0x25   :  { %83 = vst.msk [vmem:[#allocation2 + $0x1c0] sm:$0xff] %vm26_vm0, %v1350_v20  ;;  %84 = vst.msk [vmem:[#allocation2 + $0x1c8] sm:$0xff] %vm26_vm0, %v1350_v20 }
  0x26   :  { %85 = vst.msk [vmem:[#allocation2 + $0x1d0] sm:$0xff] %vm26_vm0, %v1350_v20  ;;  %86 = vst.msk [vmem:[#allocation2 + $0x1d8] sm:$0xff] %vm26_vm0, %v1350_v20 }
  0x27   :  { %87 = vst.msk [vmem:[#allocation2 + $0x1e0] sm:$0xff] %vm26_vm0, %v1350_v20  ;;  %88 = vst.msk [vmem:[#allocation2 + $0x1e8] sm:$0xff] %vm26_vm0, %v1350_v20 }
  0x28   :  { %89 = vst.msk [vmem:[#allocation2 + $0x1f0] sm:$0xff] %vm26_vm0, %v1350_v20  ;;  %90 = vst.msk [vmem:[#allocation2 + $0x1f8] sm:$0xff] %vm26_vm0, %v1350_v20 }
  0x2a   :  { %1166 = vmatmul.mubr.msk.bf16.gmra.mrb[16].mxu0 %vm26_vm0, %v1237_v21  ;;  %1198 = vmatmul.mubr.msk.bf16.gmra.mrb[16].mxu1 %vm26_vm0, %v1238_v22 }
  0x2b   :  { %1169 = vmatprep.mubr.msk.bf16.mxu0 %vm26_vm0, %v1239_v23  ;;  %1201 = vmatprep.mubr.msk.bf16.mxu1 %vm26_vm0, %v1240_v24 }
  0x32   :  { %1170 = vmatmul.mubr.msk.bf16.gmra.mrb[20].mxu0 %vm26_vm0, %v1241_v25  ;;  %1202 = vmatmul.mubr.msk.bf16.gmra.mrb[20].mxu1 %vm26_vm0, %v1242_v26 }
  0x33   :  { %1173 = vmatprep.mubr.msk.bf16.mxu0 %vm26_vm0, %v1243_v27  ;;  %1205 = vmatprep.mubr.msk.bf16.mxu1 %vm26_vm0, %v1244_v28  ;;  %v101_v27 = vld [vmem:[#allocation2 + $0x50] sm:$0xff] }
  0x34   :  { %v133_v28 = vld [vmem:[#allocation2 + $0x150] sm:$0xff] }
  0x3a   :  { %1174 = vmatmul.mubr.msk.bf16.gmra.mrb[24].mxu0 %vm26_vm0, %v1245_v29  ;;  %1206 = vmatmul.mubr.msk.bf16.gmra.mrb[24].mxu1 %vm26_vm0, %v1246_v30  ;;  %v99_v29 = vld [vmem:[#allocation2 + $0x40] sm:$0xff] }
  0x3b   :  { %1177 = vmatprep.mubr.msk.bf16.mxu0 %vm26_vm0, %v1247_v31  ;;  %1209 = vmatprep.mubr.msk.bf16.mxu1 %vm26_vm0, %v1248_v32  ;;  %v131_v30 = vld [vmem:[#allocation2 + $0x140] sm:$0xff] }
  0x42   :  { %1178 = vmatmul.mubr.msk.bf16.gmra.mrb[28].mxu0 %vm26_vm0, %v1249_v33  ;;  %1210 = vmatmul.mubr.msk.bf16.gmra.mrb[28].mxu1 %vm26_vm0, %v1250_v34  ;;  %v102_v33 = vld [vmem:[#allocation2 + $0x58] sm:$0xff] }
  0x43   :  { %v134_v34 = vld [vmem:[#allocation2 + $0x158] sm:$0xff] }
  0xdd   :  { %v1151_v39 = vpop.f32.mrb[0].mxu0  ;;  %v1183_v40 = vpop.f32.mrb[0].mxu1 }
  0xde   :  { %v783_v43 = vadd.f32 %v1151_v39, %v93_v35  ;;  %v815_v44 = vadd.f32 %v1183_v40, %v125_v36  ;;  %v526_v45 = vpop.f32.mrb[1].mxu0  ;;  %v654_v46 = vpop.f32.mrb[1].mxu1  ;;  %v100_v39 = vld [vmem:[#allocation2 + $0x48] sm:$0xff] }
  0xdf   :  { %v781_v49 = vadd.f32 %v526_v45, %v91_v37  ;;  %v813_v50 = vadd.f32 %v654_v46, %v123_v38  ;;  %v1152_v51 = vpop.f32.mrb[2].mxu0  ;;  %v1184_v52 = vpop.f32.mrb[2].mxu1  ;;  %v132_v40 = vld [vmem:[#allocation2 + $0x148] sm:$0xff] }
  0xe0   :  { %847 = vst.msk [vmem:[#allocation2 + $0x10] sm:$0xff] %vm26_vm0, %v783_v43  ;;  %879 = vst.msk [vmem:[#allocation2 + $0x110] sm:$0xff] %vm26_vm0, %v815_v44  ;;  %v784_v53 = vadd.f32 %v1152_v51, %v94_v41  ;;  %v816_v54 = vadd.f32 %v1184_v52, %v126_v42  ;;  %v529_v55 = vpop.f32.mrb[3].mxu0  ;;  %v657_v56 = vpop.f32.mrb[3].mxu1 }
  0xe1   :  { %845 = vst.msk [vmem:[#allocation2] sm:$0xff] %vm26_vm0, %v781_v49  ;;  %877 = vst.msk [vmem:[#allocation2 + $0x100] sm:$0xff] %vm26_vm0, %v813_v50  ;;  %v782_v57 = vadd.f32 %v529_v55, %v92_v47  ;;  %v814_v58 = vadd.f32 %v657_v56, %v124_v48 }
  0xe2   :  { %848 = vst.msk [vmem:[#allocation2 + $0x18] sm:$0xff] %vm26_vm0, %v784_v53  ;;  %880 = vst.msk [vmem:[#allocation2 + $0x118] sm:$0xff] %vm26_vm0, %v816_v54 }
  0xe3   :  { %846 = vst.msk [vmem:[#allocation2 + $0x8] sm:$0xff] %vm26_vm0, %v782_v57  ;;  %878 = vst.msk [vmem:[#allocation2 + $0x108] sm:$0xff] %vm26_vm0, %v814_v58 }
  0xe5   :  { %v1155_v63 = vpop.f32.mrb[4].mxu0  ;;  %v1187_v0 = vpop.f32.mrb[4].mxu1 }
  0xe6   :  { %v787_v3 = vadd.f32 %v1155_v63, %v97_v59  ;;  %v819_v4 = vadd.f32 %v1187_v0, %v129_v60  ;;  %v542_v5 = vpop.f32.mrb[5].mxu0  ;;  %v670_v6 = vpop.f32.mrb[5].mxu1  ;;  %v105_v59 = vld [vmem:[#allocation2 + $0x70] sm:$0xff] }
  0xe7   :  { %v914_v9 = vld [vmem:[#allocation2 + $0x10] sm:$0xff]  ;;  %v785_v11 = vadd.f32 %v542_v5, %v95_v61  ;;  %v817_v12 = vadd.f32 %v670_v6, %v127_v62  ;;  %v1156_v13 = vpop.f32.mrb[6].mxu0  ;;  %v1188_v14 = vpop.f32.mrb[6].mxu1  ;;  %v103_v61 = vld [vmem:[#allocation2 + $0x60] sm:$0xff] }
  0xe8   :  { %v946_v10 = vld [vmem:[#allocation2 + $0x110] sm:$0xff]  ;;  %978 = vst.msk [vmem:[%s1861_s3 + $0x10] sm:$0xff] %vm26_vm0, %v914_v9  ;;  %v912_v15 = vld [vmem:[#allocation2] sm:$0xff]  ;;  %851 = vst.msk [vmem:[#allocation2 + $0x30] sm:$0xff] %vm26_vm0, %v787_v3  ;;  %v788_v17 = vadd.f32 %v1156_v13, %v98_v1  ;;  %v820_v18 = vadd.f32 %v1188_v14, %v130_v2  ;;  %v545_v19 = vpop.f32.mrb[7].mxu0  ;;  %v673_v20 = vpop.f32.mrb[7].mxu1 }
  0xe9   :  { %1010 = vst.msk [vmem:[%s1861_s3 + $0x110] sm:$0xff] %vm26_vm0, %v946_v10  ;;  %v944_v16 = vld [vmem:[#allocation2 + $0x100] sm:$0xff]  ;;  %883 = vst.msk [vmem:[#allocation2 + $0x130] sm:$0xff] %vm26_vm0, %v819_v4  ;;  %v915_v21 = vld [vmem:[#allocation2 + $0x18] sm:$0xff]  ;;  %v786_v23 = vadd.f32 %v545_v19, %v96_v7  ;;  %v818_v24 = vadd.f32 %v673_v20, %v128_v8 }
  0xea   :  { %976 = vst.msk [vmem:[%s1861_s3] sm:$0xff] %vm26_vm0, %v912_v15  ;;  %1008 = vst.msk [vmem:[%s1861_s3 + $0x100] sm:$0xff] %vm26_vm0, %v944_v16  ;;  %v947_v22 = vld [vmem:[#allocation2 + $0x118] sm:$0xff]  ;;  %v913_v25 = vld [vmem:[#allocation2 + $0x8] sm:$0xff] }
  0xeb   :  { %849 = vst.msk [vmem:[#allocation2 + $0x20] sm:$0xff] %vm26_vm0, %v785_v11  ;;  %881 = vst.msk [vmem:[#allocation2 + $0x120] sm:$0xff] %vm26_vm0, %v817_v12  ;;  %v945_v26 = vld [vmem:[#allocation2 + $0x108] sm:$0xff]  ;;  %v137_v60 = vld [vmem:[#allocation2 + $0x170] sm:$0xff] }
  0xec   :  { %979 = vst.msk [vmem:[%s1861_s3 + $0x18] sm:$0xff] %vm26_vm0, %v915_v21  ;;  %1011 = vst.msk [vmem:[%s1861_s3 + $0x118] sm:$0xff] %vm26_vm0, %v947_v22  ;;  %v135_v62 = vld [vmem:[#allocation2 + $0x160] sm:$0xff]  ;;  %v106_v1 = vld [vmem:[#allocation2 + $0x78] sm:$0xff] }
  0xed   :  { %852 = vst.msk [vmem:[#allocation2 + $0x38] sm:$0xff] %vm26_vm0, %v788_v17  ;;  %884 = vst.msk [vmem:[#allocation2 + $0x138] sm:$0xff] %vm26_vm0, %v820_v18  ;;  %v1159_v31 = vpop.f32.mrb[8].mxu0  ;;  %v1191_v32 = vpop.f32.mrb[8].mxu1  ;;  %v138_v2 = vld [vmem:[#allocation2 + $0x178] sm:$0xff]  ;;  %v104_v7 = vld [vmem:[#allocation2 + $0x68] sm:$0xff] }
  0xee   :  { %977 = vst.msk [vmem:[%s1861_s3 + $0x8] sm:$0xff] %vm26_vm0, %v913_v25  ;;  %1009 = vst.msk [vmem:[%s1861_s3 + $0x108] sm:$0xff] %vm26_vm0, %v945_v26  ;;  %v791_v35 = vadd.f32 %v1159_v31, %v101_v27  ;;  %v823_v36 = vadd.f32 %v1191_v32, %v133_v28  ;;  %v558_v37 = vpop.f32.mrb[9].mxu0  ;;  %v686_v38 = vpop.f32.mrb[9].mxu1  ;;  %v136_v8 = vld [vmem:[#allocation2 + $0x168] sm:$0xff]  ;;  %v109_v27 = vld [vmem:[#allocation2 + $0x90] sm:$0xff] }
  0xef   :  { %850 = vst.msk [vmem:[#allocation2 + $0x28] sm:$0xff] %vm26_vm0, %v786_v23  ;;  %882 = vst.msk [vmem:[#allocation2 + $0x128] sm:$0xff] %vm26_vm0, %v818_v24  ;;  %v918_v41 = vld [vmem:[#allocation2 + $0x30] sm:$0xff]  ;;  %v789_v43 = vadd.f32 %v558_v37, %v99_v29  ;;  %v821_v44 = vadd.f32 %v686_v38, %v131_v30  ;;  %v1160_v45 = vpop.f32.mrb[10].mxu0  ;;  %v1192_v46 = vpop.f32.mrb[10].mxu1  ;;  %v107_v29 = vld [vmem:[#allocation2 + $0x80] sm:$0xff] }
  0xf0   :  { %v950_v42 = vld [vmem:[#allocation2 + $0x130] sm:$0xff]  ;;  %982 = vst.msk [vmem:[%s1861_s3 + $0x30] sm:$0xff] %vm26_vm0, %v918_v41  ;;  %855 = vst.msk [vmem:[#allocation2 + $0x50] sm:$0xff] %vm26_vm0, %v791_v35  ;;  %v792_v49 = vadd.f32 %v1160_v45, %v102_v33  ;;  %v824_v50 = vadd.f32 %v1192_v46, %v134_v34  ;;  %v561_v51 = vpop.f32.mrb[11].mxu0  ;;  %v689_v52 = vpop.f32.mrb[11].mxu1  ;;  %v139_v30 = vld [vmem:[#allocation2 + $0x180] sm:$0xff] }
  0xf1   :  { %1014 = vst.msk [vmem:[%s1861_s3 + $0x130] sm:$0xff] %vm26_vm0, %v950_v42  ;;  %887 = vst.msk [vmem:[#allocation2 + $0x150] sm:$0xff] %vm26_vm0, %v823_v36  ;;  %v790_v55 = vadd.f32 %v561_v51, %v100_v39  ;;  %v822_v56 = vadd.f32 %v689_v52, %v132_v40  ;;  %v141_v28 = vld [vmem:[#allocation2 + $0x190] sm:$0xff]  ;;  %v110_v33 = vld [vmem:[#allocation2 + $0x98] sm:$0xff] }
  0xf2   :  { %v916_v47 = vld [vmem:[#allocation2 + $0x20] sm:$0xff]  ;;  %853 = vst.msk [vmem:[#allocation2 + $0x40] sm:$0xff] %vm26_vm0, %v789_v43  ;;  %885 = vst.msk [vmem:[#allocation2 + $0x140] sm:$0xff] %vm26_vm0, %v821_v44  ;;  %v142_v34 = vld [vmem:[#allocation2 + $0x198] sm:$0xff] }
  0xf3   :  { %v948_v48 = vld [vmem:[#allocation2 + $0x120] sm:$0xff]  ;;  %980 = vst.msk [vmem:[%s1861_s3 + $0x20] sm:$0xff] %vm26_vm0, %v916_v47  ;;  %856 = vst.msk [vmem:[#allocation2 + $0x58] sm:$0xff] %vm26_vm0, %v792_v49  ;;  %v108_v39 = vld [vmem:[#allocation2 + $0x88] sm:$0xff] }
  0xf4   :  { %1012 = vst.msk [vmem:[%s1861_s3 + $0x120] sm:$0xff] %vm26_vm0, %v948_v48  ;;  %v919_v53 = vld [vmem:[#allocation2 + $0x38] sm:$0xff]  ;;  %888 = vst.msk [vmem:[#allocation2 + $0x158] sm:$0xff] %vm26_vm0, %v824_v50  ;;  %v140_v40 = vld [vmem:[#allocation2 + $0x188] sm:$0xff] }
  0xf5   :  { %v951_v54 = vld [vmem:[#allocation2 + $0x138] sm:$0xff]  ;;  %983 = vst.msk [vmem:[%s1861_s3 + $0x38] sm:$0xff] %vm26_vm0, %v919_v53  ;;  %854 = vst.msk [vmem:[#allocation2 + $0x48] sm:$0xff] %vm26_vm0, %v790_v55  ;;  %v1163_v63 = vpop.f32.mrb[12].mxu0  ;;  %v1195_v0 = vpop.f32.mrb[12].mxu1 }
  0xf6   :  { %1015 = vst.msk [vmem:[%s1861_s3 + $0x138] sm:$0xff] %vm26_vm0, %v951_v54  ;;  %v917_v57 = vld [vmem:[#allocation2 + $0x28] sm:$0xff]  ;;  %886 = vst.msk [vmem:[#allocation2 + $0x148] sm:$0xff] %vm26_vm0, %v822_v56  ;;  %v795_v3 = vadd.f32 %v1163_v63, %v105_v59  ;;  %v827_v4 = vadd.f32 %v1195_v0, %v137_v60  ;;  %v574_v5 = vpop.f32.mrb[13].mxu0  ;;  %v702_v6 = vpop.f32.mrb[13].mxu1  ;;  %v113_v59 = vld [vmem:[#allocation2 + $0xb0] sm:$0xff] }
  0xf7   :  { %v949_v58 = vld [vmem:[#allocation2 + $0x128] sm:$0xff]  ;;  %981 = vst.msk [vmem:[%s1861_s3 + $0x28] sm:$0xff] %vm26_vm0, %v917_v57  ;;  %v922_v9 = vld [vmem:[#allocation2 + $0x50] sm:$0xff]  ;;  %v793_v11 = vadd.f32 %v574_v5, %v103_v61  ;;  %v825_v12 = vadd.f32 %v702_v6, %v135_v62  ;;  %v1164_v13 = vpop.f32.mrb[14].mxu0  ;;  %v1196_v14 = vpop.f32.mrb[14].mxu1  ;;  %v111_v61 = vld [vmem:[#allocation2 + $0xa0] sm:$0xff] }
  0xf8   :  { %1013 = vst.msk [vmem:[%s1861_s3 + $0x128] sm:$0xff] %vm26_vm0, %v949_v58  ;;  %v954_v10 = vld [vmem:[#allocation2 + $0x150] sm:$0xff]  ;;  %986 = vst.msk [vmem:[%s1861_s3 + $0x50] sm:$0xff] %vm26_vm0, %v922_v9  ;;  %v796_v17 = vadd.f32 %v1164_v13, %v106_v1  ;;  %v828_v18 = vadd.f32 %v1196_v14, %v138_v2  ;;  %v577_v19 = vpop.f32.mrb[15].mxu0  ;;  %v705_v20 = vpop.f32.mrb[15].mxu1  ;;  %v143_v62 = vld [vmem:[#allocation2 + $0x1a0] sm:$0xff] }
  0xf9   :  { %1018 = vst.msk [vmem:[%s1861_s3 + $0x150] sm:$0xff] %vm26_vm0, %v954_v10  ;;  %v920_v15 = vld [vmem:[#allocation2 + $0x40] sm:$0xff]  ;;  %859 = vst.msk [vmem:[#allocation2 + $0x70] sm:$0xff] %vm26_vm0, %v795_v3  ;;  %v794_v23 = vadd.f32 %v577_v19, %v104_v7  ;;  %v826_v24 = vadd.f32 %v705_v20, %v136_v8  ;;  %v145_v60 = vld [vmem:[#allocation2 + $0x1b0] sm:$0xff] }
  0xfa   :  { %v952_v16 = vld [vmem:[#allocation2 + $0x140] sm:$0xff]  ;;  %891 = vst.msk [vmem:[#allocation2 + $0x170] sm:$0xff] %vm26_vm0, %v827_v4  ;;  %984 = vst.msk [vmem:[%s1861_s3 + $0x40] sm:$0xff] %vm26_vm0, %v920_v15  ;;  %v923_v21 = vld [vmem:[#allocation2 + $0x58] sm:$0xff] }
  0xfb   :  { %1016 = vst.msk [vmem:[%s1861_s3 + $0x140] sm:$0xff] %vm26_vm0, %v952_v16  ;;  %v955_v22 = vld [vmem:[#allocation2 + $0x158] sm:$0xff]  ;;  %857 = vst.msk [vmem:[#allocation2 + $0x60] sm:$0xff] %vm26_vm0, %v793_v11  ;;  %v112_v7 = vld [vmem:[#allocation2 + $0xa8] sm:$0xff] }
  0xfc   :  { %889 = vst.msk [vmem:[#allocation2 + $0x160] sm:$0xff] %vm26_vm0, %v825_v12  ;;  %987 = vst.msk [vmem:[%s1861_s3 + $0x58] sm:$0xff] %vm26_vm0, %v923_v21  ;;  %v921_v25 = vld [vmem:[#allocation2 + $0x48] sm:$0xff]  ;;  %v114_v1 = vld [vmem:[#allocation2 + $0xb8] sm:$0xff] }
  0xfd   :  { %1019 = vst.msk [vmem:[%s1861_s3 + $0x158] sm:$0xff] %vm26_vm0, %v955_v22  ;;  %v953_v26 = vld [vmem:[#allocation2 + $0x148] sm:$0xff]  ;;  %860 = vst.msk [vmem:[#allocation2 + $0x78] sm:$0xff] %vm26_vm0, %v796_v17  ;;  %v1167_v31 = vpop.f32.mrb[16].mxu0  ;;  %v1199_v32 = vpop.f32.mrb[16].mxu1  ;;  %v146_v2 = vld [vmem:[#allocation2 + $0x1b8] sm:$0xff] }
  0xfe   :  { %892 = vst.msk [vmem:[#allocation2 + $0x178] sm:$0xff] %vm26_vm0, %v828_v18  ;;  %985 = vst.msk [vmem:[%s1861_s3 + $0x48] sm:$0xff] %vm26_vm0, %v921_v25  ;;  %v799_v35 = vadd.f32 %v1167_v31, %v109_v27  ;;  %v831_v36 = vadd.f32 %v1199_v32, %v141_v28  ;;  %v590_v37 = vpop.f32.mrb[17].mxu0  ;;  %v718_v38 = vpop.f32.mrb[17].mxu1  ;;  %v144_v8 = vld [vmem:[#allocation2 + $0x1a8] sm:$0xff]  ;;  %v117_v27 = vld [vmem:[#allocation2 + $0xd0] sm:$0xff] }
  0xff   :  { %1017 = vst.msk [vmem:[%s1861_s3 + $0x148] sm:$0xff] %vm26_vm0, %v953_v26  ;;  %858 = vst.msk [vmem:[#allocation2 + $0x68] sm:$0xff] %vm26_vm0, %v794_v23  ;;  %v797_v43 = vadd.f32 %v590_v37, %v107_v29  ;;  %v829_v44 = vadd.f32 %v718_v38, %v139_v30  ;;  %v1168_v45 = vpop.f32.mrb[18].mxu0  ;;  %v1200_v46 = vpop.f32.mrb[18].mxu1  ;;  %v149_v28 = vld [vmem:[#allocation2 + $0x1d0] sm:$0xff]  ;;  %v115_v29 = vld [vmem:[#allocation2 + $0xc0] sm:$0xff] }
 0x100   :  { %890 = vst.msk [vmem:[#allocation2 + $0x168] sm:$0xff] %vm26_vm0, %v826_v24  ;;  %v926_v41 = vld [vmem:[#allocation2 + $0x70] sm:$0xff]  ;;  %863 = vst.msk [vmem:[#allocation2 + $0x90] sm:$0xff] %vm26_vm0, %v799_v35  ;;  %v800_v49 = vadd.f32 %v1168_v45, %v110_v33  ;;  %v832_v50 = vadd.f32 %v1200_v46, %v142_v34  ;;  %v593_v51 = vpop.f32.mrb[19].mxu0  ;;  %v721_v52 = vpop.f32.mrb[19].mxu1  ;;  %v147_v30 = vld [vmem:[#allocation2 + $0x1c0] sm:$0xff] }
 0x101   :  { %v958_v42 = vld [vmem:[#allocation2 + $0x170] sm:$0xff]  ;;  %990 = vst.msk [vmem:[%s1861_s3 + $0x70] sm:$0xff] %vm26_vm0, %v926_v41  ;;  %895 = vst.msk [vmem:[#allocation2 + $0x190] sm:$0xff] %vm26_vm0, %v831_v36  ;;  %v798_v55 = vadd.f32 %v593_v51, %v108_v39  ;;  %v830_v56 = vadd.f32 %v721_v52, %v140_v40  ;;  %v118_v33 = vld [vmem:[#allocation2 + $0xd8] sm:$0xff] }
 0x102   :  { %1022 = vst.msk [vmem:[%s1861_s3 + $0x170] sm:$0xff] %vm26_vm0, %v958_v42  ;;  %v924_v47 = vld [vmem:[#allocation2 + $0x60] sm:$0xff]  ;;  %861 = vst.msk [vmem:[#allocation2 + $0x80] sm:$0xff] %vm26_vm0, %v797_v43  ;;  %v150_v34 = vld [vmem:[#allocation2 + $0x1d8] sm:$0xff] }
 0x103   :  { %v956_v48 = vld [vmem:[#allocation2 + $0x160] sm:$0xff]  ;;  %988 = vst.msk [vmem:[%s1861_s3 + $0x60] sm:$0xff] %vm26_vm0, %v924_v47  ;;  %893 = vst.msk [vmem:[#allocation2 + $0x180] sm:$0xff] %vm26_vm0, %v829_v44  ;;  %v116_v39 = vld [vmem:[#allocation2 + $0xc8] sm:$0xff] }
 0x104   :  { %1020 = vst.msk [vmem:[%s1861_s3 + $0x160] sm:$0xff] %vm26_vm0, %v956_v48  ;;  %v927_v53 = vld [vmem:[#allocation2 + $0x78] sm:$0xff]  ;;  %864 = vst.msk [vmem:[#allocation2 + $0x98] sm:$0xff] %vm26_vm0, %v800_v49  ;;  %v148_v40 = vld [vmem:[#allocation2 + $0x1c8] sm:$0xff] }
 0x105   :  { %v959_v54 = vld [vmem:[#allocation2 + $0x178] sm:$0xff]  ;;  %991 = vst.msk [vmem:[%s1861_s3 + $0x78] sm:$0xff] %vm26_vm0, %v927_v53  ;;  %896 = vst.msk [vmem:[#allocation2 + $0x198] sm:$0xff] %vm26_vm0, %v832_v50  ;;  %v1171_v63 = vpop.f32.mrb[20].mxu0  ;;  %v1203_v0 = vpop.f32.mrb[20].mxu1 }
 0x106   :  { %1023 = vst.msk [vmem:[%s1861_s3 + $0x178] sm:$0xff] %vm26_vm0, %v959_v54  ;;  %v925_v57 = vld [vmem:[#allocation2 + $0x68] sm:$0xff]  ;;  %862 = vst.msk [vmem:[#allocation2 + $0x88] sm:$0xff] %vm26_vm0, %v798_v55  ;;  %v803_v3 = vadd.f32 %v1171_v63, %v113_v59  ;;  %v835_v4 = vadd.f32 %v1203_v0, %v145_v60  ;;  %v606_v5 = vpop.f32.mrb[21].mxu0  ;;  %v734_v6 = vpop.f32.mrb[21].mxu1  ;;  %v121_v59 = vld [vmem:[#allocation2 + $0xf0] sm:$0xff] }
 0x107   :  { %v957_v58 = vld [vmem:[#allocation2 + $0x168] sm:$0xff]  ;;  %989 = vst.msk [vmem:[%s1861_s3 + $0x68] sm:$0xff] %vm26_vm0, %v925_v57  ;;  %894 = vst.msk [vmem:[#allocation2 + $0x188] sm:$0xff] %vm26_vm0, %v830_v56  ;;  %v930_v9 = vld [vmem:[#allocation2 + $0x90] sm:$0xff]  ;;  %v801_v11 = vadd.f32 %v606_v5, %v111_v61  ;;  %v833_v12 = vadd.f32 %v734_v6, %v143_v62  ;;  %v1172_v13 = vpop.f32.mrb[22].mxu0  ;;  %v1204_v14 = vpop.f32.mrb[22].mxu1 }
 0x108   :  { %1021 = vst.msk [vmem:[%s1861_s3 + $0x168] sm:$0xff] %vm26_vm0, %v957_v58  ;;  %v962_v10 = vld [vmem:[#allocation2 + $0x190] sm:$0xff]  ;;  %994 = vst.msk [vmem:[%s1861_s3 + $0x90] sm:$0xff] %vm26_vm0, %v930_v9  ;;  %v804_v17 = vadd.f32 %v1172_v13, %v114_v1  ;;  %v836_v18 = vadd.f32 %v1204_v14, %v146_v2  ;;  %v609_v19 = vpop.f32.mrb[23].mxu0  ;;  %v737_v20 = vpop.f32.mrb[23].mxu1  ;;  %v119_v61 = vld [vmem:[#allocation2 + $0xe0] sm:$0xff] }
 0x109   :  { %1026 = vst.msk [vmem:[%s1861_s3 + $0x190] sm:$0xff] %vm26_vm0, %v962_v10  ;;  %v928_v15 = vld [vmem:[#allocation2 + $0x80] sm:$0xff]  ;;  %867 = vst.msk [vmem:[#allocation2 + $0xb0] sm:$0xff] %vm26_vm0, %v803_v3  ;;  %v802_v23 = vadd.f32 %v609_v19, %v112_v7  ;;  %v834_v24 = vadd.f32 %v737_v20, %v144_v8  ;;  %v153_v60 = vld [vmem:[#allocation2 + $0x1f0] sm:$0xff] }
 0x10a   :  { %v960_v16 = vld [vmem:[#allocation2 + $0x180] sm:$0xff]  ;;  %899 = vst.msk [vmem:[#allocation2 + $0x1b0] sm:$0xff] %vm26_vm0, %v835_v4  ;;  %992 = vst.msk [vmem:[%s1861_s3 + $0x80] sm:$0xff] %vm26_vm0, %v928_v15  ;;  %v122_v1 = vld [vmem:[#allocation2 + $0xf8] sm:$0xff] }
 0x10b   :  { %1024 = vst.msk [vmem:[%s1861_s3 + $0x180] sm:$0xff] %vm26_vm0, %v960_v16  ;;  %v931_v21 = vld [vmem:[#allocation2 + $0x98] sm:$0xff]  ;;  %865 = vst.msk [vmem:[#allocation2 + $0xa0] sm:$0xff] %vm26_vm0, %v801_v11  ;;  %v151_v62 = vld [vmem:[#allocation2 + $0x1e0] sm:$0xff] }
 0x10c   :  { %v963_v22 = vld [vmem:[#allocation2 + $0x198] sm:$0xff]  ;;  %897 = vst.msk [vmem:[#allocation2 + $0x1a0] sm:$0xff] %vm26_vm0, %v833_v12  ;;  %995 = vst.msk [vmem:[%s1861_s3 + $0x98] sm:$0xff] %vm26_vm0, %v931_v21  ;;  %v120_v7 = vld [vmem:[#allocation2 + $0xe8] sm:$0xff] }
 0x10d   :  { %1027 = vst.msk [vmem:[%s1861_s3 + $0x198] sm:$0xff] %vm26_vm0, %v963_v22  ;;  %v929_v25 = vld [vmem:[#allocation2 + $0x88] sm:$0xff]  ;;  %868 = vst.msk [vmem:[#allocation2 + $0xb8] sm:$0xff] %vm26_vm0, %v804_v17  ;;  %v1175_v31 = vpop.f32.mrb[24].mxu0  ;;  %v1207_v32 = vpop.f32.mrb[24].mxu1  ;;  %v154_v2 = vld [vmem:[#allocation2 + $0x1f8] sm:$0xff] }
 0x10e   :  { %v961_v26 = vld [vmem:[#allocation2 + $0x188] sm:$0xff]  ;;  %900 = vst.msk [vmem:[#allocation2 + $0x1b8] sm:$0xff] %vm26_vm0, %v836_v18  ;;  %993 = vst.msk [vmem:[%s1861_s3 + $0x88] sm:$0xff] %vm26_vm0, %v929_v25  ;;  %v807_v35 = vadd.f32 %v1175_v31, %v117_v27  ;;  %v839_v36 = vadd.f32 %v1207_v32, %v149_v28  ;;  %v622_v37 = vpop.f32.mrb[25].mxu0  ;;  %v750_v38 = vpop.f32.mrb[25].mxu1 }
 0x10f   :  { %1025 = vst.msk [vmem:[%s1861_s3 + $0x188] sm:$0xff] %vm26_vm0, %v961_v26  ;;  %866 = vst.msk [vmem:[#allocation2 + $0xa8] sm:$0xff] %vm26_vm0, %v802_v23  ;;  %v805_v43 = vadd.f32 %v622_v37, %v115_v29  ;;  %v837_v44 = vadd.f32 %v750_v38, %v147_v30  ;;  %v1176_v45 = vpop.f32.mrb[26].mxu0  ;;  %v1208_v46 = vpop.f32.mrb[26].mxu1  ;;  %v152_v8 = vld [vmem:[#allocation2 + $0x1e8] sm:$0xff] }
 0x110   :  { %898 = vst.msk [vmem:[#allocation2 + $0x1a8] sm:$0xff] %vm26_vm0, %v834_v24  ;;  %v934_v41 = vld [vmem:[#allocation2 + $0xb0] sm:$0xff]  ;;  %871 = vst.msk [vmem:[#allocation2 + $0xd0] sm:$0xff] %vm26_vm0, %v807_v35  ;;  %v808_v49 = vadd.f32 %v1176_v45, %v118_v33  ;;  %v840_v50 = vadd.f32 %v1208_v46, %v150_v34  ;;  %v625_v51 = vpop.f32.mrb[27].mxu0  ;;  %v753_v52 = vpop.f32.mrb[27].mxu1 }
 0x111   :  { %v966_v42 = vld [vmem:[#allocation2 + $0x1b0] sm:$0xff]  ;;  %998 = vst.msk [vmem:[%s1861_s3 + $0xb0] sm:$0xff] %vm26_vm0, %v934_v41  ;;  %903 = vst.msk [vmem:[#allocation2 + $0x1d0] sm:$0xff] %vm26_vm0, %v839_v36  ;;  %v806_v55 = vadd.f32 %v625_v51, %v116_v39  ;;  %v838_v56 = vadd.f32 %v753_v52, %v148_v40 }
 0x112   :  { %1030 = vst.msk [vmem:[%s1861_s3 + $0x1b0] sm:$0xff] %vm26_vm0, %v966_v42  ;;  %v932_v47 = vld [vmem:[#allocation2 + $0xa0] sm:$0xff]  ;;  %869 = vst.msk [vmem:[#allocation2 + $0xc0] sm:$0xff] %vm26_vm0, %v805_v43 }
 0x113   :  { %v964_v48 = vld [vmem:[#allocation2 + $0x1a0] sm:$0xff]  ;;  %996 = vst.msk [vmem:[%s1861_s3 + $0xa0] sm:$0xff] %vm26_vm0, %v932_v47  ;;  %901 = vst.msk [vmem:[#allocation2 + $0x1c0] sm:$0xff] %vm26_vm0, %v837_v44 }
 0x114   :  { %1028 = vst.msk [vmem:[%s1861_s3 + $0x1a0] sm:$0xff] %vm26_vm0, %v964_v48  ;;  %v935_v53 = vld [vmem:[#allocation2 + $0xb8] sm:$0xff]  ;;  %872 = vst.msk [vmem:[#allocation2 + $0xd8] sm:$0xff] %vm26_vm0, %v808_v49 }
 0x115   :  { %v967_v54 = vld [vmem:[#allocation2 + $0x1b8] sm:$0xff]  ;;  %999 = vst.msk [vmem:[%s1861_s3 + $0xb8] sm:$0xff] %vm26_vm0, %v935_v53  ;;  %904 = vst.msk [vmem:[#allocation2 + $0x1d8] sm:$0xff] %vm26_vm0, %v840_v50  ;;  %v1179_v63 = vpop.f32.mrb[28].mxu0  ;;  %v1211_v0 = vpop.f32.mrb[28].mxu1 }
 0x116   :  { %1031 = vst.msk [vmem:[%s1861_s3 + $0x1b8] sm:$0xff] %vm26_vm0, %v967_v54  ;;  %v933_v57 = vld [vmem:[#allocation2 + $0xa8] sm:$0xff]  ;;  %870 = vst.msk [vmem:[#allocation2 + $0xc8] sm:$0xff] %vm26_vm0, %v806_v55  ;;  %v811_v3 = vadd.f32 %v1179_v63, %v121_v59  ;;  %v843_v4 = vadd.f32 %v1211_v0, %v153_v60  ;;  %v638_v5 = vpop.f32.mrb[29].mxu0  ;;  %v766_v6 = vpop.f32.mrb[29].mxu1 }
 0x117   :  { %v965_v58 = vld [vmem:[#allocation2 + $0x1a8] sm:$0xff]  ;;  %997 = vst.msk [vmem:[%s1861_s3 + $0xa8] sm:$0xff] %vm26_vm0, %v933_v57  ;;  %902 = vst.msk [vmem:[#allocation2 + $0x1c8] sm:$0xff] %vm26_vm0, %v838_v56  ;;  %v938_v9 = vld [vmem:[#allocation2 + $0xd0] sm:$0xff]  ;;  %v809_v11 = vadd.f32 %v638_v5, %v119_v61  ;;  %v841_v12 = vadd.f32 %v766_v6, %v151_v62  ;;  %v1180_v13 = vpop.f32.mrb[30].mxu0  ;;  %v1212_v14 = vpop.f32.mrb[30].mxu1 }
 0x118   :  { %1029 = vst.msk [vmem:[%s1861_s3 + $0x1a8] sm:$0xff] %vm26_vm0, %v965_v58  ;;  %v970_v10 = vld [vmem:[#allocation2 + $0x1d0] sm:$0xff]  ;;  %1002 = vst.msk [vmem:[%s1861_s3 + $0xd0] sm:$0xff] %vm26_vm0, %v938_v9  ;;  %v812_v17 = vadd.f32 %v1180_v13, %v122_v1  ;;  %v844_v18 = vadd.f32 %v1212_v14, %v154_v2  ;;  %v641_v19 = vpop.f32.mrb[31].mxu0  ;;  %v769_v20 = vpop.f32.mrb[31].mxu1 }
 0x119   :  { %1034 = vst.msk [vmem:[%s1861_s3 + $0x1d0] sm:$0xff] %vm26_vm0, %v970_v10  ;;  %v936_v15 = vld [vmem:[#allocation2 + $0xc0] sm:$0xff]  ;;  %875 = vst.msk [vmem:[#allocation2 + $0xf0] sm:$0xff] %vm26_vm0, %v811_v3  ;;  %v810_v23 = vadd.f32 %v641_v19, %v120_v7  ;;  %v842_v24 = vadd.f32 %v769_v20, %v152_v8 }
 0x11a   :  { %v968_v16 = vld [vmem:[#allocation2 + $0x1c0] sm:$0xff]  ;;  %907 = vst.msk [vmem:[#allocation2 + $0x1f0] sm:$0xff] %vm26_vm0, %v843_v4  ;;  %1000 = vst.msk [vmem:[%s1861_s3 + $0xc0] sm:$0xff] %vm26_vm0, %v936_v15 }
 0x11b   :  { %1032 = vst.msk [vmem:[%s1861_s3 + $0x1c0] sm:$0xff] %vm26_vm0, %v968_v16  ;;  %v939_v21 = vld [vmem:[#allocation2 + $0xd8] sm:$0xff]  ;;  %873 = vst.msk [vmem:[#allocation2 + $0xe0] sm:$0xff] %vm26_vm0, %v809_v11 }
 0x11c   :  { %v971_v22 = vld [vmem:[#allocation2 + $0x1d8] sm:$0xff]  ;;  %905 = vst.msk [vmem:[#allocation2 + $0x1e0] sm:$0xff] %vm26_vm0, %v841_v12  ;;  %1003 = vst.msk [vmem:[%s1861_s3 + $0xd8] sm:$0xff] %vm26_vm0, %v939_v21 }
 0x11d   :  { %1035 = vst.msk [vmem:[%s1861_s3 + $0x1d8] sm:$0xff] %vm26_vm0, %v971_v22  ;;  %v937_v25 = vld [vmem:[#allocation2 + $0xc8] sm:$0xff]  ;;  %876 = vst.msk [vmem:[#allocation2 + $0xf8] sm:$0xff] %vm26_vm0, %v812_v17 }
 0x11e   :  { %v969_v26 = vld [vmem:[#allocation2 + $0x1c8] sm:$0xff]  ;;  %908 = vst.msk [vmem:[#allocation2 + $0x1f8] sm:$0xff] %vm26_vm0, %v844_v18  ;;  %1001 = vst.msk [vmem:[%s1861_s3 + $0xc8] sm:$0xff] %vm26_vm0, %v937_v25 }
 0x11f   :  { %1033 = vst.msk [vmem:[%s1861_s3 + $0x1c8] sm:$0xff] %vm26_vm0, %v969_v26  ;;  %874 = vst.msk [vmem:[#allocation2 + $0xe8] sm:$0xff] %vm26_vm0, %v810_v23 }
 0x120   :  { %906 = vst.msk [vmem:[#allocation2 + $0x1e8] sm:$0xff] %vm26_vm0, %v842_v24  ;;  %v942_v27 = vld [vmem:[#allocation2 + $0xf0] sm:$0xff] }
 0x121   :  { %v974_v28 = vld [vmem:[#allocation2 + $0x1f0] sm:$0xff]  ;;  %1006 = vst.msk [vmem:[%s1861_s3 + $0xf0] sm:$0xff] %vm26_vm0, %v942_v27 }
 0x122   :  { %1038 = vst.msk [vmem:[%s1861_s3 + $0x1f0] sm:$0xff] %vm26_vm0, %v974_v28  ;;  %v940_v29 = vld [vmem:[#allocation2 + $0xe0] sm:$0xff] }
 0x123   :  { %v972_v30 = vld [vmem:[#allocation2 + $0x1e0] sm:$0xff]  ;;  %1004 = vst.msk [vmem:[%s1861_s3 + $0xe0] sm:$0xff] %vm26_vm0, %v940_v29 }
 0x124   :  { %1036 = vst.msk [vmem:[%s1861_s3 + $0x1e0] sm:$0xff] %vm26_vm0, %v972_v30  ;;  %v943_v31 = vld [vmem:[#allocation2 + $0xf8] sm:$0xff] }
 0x125   :  { %v975_v32 = vld [vmem:[#allocation2 + $0x1f8] sm:$0xff]  ;;  %1007 = vst.msk [vmem:[%s1861_s3 + $0xf8] sm:$0xff] %vm26_vm0, %v943_v31 }
 0x126   :  { %1039 = vst.msk [vmem:[%s1861_s3 + $0x1f8] sm:$0xff] %vm26_vm0, %v975_v32  ;;  %v941_v33 = vld [vmem:[#allocation2 + $0xe8] sm:$0xff] }
 0x127   :  { %v973_v34 = vld [vmem:[#allocation2 + $0x1e8] sm:$0xff]  ;;  %1005 = vst.msk [vmem:[%s1861_s3 + $0xe8] sm:$0xff] %vm26_vm0, %v941_v33 }
 0x128   :  { %1037 = vst.msk [vmem:[%s1861_s3 + $0x1e8] sm:$0xff] %vm26_vm0, %v973_v34 }

// kernel: msca_forward.10
= control target key start
LH: loop header
LB: loop body
LE: loop exit
PB: predicated region body
PF: predicated region fallthrough
CT: control target
= control target key end

     0   :  { %vm477_vm0 = vcmask 1041408   ;;  %vm380_vm1 = vcmask 31744   ;;  %vm26_vm2 = vcmask 261120   ;;  %s1841_s1 = inlined_call_operand.vmem [shape: bf16[4,32], index: 1, kind: input, shape index: {}]   ;;  %s1842_s0 = inlined_call_operand.vmem [shape: bf16[512,4], index: 0, kind: input, shape index: {}]   ;;  %s1843_s2 = inlined_call_operand.vmem [shape: f32[1,32], index: 2, kind: input, shape index: {}]   ;;  %s1844_s3 = inlined_call_operand.vmem [shape: f32[512,32], index: 3, kind: output, shape index: {}]  }
   0x1   :  { %v219_v0 = vld [vmem:[%s1841_s1] sm:$0x3]  ;;  %v1204_v4 = vld [vmem:[%s1842_s0 + $0x8] sm:$0xff]   ;;  %v1206_v6 = vld [vmem:[%s1842_s0 + $0x10] sm:$0xff]  }
   0x2   :  { %1200 = vmatprep.subr.msk.bf16.mxu0 %vm477_vm0, %v219_v0  ;;  %1201 = vmatprep.subr.msk.bf16.mxu1 %vm477_vm0, %v219_v0  ;;  %v479_v1 = vsel %vm477_vm0, %v219_v0, 0  ;;  %v1202_v2 = vld [vmem:[%s1842_s0] sm:$0xff]   ;;  %v1205_v5 = vld [vmem:[%s1842_s0 + $0x88] sm:$0xff]   ;;  %v1207_v7 = vld [vmem:[%s1842_s0 + $0x90] sm:$0xff]  }
   0x3   :  { %1133 = vmatpush3.bf16.msra.mxu0 %v479_v1  ;;  %1199 = vmatpush3.bf16.msra.mxu1 %v479_v1  ;;  %v1203_v3 = vld [vmem:[%s1842_s0 + $0x80] sm:$0xff]   ;;  %v1208_v8 = vld [vmem:[%s1842_s0 + $0x18] sm:$0xff]   ;;  %v1212_v12 = vld [vmem:[%s1842_s0 + $0x28] sm:$0xff]  }
   0x4   :  { %1134 = vmatprep.mubr.msk.bf16.mxu0 %vm380_vm1, %v1202_v2  ;;  %1166 = vmatprep.mubr.msk.bf16.mxu1 %vm380_vm1, %v1203_v3  ;;  %v1209_v9 = vld [vmem:[%s1842_s0 + $0x98] sm:$0xff]   ;;  %v1210_v10 = vld [vmem:[%s1842_s0 + $0x20] sm:$0xff]   ;;  %v1213_v13 = vld [vmem:[%s1842_s0 + $0xa8] sm:$0xff]  }
   0x5   :  { %v1211_v11 = vld [vmem:[%s1842_s0 + $0xa0] sm:$0xff]   ;;  %v1214_v14 = vld [vmem:[%s1842_s0 + $0x30] sm:$0xff]   ;;  %v1216_v16 = vld [vmem:[%s1842_s0 + $0x38] sm:$0xff]  }
   0x6   :  { %1135 = vmatmul.mubr.msk.bf16.vlgmr.msra.gmra.mrb[0].mxu0 %vm380_vm1, %v1204_v4  ;;  %1167 = vmatmul.mubr.msk.bf16.vlgmr.msra.gmra.mrb[0].mxu1 %vm380_vm1, %v1205_v5  ;;  %v1215_v15 = vld [vmem:[%s1842_s0 + $0xb0] sm:$0xff]   ;;  %v1217_v17 = vld [vmem:[%s1842_s0 + $0xb8] sm:$0xff]   ;;  %v1218_v18 = vld [vmem:[%s1842_s0 + $0x40] sm:$0xff]  }
   0x7   :  { %1138 = vmatprep.mubr.msk.bf16.mxu0 %vm380_vm1, %v1206_v6  ;;  %1170 = vmatprep.mubr.msk.bf16.mxu1 %vm380_vm1, %v1207_v7  ;;  %v1219_v19 = vld [vmem:[%s1842_s0 + $0xc0] sm:$0xff]   ;;  %v1337_v21 = vld [vmem:[%s1842_s0 + $0x48] sm:$0xff]   ;;  %v1222_v23 = vld [vmem:[%s1842_s0 + $0x50] sm:$0xff]  }
   0x8   :  { %v1332_v20 = vld [vmem:[%s1843_s2] ss:$0 sm:$0xff]  ;;  %v1221_v22 = vld [vmem:[%s1842_s0 + $0xc8] sm:$0xff]   ;;  %v1223_v24 = vld [vmem:[%s1842_s0 + $0xd0] sm:$0xff]  }
   0x9   :  { %29 = vst.msk [vmem:[#allocation2 + $0x10] sm:$0xff] %vm26_vm2, %v1332_v20  ;;  %27 = vst.msk [vmem:[#allocation2] sm:$0xff] %vm26_vm2, %v1332_v20  ;;  %v1224_v25 = vld [vmem:[%s1842_s0 + $0x58] sm:$0xff]   ;;  %v1226_v27 = vld [vmem:[%s1842_s0 + $0x60] sm:$0xff]  }
   0xa   :  { %28 = vst.msk [vmem:[#allocation2 + $0x8] sm:$0xff] %vm26_vm2, %v1332_v20  ;;  %30 = vst.msk [vmem:[#allocation2 + $0x18] sm:$0xff] %vm26_vm2, %v1332_v20  ;;  %v1225_v26 = vld [vmem:[%s1842_s0 + $0xd8] sm:$0xff]   ;;  %v1227_v28 = vld [vmem:[%s1842_s0 + $0xe0] sm:$0xff]  }
   0xb   :  { %31 = vst.msk [vmem:[#allocation2 + $0x20] sm:$0xff] %vm26_vm2, %v1332_v20  ;;  %32 = vst.msk [vmem:[#allocation2 + $0x28] sm:$0xff] %vm26_vm2, %v1332_v20  ;;  %v1228_v29 = vld [vmem:[%s1842_s0 + $0x68] sm:$0xff]   ;;  %v1230_v31 = vld [vmem:[%s1842_s0 + $0x70] sm:$0xff]  }
   0xc   :  { %33 = vst.msk [vmem:[#allocation2 + $0x30] sm:$0xff] %vm26_vm2, %v1332_v20  ;;  %34 = vst.msk [vmem:[#allocation2 + $0x38] sm:$0xff] %vm26_vm2, %v1332_v20  ;;  %v1229_v30 = vld [vmem:[%s1842_s0 + $0xe8] sm:$0xff]   ;;  %v1231_v32 = vld [vmem:[%s1842_s0 + $0xf0] sm:$0xff]  }
   0xd   :  { %35 = vst.msk [vmem:[#allocation2 + $0x40] sm:$0xff] %vm26_vm2, %v1332_v20  ;;  %36 = vst.msk [vmem:[#allocation2 + $0x48] sm:$0xff] %vm26_vm2, %v1332_v20  ;;  %v1232_v33 = vld [vmem:[%s1842_s0 + $0x78] sm:$0xff]  }
   0xe   :  { %1139 = vmatmul.mubr.msk.bf16.gmra.mrb[4].mxu0 %vm380_vm1, %v1208_v8  ;;  %1171 = vmatmul.mubr.msk.bf16.gmra.mrb[4].mxu1 %vm380_vm1, %v1209_v9  ;;  %37 = vst.msk [vmem:[#allocation2 + $0x50] sm:$0xff] %vm26_vm2, %v1332_v20  ;;  %38 = vst.msk [vmem:[#allocation2 + $0x58] sm:$0xff] %vm26_vm2, %v1332_v20  ;;  %v1233_v34 = vld [vmem:[%s1842_s0 + $0xf8] sm:$0xff]  }
   0xf   :  { %1142 = vmatprep.mubr.msk.bf16.mxu0 %vm380_vm1, %v1210_v10  ;;  %1174 = vmatprep.mubr.msk.bf16.mxu1 %vm380_vm1, %v1211_v11  ;;  %39 = vst.msk [vmem:[#allocation2 + $0x60] sm:$0xff] %vm26_vm2, %v1332_v20  ;;  %40 = vst.msk [vmem:[#allocation2 + $0x68] sm:$0xff] %vm26_vm2, %v1332_v20 }
  0x10   :  { %41 = vst.msk [vmem:[#allocation2 + $0x70] sm:$0xff] %vm26_vm2, %v1332_v20  ;;  %42 = vst.msk [vmem:[#allocation2 + $0x78] sm:$0xff] %vm26_vm2, %v1332_v20  ;;  %v93_v35 = vld [vmem:[#allocation2 + $0x10] sm:$0xff]  ;;  %v91_v37 = vld [vmem:[#allocation2] sm:$0xff] }
  0x11   :  { %43 = vst.msk [vmem:[#allocation2 + $0x80] sm:$0xff] %vm26_vm2, %v1332_v20  ;;  %44 = vst.msk [vmem:[#allocation2 + $0x88] sm:$0xff] %vm26_vm2, %v1332_v20  ;;  %v94_v40 = vld [vmem:[#allocation2 + $0x18] sm:$0xff]  ;;  %v92_v45 = vld [vmem:[#allocation2 + $0x8] sm:$0xff] }
  0x12   :  { %45 = vst.msk [vmem:[#allocation2 + $0x90] sm:$0xff] %vm26_vm2, %v1332_v20  ;;  %46 = vst.msk [vmem:[#allocation2 + $0x98] sm:$0xff] %vm26_vm2, %v1332_v20  ;;  %v95_v61 = vld [vmem:[#allocation2 + $0x20] sm:$0xff]  ;;  %v96_v5 = vld [vmem:[#allocation2 + $0x28] sm:$0xff] }
  0x13   :  { %47 = vst.msk [vmem:[#allocation2 + $0xa0] sm:$0xff] %vm26_vm2, %v1332_v20  ;;  %48 = vst.msk [vmem:[#allocation2 + $0xa8] sm:$0xff] %vm26_vm2, %v1332_v20  ;;  %v97_v59 = vld [vmem:[#allocation2 + $0x30] sm:$0xff]  ;;  %v98_v0 = vld [vmem:[#allocation2 + $0x38] sm:$0xff] }
  0x14   :  { %49 = vst.msk [vmem:[#allocation2 + $0xb0] sm:$0xff] %vm26_vm2, %v1332_v20  ;;  %50 = vst.msk [vmem:[#allocation2 + $0xb8] sm:$0xff] %vm26_vm2, %v1332_v20 }
  0x15   :  { %51 = vst.msk [vmem:[#allocation2 + $0xc0] sm:$0xff] %vm26_vm2, %v1332_v20  ;;  %52 = vst.msk [vmem:[#allocation2 + $0xc8] sm:$0xff] %vm26_vm2, %v1332_v20 }
  0x16   :  { %1143 = vmatmul.mubr.msk.bf16.gmra.mrb[8].mxu0 %vm380_vm1, %v1212_v12  ;;  %1175 = vmatmul.mubr.msk.bf16.gmra.mrb[8].mxu1 %vm380_vm1, %v1213_v13  ;;  %53 = vst.msk [vmem:[#allocation2 + $0xd0] sm:$0xff] %vm26_vm2, %v1332_v20  ;;  %54 = vst.msk [vmem:[#allocation2 + $0xd8] sm:$0xff] %vm26_vm2, %v1332_v20 }
  0x17   :  { %1146 = vmatprep.mubr.msk.bf16.mxu0 %vm380_vm1, %v1214_v14  ;;  %1178 = vmatprep.mubr.msk.bf16.mxu1 %vm380_vm1, %v1215_v15  ;;  %55 = vst.msk [vmem:[#allocation2 + $0xe0] sm:$0xff] %vm26_vm2, %v1332_v20  ;;  %56 = vst.msk [vmem:[#allocation2 + $0xe8] sm:$0xff] %vm26_vm2, %v1332_v20 }
  0x18   :  { %57 = vst.msk [vmem:[#allocation2 + $0xf0] sm:$0xff] %vm26_vm2, %v1332_v20  ;;  %58 = vst.msk [vmem:[#allocation2 + $0xf8] sm:$0xff] %vm26_vm2, %v1332_v20 }
  0x19   :  { %59 = vst.msk [vmem:[#allocation2 + $0x100] sm:$0xff] %vm26_vm2, %v1332_v20  ;;  %60 = vst.msk [vmem:[#allocation2 + $0x108] sm:$0xff] %vm26_vm2, %v1332_v20 }
  0x1a   :  { %61 = vst.msk [vmem:[#allocation2 + $0x110] sm:$0xff] %vm26_vm2, %v1332_v20  ;;  %62 = vst.msk [vmem:[#allocation2 + $0x118] sm:$0xff] %vm26_vm2, %v1332_v20 }
  0x1b   :  { %63 = vst.msk [vmem:[#allocation2 + $0x120] sm:$0xff] %vm26_vm2, %v1332_v20  ;;  %64 = vst.msk [vmem:[#allocation2 + $0x128] sm:$0xff] %vm26_vm2, %v1332_v20 }
  0x1c   :  { %65 = vst.msk [vmem:[#allocation2 + $0x130] sm:$0xff] %vm26_vm2, %v1332_v20  ;;  %66 = vst.msk [vmem:[#allocation2 + $0x138] sm:$0xff] %vm26_vm2, %v1332_v20 }
  0x1d   :  { %67 = vst.msk [vmem:[#allocation2 + $0x140] sm:$0xff] %vm26_vm2, %v1332_v20  ;;  %68 = vst.msk [vmem:[#allocation2 + $0x148] sm:$0xff] %vm26_vm2, %v1332_v20 }
  0x1e   :  { %1147 = vmatmul.mubr.msk.bf16.gmra.mrb[12].mxu0 %vm380_vm1, %v1216_v16  ;;  %1179 = vmatmul.mubr.msk.bf16.gmra.mrb[12].mxu1 %vm380_vm1, %v1217_v17  ;;  %69 = vst.msk [vmem:[#allocation2 + $0x150] sm:$0xff] %vm26_vm2, %v1332_v20  ;;  %70 = vst.msk [vmem:[#allocation2 + $0x158] sm:$0xff] %vm26_vm2, %v1332_v20 }
  0x1f   :  { %1150 = vmatprep.mubr.msk.bf16.mxu0 %vm380_vm1, %v1218_v18  ;;  %1182 = vmatprep.mubr.msk.bf16.mxu1 %vm380_vm1, %v1219_v19  ;;  %71 = vst.msk [vmem:[#allocation2 + $0x160] sm:$0xff] %vm26_vm2, %v1332_v20  ;;  %72 = vst.msk [vmem:[#allocation2 + $0x168] sm:$0xff] %vm26_vm2, %v1332_v20 }
  0x20   :  { %73 = vst.msk [vmem:[#allocation2 + $0x170] sm:$0xff] %vm26_vm2, %v1332_v20  ;;  %74 = vst.msk [vmem:[#allocation2 + $0x178] sm:$0xff] %vm26_vm2, %v1332_v20  ;;  %v123_v39 = vld [vmem:[#allocation2 + $0x100] sm:$0xff]  ;;  %v124_v50 = vld [vmem:[#allocation2 + $0x108] sm:$0xff] }
  0x21   :  { %75 = vst.msk [vmem:[#allocation2 + $0x180] sm:$0xff] %vm26_vm2, %v1332_v20  ;;  %76 = vst.msk [vmem:[#allocation2 + $0x188] sm:$0xff] %vm26_vm2, %v1332_v20  ;;  %v125_v36 = vld [vmem:[#allocation2 + $0x110] sm:$0xff]  ;;  %v126_v44 = vld [vmem:[#allocation2 + $0x118] sm:$0xff] }
  0x22   :  { %77 = vst.msk [vmem:[#allocation2 + $0x190] sm:$0xff] %vm26_vm2, %v1332_v20  ;;  %78 = vst.msk [vmem:[#allocation2 + $0x198] sm:$0xff] %vm26_vm2, %v1332_v20  ;;  %v127_v63 = vld [vmem:[#allocation2 + $0x120] sm:$0xff]  ;;  %v128_v11 = vld [vmem:[#allocation2 + $0x128] sm:$0xff] }
  0x23   :  { %79 = vst.msk [vmem:[#allocation2 + $0x1a0] sm:$0xff] %vm26_vm2, %v1332_v20  ;;  %80 = vst.msk [vmem:[#allocation2 + $0x1a8] sm:$0xff] %vm26_vm2, %v1332_v20  ;;  %v129_v60 = vld [vmem:[#allocation2 + $0x130] sm:$0xff]  ;;  %v130_v4 = vld [vmem:[#allocation2 + $0x138] sm:$0xff] }
  0x24   :  { %81 = vst.msk [vmem:[#allocation2 + $0x1b0] sm:$0xff] %vm26_vm2, %v1332_v20  ;;  %82 = vst.msk [vmem:[#allocation2 + $0x1b8] sm:$0xff] %vm26_vm2, %v1332_v20 }
  0x25   :  { %83 = vst.msk [vmem:[#allocation2 + $0x1c0] sm:$0xff] %vm26_vm2, %v1332_v20  ;;  %84 = vst.msk [vmem:[#allocation2 + $0x1c8] sm:$0xff] %vm26_vm2, %v1332_v20 }
  0x26   :  { %85 = vst.msk [vmem:[#allocation2 + $0x1d0] sm:$0xff] %vm26_vm2, %v1332_v20  ;;  %86 = vst.msk [vmem:[#allocation2 + $0x1d8] sm:$0xff] %vm26_vm2, %v1332_v20  ;;  %1151 = vmatmul.mubr.msk.bf16.gmra.mrb[16].mxu0 %vm380_vm1, %v1337_v21  ;;  %1183 = vmatmul.mubr.msk.bf16.gmra.mrb[16].mxu1 %vm380_vm1, %v1221_v22 }
  0x27   :  { %87 = vst.msk [vmem:[#allocation2 + $0x1e0] sm:$0xff] %vm26_vm2, %v1332_v20  ;;  %88 = vst.msk [vmem:[#allocation2 + $0x1e8] sm:$0xff] %vm26_vm2, %v1332_v20  ;;  %1154 = vmatprep.mubr.msk.bf16.mxu0 %vm380_vm1, %v1222_v23  ;;  %1186 = vmatprep.mubr.msk.bf16.mxu1 %vm380_vm1, %v1223_v24 }
  0x28   :  { %89 = vst.msk [vmem:[#allocation2 + $0x1f0] sm:$0xff] %vm26_vm2, %v1332_v20  ;;  %90 = vst.msk [vmem:[#allocation2 + $0x1f8] sm:$0xff] %vm26_vm2, %v1332_v20 }
  0x2e   :  { %1155 = vmatmul.mubr.msk.bf16.gmra.mrb[20].mxu0 %vm380_vm1, %v1224_v25  ;;  %1187 = vmatmul.mubr.msk.bf16.gmra.mrb[20].mxu1 %vm380_vm1, %v1225_v26 }
  0x2f   :  { %1158 = vmatprep.mubr.msk.bf16.mxu0 %vm380_vm1, %v1226_v27  ;;  %1190 = vmatprep.mubr.msk.bf16.mxu1 %vm380_vm1, %v1227_v28  ;;  %v101_v27 = vld [vmem:[#allocation2 + $0x50] sm:$0xff] }
  0x30   :  { %v133_v28 = vld [vmem:[#allocation2 + $0x150] sm:$0xff] }
  0x36   :  { %1159 = vmatmul.mubr.msk.bf16.gmra.mrb[24].mxu0 %vm380_vm1, %v1228_v29  ;;  %1191 = vmatmul.mubr.msk.bf16.gmra.mrb[24].mxu1 %vm380_vm1, %v1229_v30  ;;  %v99_v29 = vld [vmem:[#allocation2 + $0x40] sm:$0xff] }
  0x37   :  { %1162 = vmatprep.mubr.msk.bf16.mxu0 %vm380_vm1, %v1230_v31  ;;  %1194 = vmatprep.mubr.msk.bf16.mxu1 %vm380_vm1, %v1231_v32  ;;  %v131_v31 = vld [vmem:[#allocation2 + $0x140] sm:$0xff]  ;;  %v102_v32 = vld [vmem:[#allocation2 + $0x58] sm:$0xff] }
  0x3e   :  { %1163 = vmatmul.mubr.msk.bf16.gmra.mrb[28].mxu0 %vm380_vm1, %v1232_v33  ;;  %1195 = vmatmul.mubr.msk.bf16.gmra.mrb[28].mxu1 %vm380_vm1, %v1233_v34 }
  0xd9   :  { %v1136_v38 = vpop.f32.mrb[0].mxu0  ;;  %v1168_v42 = vpop.f32.mrb[0].mxu1 }
  0xda   :  { %v772_v41 = vadd.f32 %v1136_v38, %v93_v35  ;;  %v515_v43 = vpop.f32.mrb[1].mxu0  ;;  %v804_v46 = vadd.f32 %v1168_v42, %v125_v36  ;;  %v643_v48 = vpop.f32.mrb[1].mxu1  ;;  %v134_v36 = vld [vmem:[#allocation2 + $0x158] sm:$0xff] }
  0xdb   :  { %v770_v47 = vadd.f32 %v515_v43, %v91_v37  ;;  %v1137_v49 = vpop.f32.mrb[2].mxu0  ;;  %v802_v51 = vadd.f32 %v643_v48, %v123_v39  ;;  %v1169_v53 = vpop.f32.mrb[2].mxu1  ;;  %v100_v37 = vld [vmem:[#allocation2 + $0x48] sm:$0xff] }
  0xdc   :  { %837 = vst.msk [vmem:[#allocation2 + $0x10] sm:$0xff] %vm26_vm2, %v772_v41  ;;  %v773_v52 = vadd.f32 %v1137_v49, %v94_v40  ;;  %v518_v54 = vpop.f32.mrb[3].mxu0  ;;  %869 = vst.msk [vmem:[#allocation2 + $0x110] sm:$0xff] %vm26_vm2, %v804_v46  ;;  %v805_v55 = vadd.f32 %v1169_v53, %v126_v44  ;;  %v646_v57 = vpop.f32.mrb[3].mxu1  ;;  %v132_v43 = vld [vmem:[#allocation2 + $0x148] sm:$0xff] }
  0xdd   :  { %835 = vst.msk [vmem:[#allocation2] sm:$0xff] %vm26_vm2, %v770_v47  ;;  %v771_v56 = vadd.f32 %v518_v54, %v92_v45  ;;  %867 = vst.msk [vmem:[#allocation2 + $0x100] sm:$0xff] %vm26_vm2, %v802_v51  ;;  %v803_v58 = vadd.f32 %v646_v57, %v124_v50 }
  0xde   :  { %838 = vst.msk [vmem:[#allocation2 + $0x18] sm:$0xff] %vm26_vm2, %v773_v52  ;;  %870 = vst.msk [vmem:[#allocation2 + $0x118] sm:$0xff] %vm26_vm2, %v805_v55 }
  0xdf   :  { %836 = vst.msk [vmem:[#allocation2 + $0x8] sm:$0xff] %vm26_vm2, %v771_v56  ;;  %868 = vst.msk [vmem:[#allocation2 + $0x108] sm:$0xff] %vm26_vm2, %v803_v58 }
  0xe1   :  { %v1140_v62 = vpop.f32.mrb[4].mxu0  ;;  %v1172_v2 = vpop.f32.mrb[4].mxu1 }
  0xe2   :  { %v776_v1 = vadd.f32 %v1140_v62, %v97_v59  ;;  %v531_v3 = vpop.f32.mrb[5].mxu0  ;;  %v808_v7 = vadd.f32 %v1172_v2, %v129_v60  ;;  %v659_v9 = vpop.f32.mrb[5].mxu1  ;;  %v105_v59 = vld [vmem:[#allocation2 + $0x70] sm:$0xff] }
  0xe3   :  { %v904_v6 = vld [vmem:[#allocation2 + $0x10] sm:$0xff]  ;;  %v774_v8 = vadd.f32 %v531_v3, %v95_v61  ;;  %v1141_v10 = vpop.f32.mrb[6].mxu0  ;;  %v806_v14 = vadd.f32 %v659_v9, %v127_v63  ;;  %v1173_v16 = vpop.f32.mrb[6].mxu1  ;;  %v103_v61 = vld [vmem:[#allocation2 + $0x60] sm:$0xff] }
  0xe4   :  { %968 = vst.msk [vmem:[%s1844_s3 + $0x10] sm:$0xff] %vm26_vm2, %v904_v6  ;;  %v936_v12 = vld [vmem:[#allocation2 + $0x110] sm:$0xff]  ;;  %v902_v13 = vld [vmem:[#allocation2] sm:$0xff]  ;;  %841 = vst.msk [vmem:[#allocation2 + $0x30] sm:$0xff] %vm26_vm2, %v776_v1  ;;  %v777_v15 = vadd.f32 %v1141_v10, %v98_v0  ;;  %v534_v17 = vpop.f32.mrb[7].mxu0  ;;  %v809_v20 = vadd.f32 %v1173_v16, %v130_v4  ;;  %v662_v22 = vpop.f32.mrb[7].mxu1 }
  0xe5   :  { %1000 = vst.msk [vmem:[%s1844_s3 + $0x110] sm:$0xff] %vm26_vm2, %v936_v12  ;;  %966 = vst.msk [vmem:[%s1844_s3] sm:$0xff] %vm26_vm2, %v902_v13  ;;  %v934_v18 = vld [vmem:[#allocation2 + $0x100] sm:$0xff]  ;;  %v905_v19 = vld [vmem:[#allocation2 + $0x18] sm:$0xff]  ;;  %v775_v21 = vadd.f32 %v534_v17, %v96_v5  ;;  %v807_v25 = vadd.f32 %v662_v22, %v128_v11 }
  0xe6   :  { %873 = vst.msk [vmem:[#allocation2 + $0x130] sm:$0xff] %vm26_vm2, %v808_v7  ;;  %839 = vst.msk [vmem:[#allocation2 + $0x20] sm:$0xff] %vm26_vm2, %v774_v8  ;;  %v937_v23 = vld [vmem:[#allocation2 + $0x118] sm:$0xff]  ;;  %v903_v24 = vld [vmem:[#allocation2 + $0x8] sm:$0xff] }
  0xe7   :  { %998 = vst.msk [vmem:[%s1844_s3 + $0x100] sm:$0xff] %vm26_vm2, %v934_v18  ;;  %969 = vst.msk [vmem:[%s1844_s3 + $0x18] sm:$0xff] %vm26_vm2, %v905_v19  ;;  %v935_v26 = vld [vmem:[#allocation2 + $0x108] sm:$0xff]  ;;  %v137_v60 = vld [vmem:[#allocation2 + $0x170] sm:$0xff] }
  0xe8   :  { %871 = vst.msk [vmem:[#allocation2 + $0x120] sm:$0xff] %vm26_vm2, %v806_v14  ;;  %842 = vst.msk [vmem:[#allocation2 + $0x38] sm:$0xff] %vm26_vm2, %v777_v15  ;;  %v135_v63 = vld [vmem:[#allocation2 + $0x160] sm:$0xff]  ;;  %v106_v0 = vld [vmem:[#allocation2 + $0x78] sm:$0xff] }
  0xe9   :  { %1001 = vst.msk [vmem:[%s1844_s3 + $0x118] sm:$0xff] %vm26_vm2, %v937_v23  ;;  %967 = vst.msk [vmem:[%s1844_s3 + $0x8] sm:$0xff] %vm26_vm2, %v903_v24  ;;  %v1144_v30 = vpop.f32.mrb[8].mxu0  ;;  %v1176_v34 = vpop.f32.mrb[8].mxu1  ;;  %v138_v4 = vld [vmem:[#allocation2 + $0x178] sm:$0xff]  ;;  %v104_v5 = vld [vmem:[#allocation2 + $0x68] sm:$0xff] }
  0xea   :  { %874 = vst.msk [vmem:[#allocation2 + $0x138] sm:$0xff] %vm26_vm2, %v809_v20  ;;  %840 = vst.msk [vmem:[#allocation2 + $0x28] sm:$0xff] %vm26_vm2, %v775_v21  ;;  %v780_v33 = vadd.f32 %v1144_v30, %v101_v27  ;;  %v547_v35 = vpop.f32.mrb[9].mxu0  ;;  %v812_v39 = vadd.f32 %v1176_v34, %v133_v28  ;;  %v675_v41 = vpop.f32.mrb[9].mxu1  ;;  %v136_v11 = vld [vmem:[#allocation2 + $0x168] sm:$0xff]  ;;  %v109_v27 = vld [vmem:[#allocation2 + $0x90] sm:$0xff] }
  0xeb   :  { %999 = vst.msk [vmem:[%s1844_s3 + $0x108] sm:$0xff] %vm26_vm2, %v935_v26  ;;  %872 = vst.msk [vmem:[#allocation2 + $0x128] sm:$0xff] %vm26_vm2, %v807_v25  ;;  %v908_v38 = vld [vmem:[#allocation2 + $0x30] sm:$0xff]  ;;  %v778_v40 = vadd.f32 %v547_v35, %v99_v29  ;;  %v1145_v42 = vpop.f32.mrb[10].mxu0  ;;  %v810_v46 = vadd.f32 %v675_v41, %v131_v31  ;;  %v1177_v48 = vpop.f32.mrb[10].mxu1  ;;  %v107_v29 = vld [vmem:[#allocation2 + $0x80] sm:$0xff] }
  0xec   :  { %972 = vst.msk [vmem:[%s1844_s3 + $0x30] sm:$0xff] %vm26_vm2, %v908_v38  ;;  %845 = vst.msk [vmem:[#allocation2 + $0x50] sm:$0xff] %vm26_vm2, %v780_v33  ;;  %v781_v47 = vadd.f32 %v1145_v42, %v102_v32  ;;  %v550_v49 = vpop.f32.mrb[11].mxu0  ;;  %v813_v52 = vadd.f32 %v1177_v48, %v134_v36  ;;  %v678_v54 = vpop.f32.mrb[11].mxu1  ;;  %v141_v28 = vld [vmem:[#allocation2 + $0x190] sm:$0xff]  ;;  %v139_v31 = vld [vmem:[#allocation2 + $0x180] sm:$0xff] }
  0xed   :  { %v940_v44 = vld [vmem:[#allocation2 + $0x130] sm:$0xff]  ;;  %v906_v45 = vld [vmem:[#allocation2 + $0x20] sm:$0xff]  ;;  %877 = vst.msk [vmem:[#allocation2 + $0x150] sm:$0xff] %vm26_vm2, %v812_v39  ;;  %843 = vst.msk [vmem:[#allocation2 + $0x40] sm:$0xff] %vm26_vm2, %v778_v40  ;;  %v779_v53 = vadd.f32 %v550_v49, %v100_v37  ;;  %v811_v57 = vadd.f32 %v678_v54, %v132_v43 }
  0xee   :  { %1004 = vst.msk [vmem:[%s1844_s3 + $0x130] sm:$0xff] %vm26_vm2, %v940_v44  ;;  %970 = vst.msk [vmem:[%s1844_s3 + $0x20] sm:$0xff] %vm26_vm2, %v906_v45  ;;  %v110_v32 = vld [vmem:[#allocation2 + $0x98] sm:$0xff]  ;;  %v108_v37 = vld [vmem:[#allocation2 + $0x88] sm:$0xff] }
  0xef   :  { %v938_v50 = vld [vmem:[#allocation2 + $0x120] sm:$0xff]  ;;  %v909_v51 = vld [vmem:[#allocation2 + $0x38] sm:$0xff]  ;;  %875 = vst.msk [vmem:[#allocation2 + $0x140] sm:$0xff] %vm26_vm2, %v810_v46  ;;  %846 = vst.msk [vmem:[#allocation2 + $0x58] sm:$0xff] %vm26_vm2, %v781_v47 }
  0xf0   :  { %1002 = vst.msk [vmem:[%s1844_s3 + $0x120] sm:$0xff] %vm26_vm2, %v938_v50  ;;  %973 = vst.msk [vmem:[%s1844_s3 + $0x38] sm:$0xff] %vm26_vm2, %v909_v51  ;;  %v142_v36 = vld [vmem:[#allocation2 + $0x198] sm:$0xff]  ;;  %v140_v43 = vld [vmem:[#allocation2 + $0x188] sm:$0xff] }
  0xf1   :  { %v941_v55 = vld [vmem:[#allocation2 + $0x138] sm:$0xff]  ;;  %v907_v56 = vld [vmem:[#allocation2 + $0x28] sm:$0xff]  ;;  %878 = vst.msk [vmem:[#allocation2 + $0x158] sm:$0xff] %vm26_vm2, %v813_v52  ;;  %844 = vst.msk [vmem:[#allocation2 + $0x48] sm:$0xff] %vm26_vm2, %v779_v53  ;;  %v1148_v62 = vpop.f32.mrb[12].mxu0  ;;  %v1180_v2 = vpop.f32.mrb[12].mxu1 }
  0xf2   :  { %1005 = vst.msk [vmem:[%s1844_s3 + $0x138] sm:$0xff] %vm26_vm2, %v941_v55  ;;  %971 = vst.msk [vmem:[%s1844_s3 + $0x28] sm:$0xff] %vm26_vm2, %v907_v56  ;;  %v939_v58 = vld [vmem:[#allocation2 + $0x128] sm:$0xff]  ;;  %v784_v1 = vadd.f32 %v1148_v62, %v105_v59  ;;  %v563_v3 = vpop.f32.mrb[13].mxu0  ;;  %v816_v7 = vadd.f32 %v1180_v2, %v137_v60  ;;  %v691_v9 = vpop.f32.mrb[13].mxu1  ;;  %v113_v59 = vld [vmem:[#allocation2 + $0xb0] sm:$0xff] }
  0xf3   :  { %1003 = vst.msk [vmem:[%s1844_s3 + $0x128] sm:$0xff] %vm26_vm2, %v939_v58  ;;  %876 = vst.msk [vmem:[#allocation2 + $0x148] sm:$0xff] %vm26_vm2, %v811_v57  ;;  %v912_v6 = vld [vmem:[#allocation2 + $0x50] sm:$0xff]  ;;  %v782_v8 = vadd.f32 %v563_v3, %v103_v61  ;;  %v1149_v10 = vpop.f32.mrb[14].mxu0  ;;  %v814_v14 = vadd.f32 %v691_v9, %v135_v63  ;;  %v1181_v16 = vpop.f32.mrb[14].mxu1  ;;  %v111_v61 = vld [vmem:[#allocation2 + $0xa0] sm:$0xff] }
  0xf4   :  { %976 = vst.msk [vmem:[%s1844_s3 + $0x50] sm:$0xff] %vm26_vm2, %v912_v6  ;;  %v944_v12 = vld [vmem:[#allocation2 + $0x150] sm:$0xff]  ;;  %v910_v13 = vld [vmem:[#allocation2 + $0x40] sm:$0xff]  ;;  %849 = vst.msk [vmem:[#allocation2 + $0x70] sm:$0xff] %vm26_vm2, %v784_v1  ;;  %v785_v15 = vadd.f32 %v1149_v10, %v106_v0  ;;  %v566_v17 = vpop.f32.mrb[15].mxu0  ;;  %v817_v20 = vadd.f32 %v1181_v16, %v138_v4  ;;  %v694_v22 = vpop.f32.mrb[15].mxu1 }
  0xf5   :  { %1008 = vst.msk [vmem:[%s1844_s3 + $0x150] sm:$0xff] %vm26_vm2, %v944_v12  ;;  %974 = vst.msk [vmem:[%s1844_s3 + $0x40] sm:$0xff] %vm26_vm2, %v910_v13  ;;  %v783_v21 = vadd.f32 %v566_v17, %v104_v5  ;;  %v815_v25 = vadd.f32 %v694_v22, %v136_v11  ;;  %v145_v60 = vld [vmem:[#allocation2 + $0x1b0] sm:$0xff]  ;;  %v143_v63 = vld [vmem:[#allocation2 + $0x1a0] sm:$0xff] }
  0xf6   :  { %v942_v18 = vld [vmem:[#allocation2 + $0x140] sm:$0xff]  ;;  %v913_v19 = vld [vmem:[#allocation2 + $0x58] sm:$0xff]  ;;  %881 = vst.msk [vmem:[#allocation2 + $0x170] sm:$0xff] %vm26_vm2, %v816_v7  ;;  %847 = vst.msk [vmem:[#allocation2 + $0x60] sm:$0xff] %vm26_vm2, %v782_v8 }
  0xf7   :  { %1006 = vst.msk [vmem:[%s1844_s3 + $0x140] sm:$0xff] %vm26_vm2, %v942_v18  ;;  %977 = vst.msk [vmem:[%s1844_s3 + $0x58] sm:$0xff] %vm26_vm2, %v913_v19  ;;  %v114_v0 = vld [vmem:[#allocation2 + $0xb8] sm:$0xff]  ;;  %v112_v5 = vld [vmem:[#allocation2 + $0xa8] sm:$0xff] }
  0xf8   :  { %v945_v23 = vld [vmem:[#allocation2 + $0x158] sm:$0xff]  ;;  %v911_v24 = vld [vmem:[#allocation2 + $0x48] sm:$0xff]  ;;  %879 = vst.msk [vmem:[#allocation2 + $0x160] sm:$0xff] %vm26_vm2, %v814_v14  ;;  %850 = vst.msk [vmem:[#allocation2 + $0x78] sm:$0xff] %vm26_vm2, %v785_v15 }
  0xf9   :  { %1009 = vst.msk [vmem:[%s1844_s3 + $0x158] sm:$0xff] %vm26_vm2, %v945_v23  ;;  %975 = vst.msk [vmem:[%s1844_s3 + $0x48] sm:$0xff] %vm26_vm2, %v911_v24  ;;  %v1152_v30 = vpop.f32.mrb[16].mxu0  ;;  %v1184_v34 = vpop.f32.mrb[16].mxu1  ;;  %v146_v4 = vld [vmem:[#allocation2 + $0x1b8] sm:$0xff]  ;;  %v144_v11 = vld [vmem:[#allocation2 + $0x1a8] sm:$0xff] }
  0xfa   :  { %v943_v26 = vld [vmem:[#allocation2 + $0x148] sm:$0xff]  ;;  %882 = vst.msk [vmem:[#allocation2 + $0x178] sm:$0xff] %vm26_vm2, %v817_v20  ;;  %848 = vst.msk [vmem:[#allocation2 + $0x68] sm:$0xff] %vm26_vm2, %v783_v21  ;;  %v788_v33 = vadd.f32 %v1152_v30, %v109_v27  ;;  %v579_v35 = vpop.f32.mrb[17].mxu0  ;;  %v820_v39 = vadd.f32 %v1184_v34, %v141_v28  ;;  %v707_v41 = vpop.f32.mrb[17].mxu1  ;;  %v117_v27 = vld [vmem:[#allocation2 + $0xd0] sm:$0xff] }
  0xfb   :  { %1007 = vst.msk [vmem:[%s1844_s3 + $0x148] sm:$0xff] %vm26_vm2, %v943_v26  ;;  %880 = vst.msk [vmem:[#allocation2 + $0x168] sm:$0xff] %vm26_vm2, %v815_v25  ;;  %v916_v38 = vld [vmem:[#allocation2 + $0x70] sm:$0xff]  ;;  %v786_v40 = vadd.f32 %v579_v35, %v107_v29  ;;  %v1153_v42 = vpop.f32.mrb[18].mxu0  ;;  %v818_v46 = vadd.f32 %v707_v41, %v139_v31  ;;  %v1185_v48 = vpop.f32.mrb[18].mxu1  ;;  %v115_v29 = vld [vmem:[#allocation2 + $0xc0] sm:$0xff] }
  0xfc   :  { %980 = vst.msk [vmem:[%s1844_s3 + $0x70] sm:$0xff] %vm26_vm2, %v916_v38  ;;  %853 = vst.msk [vmem:[#allocation2 + $0x90] sm:$0xff] %vm26_vm2, %v788_v33  ;;  %v789_v47 = vadd.f32 %v1153_v42, %v110_v32  ;;  %v582_v49 = vpop.f32.mrb[19].mxu0  ;;  %v821_v52 = vadd.f32 %v1185_v48, %v142_v36  ;;  %v710_v54 = vpop.f32.mrb[19].mxu1  ;;  %v149_v28 = vld [vmem:[#allocation2 + $0x1d0] sm:$0xff]  ;;  %v147_v31 = vld [vmem:[#allocation2 + $0x1c0] sm:$0xff] }
  0xfd   :  { %v948_v44 = vld [vmem:[#allocation2 + $0x170] sm:$0xff]  ;;  %v914_v45 = vld [vmem:[#allocation2 + $0x60] sm:$0xff]  ;;  %885 = vst.msk [vmem:[#allocation2 + $0x190] sm:$0xff] %vm26_vm2, %v820_v39  ;;  %851 = vst.msk [vmem:[#allocation2 + $0x80] sm:$0xff] %vm26_vm2, %v786_v40  ;;  %v787_v53 = vadd.f32 %v582_v49, %v108_v37  ;;  %v819_v57 = vadd.f32 %v710_v54, %v140_v43 }
  0xfe   :  { %1012 = vst.msk [vmem:[%s1844_s3 + $0x170] sm:$0xff] %vm26_vm2, %v948_v44  ;;  %978 = vst.msk [vmem:[%s1844_s3 + $0x60] sm:$0xff] %vm26_vm2, %v914_v45  ;;  %v118_v32 = vld [vmem:[#allocation2 + $0xd8] sm:$0xff]  ;;  %v116_v37 = vld [vmem:[#allocation2 + $0xc8] sm:$0xff] }
  0xff   :  { %v946_v50 = vld [vmem:[#allocation2 + $0x160] sm:$0xff]  ;;  %v917_v51 = vld [vmem:[#allocation2 + $0x78] sm:$0xff]  ;;  %883 = vst.msk [vmem:[#allocation2 + $0x180] sm:$0xff] %vm26_vm2, %v818_v46  ;;  %854 = vst.msk [vmem:[#allocation2 + $0x98] sm:$0xff] %vm26_vm2, %v789_v47 }
 0x100   :  { %1010 = vst.msk [vmem:[%s1844_s3 + $0x160] sm:$0xff] %vm26_vm2, %v946_v50  ;;  %981 = vst.msk [vmem:[%s1844_s3 + $0x78] sm:$0xff] %vm26_vm2, %v917_v51  ;;  %v150_v36 = vld [vmem:[#allocation2 + $0x1d8] sm:$0xff]  ;;  %v148_v43 = vld [vmem:[#allocation2 + $0x1c8] sm:$0xff] }
 0x101   :  { %v949_v55 = vld [vmem:[#allocation2 + $0x178] sm:$0xff]  ;;  %v915_v56 = vld [vmem:[#allocation2 + $0x68] sm:$0xff]  ;;  %886 = vst.msk [vmem:[#allocation2 + $0x198] sm:$0xff] %vm26_vm2, %v821_v52  ;;  %852 = vst.msk [vmem:[#allocation2 + $0x88] sm:$0xff] %vm26_vm2, %v787_v53  ;;  %v1156_v62 = vpop.f32.mrb[20].mxu0  ;;  %v1188_v2 = vpop.f32.mrb[20].mxu1 }
 0x102   :  { %1013 = vst.msk [vmem:[%s1844_s3 + $0x178] sm:$0xff] %vm26_vm2, %v949_v55  ;;  %979 = vst.msk [vmem:[%s1844_s3 + $0x68] sm:$0xff] %vm26_vm2, %v915_v56  ;;  %v947_v58 = vld [vmem:[#allocation2 + $0x168] sm:$0xff]  ;;  %v792_v1 = vadd.f32 %v1156_v62, %v113_v59  ;;  %v595_v3 = vpop.f32.mrb[21].mxu0  ;;  %v824_v7 = vadd.f32 %v1188_v2, %v145_v60  ;;  %v723_v9 = vpop.f32.mrb[21].mxu1  ;;  %v121_v59 = vld [vmem:[#allocation2 + $0xf0] sm:$0xff] }
 0x103   :  { %1011 = vst.msk [vmem:[%s1844_s3 + $0x168] sm:$0xff] %vm26_vm2, %v947_v58  ;;  %884 = vst.msk [vmem:[#allocation2 + $0x188] sm:$0xff] %vm26_vm2, %v819_v57  ;;  %v920_v6 = vld [vmem:[#allocation2 + $0x90] sm:$0xff]  ;;  %v790_v8 = vadd.f32 %v595_v3, %v111_v61  ;;  %v1157_v10 = vpop.f32.mrb[22].mxu0  ;;  %v822_v14 = vadd.f32 %v723_v9, %v143_v63  ;;  %v1189_v16 = vpop.f32.mrb[22].mxu1  ;;  %v119_v61 = vld [vmem:[#allocation2 + $0xe0] sm:$0xff] }
 0x104   :  { %984 = vst.msk [vmem:[%s1844_s3 + $0x90] sm:$0xff] %vm26_vm2, %v920_v6  ;;  %v952_v12 = vld [vmem:[#allocation2 + $0x190] sm:$0xff]  ;;  %v918_v13 = vld [vmem:[#allocation2 + $0x80] sm:$0xff]  ;;  %857 = vst.msk [vmem:[#allocation2 + $0xb0] sm:$0xff] %vm26_vm2, %v792_v1  ;;  %v793_v15 = vadd.f32 %v1157_v10, %v114_v0  ;;  %v598_v17 = vpop.f32.mrb[23].mxu0  ;;  %v825_v20 = vadd.f32 %v1189_v16, %v146_v4  ;;  %v726_v22 = vpop.f32.mrb[23].mxu1 }
 0x105   :  { %1016 = vst.msk [vmem:[%s1844_s3 + $0x190] sm:$0xff] %vm26_vm2, %v952_v12  ;;  %982 = vst.msk [vmem:[%s1844_s3 + $0x80] sm:$0xff] %vm26_vm2, %v918_v13  ;;  %v791_v21 = vadd.f32 %v598_v17, %v112_v5  ;;  %v823_v25 = vadd.f32 %v726_v22, %v144_v11  ;;  %v153_v60 = vld [vmem:[#allocation2 + $0x1f0] sm:$0xff]  ;;  %v151_v63 = vld [vmem:[#allocation2 + $0x1e0] sm:$0xff] }
 0x106   :  { %v950_v18 = vld [vmem:[#allocation2 + $0x180] sm:$0xff]  ;;  %v921_v19 = vld [vmem:[#allocation2 + $0x98] sm:$0xff]  ;;  %889 = vst.msk [vmem:[#allocation2 + $0x1b0] sm:$0xff] %vm26_vm2, %v824_v7  ;;  %855 = vst.msk [vmem:[#allocation2 + $0xa0] sm:$0xff] %vm26_vm2, %v790_v8 }
 0x107   :  { %1014 = vst.msk [vmem:[%s1844_s3 + $0x180] sm:$0xff] %vm26_vm2, %v950_v18  ;;  %985 = vst.msk [vmem:[%s1844_s3 + $0x98] sm:$0xff] %vm26_vm2, %v921_v19  ;;  %v122_v0 = vld [vmem:[#allocation2 + $0xf8] sm:$0xff]  ;;  %v120_v5 = vld [vmem:[#allocation2 + $0xe8] sm:$0xff] }
 0x108   :  { %v953_v23 = vld [vmem:[#allocation2 + $0x198] sm:$0xff]  ;;  %v919_v24 = vld [vmem:[#allocation2 + $0x88] sm:$0xff]  ;;  %887 = vst.msk [vmem:[#allocation2 + $0x1a0] sm:$0xff] %vm26_vm2, %v822_v14  ;;  %858 = vst.msk [vmem:[#allocation2 + $0xb8] sm:$0xff] %vm26_vm2, %v793_v15 }
 0x109   :  { %1017 = vst.msk [vmem:[%s1844_s3 + $0x198] sm:$0xff] %vm26_vm2, %v953_v23  ;;  %983 = vst.msk [vmem:[%s1844_s3 + $0x88] sm:$0xff] %vm26_vm2, %v919_v24  ;;  %v1160_v30 = vpop.f32.mrb[24].mxu0  ;;  %v1192_v34 = vpop.f32.mrb[24].mxu1  ;;  %v154_v4 = vld [vmem:[#allocation2 + $0x1f8] sm:$0xff]  ;;  %v152_v11 = vld [vmem:[#allocation2 + $0x1e8] sm:$0xff] }
 0x10a   :  { %v951_v26 = vld [vmem:[#allocation2 + $0x188] sm:$0xff]  ;;  %890 = vst.msk [vmem:[#allocation2 + $0x1b8] sm:$0xff] %vm26_vm2, %v825_v20  ;;  %856 = vst.msk [vmem:[#allocation2 + $0xa8] sm:$0xff] %vm26_vm2, %v791_v21  ;;  %v796_v33 = vadd.f32 %v1160_v30, %v117_v27  ;;  %v611_v35 = vpop.f32.mrb[25].mxu0  ;;  %v828_v39 = vadd.f32 %v1192_v34, %v149_v28  ;;  %v739_v41 = vpop.f32.mrb[25].mxu1 }
 0x10b   :  { %1015 = vst.msk [vmem:[%s1844_s3 + $0x188] sm:$0xff] %vm26_vm2, %v951_v26  ;;  %888 = vst.msk [vmem:[#allocation2 + $0x1a8] sm:$0xff] %vm26_vm2, %v823_v25  ;;  %v924_v38 = vld [vmem:[#allocation2 + $0xb0] sm:$0xff]  ;;  %v794_v40 = vadd.f32 %v611_v35, %v115_v29  ;;  %v1161_v42 = vpop.f32.mrb[26].mxu0  ;;  %v826_v46 = vadd.f32 %v739_v41, %v147_v31  ;;  %v1193_v48 = vpop.f32.mrb[26].mxu1 }
 0x10c   :  { %988 = vst.msk [vmem:[%s1844_s3 + $0xb0] sm:$0xff] %vm26_vm2, %v924_v38  ;;  %861 = vst.msk [vmem:[#allocation2 + $0xd0] sm:$0xff] %vm26_vm2, %v796_v33  ;;  %v797_v47 = vadd.f32 %v1161_v42, %v118_v32  ;;  %v614_v49 = vpop.f32.mrb[27].mxu0  ;;  %v829_v52 = vadd.f32 %v1193_v48, %v150_v36  ;;  %v742_v54 = vpop.f32.mrb[27].mxu1 }
 0x10d   :  { %v956_v44 = vld [vmem:[#allocation2 + $0x1b0] sm:$0xff]  ;;  %v922_v45 = vld [vmem:[#allocation2 + $0xa0] sm:$0xff]  ;;  %893 = vst.msk [vmem:[#allocation2 + $0x1d0] sm:$0xff] %vm26_vm2, %v828_v39  ;;  %859 = vst.msk [vmem:[#allocation2 + $0xc0] sm:$0xff] %vm26_vm2, %v794_v40  ;;  %v795_v53 = vadd.f32 %v614_v49, %v116_v37  ;;  %v827_v57 = vadd.f32 %v742_v54, %v148_v43 }
 0x10e   :  { %1020 = vst.msk [vmem:[%s1844_s3 + $0x1b0] sm:$0xff] %vm26_vm2, %v956_v44  ;;  %986 = vst.msk [vmem:[%s1844_s3 + $0xa0] sm:$0xff] %vm26_vm2, %v922_v45 }
 0x10f   :  { %v954_v50 = vld [vmem:[#allocation2 + $0x1a0] sm:$0xff]  ;;  %v925_v51 = vld [vmem:[#allocation2 + $0xb8] sm:$0xff]  ;;  %891 = vst.msk [vmem:[#allocation2 + $0x1c0] sm:$0xff] %vm26_vm2, %v826_v46  ;;  %862 = vst.msk [vmem:[#allocation2 + $0xd8] sm:$0xff] %vm26_vm2, %v797_v47 }
 0x110   :  { %1018 = vst.msk [vmem:[%s1844_s3 + $0x1a0] sm:$0xff] %vm26_vm2, %v954_v50  ;;  %989 = vst.msk [vmem:[%s1844_s3 + $0xb8] sm:$0xff] %vm26_vm2, %v925_v51 }
 0x111   :  { %v957_v55 = vld [vmem:[#allocation2 + $0x1b8] sm:$0xff]  ;;  %v923_v56 = vld [vmem:[#allocation2 + $0xa8] sm:$0xff]  ;;  %894 = vst.msk [vmem:[#allocation2 + $0x1d8] sm:$0xff] %vm26_vm2, %v829_v52  ;;  %860 = vst.msk [vmem:[#allocation2 + $0xc8] sm:$0xff] %vm26_vm2, %v795_v53  ;;  %v1164_v62 = vpop.f32.mrb[28].mxu0  ;;  %v1196_v2 = vpop.f32.mrb[28].mxu1 }
 0x112   :  { %1021 = vst.msk [vmem:[%s1844_s3 + $0x1b8] sm:$0xff] %vm26_vm2, %v957_v55  ;;  %987 = vst.msk [vmem:[%s1844_s3 + $0xa8] sm:$0xff] %vm26_vm2, %v923_v56  ;;  %v955_v58 = vld [vmem:[#allocation2 + $0x1a8] sm:$0xff]  ;;  %v800_v1 = vadd.f32 %v1164_v62, %v121_v59  ;;  %v627_v3 = vpop.f32.mrb[29].mxu0  ;;  %v832_v7 = vadd.f32 %v1196_v2, %v153_v60  ;;  %v755_v9 = vpop.f32.mrb[29].mxu1 }
 0x113   :  { %1019 = vst.msk [vmem:[%s1844_s3 + $0x1a8] sm:$0xff] %vm26_vm2, %v955_v58  ;;  %892 = vst.msk [vmem:[#allocation2 + $0x1c8] sm:$0xff] %vm26_vm2, %v827_v57  ;;  %v928_v6 = vld [vmem:[#allocation2 + $0xd0] sm:$0xff]  ;;  %v798_v8 = vadd.f32 %v627_v3, %v119_v61  ;;  %v1165_v10 = vpop.f32.mrb[30].mxu0  ;;  %v830_v14 = vadd.f32 %v755_v9, %v151_v63  ;;  %v1197_v16 = vpop.f32.mrb[30].mxu1 }
 0x114   :  { %992 = vst.msk [vmem:[%s1844_s3 + $0xd0] sm:$0xff] %vm26_vm2, %v928_v6  ;;  %v960_v12 = vld [vmem:[#allocation2 + $0x1d0] sm:$0xff]  ;;  %v926_v13 = vld [vmem:[#allocation2 + $0xc0] sm:$0xff]  ;;  %865 = vst.msk [vmem:[#allocation2 + $0xf0] sm:$0xff] %vm26_vm2, %v800_v1  ;;  %v801_v15 = vadd.f32 %v1165_v10, %v122_v0  ;;  %v630_v17 = vpop.f32.mrb[31].mxu0  ;;  %v833_v20 = vadd.f32 %v1197_v16, %v154_v4  ;;  %v758_v22 = vpop.f32.mrb[31].mxu1 }
 0x115   :  { %1024 = vst.msk [vmem:[%s1844_s3 + $0x1d0] sm:$0xff] %vm26_vm2, %v960_v12  ;;  %990 = vst.msk [vmem:[%s1844_s3 + $0xc0] sm:$0xff] %vm26_vm2, %v926_v13  ;;  %v799_v21 = vadd.f32 %v630_v17, %v120_v5  ;;  %v831_v25 = vadd.f32 %v758_v22, %v152_v11 }
 0x116   :  { %v958_v18 = vld [vmem:[#allocation2 + $0x1c0] sm:$0xff]  ;;  %v929_v19 = vld [vmem:[#allocation2 + $0xd8] sm:$0xff]  ;;  %897 = vst.msk [vmem:[#allocation2 + $0x1f0] sm:$0xff] %vm26_vm2, %v832_v7  ;;  %863 = vst.msk [vmem:[#allocation2 + $0xe0] sm:$0xff] %vm26_vm2, %v798_v8 }
 0x117   :  { %1022 = vst.msk [vmem:[%s1844_s3 + $0x1c0] sm:$0xff] %vm26_vm2, %v958_v18  ;;  %993 = vst.msk [vmem:[%s1844_s3 + $0xd8] sm:$0xff] %vm26_vm2, %v929_v19 }
 0x118   :  { %v961_v23 = vld [vmem:[#allocation2 + $0x1d8] sm:$0xff]  ;;  %v927_v24 = vld [vmem:[#allocation2 + $0xc8] sm:$0xff]  ;;  %895 = vst.msk [vmem:[#allocation2 + $0x1e0] sm:$0xff] %vm26_vm2, %v830_v14  ;;  %866 = vst.msk [vmem:[#allocation2 + $0xf8] sm:$0xff] %vm26_vm2, %v801_v15 }
 0x119   :  { %1025 = vst.msk [vmem:[%s1844_s3 + $0x1d8] sm:$0xff] %vm26_vm2, %v961_v23  ;;  %991 = vst.msk [vmem:[%s1844_s3 + $0xc8] sm:$0xff] %vm26_vm2, %v927_v24 }
 0x11a   :  { %v959_v26 = vld [vmem:[#allocation2 + $0x1c8] sm:$0xff]  ;;  %898 = vst.msk [vmem:[#allocation2 + $0x1f8] sm:$0xff] %vm26_vm2, %v833_v20  ;;  %864 = vst.msk [vmem:[#allocation2 + $0xe8] sm:$0xff] %vm26_vm2, %v799_v21 }
 0x11b   :  { %1023 = vst.msk [vmem:[%s1844_s3 + $0x1c8] sm:$0xff] %vm26_vm2, %v959_v26  ;;  %896 = vst.msk [vmem:[#allocation2 + $0x1e8] sm:$0xff] %vm26_vm2, %v831_v25  ;;  %v932_v27 = vld [vmem:[#allocation2 + $0xf0] sm:$0xff] }
 0x11c   :  { %996 = vst.msk [vmem:[%s1844_s3 + $0xf0] sm:$0xff] %vm26_vm2, %v932_v27 }
 0x11d   :  { %v964_v28 = vld [vmem:[#allocation2 + $0x1f0] sm:$0xff]  ;;  %v930_v29 = vld [vmem:[#allocation2 + $0xe0] sm:$0xff] }
 0x11e   :  { %1028 = vst.msk [vmem:[%s1844_s3 + $0x1f0] sm:$0xff] %vm26_vm2, %v964_v28  ;;  %994 = vst.msk [vmem:[%s1844_s3 + $0xe0] sm:$0xff] %vm26_vm2, %v930_v29 }
 0x11f   :  { %v962_v30 = vld [vmem:[#allocation2 + $0x1e0] sm:$0xff]  ;;  %v933_v31 = vld [vmem:[#allocation2 + $0xf8] sm:$0xff] }
 0x120   :  { %1026 = vst.msk [vmem:[%s1844_s3 + $0x1e0] sm:$0xff] %vm26_vm2, %v962_v30  ;;  %997 = vst.msk [vmem:[%s1844_s3 + $0xf8] sm:$0xff] %vm26_vm2, %v933_v31 }
 0x121   :  { %v965_v32 = vld [vmem:[#allocation2 + $0x1f8] sm:$0xff]  ;;  %v931_v33 = vld [vmem:[#allocation2 + $0xe8] sm:$0xff] }
 0x122   :  { %1029 = vst.msk [vmem:[%s1844_s3 + $0x1f8] sm:$0xff] %vm26_vm2, %v965_v32  ;;  %995 = vst.msk [vmem:[%s1844_s3 + $0xe8] sm:$0xff] %vm26_vm2, %v931_v33  ;;  %v963_v34 = vld [vmem:[#allocation2 + $0x1e8] sm:$0xff] }
 0x123   :  { %1027 = vst.msk [vmem:[%s1844_s3 + $0x1e8] sm:$0xff] %vm26_vm2, %v963_v34 }

</bundles_post_ra>
